<compile_context>
chip_gen: v7x
topology: tpu7x:2x2x1
jax: 0.10.0
libtpu: 0.0.40
codegen_flags: <defaults>
</compile_context>

<pallas_src>
import functools

import jax
import jax.numpy as jnp
from jax.experimental import pallas as pl
from jax.experimental.pallas import tpu as pltpu


def bottleneck_kernel(x_ref, xt_ref, xb_ref, w1_ref, w2_ref, w3_ref,
                      b1_ref, b2_ref, b3_ref, o_ref, ypad_ref, *, tile_h, W):
    """One (image, row-tile) per grid step.

    x_ref   : (1, tile_h, W, Cin)    bf16  rows owned by this step
    xt_ref  : (1, 1, W, Cin)         bf16  row above the tile (clamped index)
    xb_ref  : (1, 1, W, Cin)         bf16  row below the tile (clamped index)
    w1_ref  : (Cin, P)               bf16  BN1 scale folded in (P padded to 128k)
    w2_ref  : (9, P, P)              bf16  BN2 scale folded in, dy-major taps
    w3_ref  : (P, Cout)              bf16  BN3 scale folded in
    b*_ref  : (1, C)                 f32   folded BN biases
    o_ref   : (1, tile_h, W, Cout)   bf16
    ypad_ref: (tile_h+2, W+2, P)     bf16  zero-halo staging for the 3x3 conv
    """
    t = pl.program_id(1)
    num_t = pl.num_programs(1)
    TH = tile_h
    P = w1_ref.shape[1]
    Cin = x_ref.shape[3]
    Cout = w3_ref.shape[1]
    M = TH * W

    w1 = w1_ref[...]
    b1 = b1_ref[...]

    # ---- conv1 (1x1) + bias + ReLU on the tile's own rows -----------------
    xm = x_ref[0].reshape(M, Cin)                                     # bf16
    y1 = jnp.maximum(
        jnp.dot(xm, w1, preferred_element_type=jnp.float32) + b1, 0.0)

    # ---- conv1 on the two halo rows (recompute of neighbour edge rows).
    # Rows outside the image must be exact zeros (conv2's pad=1 acts on y1),
    # so mask them out at the image boundary (post-ReLU -> multiply is exact).
    top_m = (t > 0).astype(jnp.float32)
    bot_m = (t < num_t - 1).astype(jnp.float32)
    xt = xt_ref[0].reshape(W, Cin)
    xb = xb_ref[0].reshape(W, Cin)
    y1t = jnp.maximum(
        jnp.dot(xt, w1, preferred_element_type=jnp.float32) + b1, 0.0) * top_m
    y1b = jnp.maximum(
        jnp.dot(xb, w1, preferred_element_type=jnp.float32) + b1, 0.0) * bot_m

    # ---- stage into the zero-halo scratch: zero ONLY the halo ring columns;
    # the interior and both halo rows are fully overwritten below.
    ypad_ref[:, 0:1, :] = jnp.zeros((TH + 2, 1, P), ypad_ref.dtype)
    ypad_ref[:, W + 1:W + 2, :] = jnp.zeros((TH + 2, 1, P), ypad_ref.dtype)
    ypad_ref[0:1, 1:W + 1, :] = y1t.reshape(1, W, P).astype(ypad_ref.dtype)
    ypad_ref[TH + 1:TH + 2, 1:W + 1, :] = (
        y1b.reshape(1, W, P).astype(ypad_ref.dtype))
    ypad_ref[1:TH + 1, 1:W + 1, :] = (
        y1.reshape(TH, W, P).astype(ypad_ref.dtype))

    # ---- conv2 (3x3, pad=1, stride=1): 9 accumulating MXU dots over static
    # window views of the bf16 scratch (no materialized im2col / concat).
    acc = jnp.zeros((M, P), jnp.float32)
    for dy in range(3):
        for dx in range(3):
            tap = ypad_ref[dy:dy + TH, dx:dx + W, :].reshape(M, P)    # bf16
            acc = acc + jnp.dot(tap, w2_ref[dy * 3 + dx],
                                preferred_element_type=jnp.float32)
    y2 = jnp.maximum(acc + b2_ref[...], 0.0)                          # (M, P)

    # ---- conv3 (1x1) + bias + identity residual + ReLU -> bf16 output -----
    y3 = jnp.dot(y2.astype(jnp.bfloat16), w3_ref[...],
                 preferred_element_type=jnp.float32)
    y3 = y3 + b3_ref[...] + xm.astype(jnp.float32)
    o_ref[0] = jnp.maximum(y3, 0.0).reshape(TH, W, Cout).astype(o_ref.dtype)


def bottleneck(x_nhwc, w1, w2_hwio, w3, b1, b2, b3, *, tile_h=None):
    """Fused identity-residual Bottleneck (eval-mode BN folded into weights).

    x_nhwc : (N, H, W, Cin) activations, NHWC (channels lane-dense).
    w1     : (Cin, P)       conv1 1x1 weights, BN1 scale folded in.
    w2_hwio: (3, 3, P, P)   conv2 3x3 weights (HWIO), BN2 scale folded in.
    w3     : (P, Cout)      conv3 1x1 weights, BN3 scale folded in.
    b1..b3 : (1, C) f32     folded BN biases.
    """
    N, H, W, Cin = x_nhwc.shape
    P = w1.shape[1]
    Cout = w3.shape[1]
    assert Cin == Cout, "identity residual requires Cin == Cout"
    assert Cin % 128 == 0 and Cout % 128 == 0, "channels must be lane-dense"

    if tile_h is None:
        tile_h = 8 if H % 8 == 0 else H
    assert H % tile_h == 0, "H must be divisible by tile_h"
    # TODO(synk): ragged H (H % tile_h != 0) would need a masked last row-tile.
    T = H // tile_h

    # Pad the bottleneck width to a multiple of 128 lanes (zero channels are
    # exact no-ops: relu(0)=0 feeds zero weight rows downstream).
    P_pad = max(128, ((P + 127) // 128) * 128)
    pp = P_pad - P
    w1p = jnp.pad(w1, ((0, 0), (0, pp))).astype(jnp.bfloat16)
    b1p = jnp.pad(b1, ((0, 0), (0, pp))).astype(jnp.float32)
    w2p = jnp.pad(w2_hwio, ((0, 0), (0, 0), (0, pp), (0, pp)))
    w2p = w2p.reshape(9, P_pad, P_pad).astype(jnp.bfloat16)
    b2p = jnp.pad(b2, ((0, 0), (0, pp))).astype(jnp.float32)
    w3p = jnp.pad(w3, ((0, pp), (0, 0))).astype(jnp.bfloat16)
    b3p = b3.astype(jnp.float32)

    x_bf = x_nhwc.astype(jnp.bfloat16)

    kernel = functools.partial(bottleneck_kernel, tile_h=tile_h, W=W)

    # Advisory cost estimate (includes the 2-row halo recompute of conv1).
    flops = (2 * N * (H + 2 * T) * W * Cin * P_pad
             + 2 * N * H * W * (9 * P_pad * P_pad + P_pad * Cout))
    bytes_accessed = (N * (H + 2 * T) * W * Cin * 2 + N * H * W * Cout * 2 +
                      (w1p.size + w2p.size + w3p.size) * 2 +
                      (b1p.size + b2p.size + b3p.size) * 4)

    # VMEM budget derived from the actual footprint: >= 32 MiB scoped default,
    # grows with big tiles (v5e/v6e have 128 MiB physical), stays below v7x's
    # 64 MiB physical VMEM.
    weight_bytes = ((w1p.size + w2p.size + w3p.size) * 2 +
                    (b1p.size + b2p.size + b3p.size) * 4)
    act_bytes = 2 * ((tile_h + 2) * W * Cin * 2 + tile_h * W * Cout * 2)
    scratch_bytes = (tile_h + 2) * (W + 2) * P_pad * 2
    est = weight_bytes + act_bytes + scratch_bytes
    vmem_limit = int(min(max(32 * 2**20, 4 * est), 56 * 2**20))

    def x_main_map(b, t):
        return (b, t, 0, 0)

    def x_top_map(b, t):
        # Row above the tile; clamped at the image top (value is masked to 0
        # inside the kernel when t == 0).
        return (b, jnp.maximum(t * tile_h - 1, 0), 0, 0)

    def x_bot_map(b, t):
        # Row below the tile; clamped at the image bottom (masked when last).
        return (b, jnp.minimum((t + 1) * tile_h, H - 1), 0, 0)

    def build(single_buffer_weights):
        def const_spec(arr):
            nd = arr.ndim
            kwargs = {}
            if single_buffer_weights:
                # Weights/biases never change across grid steps: one buffer.
                kwargs["pipeline_mode"] = pl.Buffered(1)
            return pl.BlockSpec(arr.shape, lambda b, t, _nd=nd: (0,) * _nd,
                                **kwargs)

        return pl.pallas_call(
            kernel,
            out_shape=jax.ShapeDtypeStruct((N, H, W, Cout), jnp.bfloat16),
            grid=(N, T),
            in_specs=[
                pl.BlockSpec((1, tile_h, W, Cin), x_main_map),
                pl.BlockSpec((1, 1, W, Cin), x_top_map),
                pl.BlockSpec((1, 1, W, Cin), x_bot_map),
                const_spec(w1p), const_spec(w2p), const_spec(w3p),
                const_spec(b1p), const_spec(b2p), const_spec(b3p),
            ],
            out_specs=pl.BlockSpec((1, tile_h, W, Cout), x_main_map),
            scratch_shapes=[
                pltpu.VMEM((tile_h + 2, W + 2, P_pad), jnp.bfloat16)],
            compiler_params=pltpu.CompilerParams(
                dimension_semantics=("parallel", "parallel"),
                vmem_limit_bytes=vmem_limit),
            cost_estimate=pl.CostEstimate(
                flops=flops, transcendentals=0,
                bytes_accessed=bytes_accessed),
        )

    args = (x_bf, x_bf, x_bf, w1p, w2p, w3p, b1p, b2p, b3p)
    try:
        out = build(True)(*args)
    except Exception:
        # pipeline_mode / pl.Buffered(1) not supported by this jax version:
        # fall back to default double-buffered weight blocks.
        out = build(False)(*args)

    return out


def ref_bottleneck(x_bf16, w1, w2_hwio, w3, b1, b2, b3):
    """Pure-JAX reference with the same bf16-matmul / f32-accumulate precision."""
    def conv(inp, w, pad):
        return jax.lax.conv_general_dilated(
            inp.astype(jnp.bfloat16), w, window_strides=(1, 1),
            padding=[(pad, pad), (pad, pad)],
            dimension_numbers=('NHWC', 'HWIO', 'NHWC'),
            preferred_element_type=jnp.float32)
    y = jnp.maximum(conv(x_bf16, w1[None, None], 0) + b1, 0.0)
    y = jnp.maximum(conv(y, w2_hwio, 1) + b2, 0.0)
    y = conv(y, w3[None, None], 0) + b3
    return jnp.maximum(y + x_bf16.astype(jnp.float32), 0.0)


if __name__ == "__main__":
    # Bottleneck with identity residual (a non-first block of layer1):
    # planes=64, expansion=4 -> inplanes = outplanes = 256 (lane-dense),
    # 16x16 spatial extent, batch 2, 8-row spatial tiles -> grid (2, 2).
    N, H, W = 2, 16, 16
    planes = 64
    expansion = 4
    inplanes = planes * expansion       # 256
    outplanes = planes * expansion      # 256

    key = jax.random.PRNGKey(0)
    keys = jax.random.split(key, 16)

    x = jax.random.normal(keys[0], (N, H, W, inplanes), jnp.float32)

    # Conv weights in matmul / HWIO layouts (PyTorch OIHW transposed).
    w1 = 0.05 * jax.random.normal(keys[1], (inplanes, planes), jnp.float32)
    w2 = 0.05 * jax.random.normal(keys[2], (3, 3, planes, planes), jnp.float32)
    w3 = 0.05 * jax.random.normal(keys[3], (planes, outplanes), jnp.float32)

    # BatchNorm running-stats parameters (inference / eval() semantics).
    def bn_params(kg, kb, km, kv, c):
        gamma = 1.0 + 0.1 * jax.random.normal(kg, (c,), jnp.float32)
        beta = 0.1 * jax.random.normal(kb, (c,), jnp.float32)
        mean = 0.1 * jax.random.normal(km, (c,), jnp.float32)
        var = jnp.abs(jax.random.normal(kv, (c,), jnp.float32)) + 0.5
        return gamma, beta, mean, var

    bn1 = bn_params(keys[4], keys[5], keys[6], keys[7], planes)
    bn2 = bn_params(keys[8], keys[9], keys[10], keys[11], planes)
    bn3 = bn_params(keys[12], keys[13], keys[14], keys[15], outplanes)

    # Fold BN scale into conv output channels; cast folded weights to bf16.
    def fold(w, bn, eps=1e-5):
        gamma, beta, mean, var = bn
        scale = gamma / jnp.sqrt(var + eps)
        bias = (beta - mean * scale).reshape(1, -1).astype(jnp.float32)
        return (w * scale).astype(jnp.bfloat16), bias

    w1b, b1 = fold(w1, bn1)
    w2b, b2 = fold(w2, bn2)
    w3b, b3 = fold(w3, bn3)

    x_bf16 = x.astype(jnp.bfloat16)

    out = jax.block_until_ready(
        bottleneck(x_bf16, w1b, w2b, w3b, b1, b2, b3, tile_h=8))
    ref = jax.block_until_ready(
        ref_bottleneck(x_bf16, w1b, w2b, w3b, b1, b2, b3))

    assert out.shape == (N, H, W, outplanes)
    assert out.dtype == jnp.bfloat16
    # Quantize the reference to bf16 too (kernel now emits bf16).
    ref_q = ref.astype(jnp.bfloat16).astype(jnp.float32)
    assert jnp.allclose(out.astype(jnp.float32), ref_q, atol=2e-2, rtol=2e-2), \
        "mismatch vs reference"
    print("KERNEL_OK")
</pallas_src>

<mosaic_0001>
module attributes {stable_mosaic.version = 11 : i64} {
  func.func @bottleneck_kernel(%arg0: i32, %arg1: i32, %arg2: memref<1x8x16x256xbf16, #tpu.memory_space<vmem>>, %arg3: memref<1x1x16x256xbf16, #tpu.memory_space<vmem>>, %arg4: memref<1x1x16x256xbf16, #tpu.memory_space<vmem>>, %arg5: memref<256x128xbf16, #tpu.memory_space<vmem>>, %arg6: memref<9x128x128xbf16, #tpu.memory_space<vmem>>, %arg7: memref<128x256xbf16, #tpu.memory_space<vmem>>, %arg8: memref<1x128xf32, #tpu.memory_space<vmem>>, %arg9: memref<1x128xf32, #tpu.memory_space<vmem>>, %arg10: memref<1x256xf32, #tpu.memory_space<vmem>>, %arg11: memref<1x8x16x256xbf16, #tpu.memory_space<vmem>>, %arg12: memref<10x18x128xbf16, #tpu.memory_space<vmem>>) attributes {dimension_semantics = [#tpu.dimension_semantics<parallel>, #tpu.dimension_semantics<parallel>], iteration_bounds = array<i64: 2, 2>, scalar_prefetch = 0 : i64, scratch_operands = 1 : i64, tpu.core_type = #tpu.core_type<tc>, window_params = [{transform_indices = @transform_0, window_bounds = array<i64: 1, 8, 16, 256>}, {transform_indices = @transform_1, window_bounds = array<i64: 1, 1, 16, 256>}, {transform_indices = @transform_2, window_bounds = array<i64: 1, 1, 16, 256>}, {pipeline_mode = #tpu.pipeline_mode<synchronous>, transform_indices = @transform_3, window_bounds = array<i64: 256, 128>}, {pipeline_mode = #tpu.pipeline_mode<synchronous>, transform_indices = @transform_4, window_bounds = array<i64: 9, 128, 128>}, {pipeline_mode = #tpu.pipeline_mode<synchronous>, transform_indices = @transform_5, window_bounds = array<i64: 128, 256>}, {pipeline_mode = #tpu.pipeline_mode<synchronous>, transform_indices = @transform_6, window_bounds = array<i64: 1, 128>}, {pipeline_mode = #tpu.pipeline_mode<synchronous>, transform_indices = @transform_7, window_bounds = array<i64: 1, 128>}, {pipeline_mode = #tpu.pipeline_mode<synchronous>, transform_indices = @transform_8, window_bounds = array<i64: 1, 256>}, {transform_indices = @transform_9, window_bounds = array<i64: 1, 8, 16, 256>}]} {
    %c0 = arith.constant 0 : index
    %c0_0 = arith.constant 0 : index
    %0 = vector.load %arg5[%c0, %c0_0] : memref<256x128xbf16, #tpu.memory_space<vmem>>, vector<256x128xbf16>
    %c0_1 = arith.constant 0 : index
    %c0_2 = arith.constant 0 : index
    %1 = vector.load %arg8[%c0_1, %c0_2] : memref<1x128xf32, #tpu.memory_space<vmem>>, vector<1x128xf32>
    %c0_3 = arith.constant 0 : index
    %c0_4 = arith.constant 0 : index
    %c0_5 = arith.constant 0 : index
    %c0_6 = arith.constant 0 : index
    %2 = vector.load %arg2[%c0_3, %c0_4, %c0_5, %c0_6] : memref<1x8x16x256xbf16, #tpu.memory_space<vmem>>, vector<1x8x16x256xbf16>
    %3 = vector.shape_cast %2 : vector<1x8x16x256xbf16> to vector<8x16x256xbf16>
    %4 = vector.shape_cast %3 : vector<8x16x256xbf16> to vector<128x256xbf16>
    %cst = arith.constant dense<0.000000e+00> : vector<128x128xf32>
    %5 = tpu.matmul %4, %0, %cst {dimension_numbers = #tpu.dot_dimension_numbers<[1], [0], [0], [1], [0, 0, 1, 1], [], []>} : vector<128x256xbf16>, vector<256x128xbf16>, vector<128x128xf32> -> vector<128x128xf32>
    %6 = vector.broadcast %1 : vector<1x128xf32> to vector<128x128xf32>
    %7 = arith.addf %5, %6 : vector<128x128xf32>
    %cst_7 = arith.constant 0.000000e+00 : f32
    %8 = vector.broadcast %cst_7 : f32 to vector<128x128xf32>
    %9 = arith.maximumf %7, %8 : vector<128x128xf32>
    %c0_i32 = arith.constant 0 : i32
    %10 = arith.cmpi sgt, %arg1, %c0_i32 : i32
    %11 = arith.extui %10 : i1 to i32
    %12 = arith.sitofp %11 : i32 to f32
    %c1_i32 = arith.constant 1 : i32
    %13 = arith.cmpi slt, %arg1, %c1_i32 : i32
    %14 = arith.extui %13 : i1 to i32
    %15 = arith.sitofp %14 : i32 to f32
    %c0_8 = arith.constant 0 : index
    %c0_9 = arith.constant 0 : index
    %c0_10 = arith.constant 0 : index
    %c0_11 = arith.constant 0 : index
    %16 = vector.load %arg3[%c0_8, %c0_9, %c0_10, %c0_11] : memref<1x1x16x256xbf16, #tpu.memory_space<vmem>>, vector<1x1x16x256xbf16>
    %17 = vector.shape_cast %16 : vector<1x1x16x256xbf16> to vector<1x16x256xbf16>
    %18 = vector.shape_cast %17 : vector<1x16x256xbf16> to vector<16x256xbf16>
    %c0_12 = arith.constant 0 : index
    %c0_13 = arith.constant 0 : index
    %c0_14 = arith.constant 0 : index
    %c0_15 = arith.constant 0 : index
    %19 = vector.load %arg4[%c0_12, %c0_13, %c0_14, %c0_15] : memref<1x1x16x256xbf16, #tpu.memory_space<vmem>>, vector<1x1x16x256xbf16>
    %20 = vector.shape_cast %19 : vector<1x1x16x256xbf16> to vector<1x16x256xbf16>
    %21 = vector.shape_cast %20 : vector<1x16x256xbf16> to vector<16x256xbf16>
    %cst_16 = arith.constant dense<0.000000e+00> : vector<16x128xf32>
    %22 = tpu.matmul %18, %0, %cst_16 {dimension_numbers = #tpu.dot_dimension_numbers<[1], [0], [0], [1], [0, 0, 1, 1], [], []>} : vector<16x256xbf16>, vector<256x128xbf16>, vector<16x128xf32> -> vector<16x128xf32>
    %23 = vector.broadcast %1 : vector<1x128xf32> to vector<16x128xf32>
    %24 = arith.addf %22, %23 : vector<16x128xf32>
    %cst_17 = arith.constant 0.000000e+00 : f32
    %25 = vector.broadcast %cst_17 : f32 to vector<16x128xf32>
    %26 = arith.maximumf %24, %25 : vector<16x128xf32>
    %27 = vector.broadcast %12 : f32 to vector<16x128xf32>
    %28 = arith.mulf %26, %27 : vector<16x128xf32>
    %cst_18 = arith.constant dense<0.000000e+00> : vector<16x128xf32>
    %29 = tpu.matmul %21, %0, %cst_18 {dimension_numbers = #tpu.dot_dimension_numbers<[1], [0], [0], [1], [0, 0, 1, 1], [], []>} : vector<16x256xbf16>, vector<256x128xbf16>, vector<16x128xf32> -> vector<16x128xf32>
    %30 = vector.broadcast %1 : vector<1x128xf32> to vector<16x128xf32>
    %31 = arith.addf %29, %30 : vector<16x128xf32>
    %cst_19 = arith.constant 0.000000e+00 : f32
    %32 = vector.broadcast %cst_19 : f32 to vector<16x128xf32>
    %33 = arith.maximumf %31, %32 : vector<16x128xf32>
    %34 = vector.broadcast %15 : f32 to vector<16x128xf32>
    %35 = arith.mulf %33, %34 : vector<16x128xf32>
    %cst_20 = arith.constant 0.000000e+00 : bf16
    %36 = vector.broadcast %cst_20 : bf16 to vector<10x1x128xbf16>
    %c0_21 = arith.constant 0 : index
    %c0_22 = arith.constant 0 : index
    %c0_23 = arith.constant 0 : index
    %37 = vector.load %arg12[%c0_21, %c0_22, %c0_23] : memref<10x18x128xbf16, #tpu.memory_space<vmem>>, vector<10x1x128xbf16>
    tpu.vector_store %arg12[%c0_21, %c0_22, %c0_23], %36 {strides = array<i32>} : memref<10x18x128xbf16, #tpu.memory_space<vmem>>, vector<10x1x128xbf16>,
    %cst_24 = arith.constant 0.000000e+00 : bf16
    %38 = vector.broadcast %cst_24 : bf16 to vector<10x1x128xbf16>
    %c0_25 = arith.constant 0 : index
    %c17 = arith.constant 17 : index
    %c0_26 = arith.constant 0 : index
    %39 = vector.load %arg12[%c0_25, %c17, %c0_26] : memref<10x18x128xbf16, #tpu.memory_space<vmem>>, vector<10x1x128xbf16>
    tpu.vector_store %arg12[%c0_25, %c17, %c0_26], %38 {strides = array<i32>} : memref<10x18x128xbf16, #tpu.memory_space<vmem>>, vector<10x1x128xbf16>,
    %40 = vector.shape_cast %28 : vector<16x128xf32> to vector<1x16x128xf32>
    %41 = arith.truncf %40 : vector<1x16x128xf32> to vector<1x16x128xbf16>
    %c0_27 = arith.constant 0 : index
    %c1 = arith.constant 1 : index
    %c0_28 = arith.constant 0 : index
    %42 = vector.load %arg12[%c0_27, %c1, %c0_28] : memref<10x18x128xbf16, #tpu.memory_space<vmem>>, vector<1x16x128xbf16>
    tpu.vector_store %arg12[%c0_27, %c1, %c0_28], %41 {strides = array<i32>} : memref<10x18x128xbf16, #tpu.memory_space<vmem>>, vector<1x16x128xbf16>,
    %43 = vector.shape_cast %35 : vector<16x128xf32> to vector<1x16x128xf32>
    %44 = arith.truncf %43 : vector<1x16x128xf32> to vector<1x16x128xbf16>
    %c9 = arith.constant 9 : index
    %c1_29 = arith.constant 1 : index
    %c0_30 = arith.constant 0 : index
    %45 = vector.load %arg12[%c9, %c1_29, %c0_30] : memref<10x18x128xbf16, #tpu.memory_space<vmem>>, vector<1x16x128xbf16>
    tpu.vector_store %arg12[%c9, %c1_29, %c0_30], %44 {strides = array<i32>} : memref<10x18x128xbf16, #tpu.memory_space<vmem>>, vector<1x16x128xbf16>,
    %46 = vector.shape_cast %9 : vector<128x128xf32> to vector<8x16x128xf32>
    %47 = arith.truncf %46 : vector<8x16x128xf32> to vector<8x16x128xbf16>
    %c1_31 = arith.constant 1 : index
    %c1_32 = arith.constant 1 : index
    %c0_33 = arith.constant 0 : index
    %48 = vector.load %arg12[%c1_31, %c1_32, %c0_33] : memref<10x18x128xbf16, #tpu.memory_space<vmem>>, vector<8x16x128xbf16>
    tpu.vector_store %arg12[%c1_31, %c1_32, %c0_33], %47 {strides = array<i32>} : memref<10x18x128xbf16, #tpu.memory_space<vmem>>, vector<8x16x128xbf16>,
    %cst_34 = arith.constant 0.000000e+00 : f32
    %49 = vector.broadcast %cst_34 : f32 to vector<128x128xf32>
    %c0_35 = arith.constant 0 : index
    %c0_36 = arith.constant 0 : index
    %c0_37 = arith.constant 0 : index
    %50 = vector.load %arg12[%c0_35, %c0_36, %c0_37] : memref<10x18x128xbf16, #tpu.memory_space<vmem>>, vector<8x16x128xbf16>
    %51 = vector.shape_cast %50 : vector<8x16x128xbf16> to vector<128x128xbf16>
    %c0_38 = arith.constant 0 : index
    %c0_39 = arith.constant 0 : index
    %c0_40 = arith.constant 0 : index
    %52 = vector.load %arg6[%c0_38, %c0_39, %c0_40] : memref<9x128x128xbf16, #tpu.memory_space<vmem>>, vector<1x128x128xbf16>
    %53 = vector.shape_cast %52 : vector<1x128x128xbf16> to vector<128x128xbf16>
    %cst_41 = arith.constant dense<0.000000e+00> : vector<128x128xf32>
    %54 = tpu.matmul %51, %53, %cst_41 {dimension_numbers = #tpu.dot_dimension_numbers<[1], [0], [0], [1], [0, 0, 1, 1], [], []>} : vector<128x128xbf16>, vector<128x128xbf16>, vector<128x128xf32> -> vector<128x128xf32>
    %55 = arith.addf %49, %54 : vector<128x128xf32>
    %c0_42 = arith.constant 0 : index
    %c1_43 = arith.constant 1 : index
    %c0_44 = arith.constant 0 : index
    %56 = vector.load %arg12[%c0_42, %c1_43, %c0_44] : memref<10x18x128xbf16, #tpu.memory_space<vmem>>, vector<8x16x128xbf16>
    %57 = vector.shape_cast %56 : vector<8x16x128xbf16> to vector<128x128xbf16>
    %c1_45 = arith.constant 1 : index
    %c0_46 = arith.constant 0 : index
    %c0_47 = arith.constant 0 : index
    %58 = vector.load %arg6[%c1_45, %c0_46, %c0_47] : memref<9x128x128xbf16, #tpu.memory_space<vmem>>, vector<1x128x128xbf16>
    %59 = vector.shape_cast %58 : vector<1x128x128xbf16> to vector<128x128xbf16>
    %cst_48 = arith.constant dense<0.000000e+00> : vector<128x128xf32>
    %60 = tpu.matmul %57, %59, %cst_48 {dimension_numbers = #tpu.dot_dimension_numbers<[1], [0], [0], [1], [0, 0, 1, 1], [], []>} : vector<128x128xbf16>, vector<128x128xbf16>, vector<128x128xf32> -> vector<128x128xf32>
    %61 = arith.addf %55, %60 : vector<128x128xf32>
    %c0_49 = arith.constant 0 : index
    %c2 = arith.constant 2 : index
    %c0_50 = arith.constant 0 : index
    %62 = vector.load %arg12[%c0_49, %c2, %c0_50] : memref<10x18x128xbf16, #tpu.memory_space<vmem>>, vector<8x16x128xbf16>
    %63 = vector.shape_cast %62 : vector<8x16x128xbf16> to vector<128x128xbf16>
    %c2_51 = arith.constant 2 : index
    %c0_52 = arith.constant 0 : index
    %c0_53 = arith.constant 0 : index
    %64 = vector.load %arg6[%c2_51, %c0_52, %c0_53] : memref<9x128x128xbf16, #tpu.memory_space<vmem>>, vector<1x128x128xbf16>
    %65 = vector.shape_cast %64 : vector<1x128x128xbf16> to vector<128x128xbf16>
    %cst_54 = arith.constant dense<0.000000e+00> : vector<128x128xf32>
    %66 = tpu.matmul %63, %65, %cst_54 {dimension_numbers = #tpu.dot_dimension_numbers<[1], [0], [0], [1], [0, 0, 1, 1], [], []>} : vector<128x128xbf16>, vector<128x128xbf16>, vector<128x128xf32> -> vector<128x128xf32>
    %67 = arith.addf %61, %66 : vector<128x128xf32>
    %c1_55 = arith.constant 1 : index
    %c0_56 = arith.constant 0 : index
    %c0_57 = arith.constant 0 : index
    %68 = vector.load %arg12[%c1_55, %c0_56, %c0_57] : memref<10x18x128xbf16, #tpu.memory_space<vmem>>, vector<8x16x128xbf16>
    %69 = vector.shape_cast %68 : vector<8x16x128xbf16> to vector<128x128xbf16>
    %c3 = arith.constant 3 : index
    %c0_58 = arith.constant 0 : index
    %c0_59 = arith.constant 0 : index
    %70 = vector.load %arg6[%c3, %c0_58, %c0_59] : memref<9x128x128xbf16, #tpu.memory_space<vmem>>, vector<1x128x128xbf16>
    %71 = vector.shape_cast %70 : vector<1x128x128xbf16> to vector<128x128xbf16>
    %cst_60 = arith.constant dense<0.000000e+00> : vector<128x128xf32>
    %72 = tpu.matmul %69, %71, %cst_60 {dimension_numbers = #tpu.dot_dimension_numbers<[1], [0], [0], [1], [0, 0, 1, 1], [], []>} : vector<128x128xbf16>, vector<128x128xbf16>, vector<128x128xf32> -> vector<128x128xf32>
    %73 = arith.addf %67, %72 : vector<128x128xf32>
    %c1_61 = arith.constant 1 : index
    %c1_62 = arith.constant 1 : index
    %c0_63 = arith.constant 0 : index
    %74 = vector.load %arg12[%c1_61, %c1_62, %c0_63] : memref<10x18x128xbf16, #tpu.memory_space<vmem>>, vector<8x16x128xbf16>
    %75 = vector.shape_cast %74 : vector<8x16x128xbf16> to vector<128x128xbf16>
    %c4 = arith.constant 4 : index
    %c0_64 = arith.constant 0 : index
    %c0_65 = arith.constant 0 : index
    %76 = vector.load %arg6[%c4, %c0_64, %c0_65] : memref<9x128x128xbf16, #tpu.memory_space<vmem>>, vector<1x128x128xbf16>
    %77 = vector.shape_cast %76 : vector<1x128x128xbf16> to vector<128x128xbf16>
    %cst_66 = arith.constant dense<0.000000e+00> : vector<128x128xf32>
    %78 = tpu.matmul %75, %77, %cst_66 {dimension_numbers = #tpu.dot_dimension_numbers<[1], [0], [0], [1], [0, 0, 1, 1], [], []>} : vector<128x128xbf16>, vector<128x128xbf16>, vector<128x128xf32> -> vector<128x128xf32>
    %79 = arith.addf %73, %78 : vector<128x128xf32>
    %c1_67 = arith.constant 1 : index
    %c2_68 = arith.constant 2 : index
    %c0_69 = arith.constant 0 : index
    %80 = vector.load %arg12[%c1_67, %c2_68, %c0_69] : memref<10x18x128xbf16, #tpu.memory_space<vmem>>, vector<8x16x128xbf16>
    %81 = vector.shape_cast %80 : vector<8x16x128xbf16> to vector<128x128xbf16>
    %c5 = arith.constant 5 : index
    %c0_70 = arith.constant 0 : index
    %c0_71 = arith.constant 0 : index
    %82 = vector.load %arg6[%c5, %c0_70, %c0_71] : memref<9x128x128xbf16, #tpu.memory_space<vmem>>, vector<1x128x128xbf16>
    %83 = vector.shape_cast %82 : vector<1x128x128xbf16> to vector<128x128xbf16>
    %cst_72 = arith.constant dense<0.000000e+00> : vector<128x128xf32>
    %84 = tpu.matmul %81, %83, %cst_72 {dimension_numbers = #tpu.dot_dimension_numbers<[1], [0], [0], [1], [0, 0, 1, 1], [], []>} : vector<128x128xbf16>, vector<128x128xbf16>, vector<128x128xf32> -> vector<128x128xf32>
    %85 = arith.addf %79, %84 : vector<128x128xf32>
    %c2_73 = arith.constant 2 : index
    %c0_74 = arith.constant 0 : index
    %c0_75 = arith.constant 0 : index
    %86 = vector.load %arg12[%c2_73, %c0_74, %c0_75] : memref<10x18x128xbf16, #tpu.memory_space<vmem>>, vector<8x16x128xbf16>
    %87 = vector.shape_cast %86 : vector<8x16x128xbf16> to vector<128x128xbf16>
    %c6 = arith.constant 6 : index
    %c0_76 = arith.constant 0 : index
    %c0_77 = arith.constant 0 : index
    %88 = vector.load %arg6[%c6, %c0_76, %c0_77] : memref<9x128x128xbf16, #tpu.memory_space<vmem>>, vector<1x128x128xbf16>
    %89 = vector.shape_cast %88 : vector<1x128x128xbf16> to vector<128x128xbf16>
    %cst_78 = arith.constant dense<0.000000e+00> : vector<128x128xf32>
    %90 = tpu.matmul %87, %89, %cst_78 {dimension_numbers = #tpu.dot_dimension_numbers<[1], [0], [0], [1], [0, 0, 1, 1], [], []>} : vector<128x128xbf16>, vector<128x128xbf16>, vector<128x128xf32> -> vector<128x128xf32>
    %91 = arith.addf %85, %90 : vector<128x128xf32>
    %c2_79 = arith.constant 2 : index
    %c1_80 = arith.constant 1 : index
    %c0_81 = arith.constant 0 : index
    %92 = vector.load %arg12[%c2_79, %c1_80, %c0_81] : memref<10x18x128xbf16, #tpu.memory_space<vmem>>, vector<8x16x128xbf16>
    %93 = vector.shape_cast %92 : vector<8x16x128xbf16> to vector<128x128xbf16>
    %c7 = arith.constant 7 : index
    %c0_82 = arith.constant 0 : index
    %c0_83 = arith.constant 0 : index
    %94 = vector.load %arg6[%c7, %c0_82, %c0_83] : memref<9x128x128xbf16, #tpu.memory_space<vmem>>, vector<1x128x128xbf16>
    %95 = vector.shape_cast %94 : vector<1x128x128xbf16> to vector<128x128xbf16>
    %cst_84 = arith.constant dense<0.000000e+00> : vector<128x128xf32>
    %96 = tpu.matmul %93, %95, %cst_84 {dimension_numbers = #tpu.dot_dimension_numbers<[1], [0], [0], [1], [0, 0, 1, 1], [], []>} : vector<128x128xbf16>, vector<128x128xbf16>, vector<128x128xf32> -> vector<128x128xf32>
    %97 = arith.addf %91, %96 : vector<128x128xf32>
    %c2_85 = arith.constant 2 : index
    %c2_86 = arith.constant 2 : index
    %c0_87 = arith.constant 0 : index
    %98 = vector.load %arg12[%c2_85, %c2_86, %c0_87] : memref<10x18x128xbf16, #tpu.memory_space<vmem>>, vector<8x16x128xbf16>
    %99 = vector.shape_cast %98 : vector<8x16x128xbf16> to vector<128x128xbf16>
    %c8 = arith.constant 8 : index
    %c0_88 = arith.constant 0 : index
    %c0_89 = arith.constant 0 : index
    %100 = vector.load %arg6[%c8, %c0_88, %c0_89] : memref<9x128x128xbf16, #tpu.memory_space<vmem>>, vector<1x128x128xbf16>
    %101 = vector.shape_cast %100 : vector<1x128x128xbf16> to vector<128x128xbf16>
    %cst_90 = arith.constant dense<0.000000e+00> : vector<128x128xf32>
    %102 = tpu.matmul %99, %101, %cst_90 {dimension_numbers = #tpu.dot_dimension_numbers<[1], [0], [0], [1], [0, 0, 1, 1], [], []>} : vector<128x128xbf16>, vector<128x128xbf16>, vector<128x128xf32> -> vector<128x128xf32>
    %103 = arith.addf %97, %102 : vector<128x128xf32>
    %c0_91 = arith.constant 0 : index
    %c0_92 = arith.constant 0 : index
    %104 = vector.load %arg9[%c0_91, %c0_92] : memref<1x128xf32, #tpu.memory_space<vmem>>, vector<1x128xf32>
    %105 = vector.broadcast %104 : vector<1x128xf32> to vector<128x128xf32>
    %106 = arith.addf %103, %105 : vector<128x128xf32>
    %cst_93 = arith.constant 0.000000e+00 : f32
    %107 = vector.broadcast %cst_93 : f32 to vector<128x128xf32>
    %108 = arith.maximumf %106, %107 : vector<128x128xf32>
    %109 = arith.truncf %108 : vector<128x128xf32> to vector<128x128xbf16>
    %c0_94 = arith.constant 0 : index
    %c0_95 = arith.constant 0 : index
    %110 = vector.load %arg7[%c0_94, %c0_95] : memref<128x256xbf16, #tpu.memory_space<vmem>>, vector<128x256xbf16>
    %cst_96 = arith.constant dense<0.000000e+00> : vector<128x256xf32>
    %111 = tpu.matmul %109, %110, %cst_96 {dimension_numbers = #tpu.dot_dimension_numbers<[1], [0], [0], [1], [0, 0, 1, 1], [], []>} : vector<128x128xbf16>, vector<128x256xbf16>, vector<128x256xf32> -> vector<128x256xf32>
    %c0_97 = arith.constant 0 : index
    %c0_98 = arith.constant 0 : index
    %112 = vector.load %arg10[%c0_97, %c0_98] : memref<1x256xf32, #tpu.memory_space<vmem>>, vector<1x256xf32>
    %113 = vector.broadcast %112 : vector<1x256xf32> to vector<128x256xf32>
    %114 = arith.addf %111, %113 : vector<128x256xf32>
    %115 = arith.extf %4 : vector<128x256xbf16> to vector<128x256xf32>
    %116 = arith.addf %114, %115 : vector<128x256xf32>
    %cst_99 = arith.constant 0.000000e+00 : f32
    %117 = vector.broadcast %cst_99 : f32 to vector<128x256xf32>
    %118 = arith.maximumf %116, %117 : vector<128x256xf32>
    %119 = vector.shape_cast %118 : vector<128x256xf32> to vector<8x16x256xf32>
    %120 = arith.truncf %119 : vector<8x16x256xf32> to vector<8x16x256xbf16>
    %c0_100 = arith.constant 0 : index
    %c0_101 = arith.constant 0 : index
    %c0_102 = arith.constant 0 : index
    %c0_103 = arith.constant 0 : index
    %121 = vector.load %arg11[%c0_100, %c0_101, %c0_102, %c0_103] : memref<1x8x16x256xbf16, #tpu.memory_space<vmem>>, vector<1x8x16x256xbf16>
    %122 = vector.shape_cast %121 : vector<1x8x16x256xbf16> to vector<8x16x256xbf16>
    %123 = vector.shape_cast %120 : vector<8x16x256xbf16> to vector<1x8x16x256xbf16>
    tpu.vector_store %arg11[%c0_100, %c0_101, %c0_102, %c0_103], %123 {strides = array<i32>} : memref<1x8x16x256xbf16, #tpu.memory_space<vmem>>, vector<1x8x16x256xbf16>,
    return
  }
  func.func @transform_0(%arg0: i32, %arg1: i32) -> (i32, i32, i32, i32) {
    %c0_i32 = arith.constant 0 : i32
    %c0_i32_0 = arith.constant 0 : i32
    %c0_i32_1 = arith.constant 0 : i32
    return %arg0, %arg1, %c0_i32, %c0_i32_0 : i32, i32, i32, i32
  }
  func.func @transform_1(%arg0: i32, %arg1: i32) -> (i32, i32, i32, i32) {
    %c8_i32 = arith.constant 8 : i32
    %0 = arith.muli %arg1, %c8_i32 : i32
    %c1_i32 = arith.constant 1 : i32
    %1 = arith.subi %0, %c1_i32 : i32
    %c0_i32 = arith.constant 0 : i32
    %2 = arith.maxsi %1, %c0_i32 : i32
    %c0_i32_0 = arith.constant 0 : i32
    %c0_i32_1 = arith.constant 0 : i32
    %c0_i32_2 = arith.constant 0 : i32
    return %arg0, %2, %c0_i32_0, %c0_i32_1 : i32, i32, i32, i32
  }
  func.func @transform_2(%arg0: i32, %arg1: i32) -> (i32, i32, i32, i32) {
    %c1_i32 = arith.constant 1 : i32
    %0 = arith.addi %arg1, %c1_i32 : i32
    %c8_i32 = arith.constant 8 : i32
    %1 = arith.muli %0, %c8_i32 : i32
    %c15_i32 = arith.constant 15 : i32
    %2 = arith.minsi %1, %c15_i32 : i32
    %c0_i32 = arith.constant 0 : i32
    %c0_i32_0 = arith.constant 0 : i32
    %c0_i32_1 = arith.constant 0 : i32
    return %arg0, %2, %c0_i32, %c0_i32_0 : i32, i32, i32, i32
  }
  func.func @transform_3(%arg0: i32, %arg1: i32) -> (i32, i32) {
    %c0_i32 = arith.constant 0 : i32
    %c0_i32_0 = arith.constant 0 : i32
    %c0_i32_1 = arith.constant 0 : i32
    return %c0_i32, %c0_i32_0 : i32, i32
  }
  func.func @transform_4(%arg0: i32, %arg1: i32) -> (i32, i32, i32) {
    %c0_i32 = arith.constant 0 : i32
    %c0_i32_0 = arith.constant 0 : i32
    %c0_i32_1 = arith.constant 0 : i32
    %c0_i32_2 = arith.constant 0 : i32
    return %c0_i32, %c0_i32_0, %c0_i32_1 : i32, i32, i32
  }
  func.func @transform_5(%arg0: i32, %arg1: i32) -> (i32, i32) {
    %c0_i32 = arith.constant 0 : i32
    %c0_i32_0 = arith.constant 0 : i32
    %c0_i32_1 = arith.constant 0 : i32
    return %c0_i32, %c0_i32_0 : i32, i32
  }
  func.func @transform_6(%arg0: i32, %arg1: i32) -> (i32, i32) {
    %c0_i32 = arith.constant 0 : i32
    %c0_i32_0 = arith.constant 0 : i32
    %c0_i32_1 = arith.constant 0 : i32
    return %c0_i32, %c0_i32_0 : i32, i32
  }
  func.func @transform_7(%arg0: i32, %arg1: i32) -> (i32, i32) {
    %c0_i32 = arith.constant 0 : i32
    %c0_i32_0 = arith.constant 0 : i32
    %c0_i32_1 = arith.constant 0 : i32
    return %c0_i32, %c0_i32_0 : i32, i32
  }
  func.func @transform_8(%arg0: i32, %arg1: i32) -> (i32, i32) {
    %c0_i32 = arith.constant 0 : i32
    %c0_i32_0 = arith.constant 0 : i32
    %c0_i32_1 = arith.constant 0 : i32
    return %c0_i32, %c0_i32_0 : i32, i32
  }
  func.func @transform_9(%arg0: i32, %arg1: i32) -> (i32, i32, i32, i32) {
    %c0_i32 = arith.constant 0 : i32
    %c0_i32_0 = arith.constant 0 : i32
    %c0_i32_1 = arith.constant 0 : i32
    return %arg0, %arg1, %c0_i32, %c0_i32_0 : i32, i32, i32, i32
  }
}

module attributes {stable_mosaic.version = 11 : i64} {
  func.func @bottleneck_kernel(%arg0: i32, %arg1: i32, %arg2: memref<1x8x16x256xbf16, #tpu.memory_space<vmem>>, %arg3: memref<1x1x16x256xbf16, #tpu.memory_space<vmem>>, %arg4: memref<1x1x16x256xbf16, #tpu.memory_space<vmem>>, %arg5: memref<256x128xbf16, #tpu.memory_space<vmem>>, %arg6: memref<9x128x128xbf16, #tpu.memory_space<vmem>>, %arg7: memref<128x256xbf16, #tpu.memory_space<vmem>>, %arg8: memref<1x128xf32, #tpu.memory_space<vmem>>, %arg9: memref<1x128xf32, #tpu.memory_space<vmem>>, %arg10: memref<1x256xf32, #tpu.memory_space<vmem>>, %arg11: memref<1x8x16x256xbf16, #tpu.memory_space<vmem>>, %arg12: memref<10x18x128xbf16, #tpu.memory_space<vmem>>) attributes {dimension_semantics = [#tpu.dimension_semantics<parallel>, #tpu.dimension_semantics<parallel>], iteration_bounds = array<i64: 2, 2>, scalar_prefetch = 0 : i64, scratch_operands = 1 : i64, tpu.core_type = #tpu.core_type<tc>, window_params = [{transform_indices = @transform_0, window_bounds = array<i64: 1, 8, 16, 256>}, {transform_indices = @transform_1, window_bounds = array<i64: 1, 1, 16, 256>}, {transform_indices = @transform_2, window_bounds = array<i64: 1, 1, 16, 256>}, {pipeline_mode = #tpu.pipeline_mode<synchronous>, transform_indices = @transform_3, window_bounds = array<i64: 256, 128>}, {pipeline_mode = #tpu.pipeline_mode<synchronous>, transform_indices = @transform_4, window_bounds = array<i64: 9, 128, 128>}, {pipeline_mode = #tpu.pipeline_mode<synchronous>, transform_indices = @transform_5, window_bounds = array<i64: 128, 256>}, {pipeline_mode = #tpu.pipeline_mode<synchronous>, transform_indices = @transform_6, window_bounds = array<i64: 1, 128>}, {pipeline_mode = #tpu.pipeline_mode<synchronous>, transform_indices = @transform_7, window_bounds = array<i64: 1, 128>}, {pipeline_mode = #tpu.pipeline_mode<synchronous>, transform_indices = @transform_8, window_bounds = array<i64: 1, 256>}, {transform_indices = @transform_9, window_bounds = array<i64: 1, 8, 16, 256>}]} {
    %c0 = arith.constant 0 : index
    %c0_0 = arith.constant 0 : index
    %0 = vector.load %arg5[%c0, %c0_0] : memref<256x128xbf16, #tpu.memory_space<vmem>>, vector<256x128xbf16>
    %c0_1 = arith.constant 0 : index
    %c0_2 = arith.constant 0 : index
    %1 = vector.load %arg8[%c0_1, %c0_2] : memref<1x128xf32, #tpu.memory_space<vmem>>, vector<1x128xf32>
    %c0_3 = arith.constant 0 : index
    %c0_4 = arith.constant 0 : index
    %c0_5 = arith.constant 0 : index
    %c0_6 = arith.constant 0 : index
    %2 = vector.load %arg2[%c0_3, %c0_4, %c0_5, %c0_6] : memref<1x8x16x256xbf16, #tpu.memory_space<vmem>>, vector<1x8x16x256xbf16>
    %3 = vector.shape_cast %2 : vector<1x8x16x256xbf16> to vector<8x16x256xbf16>
    %4 = vector.shape_cast %3 : vector<8x16x256xbf16> to vector<128x256xbf16>
    %cst = arith.constant dense<0.000000e+00> : vector<128x128xf32>
    %5 = tpu.matmul %4, %0, %cst {dimension_numbers = #tpu.dot_dimension_numbers<[1], [0], [0], [1], [0, 0, 1, 1], [], []>} : vector<128x256xbf16>, vector<256x128xbf16>, vector<128x128xf32> -> vector<128x128xf32>
    %6 = vector.broadcast %1 : vector<1x128xf32> to vector<128x128xf32>
    %7 = arith.addf %5, %6 : vector<128x128xf32>
    %cst_7 = arith.constant 0.000000e+00 : f32
    %8 = vector.broadcast %cst_7 : f32 to vector<128x128xf32>
    %9 = arith.maximumf %7, %8 : vector<128x128xf32>
    %c0_i32 = arith.constant 0 : i32
    %10 = arith.cmpi sgt, %arg1, %c0_i32 : i32
    %11 = arith.extui %10 : i1 to i32
    %12 = arith.sitofp %11 : i32 to f32
    %c1_i32 = arith.constant 1 : i32
    %13 = arith.cmpi slt, %arg1, %c1_i32 : i32
    %14 = arith.extui %13 : i1 to i32
    %15 = arith.sitofp %14 : i32 to f32
    %c0_8 = arith.constant 0 : index
    %c0_9 = arith.constant 0 : index
    %c0_10 = arith.constant 0 : index
    %c0_11 = arith.constant 0 : index
    %16 = vector.load %arg3[%c0_8, %c0_9, %c0_10, %c0_11] : memref<1x1x16x256xbf16, #tpu.memory_space<vmem>>, vector<1x1x16x256xbf16>
    %17 = vector.shape_cast %16 : vector<1x1x16x256xbf16> to vector<1x16x256xbf16>
    %18 = vector.shape_cast %17 : vector<1x16x256xbf16> to vector<16x256xbf16>
    %c0_12 = arith.constant 0 : index
    %c0_13 = arith.constant 0 : index
    %c0_14 = arith.constant 0 : index
    %c0_15 = arith.constant 0 : index
    %19 = vector.load %arg4[%c0_12, %c0_13, %c0_14, %c0_15] : memref<1x1x16x256xbf16, #tpu.memory_space<vmem>>, vector<1x1x16x256xbf16>
    %20 = vector.shape_cast %19 : vector<1x1x16x256xbf16> to vector<1x16x256xbf16>
    %21 = vector.shape_cast %20 : vector<1x16x256xbf16> to vector<16x256xbf16>
    %cst_16 = arith.constant dense<0.000000e+00> : vector<16x128xf32>
    %22 = tpu.matmul %18, %0, %cst_16 {dimension_numbers = #tpu.dot_dimension_numbers<[1], [0], [0], [1], [0, 0, 1, 1], [], []>} : vector<16x256xbf16>, vector<256x128xbf16>, vector<16x128xf32> -> vector<16x128xf32>
    %23 = vector.broadcast %1 : vector<1x128xf32> to vector<16x128xf32>
    %24 = arith.addf %22, %23 : vector<16x128xf32>
    %cst_17 = arith.constant 0.000000e+00 : f32
    %25 = vector.broadcast %cst_17 : f32 to vector<16x128xf32>
    %26 = arith.maximumf %24, %25 : vector<16x128xf32>
    %27 = vector.broadcast %12 : f32 to vector<16x128xf32>
    %28 = arith.mulf %26, %27 : vector<16x128xf32>
    %cst_18 = arith.constant dense<0.000000e+00> : vector<16x128xf32>
    %29 = tpu.matmul %21, %0, %cst_18 {dimension_numbers = #tpu.dot_dimension_numbers<[1], [0], [0], [1], [0, 0, 1, 1], [], []>} : vector<16x256xbf16>, vector<256x128xbf16>, vector<16x128xf32> -> vector<16x128xf32>
    %30 = vector.broadcast %1 : vector<1x128xf32> to vector<16x128xf32>
    %31 = arith.addf %29, %30 : vector<16x128xf32>
    %cst_19 = arith.constant 0.000000e+00 : f32
    %32 = vector.broadcast %cst_19 : f32 to vector<16x128xf32>
    %33 = arith.maximumf %31, %32 : vector<16x128xf32>
    %34 = vector.broadcast %15 : f32 to vector<16x128xf32>
    %35 = arith.mulf %33, %34 : vector<16x128xf32>
    %cst_20 = arith.constant 0.000000e+00 : bf16
    %36 = vector.broadcast %cst_20 : bf16 to vector<10x1x128xbf16>
    %c0_21 = arith.constant 0 : index
    %c0_22 = arith.constant 0 : index
    %c0_23 = arith.constant 0 : index
    %37 = vector.load %arg12[%c0_21, %c0_22, %c0_23] : memref<10x18x128xbf16, #tpu.memory_space<vmem>>, vector<10x1x128xbf16>
    tpu.vector_store %arg12[%c0_21, %c0_22, %c0_23], %36 {strides = array<i32>} : memref<10x18x128xbf16, #tpu.memory_space<vmem>>, vector<10x1x128xbf16>,
    %cst_24 = arith.constant 0.000000e+00 : bf16
    %38 = vector.broadcast %cst_24 : bf16 to vector<10x1x128xbf16>
    %c0_25 = arith.constant 0 : index
    %c17 = arith.constant 17 : index
    %c0_26 = arith.constant 0 : index
    %39 = vector.load %arg12[%c0_25, %c17, %c0_26] : memref<10x18x128xbf16, #tpu.memory_space<vmem>>, vector<10x1x128xbf16>
    tpu.vector_store %arg12[%c0_25, %c17, %c0_26], %38 {strides = array<i32>} : memref<10x18x128xbf16, #tpu.memory_space<vmem>>, vector<10x1x128xbf16>,
    %40 = vector.shape_cast %28 : vector<16x128xf32> to vector<1x16x128xf32>
    %41 = arith.truncf %40 : vector<1x16x128xf32> to vector<1x16x128xbf16>
    %c0_27 = arith.constant 0 : index
    %c1 = arith.constant 1 : index
    %c0_28 = arith.constant 0 : index
    %42 = vector.load %arg12[%c0_27, %c1, %c0_28] : memref<10x18x128xbf16, #tpu.memory_space<vmem>>, vector<1x16x128xbf16>
    tpu.vector_store %arg12[%c0_27, %c1, %c0_28], %41 {strides = array<i32>} : memref<10x18x128xbf16, #tpu.memory_space<vmem>>, vector<1x16x128xbf16>,
    %43 = vector.shape_cast %35 : vector<16x128xf32> to vector<1x16x128xf32>
    %44 = arith.truncf %43 : vector<1x16x128xf32> to vector<1x16x128xbf16>
    %c9 = arith.constant 9 : index
    %c1_29 = arith.constant 1 : index
    %c0_30 = arith.constant 0 : index
    %45 = vector.load %arg12[%c9, %c1_29, %c0_30] : memref<10x18x128xbf16, #tpu.memory_space<vmem>>, vector<1x16x128xbf16>
    tpu.vector_store %arg12[%c9, %c1_29, %c0_30], %44 {strides = array<i32>} : memref<10x18x128xbf16, #tpu.memory_space<vmem>>, vector<1x16x128xbf16>,
    %46 = vector.shape_cast %9 : vector<128x128xf32> to vector<8x16x128xf32>
    %47 = arith.truncf %46 : vector<8x16x128xf32> to vector<8x16x128xbf16>
    %c1_31 = arith.constant 1 : index
    %c1_32 = arith.constant 1 : index
    %c0_33 = arith.constant 0 : index
    %48 = vector.load %arg12[%c1_31, %c1_32, %c0_33] : memref<10x18x128xbf16, #tpu.memory_space<vmem>>, vector<8x16x128xbf16>
    tpu.vector_store %arg12[%c1_31, %c1_32, %c0_33], %47 {strides = array<i32>} : memref<10x18x128xbf16, #tpu.memory_space<vmem>>, vector<8x16x128xbf16>,
    %cst_34 = arith.constant 0.000000e+00 : f32
    %49 = vector.broadcast %cst_34 : f32 to vector<128x128xf32>
    %c0_35 = arith.constant 0 : index
    %c0_36 = arith.constant 0 : index
    %c0_37 = arith.constant 0 : index
    %50 = vector.load %arg12[%c0_35, %c0_36, %c0_37] : memref<10x18x128xbf16, #tpu.memory_space<vmem>>, vector<8x16x128xbf16>
    %51 = vector.shape_cast %50 : vector<8x16x128xbf16> to vector<128x128xbf16>
    %c0_38 = arith.constant 0 : index
    %c0_39 = arith.constant 0 : index
    %c0_40 = arith.constant 0 : index
    %52 = vector.load %arg6[%c0_38, %c0_39, %c0_40] : memref<9x128x128xbf16, #tpu.memory_space<vmem>>, vector<1x128x128xbf16>
    %53 = vector.shape_cast %52 : vector<1x128x128xbf16> to vector<128x128xbf16>
    %cst_41 = arith.constant dense<0.000000e+00> : vector<128x128xf32>
    %54 = tpu.matmul %51, %53, %cst_41 {dimension_numbers = #tpu.dot_dimension_numbers<[1], [0], [0], [1], [0, 0, 1, 1], [], []>} : vector<128x128xbf16>, vector<128x128xbf16>, vector<128x128xf32> -> vector<128x128xf32>
    %55 = arith.addf %49, %54 : vector<128x128xf32>
    %c0_42 = arith.constant 0 : index
    %c1_43 = arith.constant 1 : index
    %c0_44 = arith.constant 0 : index
    %56 = vector.load %arg12[%c0_42, %c1_43, %c0_44] : memref<10x18x128xbf16, #tpu.memory_space<vmem>>, vector<8x16x128xbf16>
    %57 = vector.shape_cast %56 : vector<8x16x128xbf16> to vector<128x128xbf16>
    %c1_45 = arith.constant 1 : index
    %c0_46 = arith.constant 0 : index
    %c0_47 = arith.constant 0 : index
    %58 = vector.load %arg6[%c1_45, %c0_46, %c0_47] : memref<9x128x128xbf16, #tpu.memory_space<vmem>>, vector<1x128x128xbf16>
    %59 = vector.shape_cast %58 : vector<1x128x128xbf16> to vector<128x128xbf16>
    %cst_48 = arith.constant dense<0.000000e+00> : vector<128x128xf32>
    %60 = tpu.matmul %57, %59, %cst_48 {dimension_numbers = #tpu.dot_dimension_numbers<[1], [0], [0], [1], [0, 0, 1, 1], [], []>} : vector<128x128xbf16>, vector<128x128xbf16>, vector<128x128xf32> -> vector<128x128xf32>
    %61 = arith.addf %55, %60 : vector<128x128xf32>
    %c0_49 = arith.constant 0 : index
    %c2 = arith.constant 2 : index
    %c0_50 = arith.constant 0 : index
    %62 = vector.load %arg12[%c0_49, %c2, %c0_50] : memref<10x18x128xbf16, #tpu.memory_space<vmem>>, vector<8x16x128xbf16>
    %63 = vector.shape_cast %62 : vector<8x16x128xbf16> to vector<128x128xbf16>
    %c2_51 = arith.constant 2 : index
    %c0_52 = arith.constant 0 : index
    %c0_53 = arith.constant 0 : index
    %64 = vector.load %arg6[%c2_51, %c0_52, %c0_53] : memref<9x128x128xbf16, #tpu.memory_space<vmem>>, vector<1x128x128xbf16>
    %65 = vector.shape_cast %64 : vector<1x128x128xbf16> to vector<128x128xbf16>
    %cst_54 = arith.constant dense<0.000000e+00> : vector<128x128xf32>
    %66 = tpu.matmul %63, %65, %cst_54 {dimension_numbers = #tpu.dot_dimension_numbers<[1], [0], [0], [1], [0, 0, 1, 1], [], []>} : vector<128x128xbf16>, vector<128x128xbf16>, vector<128x128xf32> -> vector<128x128xf32>
    %67 = arith.addf %61, %66 : vector<128x128xf32>
    %c1_55 = arith.constant 1 : index
    %c0_56 = arith.constant 0 : index
    %c0_57 = arith.constant 0 : index
    %68 = vector.load %arg12[%c1_55, %c0_56, %c0_57] : memref<10x18x128xbf16, #tpu.memory_space<vmem>>, vector<8x16x128xbf16>
    %69 = vector.shape_cast %68 : vector<8x16x128xbf16> to vector<128x128xbf16>
    %c3 = arith.constant 3 : index
    %c0_58 = arith.constant 0 : index
    %c0_59 = arith.constant 0 : index
    %70 = vector.load %arg6[%c3, %c0_58, %c0_59] : memref<9x128x128xbf16, #tpu.memory_space<vmem>>, vector<1x128x128xbf16>
    %71 = vector.shape_cast %70 : vector<1x128x128xbf16> to vector<128x128xbf16>
    %cst_60 = arith.constant dense<0.000000e+00> : vector<128x128xf32>
    %72 = tpu.matmul %69, %71, %cst_60 {dimension_numbers = #tpu.dot_dimension_numbers<[1], [0], [0], [1], [0, 0, 1, 1], [], []>} : vector<128x128xbf16>, vector<128x128xbf16>, vector<128x128xf32> -> vector<128x128xf32>
    %73 = arith.addf %67, %72 : vector<128x128xf32>
    %c1_61 = arith.constant 1 : index
    %c1_62 = arith.constant 1 : index
    %c0_63 = arith.constant 0 : index
    %74 = vector.load %arg12[%c1_61, %c1_62, %c0_63] : memref<10x18x128xbf16, #tpu.memory_space<vmem>>, vector<8x16x128xbf16>
    %75 = vector.shape_cast %74 : vector<8x16x128xbf16> to vector<128x128xbf16>
    %c4 = arith.constant 4 : index
    %c0_64 = arith.constant 0 : index
    %c0_65 = arith.constant 0 : index
    %76 = vector.load %arg6[%c4, %c0_64, %c0_65] : memref<9x128x128xbf16, #tpu.memory_space<vmem>>, vector<1x128x128xbf16>
    %77 = vector.shape_cast %76 : vector<1x128x128xbf16> to vector<128x128xbf16>
    %cst_66 = arith.constant dense<0.000000e+00> : vector<128x128xf32>
    %78 = tpu.matmul %75, %77, %cst_66 {dimension_numbers = #tpu.dot_dimension_numbers<[1], [0], [0], [1], [0, 0, 1, 1], [], []>} : vector<128x128xbf16>, vector<128x128xbf16>, vector<128x128xf32> -> vector<128x128xf32>
    %79 = arith.addf %73, %78 : vector<128x128xf32>
    %c1_67 = arith.constant 1 : index
    %c2_68 = arith.constant 2 : index
    %c0_69 = arith.constant 0 : index
    %80 = vector.load %arg12[%c1_67, %c2_68, %c0_69] : memref<10x18x128xbf16, #tpu.memory_space<vmem>>, vector<8x16x128xbf16>
    %81 = vector.shape_cast %80 : vector<8x16x128xbf16> to vector<128x128xbf16>
    %c5 = arith.constant 5 : index
    %c0_70 = arith.constant 0 : index
    %c0_71 = arith.constant 0 : index
    %82 = vector.load %arg6[%c5, %c0_70, %c0_71] : memref<9x128x128xbf16, #tpu.memory_space<vmem>>, vector<1x128x128xbf16>
    %83 = vector.shape_cast %82 : vector<1x128x128xbf16> to vector<128x128xbf16>
    %cst_72 = arith.constant dense<0.000000e+00> : vector<128x128xf32>
    %84 = tpu.matmul %81, %83, %cst_72 {dimension_numbers = #tpu.dot_dimension_numbers<[1], [0], [0], [1], [0, 0, 1, 1], [], []>} : vector<128x128xbf16>, vector<128x128xbf16>, vector<128x128xf32> -> vector<128x128xf32>
    %85 = arith.addf %79, %84 : vector<128x128xf32>
    %c2_73 = arith.constant 2 : index
    %c0_74 = arith.constant 0 : index
    %c0_75 = arith.constant 0 : index
    %86 = vector.load %arg12[%c2_73, %c0_74, %c0_75] : memref<10x18x128xbf16, #tpu.memory_space<vmem>>, vector<8x16x128xbf16>
    %87 = vector.shape_cast %86 : vector<8x16x128xbf16> to vector<128x128xbf16>
    %c6 = arith.constant 6 : index
    %c0_76 = arith.constant 0 : index
    %c0_77 = arith.constant 0 : index
    %88 = vector.load %arg6[%c6, %c0_76, %c0_77] : memref<9x128x128xbf16, #tpu.memory_space<vmem>>, vector<1x128x128xbf16>
    %89 = vector.shape_cast %88 : vector<1x128x128xbf16> to vector<128x128xbf16>
    %cst_78 = arith.constant dense<0.000000e+00> : vector<128x128xf32>
    %90 = tpu.matmul %87, %89, %cst_78 {dimension_numbers = #tpu.dot_dimension_numbers<[1], [0], [0], [1], [0, 0, 1, 1], [], []>} : vector<128x128xbf16>, vector<128x128xbf16>, vector<128x128xf32> -> vector<128x128xf32>
    %91 = arith.addf %85, %90 : vector<128x128xf32>
    %c2_79 = arith.constant 2 : index
    %c1_80 = arith.constant 1 : index
    %c0_81 = arith.constant 0 : index
    %92 = vector.load %arg12[%c2_79, %c1_80, %c0_81] : memref<10x18x128xbf16, #tpu.memory_space<vmem>>, vector<8x16x128xbf16>
    %93 = vector.shape_cast %92 : vector<8x16x128xbf16> to vector<128x128xbf16>
    %c7 = arith.constant 7 : index
    %c0_82 = arith.constant 0 : index
    %c0_83 = arith.constant 0 : index
    %94 = vector.load %arg6[%c7, %c0_82, %c0_83] : memref<9x128x128xbf16, #tpu.memory_space<vmem>>, vector<1x128x128xbf16>
    %95 = vector.shape_cast %94 : vector<1x128x128xbf16> to vector<128x128xbf16>
    %cst_84 = arith.constant dense<0.000000e+00> : vector<128x128xf32>
    %96 = tpu.matmul %93, %95, %cst_84 {dimension_numbers = #tpu.dot_dimension_numbers<[1], [0], [0], [1], [0, 0, 1, 1], [], []>} : vector<128x128xbf16>, vector<128x128xbf16>, vector<128x128xf32> -> vector<128x128xf32>
    %97 = arith.addf %91, %96 : vector<128x128xf32>
    %c2_85 = arith.constant 2 : index
    %c2_86 = arith.constant 2 : index
    %c0_87 = arith.constant 0 : index
    %98 = vector.load %arg12[%c2_85, %c2_86, %c0_87] : memref<10x18x128xbf16, #tpu.memory_space<vmem>>, vector<8x16x128xbf16>
    %99 = vector.shape_cast %98 : vector<8x16x128xbf16> to vector<128x128xbf16>
    %c8 = arith.constant 8 : index
    %c0_88 = arith.constant 0 : index
    %c0_89 = arith.constant 0 : index
    %100 = vector.load %arg6[%c8, %c0_88, %c0_89] : memref<9x128x128xbf16, #tpu.memory_space<vmem>>, vector<1x128x128xbf16>
    %101 = vector.shape_cast %100 : vector<1x128x128xbf16> to vector<128x128xbf16>
    %cst_90 = arith.constant dense<0.000000e+00> : vector<128x128xf32>
    %102 = tpu.matmul %99, %101, %cst_90 {dimension_numbers = #tpu.dot_dimension_numbers<[1], [0], [0], [1], [0, 0, 1, 1], [], []>} : vector<128x128xbf16>, vector<128x128xbf16>, vector<128x128xf32> -> vector<128x128xf32>
    %103 = arith.addf %97, %102 : vector<128x128xf32>
    %c0_91 = arith.constant 0 : index
    %c0_92 = arith.constant 0 : index
    %104 = vector.load %arg9[%c0_91, %c0_92] : memref<1x128xf32, #tpu.memory_space<vmem>>, vector<1x128xf32>
    %105 = vector.broadcast %104 : vector<1x128xf32> to vector<128x128xf32>
    %106 = arith.addf %103, %105 : vector<128x128xf32>
    %cst_93 = arith.constant 0.000000e+00 : f32
    %107 = vector.broadcast %cst_93 : f32 to vector<128x128xf32>
    %108 = arith.maximumf %106, %107 : vector<128x128xf32>
    %109 = arith.truncf %108 : vector<128x128xf32> to vector<128x128xbf16>
    %c0_94 = arith.constant 0 : index
    %c0_95 = arith.constant 0 : index
    %110 = vector.load %arg7[%c0_94, %c0_95] : memref<128x256xbf16, #tpu.memory_space<vmem>>, vector<128x256xbf16>
    %cst_96 = arith.constant dense<0.000000e+00> : vector<128x256xf32>
    %111 = tpu.matmul %109, %110, %cst_96 {dimension_numbers = #tpu.dot_dimension_numbers<[1], [0], [0], [1], [0, 0, 1, 1], [], []>} : vector<128x128xbf16>, vector<128x256xbf16>, vector<128x256xf32> -> vector<128x256xf32>
    %c0_97 = arith.constant 0 : index
    %c0_98 = arith.constant 0 : index
    %112 = vector.load %arg10[%c0_97, %c0_98] : memref<1x256xf32, #tpu.memory_space<vmem>>, vector<1x256xf32>
    %113 = vector.broadcast %112 : vector<1x256xf32> to vector<128x256xf32>
    %114 = arith.addf %111, %113 : vector<128x256xf32>
    %115 = arith.extf %4 : vector<128x256xbf16> to vector<128x256xf32>
    %116 = arith.addf %114, %115 : vector<128x256xf32>
    %cst_99 = arith.constant 0.000000e+00 : f32
    %117 = vector.broadcast %cst_99 : f32 to vector<128x256xf32>
    %118 = arith.maximumf %116, %117 : vector<128x256xf32>
    %119 = vector.shape_cast %118 : vector<128x256xf32> to vector<8x16x256xf32>
    %120 = arith.truncf %119 : vector<8x16x256xf32> to vector<8x16x256xbf16>
    %c0_100 = arith.constant 0 : index
    %c0_101 = arith.constant 0 : index
    %c0_102 = arith.constant 0 : index
    %c0_103 = arith.constant 0 : index
    %121 = vector.load %arg11[%c0_100, %c0_101, %c0_102, %c0_103] : memref<1x8x16x256xbf16, #tpu.memory_space<vmem>>, vector<1x8x16x256xbf16>
    %122 = vector.shape_cast %121 : vector<1x8x16x256xbf16> to vector<8x16x256xbf16>
    %123 = vector.shape_cast %120 : vector<8x16x256xbf16> to vector<1x8x16x256xbf16>
    tpu.vector_store %arg11[%c0_100, %c0_101, %c0_102, %c0_103], %123 {strides = array<i32>} : memref<1x8x16x256xbf16, #tpu.memory_space<vmem>>, vector<1x8x16x256xbf16>,
    return
  }
  func.func @transform_0(%arg0: i32, %arg1: i32) -> (i32, i32, i32, i32) {
    %c0_i32 = arith.constant 0 : i32
    %c0_i32_0 = arith.constant 0 : i32
    %c0_i32_1 = arith.constant 0 : i32
    return %arg0, %arg1, %c0_i32, %c0_i32_0 : i32, i32, i32, i32
  }
  func.func @transform_1(%arg0: i32, %arg1: i32) -> (i32, i32, i32, i32) {
    %c8_i32 = arith.constant 8 : i32
    %0 = arith.muli %arg1, %c8_i32 : i32
    %c1_i32 = arith.constant 1 : i32
    %1 = arith.subi %0, %c1_i32 : i32
    %c0_i32 = arith.constant 0 : i32
    %2 = arith.maxsi %1, %c0_i32 : i32
    %c0_i32_0 = arith.constant 0 : i32
    %c0_i32_1 = arith.constant 0 : i32
    %c0_i32_2 = arith.constant 0 : i32
    return %arg0, %2, %c0_i32_0, %c0_i32_1 : i32, i32, i32, i32
  }
  func.func @transform_2(%arg0: i32, %arg1: i32) -> (i32, i32, i32, i32) {
    %c1_i32 = arith.constant 1 : i32
    %0 = arith.addi %arg1, %c1_i32 : i32
    %c8_i32 = arith.constant 8 : i32
    %1 = arith.muli %0, %c8_i32 : i32
    %c15_i32 = arith.constant 15 : i32
    %2 = arith.minsi %1, %c15_i32 : i32
    %c0_i32 = arith.constant 0 : i32
    %c0_i32_0 = arith.constant 0 : i32
    %c0_i32_1 = arith.constant 0 : i32
    return %arg0, %2, %c0_i32, %c0_i32_0 : i32, i32, i32, i32
  }
  func.func @transform_3(%arg0: i32, %arg1: i32) -> (i32, i32) {
    %c0_i32 = arith.constant 0 : i32
    %c0_i32_0 = arith.constant 0 : i32
    %c0_i32_1 = arith.constant 0 : i32
    return %c0_i32, %c0_i32_0 : i32, i32
  }
  func.func @transform_4(%arg0: i32, %arg1: i32) -> (i32, i32, i32) {
    %c0_i32 = arith.constant 0 : i32
    %c0_i32_0 = arith.constant 0 : i32
    %c0_i32_1 = arith.constant 0 : i32
    %c0_i32_2 = arith.constant 0 : i32
    return %c0_i32, %c0_i32_0, %c0_i32_1 : i32, i32, i32
  }
  func.func @transform_5(%arg0: i32, %arg1: i32) -> (i32, i32) {
    %c0_i32 = arith.constant 0 : i32
    %c0_i32_0 = arith.constant 0 : i32
    %c0_i32_1 = arith.constant 0 : i32
    return %c0_i32, %c0_i32_0 : i32, i32
  }
  func.func @transform_6(%arg0: i32, %arg1: i32) -> (i32, i32) {
    %c0_i32 = arith.constant 0 : i32
    %c0_i32_0 = arith.constant 0 : i32
    %c0_i32_1 = arith.constant 0 : i32
    return %c0_i32, %c0_i32_0 : i32, i32
  }
  func.func @transform_7(%arg0: i32, %arg1: i32) -> (i32, i32) {
    %c0_i32 = arith.constant 0 : i32
    %c0_i32_0 = arith.constant 0 : i32
    %c0_i32_1 = arith.constant 0 : i32
    return %c0_i32, %c0_i32_0 : i32, i32
  }
  func.func @transform_8(%arg0: i32, %arg1: i32) -> (i32, i32) {
    %c0_i32 = arith.constant 0 : i32
    %c0_i32_0 = arith.constant 0 : i32
    %c0_i32_1 = arith.constant 0 : i32
    return %c0_i32, %c0_i32_0 : i32, i32
  }
  func.func @transform_9(%arg0: i32, %arg1: i32) -> (i32, i32, i32, i32) {
    %c0_i32 = arith.constant 0 : i32
    %c0_i32_0 = arith.constant 0 : i32
    %c0_i32_1 = arith.constant 0 : i32
    return %arg0, %arg1, %c0_i32, %c0_i32_0 : i32, i32, i32, i32
  }
}

</mosaic_0001>

<bundles_post_ra>
// kernel: tpu_custom_call.1
= control target key start
LH: loop header
LB: loop body
LE: loop exit
PB: predicated region body
PF: predicated region fallthrough
CT: control target
= control target key end

     0   :  { %s8192_s0 = inlined_call_operand.hbm [shape: bf16[2,16,16,256], index: 0, kind: input, shape index: {}]   ;;  %s8193_s1 = inlined_call_operand.hbm [shape: bf16[2,16,16,256], index: 1, kind: input, shape index: {}]   ;;  %s8194_s2 = inlined_call_operand.hbm [shape: bf16[2,16,16,256], index: 2, kind: input, shape index: {}]   ;;  %s8195_s3 = inlined_call_operand.hbm [shape: bf16[256,128], index: 3, kind: input, shape index: {}]   ;;  %s8196_s4 = inlined_call_operand.hbm [shape: bf16[9,128,128], index: 4, kind: input, shape index: {}]   ;;  %s8197_s5 = inlined_call_operand.hbm [shape: bf16[128,256], index: 5, kind: input, shape index: {}]   ;;  %s8198_s6 = inlined_call_operand.vmem [shape: f32[1,128], index: 6, kind: input, shape index: {}]   ;;  %s8199_s7 = inlined_call_operand.vmem [shape: f32[1,128], index: 7, kind: input, shape index: {}]   ;;  %s8200_s8 = inlined_call_operand.vmem [shape: f32[1,256], index: 8, kind: input, shape index: {}]   ;;  %s8201_s9 = inlined_call_operand.hbm [shape: bf16[2,16,16,256], index: 9, kind: output, shape index: {}]  }
   0x1   :  { %8236 = sst [smem:[#allocation36_spill]] %s8192_s0 }
   0x2   :  { %8237 = sst [smem:[#allocation37_spill]] %s8193_s1 }
   0x3   :  { %8238 = sst [smem:[#allocation38_spill]] %s8194_s2 }
   0x4   :  { %8239 = sst [smem:[#allocation39_spill]] %s8195_s3 }
   0x5   :  { %8240 = sst [smem:[#allocation40_spill]] %s8196_s4 }
   0x6   :  { %8241 = sst [smem:[#allocation41_spill]] %s8197_s5 }
   0x7   :  { %8242 = sst [smem:[#allocation42_spill]] %s8198_s6 }
   0x8   :  { %8243 = sst [smem:[#allocation43_spill]] %s8199_s7 }
   0x9   :  { %8244 = sst [smem:[#allocation44_spill]] %s8200_s8 }
   0xa   :  { %8245 = sst [smem:[#allocation45_spill]] %s8201_s9 }
   0xb   :  { %14 = vsyncpa [#allocation4], 0 }
   0xc   :  { %16 = vsyncpa [#allocation4 + $0x1], 0 }
   0xd   :  { %17 = vsyncpa [#allocation7], 0 }
   0xe   :  { %19 = vsyncpa [#allocation7 + $0x1], 0 }
   0xf   :  { %20 = vsyncpa [#allocation10], 0 }
  0x10   :  { %21 = vsyncpa [#allocation13], 0 }
  0x11   :  { %22 = vsyncpa [#allocation5], 0 }
  0x12   :  { %24 = vsyncpa [#allocation5 + $0x1], 0  ;;  %s6675_s30 = smov 0   ;;  %s6677_s10 = smov 0  }
  0x13   :  { %s6679_s11 = smov 0   ;;  %s6681_s12 = smov 0  }
  0x14   :  { %s6683_s13 = smov 0   ;;  %s6685_s14 = smov 0  }
  0x15   :  { %s6687_s15 = smov 0   ;;  %s6689_s16 = smov 0  }
  0x16   :  { %s6691_s17 = smov 0   ;;  %s6693_s18 = smov 0  }
  0x17   :  { %s6695_s19 = smov 0   ;;  %s6697_s20 = smov 0  }
  0x18   :  { %s6699_s21 = smov 0   ;;  %s6701_s22 = smov 0  }
  0x19 LB: > { %8246 = sst [smem:[#allocation21_spill]] %s6557_s30  ;;  %s6746_s23 = sadd.s32 4294967295, %s6609_s22   ;;  %s6609_s22 = sphi %s6701_s22, %s30_s22   ;;  %s6605_s21 = sphi %s6699_s21, %s8341_s21   ;;  %s6601_s20 = sphi %s6697_s20, %s8351_s20   ;;  %s6597_s19 = sphi %s6695_s19, %s8339_s19   ;;  %s6593_s18 = sphi %s6693_s18, %s8350_s18   ;;  %s6589_s17 = sphi %s6691_s17, %s8349_s17   ;;  %s6585_s16 = sphi %s6689_s16, %s8348_s16   ;;  %s6581_s15 = sphi %s6687_s15, %s8347_s15   ;;  %s6577_s14 = sphi %s6685_s14, %s8346_s14   ;;  %s6573_s13 = sphi %s6683_s13, %s8345_s13   ;;  %s6569_s12 = sphi %s6681_s12, %s8335_s12   ;;  %s6565_s11 = sphi %s6679_s11, %s8344_s11   ;;  %s6561_s10 = sphi %s6677_s10, %s8343_s10   ;;  %s6557_s30 = sphi %s6675_s30, %s8333_s30  }
  0x1a   : > { %8247 = sst [smem:[#allocation22_spill]] %s6561_s10  ;;  %p4918_p0 = scmp.ge.s32.totalorder %s6609_s22, 1 }
  0x1b   : > { %8248 = sst [smem:[#allocation23_spill]] %s6565_s11  ;;  %p8204_p1 = scmp.eq.s32.totalorder %s6746_s23, 0 }
  0x1c   : > { %8249 = sst [smem:[#allocation24_spill]] %s6573_s13  ;;  %p301_p3 = scmp.lt.s32.totalorder %s6609_s22, 5 }
  0x1d   : > { %8250 = sst [smem:[#allocation25_spill]] %s6593_s18  ;;  %s6611_s25 = smov [#allocation9]  }
  0x1e   : > { %8251 = sst [smem:[#allocation26_spill]] %s6597_s19  ;;  %p6752_p4 = pnand %p4918_p0, %p301_p3 }
  0x1f   : > { %8252 = sst [smem:[#allocation27_spill]] %s6601_s20  ;;  %s313_s26 = sshll.u32 %s6611_s25, 4  ;;  %s314_s26 = int_to_ptr.vmem [resolvable:$true] %s313_s26 }
  0x20   : > { %8253 = sst [smem:[#allocation28_spill]] %s6605_s21  ;;  %p5944_p5 = pneg %p6752_p4 }
  0x21   : > { %s8254_s24 = scalar_select %p6752_p4, 1, 0 }
  0x22   : > { %p6760_p6 = pnand %p5944_p5, %p8204_p1  ;;  %s8257_s3 = sld [smem:[#allocation39_spill]] }
  0x23   : > { %8255 = sst [smem:[#allocation29_spill]] %s8254_s24 }
  0x24   : > { %s8256_s27 = scalar_select %p6760_p6, 1, 0 }
  0x25   : > { %p6772_p8 = pneg %p6760_p6 }
  0x28   : > { %s6273_s9 = scalar_lea.hbm %s8257_s3, 2048 }
  0x29   : > { %p6274_p7 = scmp.ne.s32.totalorder %s8257_s3, %s6273_s9  ;;  %p6280_p11 = scmp.lt.u32.totalorder %s6273_s9, %s8257_s3 }
  0x2b   : > { %p6276_p9 = pnand %p6772_p8, %p6274_p7 }
  0x2d   : > { %p6277_p10 = pneg %p6276_p9 }
  0x2f   : > { %p6282_p12 = pnand %p6280_p11, %p6277_p10 }
  0x31   : > { %6285 = shalt.err (!%p6282_p12)
}
  0x32   : > { %s6286_s28 = scalar_lea.vmem %s314_s26, 2048  ;;  %p6294_p5 = scmp.lt.s32.totalorder %s314_s26, %s314_s26 }
  0x33   : > { %p6287_p13 = scmp.ne.s32.totalorder %s314_s26, %s6286_s28  ;;  %p6295_p2 = scmp.lt.s32.totalorder %s6286_s28, %s6286_s28 }
  0x35   : > { %p6289_p0 = pnand %p6287_p13, %p6772_p8  ;;  %p6296_p1 = por %p6295_p2, %p6294_p5 }
  0x37   : > { %p6290_p3 = pneg %p6289_p0 }
  0x39   : > { %p6297_p4 = pnand %p6296_p1, %p6290_p3 }
  0x3b   : > { %6300 = shalt.err (!%p6297_p4)
}
  0x3c   : > { %s8209_s8 = smov 64   ;;  %s8210_s7 = smov 4  }
  0x3d   : > { %5947 = dma.hbm_to_vmem [thread:$0]  (!%p6760_p6), %s8257_s3, 2048, %s314_s26, [#allocation10], %s8209_s8, %s8209_s8, %s8210_s7  }
  0x3e   : > { %s39_s19 = sadd.s32 1, %s6601_s20  ;;  %s42_s29 = sadd.s32 1, %s6605_s21 }
  0x3f   : > { %p40_p1 = scmp.ge.s32.totalorder %s39_s19, 2  ;;  %p8223_p2 = scmp.eq.s32.totalorder %s6609_s22, 0 }
  0x40   : > { %s4912_s28 = sshll.u32 %s6601_s20, 3  ;;  %s87_s6 = sadd.s32 1, %s6577_s14 }
  0x41   : > { %s8353_s19 = smov (%p40_p1, %s39_s19), 0  ;;  %s8355_s29 = smov (!%p40_p1, %s42_s29), %s6605_s21 }
  0x42   : > { %8259 = sst [smem:[#allocation30_spill]] %s8353_s19  ;;  %s47_s24 = ssub.s32 %s6601_s20, %s8353_s19 }
  0x43   : > { %s4913_s2 = sadd.s32 4294967295, %s4912_s28  ;;  %p44_p4 = scmp.ge.s32.totalorder %s8355_s29, 2 }
  0x44   : > { %p76_p7 = scmp.gt.s32.totalorder %s4913_s2, 0  ;;  %s4914_s26 = sshll.u32 %s8353_s19, 3 }
  0x45   : > { %p94_p9 = scmp.ne.s32.totalorder %s6577_s14, %s6573_s13  ;;  %s8357_s29 = smov (%p44_p4, %s8355_s29), 0 }
  0x46   : > { %8260 = sst [smem:[#allocation31_spill]] %s8357_s29  ;;  %s8359_s2 = smov (!%p76_p7, %s4913_s2), 0 }
  0x47   : > { %s6808_s9 = ssub.s32 %s6605_s21, %s8357_s29  ;;  %s4915_s18 = sadd.s32 4294967295, %s4914_s26 }
  0x48   : > { %8261 = sst [smem:[#allocation32_spill]] %s6808_s9  ;;  %s6811_s8 = sor.u32 %s47_s24, %s6808_s9 }
  0x49   : > { %p80_p10 = scmp.gt.s32.totalorder %s4915_s18, 0  ;;  %p6816_p12 = por %p94_p9, %p8223_p2 }
  0x4a   : > { %p100_p13 = scmp.ne.s32.totalorder %s6573_s13, %s6569_s12  ;;  %s6822_s3 = sadd.s32 8, %s4912_s28 }
  0x4b   : > { %s8361_s18 = smov (!%p80_p10, %s4915_s18), 0  ;;  %8263 = sst [smem:[#allocation33_spill]] %s6822_s3 }
  0x4c   : > { %s83_s29 = ssub.s32 %s8359_s2, %s8361_s18  ;;  %p8264_p3 = scmp.eq.s32.totalorder %s6746_s23, 0 }
  0x4d   : > { %s84_s24 = sor.u32 %s83_s29, %s6808_s9  ;;  %s6832_s30 = sadd.s32 8, %s4914_s26 }
  0x4e   : > { %p6828_p5 = por %p100_p13, %p8264_p3  ;;  %p85_p1 = scmp.eq.s32.totalorder %s84_s24, 0 }
  0x4f   : > { %p8222_p7 = scmp.lt.s32.totalorder %s6609_s22, 4  ;;  %s6840_s12 = sshll.u32 %s6605_s21, 6 }
  0x50   : > { %s8265_s19 = scalar_select %p6828_p5, 1, 0 }
  0x51   : > { %s6836_s10 = scalar_select %p85_p1, %s6577_s14, %s87_s6  }
  0x52   : > { %8266 = sst [smem:[#allocation34_spill]] %s8265_s19  ;;  %s386_s28 = sand.u32 1, %s6609_s22  }
  0x53   : > { %s388_s29 = sand.u32 1, %s6577_s14   ;;  %s4931_s13 = sshll.u32 %s8359_s2, 2 }
  0x54   : > { %s4928_s18 = sshll.u32 %s388_s29, 4  ;;  %s400_s9 = sadd.s32 %s4931_s13, %s6840_s12 }
  0x55   : > { %s4933_s3 = sshll.u32 %s400_s9, 6  ;;  %s390_s19 = scalar_lea.vmem [#allocation6], %s4928_s18 }
  0x56   : > { %s403_s24 = sshll.u32 %s390_s19, 4  ;;  %s8267_s1 = sld [smem:[#allocation37_spill]]  ;;  %s6850_s24 = int_to_ptr.vmem [resolvable:$true] %s403_s24 }
  0x57   : > { %p6856_p9 = pnand %p8222_p7, %p6816_p12  ;;  %s6614_s2 = smov [#allocation11]  }
  0x58   : > { %s326_s13 = sshll.u32 %s6614_s2, 4  ;;  %s6862_s0 = scalar_lea.sflag [#allocation7], %s386_s28  ;;  %s6860_s13 = int_to_ptr.vmem [resolvable:$true] %s326_s13 }
  0x59   : > { %p6303_p13 = pneg %p6856_p9 }
  0x5c   : > { %s6848_s26 = scalar_lea.hbm %s8267_s1, %s4933_s3  ;;  %s6306_s19 = scalar_lea.hbm %s8267_s1, 8192 }
  0x5d   : > { %s6301_s3 = scalar_lea.hbm %s6848_s26, 256  ;;  %p6307_p12 = scmp.lt.u32.totalorder %s6848_s26, %s8267_s1 }
  0x5e   : > { %p6302_p10 = scmp.ne.s32.totalorder %s6848_s26, %s6301_s3  ;;  %p6308_p4 = scmp.lt.u32.totalorder %s6306_s19, %s6301_s3 }
  0x5f   : > { %p6310_p7 = scmp.lt.u32.totalorder %s6301_s3, %s6848_s26 }
  0x60   : > { %p6304_p3 = pnand %p6303_p13, %p6302_p10  ;;  %p6309_p0 = por %p6308_p4, %p6307_p12 }
  0x62   : > { %p6305_p1 = pneg %p6304_p3  ;;  %p6311_p2 = por %p6310_p7, %p6309_p0 }
  0x64   : > { %p6312_p11 = pnand %p6311_p2, %p6305_p1 }
  0x66   : > { %6315 = shalt.err (!%p6312_p11)
}
  0x67   : > { %s6316_s28 = scalar_lea.vmem %s6850_s24, 256  ;;  %s6615_s18 = smov [#allocation6]  }
  0x68   : > { %p6317_p10 = scmp.ne.s32.totalorder %s6850_s24, %s6316_s28  ;;  %s6321_s2 = sshll.u32 %s6615_s18, 4  ;;  %s6322_s2 = int_to_ptr.vmem [resolvable:$false] %s6321_s2 }
  0x69   : > { %s6323_s11 = scalar_lea.vmem %s6322_s2, 512  ;;  %p6324_p6 = scmp.lt.s32.totalorder %s6850_s24, %s6322_s2 }
  0x6a   : > { %p6319_p3 = pnand %p6317_p10, %p6303_p13  ;;  %p6325_p4 = scmp.lt.s32.totalorder %s6323_s11, %s6316_s28 }
  0x6c   : > { %p6320_p5 = pneg %p6319_p3  ;;  %p6326_p12 = por %p6325_p4, %p6324_p6 }
  0x6e   : > { %p6327_p0 = pnand %p6326_p12, %p6320_p5 }
  0x70   : > { %6330 = shalt.err (!%p6327_p0)
}
  0x71   : > { %s8227_s3 = smov 128   ;;  %s8229_s7 = smov 8  }
  0x72   : > { %5960 = dma.hbm_to_vmem [thread:$0]  (!%p6856_p9), %s6848_s26, 256, %s6850_s24, %s6862_s0, %s8227_s3, %s8227_s3, %s8229_s7  }
  0x73   : > { %s8269_s4 = sld [smem:[#allocation40_spill]] }
  0x79   : > { %s6331_s29 = scalar_lea.hbm %s8269_s4, 9216 }
  0x7a   : > { %p6332_p6 = scmp.ne.s32.totalorder %s8269_s4, %s6331_s29  ;;  %p6338_p5 = scmp.lt.u32.totalorder %s6331_s29, %s8269_s4 }
  0x7c   : > { %p6334_p2 = pnand %p6332_p6, %p6772_p8 }
  0x7e   : > { %p6335_p11 = pneg %p6334_p2 }
  0x80   : > { %p6340_p7 = pnand %p6338_p5, %p6335_p11 }
  0x82   : > { %6343 = shalt.err (!%p6340_p7)
}
  0x83   : > { %s6344_s24 = scalar_lea.vmem %s6860_s13, 9216  ;;  %p6352_p10 = scmp.lt.s32.totalorder %s6860_s13, %s6860_s13 }
  0x84   : > { %p6345_p9 = scmp.ne.s32.totalorder %s6860_s13, %s6344_s24  ;;  %p6353_p3 = scmp.lt.s32.totalorder %s6344_s24, %s6344_s24 }
  0x86   : > { %p6347_p13 = pnand %p6345_p9, %p6772_p8  ;;  %p6354_p4 = por %p6353_p3, %p6352_p10 }
  0x88   : > { %p6348_p1 = pneg %p6347_p13 }
  0x8a   : > { %p6355_p12 = pnand %p6354_p4, %p6348_p1 }
  0x8c   : > { %6358 = shalt.err (!%p6355_p12)
}
  0x8d   : > { %p8270_p0 = scmp.ne.s32.totalorder %s8256_s27, 0  ;;  %s8271_s26 = smov 4  }
  0x8e   : > { %s8272_s6 = smov 64   ;;  %s6618_s29 = smov [#allocation12]  }
  0x8f   : > { %5950 = dma.hbm_to_vmem [thread:$0]  (!%p8270_p0), %s8269_s4, 9216, %s6860_s13, [#allocation10], %s8272_s6, %s8272_s6, %s8271_s26  }
  0x90   : > { %s339_s28 = sshll.u32 %s6618_s29, 4  ;;  %s8273_s5 = sld [smem:[#allocation41_spill]]  ;;  %s340_s28 = int_to_ptr.vmem [resolvable:$true] %s339_s28 }
  0x96   : > { %s6359_s11 = scalar_lea.hbm %s8273_s5, 2048 }
  0x97   : > { %p6360_p6 = scmp.ne.s32.totalorder %s8273_s5, %s6359_s11  ;;  %p6366_p5 = scmp.lt.u32.totalorder %s6359_s11, %s8273_s5 }
  0x99   : > { %p6362_p2 = pnand %p6360_p6, %p6772_p8 }
  0x9b   : > { %p6363_p11 = pneg %p6362_p2 }
  0x9d   : > { %p6368_p7 = pnand %p6366_p5, %p6363_p11 }
  0x9f   : > { %6371 = shalt.err (!%p6368_p7)
}
  0xa0   : > { %s6372_s13 = scalar_lea.vmem %s340_s28, 2048  ;;  %p6380_p10 = scmp.lt.s32.totalorder %s340_s28, %s340_s28 }
  0xa1   : > { %p6373_p9 = scmp.ne.s32.totalorder %s340_s28, %s6372_s13  ;;  %p6381_p3 = scmp.lt.s32.totalorder %s6372_s13, %s6372_s13 }
  0xa3   : > { %p6375_p13 = pnand %p6373_p9, %p6772_p8  ;;  %p6382_p4 = por %p6381_p3, %p6380_p10 }
  0xa5   : > { %p6376_p1 = pneg %p6375_p13 }
  0xa7   : > { %p6383_p12 = pnand %p6382_p4, %p6376_p1 }
  0xa9   : > { %6386 = shalt.err (!%p6383_p12)
}
  0xaa   : > { %s8274_s3 = smov 8   ;;  %s8275_s26 = smov 128  }
  0xab   : > { %5953 = dma.hbm_to_vmem [thread:$0]  (!%p8270_p0), %s8273_s5, 2048, %s340_s28, [#allocation13], %s8275_s26, %s8275_s26, %s8274_s3  }
  0xac   : > { %s4911_s27 = sadd.s32 4294967294, %s6609_s22   ;;  %s51_s25 = sadd.s32 1, %s6589_s17 }
  0xad   : > { %p8276_p8 = scmp.eq.s32.totalorder %s6811_s8, 0  ;;  %p58_p6 = scmp.ne.s32.totalorder %s6589_s17, %s6585_s16 }
  0xae   : > { %p64_p2 = scmp.ne.s32.totalorder %s6585_s16, %s6581_s15  ;;  %p294_p11 = scmp.eq.s32.totalorder %s4911_s27, 3 }
  0xaf   : > { %s6945_s6 = scalar_select %p8276_p8, %s6589_s17, %s51_s25  }
  0xb0   : > { %s362_s19 = sand.u32 1, %s6589_s17   ;;  %p8278_p5 = scmp.eq.s32.totalorder %s6609_s22, 0 }
  0xb1   : > { %8277 = sst [smem:[#allocation35_spill]] %s6945_s6  ;;  %p8279_p9 = scmp.eq.s32.totalorder %s6746_s23, 0 }
  0xb2   : > { %p60_p7 = por %p8278_p5, %p58_p6  ;;  %p8281_p1 = scmp.eq.s32.totalorder %s6746_s23, 3 }
  0xb3   : > { %p6956_p13 = por %p8279_p9, %p64_p2  ;;  %p6966_p0 = por %p294_p11, %p64_p2 }
  0xb4   : > { %p6962_p10 = por %p8281_p1, %p58_p6  ;;  %s4923_s28 = sshll.u32 %s362_s19, 7 }
  0xb5   : > { %s8283_s8 = scalar_select %p6966_p0, 1, 0 }
  0xb6   : > { %s8282_s29 = scalar_select %p6962_p10, 1, 0 }
  0xb7   : > { %s5216_s18 = sshll.u32 %s6601_s20, 5  ;;  %s366_s11 = scalar_lea.vmem [#allocation3], %s4923_s28 }
  0xb8   : > { %s373_s2 = sadd.s32 %s5216_s18, %s6840_s12  ;;  %s376_s24 = sshll.u32 %s366_s11, 4  ;;  %s6972_s24 = int_to_ptr.vmem [resolvable:$true] %s376_s24 }
  0xb9   : > { %s4927_s13 = sshll.u32 %s373_s2, 6  ;;  %s8284_s27 = sld [smem:[#allocation36_spill]] }
  0xba   : > { %p8285_p3 = scmp.lt.s32.totalorder %s6609_s22, 4  ;;  %s6985_s28 = scalar_lea.sflag [#allocation4], %s362_s19 }
  0xbc   : > { %p6981_p4 = pnand %p8285_p3, %p60_p7 }
  0xbe   : > { %p6389_p8 = pneg %p6981_p4 }
  0xbf   : > { %s6977_s25 = scalar_lea.hbm %s8284_s27, %s4927_s13  ;;  %s6392_s13 = scalar_lea.hbm %s8284_s27, 8192 }
  0xc0   : > { %s6387_s18 = scalar_lea.hbm %s6977_s25, 2048  ;;  %p6393_p11 = scmp.lt.u32.totalorder %s6977_s25, %s8284_s27 }
  0xc1   : > { %p6388_p12 = scmp.ne.s32.totalorder %s6977_s25, %s6387_s18  ;;  %p6394_p5 = scmp.lt.u32.totalorder %s6392_s13, %s6387_s18 }
  0xc2   : > { %p6396_p9 = scmp.lt.u32.totalorder %s6387_s18, %s6977_s25 }
  0xc3   : > { %p6390_p6 = pnand %p6389_p8, %p6388_p12  ;;  %p6395_p7 = por %p6394_p5, %p6393_p11 }
  0xc5   : > { %p6391_p2 = pneg %p6390_p6  ;;  %p6397_p1 = por %p6396_p9, %p6395_p7 }
  0xc7   : > { %p6398_p3 = pnand %p6397_p1, %p6391_p2 }
  0xc9   : > { %6401 = shalt.err (!%p6398_p3)
}
  0xca   : > { %s6402_s19 = scalar_lea.vmem %s6972_s24, 2048  ;;  %s6619_s2 = smov [#allocation3]  }
  0xcb   : > { %p6403_p12 = scmp.ne.s32.totalorder %s6972_s24, %s6402_s19  ;;  %s6407_s11 = sshll.u32 %s6619_s2, 4  ;;  %s6408_s11 = int_to_ptr.vmem [resolvable:$false] %s6407_s11 }
  0xcc   : > { %s6409_s1 = scalar_lea.vmem %s6408_s11, 4096  ;;  %p6410_p10 = scmp.lt.s32.totalorder %s6972_s24, %s6408_s11 }
  0xcd   : > { %p6405_p6 = pnand %p6403_p12, %p6389_p8  ;;  %p6411_p11 = scmp.lt.s32.totalorder %s6409_s1, %s6402_s19 }
  0xcf   : > { %p6406_p0 = pneg %p6405_p6  ;;  %p6412_p5 = por %p6411_p11, %p6410_p10 }
  0xd1   : > { %p6413_p7 = pnand %p6412_p5, %p6406_p0 }
  0xd3   : > { %6416 = shalt.err (!%p6413_p7)
}
  0xd4   : > { %s8287_s18 = sld [smem:[#allocation23_spill]]  ;;  %s8288_s13 = sld [smem:[#allocation33_spill]] }
  0xd5   : > { %s8289_s7 = sld [smem:[#allocation22_spill]]  ;;  %s8291_s19 = sld [smem:[#allocation32_spill]] }
  0xd6   : > { %s8290_s2 = sld [smem:[#allocation21_spill]]  ;;  %p8293_p0 = scmp.lt.s32.totalorder %s6832_s30, 15 }
  0xd7   : > { %5957 = dma.hbm_to_vmem [thread:$0]  (!%p6981_p4), %s6977_s25, 2048, %s6972_s24, %s6985_s28, %s8275_s26, %s8275_s26, %s8274_s3  }
  0xd8   : > { %s8365_s30 = smov (!%p8293_p0, %s6832_s30), 15  ;;  %p8294_p9 = scmp.eq.s32.totalorder %s6609_s22, 0 }
  0xd9   : > { %p8295_p12 = scmp.eq.s32.totalorder %s6746_s23, 0  ;;  %s8297_s6 = sld [smem:[#allocation38_spill]] }
  0xda   : > { %s123_s4 = sadd.s32 1, %s8287_s18  ;;  %p8292_p10 = scmp.lt.s32.totalorder %s8288_s13, 15 }
  0xdb   : > { %p130_p8 = scmp.ne.s32.totalorder %s8287_s18, %s8289_s7  ;;  %s415_s1 = sand.u32 1, %s8287_s18  }
  0xdc   : > { %s8363_s13 = smov (!%p8292_p10, %s8288_s13), 15  ;;  %p136_p2 = scmp.ne.s32.totalorder %s8289_s7, %s8290_s2 }
  0xdd   : > { %s119_s11 = ssub.s32 %s8363_s13, %s8365_s30  ;;  %p132_p1 = por %p130_p8, %p8294_p9 }
  0xde   : > { %s120_s5 = sor.u32 %s119_s11, %s8291_s19  ;;  %p7033_p6 = por %p136_p2, %p8295_p12 }
  0xdf   : > { %p121_p3 = scmp.eq.s32.totalorder %s120_s5, 0  ;;  %s4934_s24 = sshll.u32 %s415_s1, 4 }
  0xe0   : > { %s8296_s27 = scalar_select %p7033_p6, 1, 0 }
  0xe1   : > { %s4936_s25 = sshll.u32 %s8363_s13, 2  ;;  %s8367_s18 = smov (!%p121_p3, %s8287_s18), %s123_s4 }
  0xe2   : > { %s427_s28 = sadd.s32 %s4936_s25, %s6840_s12  ;;  %s417_s20 = scalar_lea.vmem [#allocation8], %s4934_s24 }
  0xe3   : > { %s4938_s21 = sshll.u32 %s427_s28, 6  ;;  %s430_s7 = sshll.u32 %s417_s20, 4  ;;  %s7046_s7 = int_to_ptr.vmem [resolvable:$true] %s430_s7 }
  0xe4   : > { %s7044_s19 = scalar_lea.hbm %s8297_s6, %s4938_s21  ;;  %p8298_p4 = scmp.lt.s32.totalorder %s6609_s22, 4 }
  0xe5   : > { %s6417_s12 = scalar_lea.hbm %s7044_s19, 256  ;;  %s6422_s13 = scalar_lea.hbm %s8297_s6, 8192 }
  0xe6   : > { %p7050_p11 = pnand %p8298_p4, %p132_p1  ;;  %p6418_p5 = scmp.ne.s32.totalorder %s7044_s19, %s6417_s12 }
  0xe7   : > { %p6423_p8 = scmp.lt.u32.totalorder %s7044_s19, %s8297_s6  ;;  %p6424_p2 = scmp.lt.u32.totalorder %s6422_s13, %s6417_s12 }
  0xe8   : > { %p6419_p7 = pneg %p7050_p11  ;;  %p6426_p1 = scmp.lt.u32.totalorder %s6417_s12, %s7044_s19 }
  0xe9   : > { %p6425_p9 = por %p6424_p2, %p6423_p8 }
  0xea   : > { %p6420_p10 = pnand %p6419_p7, %p6418_p5 }
  0xeb   : > { %p6427_p3 = por %p6426_p1, %p6425_p9 }
  0xec   : > { %p6421_p0 = pneg %p6420_p10 }
  0xee   : > { %p6428_p12 = pnand %p6427_p3, %p6421_p0 }
  0xf0   : > { %6431 = shalt.err (!%p6428_p12)
}
  0xf1   : > { %s6432_s1 = scalar_lea.vmem %s7046_s7, 256  ;;  %s6620_s24 = smov [#allocation8]  }
  0xf2   : > { %p6433_p4 = scmp.ne.s32.totalorder %s7046_s7, %s6432_s1  ;;  %s6437_s25 = sshll.u32 %s6620_s24, 4  ;;  %s6438_s25 = int_to_ptr.vmem [resolvable:$false] %s6437_s25 }
  0xf3   : > { %s6439_s28 = scalar_lea.vmem %s6438_s25, 512  ;;  %p6440_p6 = scmp.lt.s32.totalorder %s7046_s7, %s6438_s25 }
  0xf4   : > { %p6435_p5 = pnand %p6433_p4, %p6419_p7  ;;  %p6441_p8 = scmp.lt.s32.totalorder %s6439_s28, %s6432_s1 }
  0xf6   : > { %p6436_p10 = pneg %p6435_p5  ;;  %p6442_p2 = por %p6441_p8, %p6440_p6 }
  0xf8   : > { %p6443_p9 = pnand %p6442_p2, %p6436_p10 }
  0xfa   : > { %6446 = shalt.err (!%p6443_p9)
}
  0xfb   : > { %5963 = dma.hbm_to_vmem [thread:$0]  (!%p7050_p11), %s7044_s19, 256, %s7046_s7, %s6862_s0, %s8275_s26, %s8275_s26, %s8274_s3  }
  0xfc   : > { %s8300_s2 = sld [smem:[#allocation29_spill]] }
 0x102   : > { %p8301_p7 = scmp.ne.s32.totalorder %s8300_s2, 0 }
 0x103   : > { %s7086_s30 = sand.u32 (!%p8301_p7), 1, %s6585_s16  }
 0x104   : > { %442 = sbr.rel (%p8301_p7) target bundleno = 1377 (0x561), region = 56  ;;  %s4940_s12 = sshll.u32 (!%p8301_p7), %s7086_s30, 7 }
 0x105   : > { %s445_s20 = scalar_lea.sflag (!%p8301_p7), [#allocation4], %s7086_s30  ;;  %s7092_s5 = scalar_lea.vmem (!%p8301_p7), [#allocation3], %s4940_s12 }
 0x10b   : > { %6532 = dma.done.wait (%p6956_p13), %s445_s20, 2048  }
 0x10c   : > { %6534 = vsyncadd (%p6956_p13), %s445_s20, 4294965248  ;;  %s8302_s0 = sld [smem:[#allocation24_spill]]  ;;  %s8303_s3 = sld [smem:[#allocation34_spill]] }
 0x10d   : > { %s453_s26 = sand.u32 1, %s6746_s23  }
 0x10e   : > { %s454_s21 = scalar_lea.sflag [#allocation7], %s453_s26 }
 0x112   : > { %s455_s7 = sand.u32 1, %s8302_s0   ;;  %p8304_p6 = scmp.ne.s32.totalorder %s8303_s3, 0 }
 0x113   : > { %s7100_s19 = sshll.u32 %s455_s7, 4 }
 0x114   : > { %s457_s13 = scalar_lea.vmem [#allocation6], %s7100_s19 }
 0x115   : > { %6536 = dma.done.wait (%p8304_p6), %s454_s21, 256  }
 0x116   : > { %6538 = vsyncadd (%p8304_p6), %s454_s21, 4294967040  ;;  %s8305_s4 = sld [smem:[#allocation22_spill]]  ;;  %p8306_p13 = scmp.ne.s32.totalorder %s8296_s27, 0 }
 0x11c   : > { %s464_s11 = sand.u32 1, %s8305_s4  }
 0x11d   : > { %s7108_s9 = sshll.u32 %s464_s11, 4 }
 0x11e   : > { %s466_s1 = scalar_lea.vmem [#allocation8], %s7108_s9 }
 0x11f   : > { %6540 = dma.done.wait (%p8306_p13), %s454_s21, 256  }
 0x120   : > { %6542 = vsyncadd (%p8306_p13), %s454_s21, 4294967040  ;;  %p8307_p11 = scmp.eq.s32.totalorder %s6746_s23, 0 }
 0x122   : > { %6544 = dma.done.wait (%p8307_p11), [#allocation10], 11264   ;;  %p8308_p0 = pmov %p8307_p11 }
 0x124   : > { %6546 = vsyncadd (%p8308_p0), [#allocation10], 4294956032  ;;  %p8309_p1 = pmov %p8308_p0 }
 0x125   : > { %p8310_p3 = pmov %p8308_p0 }
 0x126   : > { %6548 = dma.done.wait (%p8309_p1), [#allocation13], 2048  }
 0x127   : > { %6550 = vsyncadd (%p8310_p3), [#allocation13], 4294965248  ;;  %v7123_v0 = vld [vmem:[#allocation9 + $0x40] sm:$0xff]   ;;  %v7128_v2 = vld [vmem:[#allocation9 + $0x48] sm:$0xff]   ;;  %vm1000_vm0 = vcmask 1040384   ;;  %s8315_s24 = sld [smem:[#allocation42_spill]] }
 0x128   : > { %v7125_v1 = vld [vmem:[#allocation9] sm:$0xff]   ;;  %5256 = vmatprep.subr.bf16.mxu1 %v7123_v0  ;;  %v7131_v3 = vld [vmem:[#allocation9 + $0x8] sm:$0xff]   ;;  %v7134_v4 = vld [vmem:[#allocation9 + $0x50] sm:$0xff]   ;;  %vm1001_vm1 = vsmask.f32 256  ;;  %vm1093_vm5 = vcmask 1043456  }
 0x129   : > { %5257 = vmatpush3.bf16.msra.mxu1 %v7125_v1  ;;  %v7137_v5 = vld [vmem:[#allocation9 + $0x10] sm:$0xff]   ;;  %v7140_v6 = vld [vmem:[#allocation9 + $0x58] sm:$0xff]   ;;  %v7146_v8 = vld [vmem:[#allocation9 + $0x60] sm:$0xff]   ;;  %vm1033_vm3 = vsmask.f32 7938  ;;  %s8320_s25 = sld [smem:[#allocation25_spill]] }
 0x12a   : > { %5258 = vmatprep.subr.bf16.mxu1 %v7128_v2  ;;  %v7143_v7 = vld [vmem:[#allocation9 + $0x18] sm:$0xff]   ;;  %v7149_v9 = vld [vmem:[#allocation9 + $0x20] sm:$0xff]   ;;  %v7152_v10 = vld [vmem:[#allocation9 + $0x68] sm:$0xff]   ;;  %vm1071_vm6 = vsmask.f32 4368  ;;  %vm2047_vm12 = vcmask 1042432  }
 0x12b   : > { %v567_v11 = vld [vmem:[%s7092_s5] sm:$0xff]  ;;  %v568_v12 = vld [vmem:[%s7092_s5 + $0x8] sm:$0xff]  ;;  %v7160_v15 = vld [vmem:[#allocation9 + $0x70] sm:$0xff]   ;;  %vm1441_vm9 = vsmask.f32 3328  ;;  %vm2048_vm13 = vcmask 1046532  }
 0x12c   : > { %v4949_v13 = vcombine.high %v567_v11, %v568_v12  ;;  %v7157_v14 = vld [vmem:[#allocation9 + $0x28] sm:$0xff]   ;;  %v7162_v16 = vld [vmem:[#allocation9 + $0x30] sm:$0xff]   ;;  %v7164_v17 = vld [vmem:[#allocation9 + $0x78] sm:$0xff]   ;;  %v4948_v21 = vcombine.low %v567_v11, %v568_v12  ;;  %vm1442_vm10 = vsmask.f32 7440  ;;  %s8325_s21 = sld [smem:[#allocation43_spill]] }
 0x12d   : > { %5259 = vmatpush3.bf16.msra.mxu1 %v7131_v3  ;;  %v7168_v18 = vld [vmem:[#allocation9 + $0x38] sm:$0xff]   ;;  %v569_v19 = vld [vmem:[%s7092_s5 + $0x10] sm:$0xff]  ;;  %v571_v23 = vld [vmem:[%s7092_s5 + $0x20] sm:$0xff]  ;;  %s8326_s11 = sld [smem:[#allocation44_spill]]  ;;  %s8049_s9 = scalar_lea.vmem [#allocation14], %s4940_s12 }
 0x12e   : > { %5260 = vmatprep.subr.bf16.mxu1 %v7134_v4  ;;  %797 = vmatprep.mubr.bf16.mxu1 %v4949_v13  ;;  %v570_v20 = vld [vmem:[%s7092_s5 + $0x18] sm:$0xff]  ;;  %v572_v24 = vld [vmem:[%s7092_s5 + $0x28] sm:$0xff]  ;;  %v573_v27 = vld [vmem:[%s7092_s5 + $0x30] sm:$0xff]  ;;  %s8327_s12 = sld [smem:[#allocation26_spill]]  ;;  %s4742_s27 = sshll.u32 %s8049_s9, 4  ;;  %s8107_s27 = int_to_ptr.vmem [resolvable:$true] %s4742_s27 }
 0x12f   : > { %v4951_v22 = vcombine.high %v569_v19, %v570_v20  ;;  %v4950_v25 = vcombine.low %v569_v19, %v570_v20  ;;  %v4953_v26 = vcombine.high %v571_v23, %v572_v24  ;;  %v574_v28 = vld [vmem:[%s7092_s5 + $0x38] sm:$0xff]  ;;  %v4952_v29 = vcombine.low %v571_v23, %v572_v24  ;;  %v575_v31 = vld [vmem:[%s7092_s5 + $0x40] sm:$0xff]  ;;  %v576_v32 = vld [vmem:[%s7092_s5 + $0x48] sm:$0xff]  ;;  %p878_p12 = scmp.gt.s32.totalorder %s8320_s25, 0  ;;  %p881_p4 = scmp.lt.s32.totalorder %s8320_s25, 1 }
 0x130   : > { %v4955_v30 = vcombine.high %v573_v27, %v574_v28  ;;  %v4954_v33 = vcombine.low %v573_v27, %v574_v28  ;;  %v4957_v34 = vcombine.high %v575_v31, %v576_v32  ;;  %v577_v35 = vld [vmem:[%s7092_s5 + $0x50] sm:$0xff]  ;;  %v578_v36 = vld [vmem:[%s7092_s5 + $0x58] sm:$0xff]  ;;  %v4956_v37 = vcombine.low %v575_v31, %v576_v32  ;;  %v579_v39 = vld [vmem:[%s7092_s5 + $0x60] sm:$0xff]  ;;  %s4726_s26 = scalar_lea.sflag [#allocation5], %s7086_s30  ;;  %s6447_s7 = scalar_lea.vmem %s8107_s27, 2048 }
 0x131   : > { %5261 = vmatpush3.bf16.msra.mxu1 %v7137_v5  ;;  %v4959_v38 = vcombine.high %v577_v35, %v578_v36  ;;  %v580_v40 = vld [vmem:[%s7092_s5 + $0x68] sm:$0xff]  ;;  %v4958_v41 = vcombine.low %v577_v35, %v578_v36  ;;  %v581_v43 = vld [vmem:[%s7092_s5 + $0x70] sm:$0xff]  ;;  %v582_v44 = vld [vmem:[%s7092_s5 + $0x78] sm:$0xff]  ;;  %s7346_s28 = scalar_select %p878_p12, 1, 0 }
 0x132   : > { %5262 = vmatprep.subr.bf16.mxu1 %v7140_v6  ;;  %v4961_v42 = vcombine.high %v579_v39, %v580_v40  ;;  %v4960_v45 = vcombine.low %v579_v39, %v580_v40  ;;  %v4963_v46 = vcombine.high %v581_v43, %v582_v44  ;;  %v4962_v47 = vcombine.low %v581_v43, %v582_v44  ;;  %v6132_v48 = vld [vmem:[%s457_s13 + $0x4] ss:$8 sps:$4 sm:$0xff]   ;;  %v6130_v49 = vld [vmem:[%s457_s13] ss:$8 sps:$4 sm:$0xff]   ;;  %vm7221_vm2 = vmand %vm1000_vm0, %vm1001_vm1  ;;  %s882_s20 = scalar_select %p881_p4, 1, 0 }
 0x133   : > { %v1006_v51 = vld [vmem:[#allocation2 + $0xc] sm:$0x1]  ;;  %vm7229_vm4 = vmand %vm1000_vm0, %vm1033_vm3  ;;  %v1038_v54 = vld [vmem:[#allocation2 + $0x14] sm:$0x1]  ;;  %s880_s2 = scvt.s32.f32 %s7346_s28  ;;  %p6448_p5 = scmp.ne.s32.totalorder %s8107_s27, %s6447_s7 }
 0x134   : > { %v1007_v52 = vsel %vm7221_vm2, 0, %v1006_v51  ;;  %v1039_v55 = vsel %vm7229_vm4, 0, %v1038_v54  ;;  %v1009_v56 = vld [vmem:[#allocation2 + $0x18] sm:$0x1]  ;;  %v1041_v58 = vld [vmem:[#allocation2 + $0x20] sm:$0x1]  ;;  %vm7285_vm7 = vmand %vm1093_vm5, %vm1033_vm3  ;;  %s883_s0 = scvt.s32.f32 %s882_s20 }
 0x135   : > { %5263 = vmatpush3.bf16.msra.mxu1 %v7143_v7  ;;  %1008 = vst [vmem:[#allocation2 + $0xc] sm:$0x1] %v1007_v52  ;;  %1040 = vst [vmem:[#allocation2 + $0x14] sm:$0x1] %v1039_v55  ;;  %v1010_v57 = vsel %vm7221_vm2, 0, %v1009_v56  ;;  %v1042_v59 = vsel %vm7229_vm4, 0, %v1041_v58 }
 0x136   : > { %5264 = vmatprep.subr.bf16.mxu1 %v7146_v8  ;;  %1011 = vst [vmem:[#allocation2 + $0x18] sm:$0x1] %v1010_v57  ;;  %1043 = vst [vmem:[#allocation2 + $0x20] sm:$0x1] %v1042_v59  ;;  %v1012_v60 = vld [vmem:[#allocation2 + $0x24] sm:$0x1] }
 0x137   : > { %v1013_v61 = vsel %vm7221_vm2, 0, %v1012_v60  ;;  %v1044_v62 = vld [vmem:[#allocation2 + $0x2c] sm:$0x1]  ;;  %v1053_v12 = vld [vmem:[#allocation2 + $0x50] sm:$0x1]  ;;  %v6136_v19 = vld [vmem:[#allocation11] sm:$0xff]  }
 0x138   : > { %1014 = vst [vmem:[#allocation2 + $0x24] sm:$0x1] %v1013_v61  ;;  %v1045_v63 = vsel %vm7229_vm4, 0, %v1044_v62  ;;  %v1054_v13 = vsel %vm7229_vm4, 0, %v1053_v12  ;;  %5540 = vmatprep.subr.bf16.mxu0 %v6136_v19  ;;  %v6137_v23 = vld [vmem:[#allocation11 + $0x8] sm:$0xff]   ;;  %v6138_v24 = vld [vmem:[#allocation11 + $0x10] sm:$0xff]   ;;  %vm7290_vm8 = vmor %vm1001_vm1, %vm1071_vm6 }
 0x139   : > { %5265 = vmatpush3.bf16.msra.mxu1 %v7149_v9  ;;  %1046 = vst [vmem:[#allocation2 + $0x2c] sm:$0x1] %v1045_v63  ;;  %1055 = vst [vmem:[#allocation2 + $0x50] sm:$0x1] %v1054_v13  ;;  %5541 = vmatpush3.bf16.msra.mxu0 %v6136_v19  ;;  %v1035_v28 = vld [vmem:[#allocation2 + $0x8] sm:$0x1] }
 0x13a   : > { %5266 = vmatprep.subr.bf16.mxu1 %v7152_v10  ;;  %5542 = vmatprep.subr.bf16.mxu0 %v6137_v23  ;;  %v6141_v31 = vld [vmem:[#allocation11 + $0x48] sm:$0xff]   ;;  %v6142_v32 = vld [vmem:[#allocation11 + $0x20] sm:$0xff]   ;;  %v6145_v35 = vld [vmem:[#allocation11 + $0x58] sm:$0xff]   ;;  %s5208_s23 = sshll.u32 %s8327_s12, 6  ;;  %s8328_s20 = sld [smem:[#allocation45_spill]] }
 0x13b   : > { %v6146_v36 = vld [vmem:[#allocation11 + $0x30] sm:$0xff]   ;;  %v6149_v39 = vld [vmem:[#allocation11 + $0x68] sm:$0xff]   ;;  %v7273_v40 = vld [vmem:[#allocation11 + $0x80] sm:$0xff]   ;;  %p8330_p10 = scmp.ne.s32.totalorder %s8282_s29, 0  ;;  %s6622_s19 = smov [#allocation14]  }
 0x13c   : > { %v7279_v44 = vld [vmem:[%s8315_s24] ss:$0 sm:$0xff]  ;;  %v1349_v13 = vld [vmem:[#allocation2 + $0x14] sm:$0x1]  ;;  %vm7403_vm11 = vmor %vm1441_vm9, %vm1442_vm10 }
 0x13d   : > { %5267 = vmatpush3.bf16.msra.mxu1 %v7157_v14  ;;  %5543 = vmatpush3.bf16.msra.mxu0 %v6137_v23  ;;  %vm7533_vm14 = vmor %vm2047_vm12, %vm2048_vm13  ;;  %p6449_p8 = pnand %p6448_p5, %p8330_p10 }
 0x13e   : > { %5268 = vmatprep.subr.bf16.mxu1 %v7160_v15  ;;  %5544 = vmatprep.subr.bf16.mxu0 %v6138_v24 }
 0x13f   : > { %p6450_p2 = pneg %p6449_p8 }
 0x141   : > { %5269 = vmatpush3.bf16.msra.mxu1 %v7162_v16  ;;  %5545 = vmatpush3.bf16.msra.mxu0 %v6138_v24 }
 0x142   : > { %5270 = vmatprep.subr.bf16.mxu1 %v7164_v17 }
 0x145   : > { %5271 = vmatpush3.bf16.msra.mxu1 %v7168_v18 }
 0x146   : > { %5320 = vmatprep.subr.bf16.mxu1 %v7123_v0 }
 0x148   : > { %798 = vmatmul.mubr.bf16.vlgmr.msra.gmra.mrb[0].mxu1 %v4948_v21  ;;  %v1059_v21 = vld [vmem:[#allocation2 + $0x68] sm:$0x1] }
 0x149   : > { %5321 = vmatpush3.bf16.msra.mxu1 %v7125_v1  ;;  %805 = vmatprep.mubr.bf16.mxu1 %v4951_v22  ;;  %v1060_v22 = vsel %vm7229_vm4, 0, %v1059_v21 }
 0x14a   : > { %5322 = vmatprep.subr.bf16.mxu1 %v7128_v2  ;;  %1061 = vst [vmem:[#allocation2 + $0x68] sm:$0x1] %v1060_v22 }
 0x14d   : > { %5323 = vmatpush3.bf16.msra.mxu1 %v7131_v3 }
 0x14e   : > { %5324 = vmatprep.subr.bf16.mxu1 %v7134_v4 }
 0x150   : > { %806 = vmatmul.mubr.bf16.gmra.mrb[4].mxu1 %v4950_v25  ;;  %v6139_v25 = vld [vmem:[#allocation11 + $0x40] sm:$0xff]  }
 0x151   : > { %813 = vmatprep.mubr.bf16.mxu1 %v4953_v26  ;;  %5325 = vmatpush3.bf16.msra.mxu1 %v7137_v5  ;;  %v1003_v26 = vld [vmem:[#allocation2] sm:$0x1] }
 0x152   : > { %5326 = vmatprep.subr.bf16.mxu1 %v7140_v6  ;;  %v1004_v27 = vsel %vm7221_vm2, 0, %v1003_v26 }
 0x153   : > { %1005 = vst [vmem:[#allocation2] sm:$0x1] %v1004_v27 }
 0x155   : > { %5327 = vmatpush3.bf16.msra.mxu1 %v7143_v7 }
 0x156   : > { %5328 = vmatprep.subr.bf16.mxu1 %v7146_v8 }
 0x158   : > { %814 = vmatmul.mubr.bf16.gmra.mrb[8].mxu1 %v4952_v29  ;;  %v6140_v29 = vld [vmem:[#allocation11 + $0x18] sm:$0xff]  }
 0x159   : > { %821 = vmatprep.mubr.bf16.mxu1 %v4955_v30  ;;  %5329 = vmatpush3.bf16.msra.mxu1 %v7149_v9  ;;  %v1036_v30 = vsel %vm7229_vm4, 0, %v1035_v28 }
 0x15a   : > { %5330 = vmatprep.subr.bf16.mxu1 %v7152_v10  ;;  %1037 = vst [vmem:[#allocation2 + $0x8] sm:$0x1] %v1036_v30  ;;  %5546 = vmatprep.subr.bf16.mxu0 %v6140_v29 }
 0x15b   : > { %5547 = vmatpush3.bf16.msra.mxu0 %v6140_v29 }
 0x15c   : > { %5548 = vmatprep.subr.bf16.mxu0 %v6142_v32 }
 0x15d   : > { %5331 = vmatpush3.bf16.msra.mxu1 %v7157_v14 }
 0x15e   : > { %5332 = vmatprep.subr.bf16.mxu1 %v7160_v15 }
 0x15f   : > { %5549 = vmatpush3.bf16.msra.mxu0 %v6142_v32  ;;  %v1352_v32 = vld [vmem:[#allocation2 + $0x18] sm:$0xf] }
 0x160   : > { %822 = vmatmul.mubr.bf16.gmra.mrb[12].mxu1 %v4954_v33  ;;  %v6143_v33 = vld [vmem:[#allocation11 + $0x50] sm:$0xff]  }
 0x161   : > { %829 = vmatprep.mubr.bf16.mxu1 %v4957_v34  ;;  %5333 = vmatpush3.bf16.msra.mxu1 %v7162_v16  ;;  %v6144_v34 = vld [vmem:[#allocation11 + $0x28] sm:$0xff]  }
 0x162   : > { %5334 = vmatprep.subr.bf16.mxu1 %v7164_v17  ;;  %5550 = vmatprep.subr.bf16.mxu0 %v6144_v34 }
 0x163   : > { %5551 = vmatpush3.bf16.msra.mxu0 %v6144_v34 }
 0x164   : > { %5552 = vmatprep.subr.bf16.mxu0 %v6146_v36 }
 0x165   : > { %5335 = vmatpush3.bf16.msra.mxu1 %v7168_v18 }
 0x166   : > { %5342 = vmatprep.subr.bf16.mxu1 %v7123_v0  ;;  %v6135_v0 = vld [vmem:[%s466_s1 + $0x4] ss:$8 sps:$4 sm:$0xff]  }
 0x167   : > { %5553 = vmatpush3.bf16.msra.mxu0 %v6146_v36 }
 0x168   : > { %830 = vmatmul.mubr.bf16.gmra.mrb[16].mxu1 %v4956_v37  ;;  %v6147_v37 = vld [vmem:[#allocation11 + $0x60] sm:$0xff]  }
 0x169   : > { %837 = vmatprep.mubr.bf16.mxu1 %v4959_v38  ;;  %v6148_v38 = vld [vmem:[#allocation11 + $0x38] sm:$0xff]  }
 0x16a   : > { %5554 = vmatprep.subr.bf16.mxu0 %v6148_v38 }
 0x16b   : > { %5555 = vmatpush3.bf16.msra.mxu0 %v6148_v38 }
 0x16c   : > { %5572 = vmatprep.subr.bf16.mxu0 %v7273_v40 }
 0x170   : > { %838 = vmatmul.mubr.bf16.gmra.mrb[20].mxu1 %v4958_v41  ;;  %v6153_v41 = vld [vmem:[#allocation11 + $0x70] sm:$0xff]  }
 0x171   : > { %845 = vmatprep.mubr.bf16.mxu1 %v4961_v42  ;;  %v6156_v42 = vld [vmem:[#allocation11 + $0x78] sm:$0xff]  }
 0x178   : > { %846 = vmatmul.mubr.bf16.gmra.mrb[24].mxu1 %v4960_v45 }
 0x179   : > { %853 = vmatprep.mubr.bf16.mxu1 %v4963_v46 }
 0x180   : > { %854 = vmatmul.mubr.bf16.gmra.mrb[28].mxu1 %v4962_v47 }
 0x181   : > { %930 = vmatprep.mubr.bf16.mxu1 %v6132_v48 }
 0x188   : > { %931 = vmatmul.mubr.bf16.vlgmr.msra.gmra.mrb[32].mxu1 %v6130_v49 }
 0x189   : > { %5343 = vmatpush3.bf16.msra.mxu1 %v7125_v1  ;;  %v6133_v1 = vld [vmem:[%s466_s1] ss:$8 sps:$4 sm:$0xff]   ;;  %986 = vmatprep.mubr.bf16.mxu1 %v6135_v0  ;;  %s5255_s1 = sshll.u32 %s8320_s25, 5 }
 0x18a   : > { %5344 = vmatprep.subr.bf16.mxu1 %v7128_v2  ;;  %v1015_v2 = vld [vmem:[#allocation2 + $0x30] sm:$0x1] }
 0x18d   : > { %5345 = vmatpush3.bf16.msra.mxu1 %v7131_v3  ;;  %v1016_v3 = vsel %vm7221_vm2, 0, %v1015_v2 }
 0x18e   : > { %5346 = vmatprep.subr.bf16.mxu1 %v7134_v4  ;;  %1017 = vst [vmem:[#allocation2 + $0x30] sm:$0x1] %v1016_v3  ;;  %v1047_v4 = vld [vmem:[#allocation2 + $0x38] sm:$0x1] }
 0x191   : > { %5347 = vmatpush3.bf16.msra.mxu1 %v7137_v5  ;;  %v1048_v5 = vsel %vm7229_vm4, 0, %v1047_v4 }
 0x192   : > { %5348 = vmatprep.subr.bf16.mxu1 %v7140_v6  ;;  %1049 = vst [vmem:[#allocation2 + $0x38] sm:$0x1] %v1048_v5  ;;  %v1018_v6 = vld [vmem:[#allocation2 + $0x3c] sm:$0x1]  ;;  %v1345_v5 = vld [vmem:[#allocation2 + $0xc] sm:$0xf] }
 0x195   : > { %5349 = vmatpush3.bf16.msra.mxu1 %v7143_v7  ;;  %v1019_v7 = vsel %vm7221_vm2, 0, %v1018_v6 }
 0x196   : > { %5350 = vmatprep.subr.bf16.mxu1 %v7146_v8  ;;  %1020 = vst [vmem:[#allocation2 + $0x3c] sm:$0x1] %v1019_v7  ;;  %v1050_v8 = vld [vmem:[#allocation2 + $0x44] sm:$0x1] }
 0x199   : > { %5351 = vmatpush3.bf16.msra.mxu1 %v7149_v9  ;;  %v1051_v9 = vsel %vm7229_vm4, 0, %v1050_v8 }
 0x19a   : > { %5352 = vmatprep.subr.bf16.mxu1 %v7152_v10  ;;  %1052 = vst [vmem:[#allocation2 + $0x44] sm:$0x1] %v1051_v9  ;;  %v1021_v10 = vld [vmem:[#allocation2 + $0x48] sm:$0x1] }
 0x19b   : > { %v1022_v11 = vsel %vm7221_vm2, 0, %v1021_v10 }
 0x19c   : > { %1023 = vst [vmem:[#allocation2 + $0x48] sm:$0x1] %v1022_v11 }
 0x19d   : > { %5353 = vmatpush3.bf16.msra.mxu1 %v7157_v14  ;;  %v1024_v14 = vld [vmem:[#allocation2 + $0x54] sm:$0x1] }
 0x19e   : > { %5354 = vmatprep.subr.bf16.mxu1 %v7160_v15  ;;  %v1025_v15 = vsel %vm7221_vm2, 0, %v1024_v14 }
 0x19f   : > { %1026 = vst [vmem:[#allocation2 + $0x54] sm:$0x1] %v1025_v15 }
 0x1a1   : > { %5355 = vmatpush3.bf16.msra.mxu1 %v7162_v16  ;;  %v1056_v16 = vld [vmem:[#allocation2 + $0x5c] sm:$0x1] }
 0x1a2   : > { %5356 = vmatprep.subr.bf16.mxu1 %v7164_v17  ;;  %v1057_v17 = vsel %vm7229_vm4, 0, %v1056_v16 }
 0x1a3   : > { %1058 = vst [vmem:[#allocation2 + $0x5c] sm:$0x1] %v1057_v17 }
 0x1a5   : > { %5357 = vmatpush3.bf16.msra.mxu1 %v7168_v18  ;;  %v1027_v18 = vld [vmem:[#allocation2 + $0x60] sm:$0x1] }
 0x1a6   : > { %v1028_v20 = vsel %vm7221_vm2, 0, %v1027_v18  ;;  %5508 = vmatprep.subr.bf16.mxu1 %v6139_v25 }
 0x1a7   : > { %1029 = vst [vmem:[#allocation2 + $0x60] sm:$0x1] %v1028_v20 }
 0x1a8   : > { %987 = vmatmul.mubr.bf16.vlgmr.msra.gmra.mrb[36].mxu1 %v6133_v1 }
 0x1a9   : > { %5509 = vmatpush3.bf16.msra.mxu1 %v6139_v25 }
 0x1aa   : > { %5510 = vmatprep.subr.bf16.mxu1 %v6141_v31 }
 0x1ad   : > { %5511 = vmatpush3.bf16.msra.mxu1 %v6141_v31 }
 0x1ae   : > { %5512 = vmatprep.subr.bf16.mxu1 %v6143_v33 }
 0x1b1   : > { %5513 = vmatpush3.bf16.msra.mxu1 %v6143_v33 }
 0x1b2   : > { %5514 = vmatprep.subr.bf16.mxu1 %v6145_v35 }
 0x1b5   : > { %5515 = vmatpush3.bf16.msra.mxu1 %v6145_v35 }
 0x1b6   : > { %5516 = vmatprep.subr.bf16.mxu1 %v6147_v37 }
 0x1b9   : > { %5517 = vmatpush3.bf16.msra.mxu1 %v6147_v37 }
 0x1ba   : > { %5518 = vmatprep.subr.bf16.mxu1 %v6149_v39 }
 0x1bd   : > { %5519 = vmatpush3.bf16.msra.mxu1 %v6149_v39 }
 0x1be   : > { %5520 = vmatprep.subr.bf16.mxu1 %v6153_v41 }
 0x1c1   : > { %5521 = vmatpush3.bf16.msra.mxu1 %v6153_v41 }
 0x1c2   : > { %5522 = vmatprep.subr.bf16.mxu1 %v6156_v42 }
 0x1c5   : > { %5523 = vmatpush3.bf16.msra.mxu1 %v6156_v42  ;;  %v1356_v42 = vld [vmem:[#allocation2 + $0x20] sm:$0x1] }
 0x21b   : > { %v5272_v43 = vpop.f32.mrb[0].mxu1 }
 0x21c   : > { %v5273_v45 = vpop.f32.mrb[1].mxu1 }
 0x21d   : > { %v5274_v46 = vadd.f32 %v5273_v45, %v5272_v43  ;;  %v5275_v47 = vpop.f32.mrb[2].mxu1 }
 0x21e   : > { %v5276_v48 = vpop.f32.mrb[3].mxu1 }
 0x21f   : > { %v800_v49 = vadd.f32 %v5274_v46, %v7279_v44  ;;  %v5277_v51 = vadd.f32 %v5276_v48, %v5275_v47 }
 0x221   : > { %v862_v52 = vmax.f32 %v800_v49, 0.0  ;;  %v803_v54 = vadd.f32 %v5277_v51, %v7279_v44 }
 0x223   : > { %v5223_v55 = vpack.c.bf16 %v862_v52, %v862_v52  ;;  %v863_v56 = vmax.f32 %v803_v54, 0.0  ;;  %v5278_v57 = vpop.f32.mrb[4].mxu1 }
 0x224   : > { %v5279_v58 = vpop.f32.mrb[5].mxu1 }
 0x225   : > { %v1185_v59 = vshrl.u32 %v5223_v55, 16  ;;  %v5224_v60 = vpack.c.bf16 %v863_v56, %v863_v56  ;;  %v5280_v61 = vadd.f32 %v5279_v58, %v5278_v57  ;;  %v5281_v62 = vpop.f32.mrb[6].mxu1  ;;  %v1188_v1 = vshll.u32 %v5223_v55, 16 }
 0x226   : > { %v5282_v63 = vpop.f32.mrb[7].mxu1 }
 0x227   : > { %v1187_v0 = vrot.slane %v1185_v59, 7  ;;  %v1193_v2 = vshrl.u32 %v5224_v60, 16  ;;  %v808_v3 = vadd.f32 %v5280_v61, %v7279_v44  ;;  %v5283_v6 = vadd.f32 %v5282_v63, %v5281_v62 }
 0x228   : > { %v1196_v9 = vshll.u32 %v5224_v60, 16 }
 0x229   : > { %v1190_v7 = vor.u32 %v1188_v1, %v1187_v0  ;;  %v1195_v8 = vrot.slane %v1193_v2, 7  ;;  %v864_v10 = vmax.f32 %v808_v3, 0.0  ;;  %v1191_v11 = vrot.slane %v1187_v0, 4  ;;  %v1359_v1 = vld [vmem:[#allocation2 + $0x24] sm:$0xf] }
 0x22a   : > { %v811_v14 = vadd.f32 %v5283_v6, %v7279_v44 }
 0x22b   : > { %v1346_v15 = vsel %vm7285_vm7, %v1190_v7, %v1345_v5  ;;  %v1198_v16 = vor.u32 %v1196_v9, %v1195_v8  ;;  %v1200_v17 = vrot.slane %v1195_v8, 4  ;;  %v5225_v18 = vpack.c.bf16 %v864_v10, %v864_v10  ;;  %v5284_v19 = vpop.f32.mrb[8].mxu1  ;;  %v1363_v9 = vld [vmem:[#allocation2 + $0x2c] sm:$0x1] }
 0x22c   : > { %1347 = vst [vmem:[#allocation2 + $0xc] sm:$0xf] %v1346_v15  ;;  %v865_v20 = vmax.f32 %v811_v14, 0.0  ;;  %v5285_v21 = vpop.f32.mrb[9].mxu1 }
 0x22d   : > { %v1199_v22 = vsel %vm7290_vm8, %v1191_v11, %v1198_v16  ;;  %v1350_v23 = vsel %vm7221_vm2, %v1200_v17, %v1349_v13  ;;  %v1202_v24 = vshrl.u32 %v5225_v18, 16  ;;  %v5287_v25 = vpop.f32.mrb[10].mxu1  ;;  %v5286_v27 = vadd.f32 %v5285_v21, %v5284_v19 }
 0x22e   : > { %1348 = vst [vmem:[#allocation2 + $0x10] sm:$0xf] %v1199_v22  ;;  %1351 = vst [vmem:[#allocation2 + $0x14] sm:$0x1] %v1350_v23  ;;  %v5226_v26 = vpack.c.bf16 %v865_v20, %v865_v20  ;;  %v5288_v28 = vpop.f32.mrb[11].mxu1  ;;  %v1205_v30 = vshll.u32 %v5225_v18, 16 }
 0x22f   : > { %v1204_v29 = vrot.slane %v1202_v24, 7  ;;  %v5289_v31 = vadd.f32 %v5288_v28, %v5287_v25  ;;  %v816_v34 = vadd.f32 %v5286_v27, %v7279_v44  ;;  %v1366_v28 = vld [vmem:[#allocation2 + $0x30] sm:$0xf] }
 0x230   : > { %v1210_v33 = vshrl.u32 %v5226_v26, 16  ;;  %v1213_v38 = vshll.u32 %v5226_v26, 16 }
 0x231   : > { %v1207_v35 = vor.u32 %v1205_v30, %v1204_v29  ;;  %v819_v36 = vadd.f32 %v5289_v31, %v7279_v44  ;;  %v866_v39 = vmax.f32 %v816_v34, 0.0  ;;  %v1208_v46 = vrot.slane %v1204_v29, 4 }
 0x232   : > { %v1212_v37 = vrot.slane %v1210_v33, 7 }
 0x233   : > { %v1353_v41 = vsel %vm7285_vm7, %v1207_v35, %v1352_v32  ;;  %v867_v43 = vmax.f32 %v819_v36, 0.0  ;;  %v5290_v45 = vpop.f32.mrb[12].mxu1  ;;  %v5227_v49 = vpack.c.bf16 %v866_v39, %v866_v39 }
 0x234   : > { %1354 = vst [vmem:[#allocation2 + $0x18] sm:$0xf] %v1353_v41  ;;  %v1215_v47 = vor.u32 %v1213_v38, %v1212_v37  ;;  %v1217_v48 = vrot.slane %v1212_v37, 4  ;;  %v5291_v51 = vpop.f32.mrb[13].mxu1  ;;  %v1370_v37 = vld [vmem:[#allocation2 + $0x38] sm:$0x1] }
 0x235   : > { %v5228_v52 = vpack.c.bf16 %v867_v43, %v867_v43  ;;  %v5292_v54 = vadd.f32 %v5291_v51, %v5290_v45  ;;  %v5293_v55 = vpop.f32.mrb[14].mxu1  ;;  %v1219_v58 = vshrl.u32 %v5227_v49, 16  ;;  %v1222_v0 = vshll.u32 %v5227_v49, 16 }
 0x236   : > { %v1216_v56 = vsel %vm7290_vm8, %v1208_v46, %v1215_v47  ;;  %v1357_v57 = vsel %vm7221_vm2, %v1217_v48, %v1356_v42  ;;  %v5294_v59 = vpop.f32.mrb[15].mxu1 }
 0x237   : > { %1355 = vst [vmem:[#allocation2 + $0x1c] sm:$0xf] %v1216_v56  ;;  %1358 = vst [vmem:[#allocation2 + $0x20] sm:$0x1] %v1357_v57  ;;  %v1227_v60 = vshrl.u32 %v5228_v52, 16  ;;  %v824_v61 = vadd.f32 %v5292_v54, %v7279_v44  ;;  %v5295_v62 = vadd.f32 %v5294_v59, %v5293_v55  ;;  %v1221_v63 = vrot.slane %v1219_v58, 7 }
 0x238   : > { %v1230_v3 = vshll.u32 %v5228_v52, 16 }
 0x239   : > { %v1229_v2 = vrot.slane %v1227_v60, 7  ;;  %v868_v5 = vmax.f32 %v824_v61, 0.0  ;;  %v827_v6 = vadd.f32 %v5295_v62, %v7279_v44  ;;  %v1224_v7 = vor.u32 %v1222_v0, %v1221_v63  ;;  %v1373_v61 = vld [vmem:[#allocation2 + $0x3c] sm:$0xf] }
 0x23a   : > { %v1225_v8 = vrot.slane %v1221_v63, 4 }
 0x23b   : > { %v1232_v10 = vor.u32 %v1230_v3, %v1229_v2  ;;  %v1234_v11 = vrot.slane %v1229_v2, 4  ;;  %v5229_v13 = vpack.c.bf16 %v868_v5, %v868_v5  ;;  %v869_v14 = vmax.f32 %v827_v6, 0.0  ;;  %v5296_v15 = vpop.f32.mrb[16].mxu1  ;;  %v1377_v5 = vld [vmem:[#allocation2 + $0x44] sm:$0x1] }
 0x23c   : > { %v1360_v16 = vsel %vm7285_vm7, %v1224_v7, %v1359_v1  ;;  %v5297_v17 = vpop.f32.mrb[17].mxu1 }
 0x23d   : > { %1361 = vst [vmem:[#allocation2 + $0x24] sm:$0xf] %v1360_v16  ;;  %v1233_v18 = vsel %vm7290_vm8, %v1225_v8, %v1232_v10  ;;  %v1364_v19 = vsel %vm7221_vm2, %v1234_v11, %v1363_v9  ;;  %v1236_v20 = vshrl.u32 %v5229_v13, 16  ;;  %v5299_v21 = vpop.f32.mrb[18].mxu1  ;;  %v5230_v22 = vpack.c.bf16 %v869_v14, %v869_v14 }
 0x23e   : > { %1362 = vst [vmem:[#allocation2 + $0x28] sm:$0xf] %v1233_v18  ;;  %1365 = vst [vmem:[#allocation2 + $0x2c] sm:$0x1] %v1364_v19  ;;  %v5298_v23 = vadd.f32 %v5297_v17, %v5296_v15  ;;  %v5300_v24 = vpop.f32.mrb[19].mxu1  ;;  %v1239_v26 = vshll.u32 %v5229_v13, 16 }
 0x23f   : > { %v1238_v25 = vrot.slane %v1236_v20, 7  ;;  %v5301_v27 = vadd.f32 %v5300_v24, %v5299_v21  ;;  %v1244_v29 = vshrl.u32 %v5230_v22, 16  ;;  %v1247_v34 = vshll.u32 %v5230_v22, 16  ;;  %v1380_v24 = vld [vmem:[#allocation2 + $0x48] sm:$0xf] }
 0x240   : > { %v832_v30 = vadd.f32 %v5298_v23, %v7279_v44 }
 0x241   : > { %v1241_v31 = vor.u32 %v1239_v26, %v1238_v25  ;;  %v835_v32 = vadd.f32 %v5301_v27, %v7279_v44  ;;  %v1246_v33 = vrot.slane %v1244_v29, 7  ;;  %v1242_v41 = vrot.slane %v1238_v25, 4 }
 0x242   : > { %v870_v35 = vmax.f32 %v832_v30, 0.0 }
 0x243   : > { %v1367_v36 = vsel %vm7285_vm7, %v1241_v31, %v1366_v28  ;;  %v871_v38 = vmax.f32 %v835_v32, 0.0  ;;  %v5302_v39 = vpop.f32.mrb[20].mxu1  ;;  %v1249_v42 = vor.u32 %v1247_v34, %v1246_v33  ;;  %v1251_v43 = vrot.slane %v1246_v33, 4  ;;  %v1384_v33 = vld [vmem:[#allocation2 + $0x50] sm:$0x1] }
 0x244   : > { %1368 = vst [vmem:[#allocation2 + $0x30] sm:$0xf] %v1367_v36  ;;  %v5231_v45 = vpack.c.bf16 %v870_v35, %v870_v35  ;;  %v5303_v46 = vpop.f32.mrb[21].mxu1 }
 0x245   : > { %v5232_v47 = vpack.c.bf16 %v871_v38, %v871_v38  ;;  %v5304_v48 = vadd.f32 %v5303_v46, %v5302_v39  ;;  %v5305_v49 = vpop.f32.mrb[22].mxu1  ;;  %v1250_v51 = vsel %vm7290_vm8, %v1242_v41, %v1249_v42  ;;  %v1371_v52 = vsel %vm7221_vm2, %v1251_v43, %v1370_v37 }
 0x246   : > { %v1253_v54 = vshrl.u32 %v5231_v45, 16  ;;  %v5306_v55 = vpop.f32.mrb[23].mxu1  ;;  %1369 = vst [vmem:[#allocation2 + $0x34] sm:$0xf] %v1250_v51  ;;  %1372 = vst [vmem:[#allocation2 + $0x38] sm:$0x1] %v1371_v52 }
 0x247   : > { %v1261_v56 = vshrl.u32 %v5232_v47, 16  ;;  %v840_v57 = vadd.f32 %v5304_v48, %v7279_v44  ;;  %v5307_v58 = vadd.f32 %v5306_v55, %v5305_v49  ;;  %v1256_v60 = vshll.u32 %v5231_v45, 16 }
 0x248   : > { %v1255_v59 = vrot.slane %v1253_v54, 7  ;;  %v1264_v63 = vshll.u32 %v5232_v47, 16 }
 0x249   : > { %v1263_v62 = vrot.slane %v1261_v56, 7  ;;  %v872_v0 = vmax.f32 %v840_v57, 0.0  ;;  %v843_v1 = vadd.f32 %v5307_v58, %v7279_v44  ;;  %v1387_v57 = vld [vmem:[#allocation2 + $0x54] sm:$0xf] }
 0x24a   : > { %v1258_v2 = vor.u32 %v1256_v60, %v1255_v59  ;;  %v1259_v3 = vrot.slane %v1255_v59, 4 }
 0x24b   : > { %v1266_v6 = vor.u32 %v1264_v63, %v1263_v62  ;;  %v1268_v7 = vrot.slane %v1263_v62, 4  ;;  %v5233_v8 = vpack.c.bf16 %v872_v0, %v872_v0  ;;  %v873_v9 = vmax.f32 %v843_v1, 0.0  ;;  %v5308_v10 = vpop.f32.mrb[24].mxu1  ;;  %v1391_v0 = vld [vmem:[#allocation2 + $0x5c] sm:$0x1] }
 0x24c   : > { %v1374_v11 = vsel %vm7285_vm7, %v1258_v2, %v1373_v61  ;;  %v5309_v13 = vpop.f32.mrb[25].mxu1 }
 0x24d   : > { %1375 = vst [vmem:[#allocation2 + $0x3c] sm:$0xf] %v1374_v11  ;;  %v1267_v14 = vsel %vm7290_vm8, %v1259_v3, %v1266_v6  ;;  %v1378_v15 = vsel %vm7221_vm2, %v1268_v7, %v1377_v5  ;;  %v1270_v16 = vshrl.u32 %v5233_v8, 16  ;;  %v5311_v17 = vpop.f32.mrb[26].mxu1  ;;  %v5234_v18 = vpack.c.bf16 %v873_v9, %v873_v9 }
 0x24e   : > { %1376 = vst [vmem:[#allocation2 + $0x40] sm:$0xf] %v1267_v14  ;;  %1379 = vst [vmem:[#allocation2 + $0x44] sm:$0x1] %v1378_v15  ;;  %v5310_v19 = vadd.f32 %v5309_v13, %v5308_v10  ;;  %v5312_v20 = vpop.f32.mrb[27].mxu1  ;;  %v1273_v22 = vshll.u32 %v5233_v8, 16 }
 0x24f   : > { %v1272_v21 = vrot.slane %v1270_v16, 7  ;;  %v5313_v23 = vadd.f32 %v5312_v20, %v5311_v17  ;;  %v1278_v25 = vshrl.u32 %v5234_v18, 16  ;;  %v1281_v30 = vshll.u32 %v5234_v18, 16  ;;  %v7355_v17 = vld [vmem:[#allocation2 + $0xc] sm:$0xf] }
 0x250   : > { %v848_v26 = vadd.f32 %v5310_v19, %v7279_v44 }
 0x251   : > { %v1275_v27 = vor.u32 %v1273_v22, %v1272_v21  ;;  %v851_v28 = vadd.f32 %v5313_v23, %v7279_v44  ;;  %v1280_v29 = vrot.slane %v1278_v25, 7  ;;  %v1276_v36 = vrot.slane %v1272_v21, 4  ;;  %v1394_v21 = vld [vmem:[#allocation2 + $0x60] sm:$0xf] }
 0x252   : > { %v874_v31 = vmax.f32 %v848_v26, 0.0  ;;  %v941_v26 = vstv %s880_s2 }
 0x253   : > { %v1381_v32 = vsel %vm7285_vm7, %v1275_v27, %v1380_v24  ;;  %v875_v34 = vmax.f32 %v851_v28, 0.0  ;;  %v5314_v35 = vpop.f32.mrb[28].mxu1  ;;  %v1283_v37 = vor.u32 %v1281_v30, %v1280_v29  ;;  %v1285_v38 = vrot.slane %v1280_v29, 4  ;;  %v7358_v24 = vld [vmem:[#allocation2 + $0x10] sm:$0xf] }
 0x254   : > { %1382 = vst [vmem:[#allocation2 + $0x48] sm:$0xf] %v1381_v32  ;;  %v5235_v39 = vpack.c.bf16 %v874_v31, %v874_v31  ;;  %v5315_v41 = vpop.f32.mrb[29].mxu1  ;;  %v1469_v28 = vshrl.u32 %v7355_v17, 16  ;;  %v1398_v31 = vld [vmem:[#allocation2 + $0x68] sm:$0x1] }
 0x255   : > { %v5236_v42 = vpack.c.bf16 %v875_v34, %v875_v34  ;;  %v5316_v43 = vadd.f32 %v5315_v41, %v5314_v35  ;;  %v5317_v45 = vpop.f32.mrb[30].mxu1  ;;  %v1284_v46 = vsel %vm7290_vm8, %v1276_v36, %v1283_v37  ;;  %v1385_v47 = vsel %vm7221_vm2, %v1285_v38, %v1384_v33 }
 0x256   : > { %v1287_v48 = vshrl.u32 %v5235_v39, 16  ;;  %v5318_v49 = vpop.f32.mrb[31].mxu1  ;;  %1383 = vst [vmem:[#allocation2 + $0x4c] sm:$0xf] %v1284_v46  ;;  %1386 = vst [vmem:[#allocation2 + $0x50] sm:$0x1] %v1385_v47 }
 0x257   : > { %v1295_v51 = vshrl.u32 %v5236_v42, 16  ;;  %v856_v52 = vadd.f32 %v5316_v43, %v7279_v44  ;;  %v5319_v54 = vadd.f32 %v5318_v49, %v5317_v45  ;;  %v1290_v56 = vshll.u32 %v5235_v39, 16 }
 0x258   : > { %v1289_v55 = vrot.slane %v1287_v48, 7  ;;  %v1298_v59 = vshll.u32 %v5236_v42, 16  ;;  %v1472_v33 = vshll.u32 %v7355_v17, 16  ;;  %v1478_v36 = vshll.u32 %v7358_v24, 16 }
 0x259   : > { %v1297_v58 = vrot.slane %v1295_v51, 7  ;;  %v876_v60 = vmax.f32 %v856_v52, 0.0  ;;  %v859_v61 = vadd.f32 %v5319_v54, %v7279_v44  ;;  %v1482_v37 = vshrl.u32 %v7358_v24, 16  ;;  %v7371_v51 = vld [vmem:[#allocation2 + $0x18] sm:$0xf] }
 0x25a   : > { %v1292_v62 = vor.u32 %v1290_v56, %v1289_v55  ;;  %v1293_v63 = vrot.slane %v1289_v55, 4  ;;  %v1471_v43 = vrot.slane %v1469_v28, 4  ;;  %v1474_v48 = vrot.slane %v1472_v33, 5  ;;  %v1095_v56 = vld [vmem:[#allocation2] sm:$0xf] }
 0x25b   : > { %v1300_v1 = vor.u32 %v1298_v59, %v1297_v58  ;;  %v1302_v2 = vrot.slane %v1297_v58, 4  ;;  %v5237_v3 = vpack.c.bf16 %v876_v60, %v876_v60  ;;  %v877_v5 = vmax.f32 %v859_v61, 0.0  ;;  %v5336_v6 = vpop.f32.mrb[32].mxu1  ;;  %v7375_v58 = vld [vmem:[#allocation2 + $0x1c] sm:$0xf] }
 0x25c   : > { %v1388_v7 = vsel %vm7285_vm7, %v1292_v62, %v1387_v57  ;;  %v5337_v8 = vpop.f32.mrb[33].mxu1  ;;  %v7373_v54 = vrot.slane %v1478_v36, 5  ;;  %v1484_v55 = vrot.slane %v1482_v37, 4  ;;  %v1475_v61 = vor.u32 %v1474_v48, %v1471_v43  ;;  %v7415_v36 = vld [vmem:[#allocation2 + $0x34] sm:$0xf] }
 0x25d   : > { %1389 = vst [vmem:[#allocation2 + $0x54] sm:$0xf] %v1388_v7  ;;  %v1301_v9 = vsel %vm7290_vm8, %v1293_v63, %v1300_v1  ;;  %v1392_v10 = vsel %vm7221_vm2, %v1302_v2, %v1391_v0  ;;  %v1304_v11 = vshrl.u32 %v5237_v3, 16  ;;  %v5339_v13 = vpop.f32.mrb[34].mxu1  ;;  %v5238_v14 = vpack.c.bf16 %v877_v5, %v877_v5  ;;  %v7378_v63 = vld [vmem:[#allocation2 + $0x14] sm:$0x1] }
 0x25e   : > { %1390 = vst [vmem:[#allocation2 + $0x58] sm:$0xf] %v1301_v9  ;;  %1393 = vst [vmem:[#allocation2 + $0x5c] sm:$0x1] %v1392_v10  ;;  %v5338_v15 = vadd.f32 %v5337_v8, %v5336_v6  ;;  %v5340_v16 = vpop.f32.mrb[35].mxu1  ;;  %v1307_v19 = vshll.u32 %v5237_v3, 16  ;;  %v1485_v8 = vor.u32 %v1484_v55, %v7373_v54  ;;  %v5021_v33 = vcombine.low %v7355_v17, %v7358_v24 }
 0x25f   : > { %v1306_v18 = vrot.slane %v1304_v11, 7  ;;  %v5341_v20 = vadd.f32 %v5340_v16, %v5339_v13  ;;  %v1312_v22 = vshrl.u32 %v5238_v14, 16  ;;  %v1315_v30 = vshll.u32 %v5238_v14, 16  ;;  %v1099_v5 = vld [vmem:[#allocation2 + $0x8] sm:$0x1] }
 0x260   : > { %v933_v23 = vadd.f32 %v5338_v15, %v7279_v44  ;;  %v1493_v62 = vshrl.u32 %v7371_v51, 16  ;;  %v1496_v2 = vshll.u32 %v7371_v51, 16  ;;  %v1506_v6 = vshrl.u32 %v7375_v58, 16  ;;  %v7382_v7 = vld [vmem:[#allocation2 + $0x24] sm:$0xf] }
 0x261   : > { %v1309_v25 = vor.u32 %v1307_v19, %v1306_v18  ;;  %v936_v27 = vadd.f32 %v5341_v20, %v7279_v44  ;;  %v1314_v29 = vrot.slane %v1312_v22, 7  ;;  %v1310_v38 = vrot.slane %v1306_v18, 4 }
 0x262   : > { %v939_v32 = vmax.f32 %v933_v23, 0.0  ;;  %v1502_v13 = vshll.u32 %v7375_v58, 16  ;;  %v1476_v15 = vrot.slane %v1475_v61, 4  ;;  %v1495_v16 = vrot.slane %v1493_v62, 4  ;;  %v7394_v23 = vld [vmem:[#allocation2 + $0x28] sm:$0xf] }
 0x263   : > { %v1395_v34 = vsel %vm7285_vm7, %v1309_v25, %v1394_v21  ;;  %v940_v35 = vmax.f32 %v936_v27, 0.0  ;;  %v1317_v39 = vor.u32 %v1315_v30, %v1314_v29  ;;  %v1319_v44 = vrot.slane %v1314_v29, 4  ;;  %v7397_v27 = vld [vmem:[#allocation2 + $0x20] sm:$0x1]  ;;  %v3952_v30 = vld [vmem:[#allocation2 + $0x24] sm:$0xe] }
 0x264   : > { %1396 = vst [vmem:[#allocation2 + $0x60] sm:$0xf] %v1395_v34  ;;  %v942_v41 = vmul.f32 %v941_v26, %v939_v32  ;;  %v1488_v18 = vshll.u32 %v7378_v63, 16  ;;  %v1498_v21 = vrot.slane %v1496_v2, 5  ;;  %v1517_v22 = vshrl.u32 %v7382_v7, 16  ;;  %v6155_v2 = vld [vmem:[#allocation11 + $0x88] sm:$0xff]  }
 0x265   : > { %v943_v42 = vmul.f32 %v941_v26, %v940_v35  ;;  %v1318_v45 = vsel %vm7290_vm8, %v1310_v38, %v1317_v39  ;;  %v1399_v46 = vsel %vm7221_vm2, %v1319_v44, %v1398_v31  ;;  %v1520_v25 = vshll.u32 %v7382_v7, 16  ;;  %v7407_v32 = vld [vmem:[#allocation2 + $0x30] sm:$0xf] }
 0x266   : > { %v5219_v47 = vpack.c.bf16 %v942_v41, %v942_v41  ;;  %1397 = vst [vmem:[#allocation2 + $0x64] sm:$0xf] %v1318_v45  ;;  %1400 = vst [vmem:[#allocation2 + $0x68] sm:$0x1] %v1399_v46  ;;  %v1486_v26 = vrot.slane %v1485_v8, 4  ;;  %v7399_v28 = vrot.slane %v1502_v13, 5  ;;  %v5022_v34 = vcombine.low %v7371_v51, %v7375_v58 }
 0x267   : > { %v5220_v49 = vpack.c.bf16 %v943_v42, %v943_v42  ;;  %v1508_v29 = vrot.slane %v1506_v6, 4  ;;  %v1490_v31 = vrot.slane %v1488_v18, 5  ;;  %v7413_v35 = vrot.slane %v1517_v22, 4  ;;  %v7455_v22 = vld [vmem:[#allocation2 + $0x2c] sm:$0x1] }
 0x268   : > { %v1074_v52 = vshrl.u32 %v5219_v47, 16  ;;  %v1077_v60 = vshll.u32 %v5219_v47, 16  ;;  %v7417_v37 = vrot.slane %v1520_v25, 5  ;;  %v1530_v38 = vshrl.u32 %v7394_v23, 16 }
 0x269   : > { %v1082_v57 = vshrl.u32 %v5220_v49, 16  ;;  %v1085_v1 = vshll.u32 %v5220_v49, 16  ;;  %v1491_v39 = vsel %vm7403_vm11, %v1486_v26, %v1490_v31  ;;  %v1499_v44 = vor.u32 %v1498_v21, %v1495_v16  ;;  %v6158_v26 = vld [vmem:[#allocation11 + $0x90] sm:$0xff]  }
 0x26a   : > { %v1076_v59 = vrot.slane %v1074_v52, 7  ;;  %v1481_v41 = vsel %vm7403_vm11, %v1476_v15, %v7373_v54  ;;  %v1541_v17 = vshrl.u32 %v7407_v32, 16  ;;  %v1544_v42 = vshll.u32 %v7407_v32, 16 }
 0x26b   : > { %v1084_v0 = vrot.slane %v1082_v57, 7  ;;  %v1509_v43 = vor.u32 %v1508_v29, %v7399_v28  ;;  %v1554_v46 = vshrl.u32 %v7415_v36, 16  ;;  %v1512_v47 = vshll.u32 %v7397_v27, 16 }
 0x26c   : > { %v1079_v3 = vor.u32 %v1077_v60, %v1076_v59  ;;  %v1080_v9 = vrot.slane %v1076_v59, 4  ;;  %v1526_v48 = vshll.u32 %v7394_v23, 16  ;;  %v1550_v49 = vshll.u32 %v7415_v36, 16 }
 0x26d   : > { %v1087_v10 = vor.u32 %v1085_v1, %v1084_v0  ;;  %v1089_v11 = vrot.slane %v1084_v0, 4  ;;  %v7438_v57 = vcombine.low %v1481_v41, %v1491_v39  ;;  %v1500_v62 = vrot.slane %v1499_v44, 4  ;;  %v7467_v44 = vld [vmem:[#allocation2 + $0x38] sm:$0x1] }
 0x26e   : > { %v1096_v14 = vsel %vm7285_vm7, %v1079_v3, %v1095_v56  ;;  %v5023_v56 = vcombine.low %v7382_v7, %v7394_v23  ;;  %v1510_v3 = vrot.slane %v1509_v43, 4  ;;  %v7444_v7 = vld [vmem:[#allocation2 + $0x3c] sm:$0xf]  ;;  %v1514_v13 = vrot.slane %v1512_v47, 5 }
 0x26f   : > { %1097 = vst [vmem:[#allocation2] sm:$0xf] %v1096_v14  ;;  %v1088_v19 = vsel %vm7290_vm8, %v1080_v9, %v1087_v10  ;;  %v1100_v20 = vsel %vm7221_vm2, %v1089_v11, %v1099_v5  ;;  %v1532_v5 = vrot.slane %v1530_v38, 4  ;;  %v7446_v10 = vrot.slane %v1526_v48, 5  ;;  %v7448_v14 = vld [vmem:[#allocation2 + $0x40] sm:$0xf] }
 0x270   : > { %1098 = vst [vmem:[#allocation2 + $0x4] sm:$0xf] %v1088_v19  ;;  %1101 = vst [vmem:[#allocation2 + $0x8] sm:$0x1] %v1100_v20  ;;  %v7450_v15 = vrot.slane %v1550_v49, 5  ;;  %v1556_v16 = vrot.slane %v1554_v46, 4  ;;  %v5024_v21 = vcombine.low %v7407_v32, %v7415_v36  ;;  %v1505_v29 = vsel %vm7403_vm11, %v1500_v62, %v7399_v28 }
 0x271   : > { %v1543_v19 = vrot.slane %v1541_v17, 4  ;;  %v1546_v20 = vrot.slane %v1544_v42, 5  ;;  %v1515_v31 = vsel %vm7403_vm11, %v1510_v3, %v1514_v13  ;;  %v1578_v32 = vshrl.u32 %v7448_v14, 16  ;;  %v7472_v17 = vld [vmem:[#allocation2 + $0x48] sm:$0xf] }
 0x272   : > { %v1533_v39 = vor.u32 %v1532_v5, %v7446_v10  ;;  %v1523_v41 = vor.u32 %v7417_v37, %v7413_v35  ;;  %v1536_v28 = vshll.u32 %v7455_v22, 16  ;;  %v1557_v42 = vor.u32 %v1556_v16, %v7450_v15 }
 0x273   : > { %v1574_v43 = vshll.u32 %v7448_v14, 16  ;;  %v1568_v37 = vshll.u32 %v7444_v7, 16  ;;  %v1547_v49 = vor.u32 %v1546_v20, %v1543_v19  ;;  %v1592_v62 = vshll.u32 %v7472_v17, 16  ;;  %v7497_v19 = vld [vmem:[#allocation2 + $0x54] sm:$0xf]  ;;  %v6162_v20 = vld [vmem:[#allocation11 + $0xa0] sm:$0xff]  }
 0x274   : > { %v1580_v5 = vrot.slane %v1578_v32, 4  ;;  %v5025_v13 = vcombine.low %v7444_v7, %v7448_v14 }
 0x275   : > { %v7490_v3 = vrot.slane %v1574_v43, 5  ;;  %v1548_v16 = vrot.slane %v1547_v49, 4 }
 0x276   : > { %v1401_v45 = vld [vmem:[#allocation2] sm:$0xf] }
 0x277   : > { %v7432_v51 = vld [vmem:[#allocation2 + $0x4] sm:$0xf]  ;;  %v1445_v52 = vshrl.u32 %v1401_v45, 16  ;;  %v1448_v55 = vshll.u32 %v1401_v45, 16  ;;  %v7434_v54 = vld [vmem:[#allocation2 + $0x8] sm:$0x1] }
 0x278   : > { %v1454_v59 = vshll.u32 %v7432_v51, 16  ;;  %v1458_v60 = vshrl.u32 %v7432_v51, 16  ;;  %v5020_v61 = vcombine.low %v1401_v45, %v7432_v51  ;;  %v1464_v9 = vshll.u32 %v7434_v54, 16 }
 0x279   : > { %v1447_v0 = vrot.slane %v1445_v52, 4  ;;  %v1450_v1 = vrot.slane %v1448_v55, 5  ;;  %v1560_v52 = vshll.u32 %v7467_v44, 16  ;;  %v6160_v55 = vld [vmem:[#allocation11 + $0x98] sm:$0xff]  }
 0x27a   : > { %v1456_v6 = vrot.slane %v1454_v59, 5  ;;  %v1460_v8 = vrot.slane %v1458_v60, 4  ;;  %5556 = vmatprep.mubr.bf16.mxu0 %v5020_v61  ;;  %v1466_v38 = vrot.slane %v1464_v9, 5  ;;  %v1534_v60 = vrot.slane %v1533_v39, 4 }
 0x27b   : > { %v1451_v11 = vor.u32 %v1450_v1, %v1447_v0  ;;  %5557 = vmatmul.mubr.bf16.vlgmr.msra.gmra.mrb[0].mxu0 %v5021_v33  ;;  %v7463_v33 = vld [vmem:[#allocation2 + $0x4c] sm:$0xf]  ;;  %v1589_v61 = vshrl.u32 %v7472_v17, 16  ;;  %v5006_v0 = vcombine.low %v1505_v29, %v1515_v31  ;;  %v1558_v1 = vrot.slane %v1557_v42, 4  ;;  %v7502_v31 = vld [vmem:[#allocation2 + $0x44] sm:$0x1] }
 0x27c   : > { %5560 = vmatprep.mubr.bf16.mxu0 %v5022_v34  ;;  %5573 = vmatpush3.bf16.msra.mxu0 %v7273_v40  ;;  %v1461_v18 = vor.u32 %v1460_v8, %v1456_v6  ;;  %v1565_v40 = vshrl.u32 %v7444_v7, 16  ;;  %v1602_v47 = vshrl.u32 %v7463_v33, 16  ;;  %v1598_v48 = vshll.u32 %v7463_v33, 16 }
 0x27d   : > { %v1452_v25 = vrot.slane %v1451_v11, 4  ;;  %5574 = vmatprep.subr.bf16.mxu0 %v6155_v2  ;;  %v1538_v8 = vrot.slane %v1536_v28, 5  ;;  %v5026_v39 = vcombine.low %v7472_v17, %v7463_v33  ;;  %v1553_v28 = vsel %vm7403_vm11, %v1548_v16, %v7450_v15 }
 0x27e   : > { %v1462_v34 = vrot.slane %v1461_v18, 4  ;;  %v7484_v59 = vrot.slane %v1565_v40, 4  ;;  %v7493_v9 = vrot.slane %v1598_v48, 5  ;;  %v1604_v11 = vrot.slane %v1602_v47, 4  ;;  %v6164_v47 = vld [vmem:[#allocation11 + $0xa8] sm:$0xff]  }
 0x27f   : > { %v1457_v45 = vsel %vm7403_vm11, %v1452_v25, %v1456_v6  ;;  %v1524_v6 = vrot.slane %v1523_v41, 4  ;;  %v1562_v18 = vrot.slane %v1560_v52, 5  ;;  %v1594_v25 = vrot.slane %v1592_v62, 5 }
 0x280   : > { %5575 = vmatpush3.bf16.msra.mxu0 %v6155_v2  ;;  %v1467_v46 = vsel %vm7403_vm11, %v1462_v34, %v1466_v38  ;;  %v7488_v2 = vld [vmem:[#allocation2 + $0x58] sm:$0xf]  ;;  %v1581_v40 = vor.u32 %v1580_v5, %v7490_v3  ;;  %v7508_v34 = vld [vmem:[#allocation2 + $0x50] sm:$0x1]  ;;  %v1613_v41 = vshrl.u32 %v7497_v19, 16  ;;  %v1616_v42 = vshll.u32 %v7497_v19, 16 }
 0x281   : > { %v5004_v35 = vcombine.low %v1457_v45, %v1467_v46  ;;  %5576 = vmatprep.subr.bf16.mxu0 %v6158_v26  ;;  %v1626_v29 = vshrl.u32 %v7488_v2, 16  ;;  %v1563_v7 = vsel %vm7403_vm11, %v1558_v1, %v1562_v18  ;;  %v1622_v38 = vshll.u32 %v7488_v2, 16  ;;  %v7528_v5 = vpop.f32.mrb[36].mxu1 }
 0x282   : > { %v1529_v32 = vsel %vm7403_vm11, %v1524_v6, %v7446_v10  ;;  %v1584_v45 = vshll.u32 %v7502_v31, 16  ;;  %v5008_v46 = vcombine.low %v1553_v28, %v1563_v7  ;;  %v1608_v48 = vshll.u32 %v7508_v34, 16  ;;  %v7539_v16 = vpop.f32.mrb[37].mxu1 }
 0x283   : > { %5524 = vmatprep.mubr.bf16.mxu1 %v5004_v35  ;;  %5561 = vmatmul.mubr.bf16.gmra.mrb[4].mxu0 %v5023_v56  ;;  %v1570_v56 = vrot.slane %v1568_v37, 5  ;;  %v1582_v35 = vrot.slane %v1581_v40, 4  ;;  %v7525_v49 = vrot.slane %v1622_v38, 5  ;;  %v1628_v52 = vrot.slane %v1626_v29, 4  ;;  %v7551_v29 = vpop.f32.mrb[38].mxu1 }
 0x284   : > { %5525 = vmatmul.mubr.bf16.vlgmr.msra.gmra.mrb[40].mxu1 %v7438_v57  ;;  %5564 = vmatprep.mubr.bf16.mxu0 %v5024_v21  ;;  %v1539_v57 = vsel %vm7403_vm11, %v1534_v60, %v1538_v8  ;;  %v1591_v21 = vrot.slane %v1589_v61, 4  ;;  %v1615_v15 = vrot.slane %v1613_v41, 4  ;;  %v1618_v60 = vrot.slane %v1616_v42, 5  ;;  %v6166_v61 = vld [vmem:[#allocation11 + $0xb0] sm:$0xff]  }
 0x285   : > { %5577 = vmatpush3.bf16.msra.mxu0 %v6158_v26  ;;  %5528 = vmatprep.mubr.bf16.mxu1 %v5006_v0  ;;  %v2052_v26 = vrot.slane %v7432_v51, 5  ;;  %v1605_v51 = vor.u32 %v1604_v11, %v7493_v9  ;;  %v1571_v43 = vor.u32 %v1570_v56, %v7484_v59  ;;  %v5007_v10 = vcombine.low %v1529_v32, %v1539_v57 }
 0x286   : > { %5578 = vmatprep.subr.bf16.mxu0 %v6160_v55  ;;  %v1595_v17 = vor.u32 %v1594_v25, %v1591_v21  ;;  %v1586_v0 = vrot.slane %v1584_v45, 5  ;;  %v2055_v1 = vrot.slane %v7434_v54, 5  ;;  %v2059_v6 = vrot.slane %v7358_v24, 5 }
 0x287   : > { %v2054_v37 = vrot.slane %v2052_v26, 4  ;;  %v1606_v59 = vrot.slane %v1605_v51, 4  ;;  %v1572_v62 = vrot.slane %v1571_v43, 4  ;;  %v1610_v56 = vrot.slane %v1608_v48, 5  ;;  %v6167_v51 = vld [vmem:[#allocation11 + $0xb8] sm:$0xff]  }
 0x288   : > { %v1596_v11 = vrot.slane %v1595_v17, 4  ;;  %v1587_v54 = vsel %vm7403_vm11, %v1582_v35, %v1586_v0  ;;  %v5027_v57 = vcombine.low %v7497_v19, %v7488_v2  ;;  %v2066_v25 = vrot.slane %v7375_v58, 5  ;;  %v6168_v17 = vld [vmem:[#allocation11 + $0xc0] sm:$0xff]  }
 0x289   : > { %5579 = vmatpush3.bf16.msra.mxu0 %v6160_v55  ;;  %v2023_v55 = vld [vmem:[#allocation2] sm:$0xe]  ;;  %v2056_v24 = vsel %vm7533_vm14, %v2054_v37, %v2055_v1  ;;  %v1611_v21 = vsel %vm7403_vm11, %v1606_v59, %v1610_v56  ;;  %v1577_v7 = vsel %vm7403_vm11, %v1572_v62, %v7490_v3  ;;  %v1619_v38 = vor.u32 %v1618_v60, %v1615_v15  ;;  %v2027_v56 = vld [vmem:[#allocation2 + $0x30] sm:$0xe] }
 0x28a   : > { %5580 = vmatprep.subr.bf16.mxu0 %v6162_v20  ;;  %v5036_v18 = vrot.slane %v2023_v55, 9  ;;  %v5009_v19 = vcombine.low %v1577_v7, %v1587_v54  ;;  %v1601_v58 = vsel %vm7403_vm11, %v1596_v11, %v7493_v9  ;;  %v2061_v28 = vrot.slane %v2059_v6, 4  ;;  %v6169_v62 = vld [vmem:[#allocation11 + $0xc8] sm:$0xff]  }
 0x28b   : > { %5565 = vmatmul.mubr.bf16.gmra.mrb[8].mxu0 %v5025_v13  ;;  %v7537_v13 = vld [vmem:[#allocation2 + $0x5c] sm:$0x1]  ;;  %v5010_v42 = vcombine.low %v1601_v58, %v1611_v21  ;;  %v2068_v43 = vrot.slane %v2066_v25, 4  ;;  %v2062_v45 = vrot.slane %v7378_v63, 5  ;;  %v2069_v9 = vrot.slane %v7397_v27, 5 }
 0x28c   : > { %5529 = vmatmul.mubr.bf16.gmra.mrb[44].mxu1 %v5007_v10  ;;  %5568 = vmatprep.mubr.bf16.mxu0 %v5026_v39  ;;  %v2053_v40 = vsel %vm7533_vm14, %v5036_v18, %v2052_v26  ;;  %v1632_v32 = vshll.u32 %v7537_v13, 16  ;;  %v7559_v39 = vpop.f32.mrb[39].mxu1  ;;  %v2024_v26 = vld [vmem:[#allocation2 + $0xc] sm:$0xe]  ;;  %v1620_v10 = vrot.slane %v1619_v38, 4  ;;  %v2080_v55 = vrot.slane %v7415_v36, 5 }
 0x28d   : > { %5581 = vmatpush3.bf16.msra.mxu0 %v6162_v20  ;;  %5532 = vmatprep.mubr.bf16.mxu1 %v5008_v46  ;;  %v1629_v20 = vor.u32 %v1628_v52, %v7525_v49  ;;  %v5044_v41 = vcombine.low %v2053_v40, %v2056_v24  ;;  %v5037_v48 = vrot.slane %v2024_v26, 9  ;;  %v2063_v35 = vsel %vm7533_vm14, %v2061_v28, %v2062_v45  ;;  %v2026_v36 = vld [vmem:[#allocation2 + $0x24] sm:$0xe]  ;;  %v6171_v40 = vld [vmem:[#allocation11 + $0xd8] sm:$0xff]   ;;  %v6172_v58 = vld [vmem:[#allocation11 + $0xe0] sm:$0xff]  }
 0x28e   : > { %5582 = vmatprep.subr.bf16.mxu0 %v6164_v47  ;;  %v1634_v46 = vrot.slane %v1632_v32, 5  ;;  %v2073_v52 = vrot.slane %v7394_v23, 5  ;;  %v2070_v63 = vsel %vm7533_vm14, %v2068_v43, %v2069_v9  ;;  %v1625_v27 = vsel %vm7403_vm11, %v1620_v10, %v7525_v49  ;;  %v6170_v49 = vld [vmem:[#allocation11 + $0xd0] sm:$0xff]   ;;  %v6173_v10 = vld [vmem:[#allocation11 + $0xe8] sm:$0xff]  }
 0x28f   : > { %v1630_v3 = vrot.slane %v1629_v20, 4  ;;  %v2060_v59 = vsel %vm7533_vm14, %v5037_v48, %v2059_v6  ;;  %v2082_v11 = vrot.slane %v2080_v55, 4  ;;  %v2076_v6 = vrot.slane %v7455_v22, 5  ;;  %v6174_v9 = vld [vmem:[#allocation11 + $0xf0] sm:$0xff]  }
 0x290   : > { %v5045_v60 = vcombine.low %v2060_v59, %v2063_v35  ;;  %v2075_v1 = vrot.slane %v2073_v52, 4  ;;  %v2083_v54 = vrot.slane %v7467_v44, 5  ;;  %v5039_v18 = vrot.slane %v2026_v36, 9  ;;  %v1062_v59 = vld [vmem:[#allocation2 + $0x74] sm:$0x1] }
 0x291   : > { %5583 = vmatpush3.bf16.msra.mxu0 %v6164_v47  ;;  %v2025_v47 = vld [vmem:[#allocation2 + $0x18] sm:$0xe]  ;;  %v1635_v37 = vsel %vm7403_vm11, %v1630_v3, %v1634_v46  ;;  %v2087_v20 = vrot.slane %v7448_v14, 5  ;;  %v2028_v14 = vld [vmem:[#allocation2 + $0x3c] sm:$0xe]  ;;  %v2101_v3 = vrot.slane %v7488_v2, 5 }
 0x292   : > { %5584 = vmatprep.subr.bf16.mxu0 %v6166_v61  ;;  %v5038_v15 = vrot.slane %v2025_v47, 9  ;;  %v2077_v24 = vsel %vm7533_vm14, %v2075_v1, %v2076_v6  ;;  %v2084_v21 = vsel %vm7533_vm14, %v2082_v11, %v2083_v54  ;;  %v2074_v22 = vsel %vm7533_vm14, %v5039_v18, %v2073_v52  ;;  %v6179_v11 = vld [vmem:[#allocation2 + $0x24] sm:$0xff]  }
 0x293   : > { %5569 = vmatmul.mubr.bf16.gmra.mrb[12].mxu0 %v5027_v57  ;;  %v5040_v57 = vrot.slane %v2027_v56, 9  ;;  %v5047_v7 = vcombine.low %v2074_v22, %v2077_v24  ;;  %v2089_v32 = vrot.slane %v2087_v20, 4  ;;  %v5041_v28 = vrot.slane %v2028_v14, 9  ;;  %v7627_v22 = vld [vmem:[#allocation2 + $0x14] sm:$0x1] }
 0x294   : > { %5533 = vmatmul.mubr.bf16.gmra.mrb[48].mxu1 %v5009_v19  ;;  %5588 = vmatprep.mubr.bf16.mxu0 %v5044_v41  ;;  %v2067_v23 = vsel %vm7533_vm14, %v5038_v15, %v2066_v25  ;;  %v2094_v25 = vrot.slane %v7463_v33, 5  ;;  %v2090_v41 = vrot.slane %v7502_v31, 5  ;;  %v2029_v33 = vld [vmem:[#allocation2 + $0x48] sm:$0xe]  ;;  %v2103_v47 = vrot.slane %v2101_v3, 4  ;;  %v6176_v15 = vld [vmem:[#allocation11 + $0xf8] sm:$0xff]  }
 0x295   : > { %5585 = vmatpush3.bf16.msra.mxu0 %v6166_v61  ;;  %5536 = vmatprep.mubr.bf16.mxu1 %v5010_v42  ;;  %v5011_v61 = vcombine.low %v1625_v27, %v1635_v37  ;;  %v5046_v0 = vcombine.low %v2067_v23, %v2070_v63  ;;  %v2081_v44 = vsel %vm7533_vm14, %v5040_v57, %v2080_v55  ;;  %v5042_v26 = vrot.slane %v2029_v33, 9  ;;  %v6175_v63 = vld [vmem:[#allocation2 + $0xc] sm:$0xff]   ;;  %v6177_v23 = vld [vmem:[#allocation2 + $0x18] sm:$0xff]  }
 0x296   : > { %5586 = vmatprep.subr.bf16.mxu0 %v6167_v51  ;;  %v5048_v38 = vcombine.low %v2081_v44, %v2084_v21  ;;  %v2096_v19 = vrot.slane %v2094_v25, 4  ;;  %v2091_v42 = vsel %vm7533_vm14, %v2089_v32, %v2090_v41  ;;  %v2088_v45 = vsel %vm7533_vm14, %v5041_v28, %v2087_v20  ;;  %v1030_v55 = vld [vmem:[#allocation2 + $0x6c] sm:$0x1]  ;;  %v7625_v20 = vld [vmem:[#allocation2 + $0x1c] sm:$0xf]  ;;  %v6184_v32 = vld [vmem:[#allocation11 + $0x118] sm:$0xff]  }
 0x297   : > { %v5049_v31 = vcombine.low %v2088_v45, %v2091_v42  ;;  %v2104_v2 = vrot.slane %v7537_v13, 5  ;;  %v6178_v13 = vld [vmem:[#allocation11 + $0x100] sm:$0xff]   ;;  %v2558_v27 = vld [vmem:[#allocation2 + $0xc] sm:$0xf]  ;;  %v5363_v1 = vadd.f32 %v7559_v39, %v7551_v29  ;;  %v1063_v36 = vsel %vm7229_vm4, 0, %v1062_v59 }
 0x298   : > { %1064 = vst [vmem:[#allocation2 + $0x74] sm:$0x1] %v1063_v36  ;;  %v997_v6 = vstv %s883_s0  ;;  %v6182_v29 = vld [vmem:[#allocation11 + $0x110] sm:$0xff]   ;;  %v2586_v24 = vshll.u32 %v2558_v27, 16  ;;  %v2561_v21 = vld [vmem:[#allocation2 + $0x18] sm:$0xf]  ;;  %s8329_s0 = smov %s8328_s20 }
 0x299   : > { %5587 = vmatpush3.bf16.msra.mxu0 %v6167_v51  ;;  %v2097_v51 = vrot.slane %v7508_v34, 5  ;;  %v2095_v34 = vsel %vm7533_vm14, %v5042_v26, %v2094_v25  ;;  %v2105_v35 = vsel %vm7533_vm14, %v2103_v47, %v2104_v2  ;;  %v2620_v41 = vshrl.u32 %v7625_v20, 16  ;;  %v2564_v26 = vld [vmem:[#allocation2 + $0x24] sm:$0xf]  ;;  %v6186_v47 = vld [vmem:[#allocation11 + $0x120] sm:$0xff]  }
 0x29a   : > { %5604 = vmatprep.subr.bf16.mxu0 %v6168_v17  ;;  %v2607_v28 = vshrl.u32 %v2561_v21, 16  ;;  %v6621_v8 = vmov 0  }
 0x29b   : > { %v2098_v43 = vsel %vm7533_vm14, %v2096_v19, %v2097_v51  ;;  %v2616_v19 = vshll.u32 %v7625_v20, 16  ;;  %v2588_v51 = vrot.slane %v2586_v24, 5  ;;  %v7656_v24 = vld [vmem:[#allocation2 + $0x34] sm:$0xf] }
 0x29c   : > { %5589 = vmatmul.mubr.bf16.vlgmr.msra.gmra.mrb[0].mxu0 %v5045_v60  ;;  %5537 = vmatmul.mubr.bf16.gmra.mrb[52].mxu1 %v5011_v61  ;;  %v5050_v46 = vcombine.low %v2095_v34, %v2098_v43  ;;  %v5360_v60 = vadd.f32 %v7539_v16, %v7528_v5  ;;  %v1031_v61 = vsel %vm7221_vm2, 0, %v1030_v55  ;;  %v6256_v5 = vld [vmem:[%s8315_s24] ss:$0 sm:$0xff]  ;;  %v2610_v34 = vshll.u32 %v2561_v21, 16 }
 0x29d   : > { %5592 = vmatprep.mubr.bf16.mxu0 %v5046_v0  ;;  %5605 = vmatpush3.bf16.msra.mxu0 %v6168_v17  ;;  %v2030_v17 = vld [vmem:[#allocation2 + $0x54] sm:$0xe]  ;;  %v7614_v0 = vld [vmem:[#allocation2 + $0x10] sm:$0xf]  ;;  %1032 = vst [vmem:[#allocation2 + $0x6c] sm:$0x1] %v1031_v61  ;;  %v992_v56 = vadd.f32 %v6256_v5, %v5363_v1 }
 0x29e   : > { %5606 = vmatprep.subr.bf16.mxu0 %v6169_v62  ;;  %v5043_v48 = vrot.slane %v2030_v17, 9  ;;  %v989_v16 = vadd.f32 %v6256_v5, %v5360_v60  ;;  %v2592_v54 = vshll.u32 %v7614_v0, 16  ;;  %v2596_v53 = vshrl.u32 %v7614_v0, 16  ;;  %v7644_v61 = vld [vmem:[#allocation2 + $0x20] sm:$0x1]  ;;  %4436 = vmatprep.mubr.bf16.mxu1 %v6621_v8 }
 0x29f   : > { %v996_v39 = vmax.f32 %v992_v56, 0.0  ;;  %v7639_v2 = vrot.slane %v2616_v19, 5  ;;  %v2634_v1 = vshll.u32 %v2564_v26, 16  ;;  %v6188_v5 = vld [vmem:[#allocation11 + $0x128] sm:$0xff]  }
 0x2a0   : > { %v2102_v37 = vsel %vm7533_vm14, %v5043_v48, %v2101_v3  ;;  %v995_v18 = vmax.f32 %v989_v16, 0.0  ;;  %v7631_v44 = vrot.slane %v2592_v54, 5  ;;  %v2598_v14 = vrot.slane %v2596_v53, 4  ;;  %v6187_v54 = vld [vmem:[#allocation2 + $0x54] sm:$0xff]  }
 0x2a1   : > { %5607 = vmatpush3.bf16.msra.mxu0 %v6169_v62  ;;  %v5051_v52 = vcombine.low %v2102_v37, %v2105_v35  ;;  %v6180_v62 = vld [vmem:[#allocation11 + $0x108] sm:$0xff]   ;;  %v999_v25 = vmul.f32 %v997_v6, %v996_v39  ;;  %v2636_v50 = vrot.slane %v2634_v1, 5  ;;  %v6192_v1 = vld [vmem:[#allocation11 + $0x140] sm:$0xff]  }
 0x2a2   : > { %5608 = vmatprep.subr.bf16.mxu0 %v6170_v49  ;;  %v998_v57 = vmul.f32 %v997_v6, %v995_v18  ;;  %v2599_v17 = vor.u32 %v2598_v14, %v7631_v44  ;;  %v2567_v18 = vld [vmem:[#allocation2 + $0x30] sm:$0xf] }
 0x2a3   : > { %v5222_v33 = vpack.c.bf16 %v999_v25, %v999_v25  ;;  %v7658_v25 = vld [vmem:[#allocation2 + $0x40] sm:$0xf]  ;;  %v2655_v14 = vshrl.u32 %v2567_v18, 16  ;;  %v2658_v19 = vshll.u32 %v2567_v18, 16  ;;  %v2576_v18 = vld [vmem:[#allocation2 + $0x54] sm:$0xf] }
 0x2a4   : > { %5593 = vmatmul.mubr.bf16.gmra.mrb[4].mxu0 %v5047_v7  ;;  %v1129_v48 = vld [vmem:[#allocation2 + $0x6c] sm:$0xf]  ;;  %v2600_v16 = vrot.slane %v2599_v17, 4 }
 0x2a5   : > { %5596 = vmatprep.mubr.bf16.mxu0 %v5048_v38  ;;  %5609 = vmatpush3.bf16.msra.mxu0 %v6170_v49  ;;  %v2583_v49 = vshrl.u32 %v2558_v27, 16  ;;  %v6181_v38 = vld [vmem:[#allocation2 + $0x30] sm:$0xff]   ;;  %v1117_v43 = vshrl.u32 %v5222_v33, 16  ;;  %v1120_v45 = vshll.u32 %v5222_v33, 16  ;;  %v2668_v33 = vshrl.u32 %v7656_v24, 16 }
 0x2a6   : > { %5610 = vmatprep.subr.bf16.mxu0 %v6171_v40 }
 0x2a7   : > { %v7629_v7 = vrot.slane %v2583_v49, 4  ;;  %v1119_v35 = vrot.slane %v1117_v43, 7 }
 0x2a9   : > { %5611 = vmatpush3.bf16.msra.mxu0 %v6171_v40  ;;  %v5221_v40 = vpack.c.bf16 %v998_v57, %v998_v57  ;;  %v2589_v37 = vor.u32 %v2588_v51, %v7629_v7  ;;  %v1122_v27 = vor.u32 %v1120_v45, %v1119_v35  ;;  %v1124_v60 = vrot.slane %v1119_v35, 4  ;;  %v6190_v7 = vld [vmem:[#allocation11 + $0x130] sm:$0xff]  }
 0x2aa   : > { %5612 = vmatprep.subr.bf16.mxu0 %v6172_v58  ;;  %v2657_v35 = vrot.slane %v2655_v14, 4 }
 0x2ab   : > { %v1109_v42 = vshrl.u32 %v5221_v40, 16  ;;  %v1112_v3 = vshll.u32 %v5221_v40, 16  ;;  %v2590_v12 = vrot.slane %v2589_v37, 4  ;;  %v2660_v37 = vrot.slane %v2658_v19, 5 }
 0x2ac   : > { %5597 = vmatmul.mubr.bf16.gmra.mrb[8].mxu0 %v5049_v31  ;;  %v2602_v31 = vshll.u32 %v7627_v22, 16  ;;  %v2727_v19 = vshrl.u32 %v2576_v18, 16 }
 0x2ad   : > { %5600 = vmatprep.mubr.bf16.mxu0 %v5050_v46  ;;  %5613 = vmatpush3.bf16.msra.mxu0 %v6172_v58  ;;  %v6183_v58 = vld [vmem:[#allocation2 + $0x3c] sm:$0xff]   ;;  %v1111_v46 = vrot.slane %v1109_v42, 7  ;;  %v2688_v42 = vshll.u32 %v7658_v25, 16 }
 0x2ae   : > { %5614 = vmatprep.subr.bf16.mxu0 %v6173_v10  ;;  %v2604_v4 = vrot.slane %v2602_v31, 5 }
 0x2b0   : > { %v2605_v40 = vsel %vm7403_vm11, %v2600_v16, %v2604_v4  ;;  %v2573_v16 = vld [vmem:[#allocation2 + $0x48] sm:$0xf] }
 0x2b1   : > { %5615 = vmatpush3.bf16.msra.mxu0 %v6173_v10  ;;  %v7636_v10 = vld [vmem:[#allocation2 + $0x28] sm:$0xf] }
 0x2b2   : > { %5616 = vmatprep.subr.bf16.mxu0 %v6174_v9  ;;  %v2640_v55 = vshll.u32 %v7636_v10, 16  ;;  %v2644_v59 = vshrl.u32 %v7636_v10, 16 }
 0x2b4   : > { %5601 = vmatmul.mubr.bf16.gmra.mrb[12].mxu0 %v5051_v52  ;;  %v2609_v52 = vrot.slane %v2607_v28, 4  ;;  %v7654_v53 = vrot.slane %v2640_v55, 5  ;;  %v2646_v39 = vrot.slane %v2644_v59, 4  ;;  %v7679_v55 = vld [vmem:[#allocation2 + $0x4c] sm:$0xf] }
 0x2b5   : > { %5617 = vmatpush3.bf16.msra.mxu0 %v6174_v9  ;;  %5620 = vmatprep.mubr.bf16.mxu0 %v6175_v63  ;;  %v2622_v9 = vrot.slane %v2620_v41, 4  ;;  %v1115_v63 = vrot.slane %v1111_v46, 4  ;;  %v2664_v41 = vshll.u32 %v7656_v24, 16 }
 0x2b6   : > { %5618 = vmatprep.subr.bf16.mxu0 %v6176_v15  ;;  %v2647_v28 = vor.u32 %v2646_v39, %v7654_v53 }
 0x2b7   : > { %v2623_v6 = vor.u32 %v2622_v9, %v7639_v2  ;;  %v1123_v56 = vsel %vm7290_vm8, %v1115_v63, %v1122_v27  ;;  %v7677_v63 = vrot.slane %v2688_v42, 5 }
 0x2b8   : > { %1132 = vst [vmem:[#allocation2 + $0x70] sm:$0xf] %v1123_v56 }
 0x2b9   : > { %5619 = vmatpush3.bf16.msra.mxu0 %v6176_v15  ;;  %v1114_v15 = vor.u32 %v1112_v3, %v1111_v46  ;;  %v2692_v3 = vshrl.u32 %v7658_v25, 16 }
 0x2ba   : > { %5636 = vmatprep.subr.bf16.mxu0 %v6178_v13 }
 0x2bb   : > { %v1130_v36 = vsel %vm7285_vm7, %v1114_v15, %v1129_v48  ;;  %v2670_v15 = vrot.slane %v2668_v33, 4 }
 0x2bc   : > { %5621 = vmatmul.mubr.bf16.vlgmr.msra.gmra.mrb[0].mxu0 %v6177_v23  ;;  %v2612_v23 = vrot.slane %v2610_v34, 5  ;;  %1131 = vst [vmem:[#allocation2 + $0x6c] sm:$0xf] %v1130_v36  ;;  %v6189_v34 = vld [vmem:[#allocation2 + $0x60] sm:$0xff]  }
 0x2bd   : > { %5624 = vmatprep.mubr.bf16.mxu0 %v6179_v11  ;;  %5637 = vmatpush3.bf16.msra.mxu0 %v6178_v13  ;;  %v1133_v13 = vld [vmem:[#allocation2 + $0x74] sm:$0x1]  ;;  %v6185_v11 = vld [vmem:[#allocation2 + $0x48] sm:$0xff]  }
 0x2be   : > { %5638 = vmatprep.subr.bf16.mxu0 %v6180_v62  ;;  %v1134_v49 = vsel %vm7221_vm2, %v1124_v60, %v1133_v13  ;;  %v2613_v57 = vor.u32 %v2612_v23, %v2609_v52  ;;  %v7675_v52 = vrot.slane %v2664_v41, 5  ;;  %v2694_v13 = vrot.slane %v2692_v3, 4  ;;  %v7684_v60 = vld [vmem:[#allocation2 + $0x38] sm:$0x1] }
 0x2bf   : > { %1135 = vst [vmem:[#allocation2 + $0x74] sm:$0x1] %v1134_v49  ;;  %v7686_v23 = vld [vmem:[#allocation2 + $0x58] sm:$0xf]  ;;  %v7689_v49 = vld [vmem:[#allocation2 + $0x44] sm:$0x1] }
 0x2c0   : > { %v2614_v43 = vrot.slane %v2613_v57, 4  ;;  %v2671_v56 = vor.u32 %v2670_v15, %v7675_v52  ;;  %v2736_v39 = vshll.u32 %v7686_v23, 16  ;;  %v2698_v14 = vshll.u32 %v7689_v49, 16 }
 0x2c1   : > { %5639 = vmatpush3.bf16.msra.mxu0 %v6180_v62  ;;  %v2631_v62 = vshrl.u32 %v2564_v26, 16  ;;  %v2595_v26 = vsel %vm7403_vm11, %v2590_v12, %v7631_v44  ;;  %v2648_v44 = vrot.slane %v2647_v28, 4  ;;  %v2740_v12 = vshrl.u32 %v7686_v23, 16 }
 0x2c2   : > { %5640 = vmatprep.subr.bf16.mxu0 %v6182_v29  ;;  %v5076_v46 = vcombine.low %v2595_v26, %v2605_v40  ;;  %v2619_v59 = vsel %vm7403_vm11, %v2614_v43, %v7639_v2  ;;  %v2716_v2 = vshrl.u32 %v7679_v55, 16  ;;  %v6193_v40 = vld [vmem:[#allocation11 + $0x148] sm:$0xff]   ;;  %v2730_v41 = vshll.u32 %v2576_v18, 16 }
 0x2c3   : > { %v2633_v21 = vrot.slane %v2631_v62, 4  ;;  %v2742_v26 = vrot.slane %v2740_v12, 4  ;;  %v7707_v43 = vld [vmem:[#allocation2 + $0x64] sm:$0xf] }
 0x2c4   : > { %5625 = vmatmul.mubr.bf16.gmra.mrb[4].mxu0 %v6181_v38  ;;  %v2624_v38 = vrot.slane %v2623_v6, 4  ;;  %v2661_v6 = vor.u32 %v2660_v37, %v2657_v35  ;;  %v2718_v28 = vrot.slane %v2716_v2, 4  ;;  %v2732_v35 = vrot.slane %v2730_v41, 5  ;;  %v2579_v37 = vld [vmem:[#allocation2 + $0x60] sm:$0xf]  ;;  %v6195_v2 = vld [vmem:[#allocation11 + $0x158] sm:$0xff]  }
 0x2c5   : > { %5628 = vmatprep.mubr.bf16.mxu0 %v6183_v58  ;;  %5641 = vmatpush3.bf16.msra.mxu0 %v6182_v29  ;;  %v2626_v29 = vshll.u32 %v7644_v61, 16  ;;  %v2570_v58 = vld [vmem:[#allocation2 + $0x3c] sm:$0xf]  ;;  %v2637_v45 = vor.u32 %v2636_v50, %v2633_v21  ;;  %v2674_v21 = vshll.u32 %v7684_v60, 16  ;;  %v2703_v50 = vshrl.u32 %v2573_v16, 16 }
 0x2c6   : > { %5642 = vmatprep.subr.bf16.mxu0 %v6184_v32  ;;  %v2679_v9 = vshrl.u32 %v2570_v58, 16  ;;  %v2682_v48 = vshll.u32 %v2570_v58, 16  ;;  %v2672_v58 = vrot.slane %v2671_v56, 4  ;;  %v2662_v42 = vrot.slane %v2661_v6, 4 }
 0x2c7   : > { %v2628_v51 = vrot.slane %v2626_v29, 5  ;;  %v2638_v27 = vrot.slane %v2637_v45, 4  ;;  %v2695_v29 = vor.u32 %v2694_v13, %v7677_v63  ;;  %v2676_v45 = vrot.slane %v2674_v21, 5  ;;  %v7714_v13 = vld [vmem:[#allocation2 + $0x5c] sm:$0x1] }
 0x2c8   : > { %v2754_v6 = vshll.u32 %v2579_v37, 16 }
 0x2c9   : > { %5643 = vmatpush3.bf16.msra.mxu0 %v6184_v32  ;;  %v7662_v32 = vld [vmem:[#allocation2 + $0x2c] sm:$0x1]  ;;  %v2629_v17 = vsel %vm7403_vm11, %v2624_v38, %v2628_v51  ;;  %v2643_v57 = vsel %vm7403_vm11, %v2638_v27, %v7654_v53  ;;  %v2696_v3 = vrot.slane %v2695_v29, 4  ;;  %v7705_v53 = vrot.slane %v2736_v39, 5 }
 0x2ca   : > { %5644 = vmatprep.subr.bf16.mxu0 %v6186_v47  ;;  %v2650_v31 = vshll.u32 %v7662_v32, 16  ;;  %v5077_v62 = vcombine.low %v2619_v59, %v2629_v17  ;;  %v2677_v15 = vsel %vm7403_vm11, %v2672_v58, %v2676_v45  ;;  %v2760_v59 = vshll.u32 %v7707_v43, 16 }
 0x2cb   : > { %v2764_v27 = vshrl.u32 %v7707_v43, 16 }
 0x2cc   : > { %5629 = vmatmul.mubr.bf16.gmra.mrb[8].mxu0 %v6185_v11  ;;  %v2652_v36 = vrot.slane %v2650_v31, 5  ;;  %v2681_v11 = vrot.slane %v2679_v9, 4  ;;  %v6194_v31 = vld [vmem:[#allocation11 + $0x150] sm:$0xff]   ;;  %v2700_v9 = vrot.slane %v2698_v14, 5  ;;  %v2762_v39 = vrot.slane %v2760_v59, 5 }
 0x2cd   : > { %5632 = vmatprep.mubr.bf16.mxu0 %v6187_v54  ;;  %5645 = vmatpush3.bf16.msra.mxu0 %v6186_v47  ;;  %v6191_v47 = vld [vmem:[#allocation11 + $0x138] sm:$0xff]   ;;  %v2712_v54 = vshll.u32 %v7679_v55, 16  ;;  %v2766_v12 = vrot.slane %v2764_v27, 4  ;;  %v3032_v27 = vrot.slane %v7636_v10, 5  ;;  %v3028_v10 = vrot.slane %v7644_v61, 5 }
 0x2ce   : > { %5646 = vmatprep.subr.bf16.mxu0 %v6188_v5  ;;  %v2653_v4 = vsel %vm7403_vm11, %v2648_v44, %v2652_v36  ;;  %v2743_v36 = vor.u32 %v2742_v26, %v7705_v53  ;;  %v3046_v61 = vrot.slane %v7658_v25, 5  ;;  %v6243_v25 = vld [vmem:[#allocation12 + $0x34] ss:$8 sps:$4 sm:$0xff]  }
 0x2cf   : > { %v5078_v33 = vcombine.low %v2643_v57, %v2653_v4  ;;  %v7703_v51 = vrot.slane %v2712_v54, 5 }
 0x2d0   : > { %v2744_v57 = vrot.slane %v2743_v36, 4  ;;  %v6199_v36 = vld [vmem:[#allocation11 + $0x178] sm:$0xff]  }
 0x2d1   : > { %5647 = vmatpush3.bf16.msra.mxu0 %v6188_v5  ;;  %v2684_v5 = vrot.slane %v2682_v48, 5  ;;  %v2729_v48 = vrot.slane %v2727_v19, 4  ;;  %v2719_v44 = vor.u32 %v2718_v28, %v7703_v51  ;;  %v7729_v19 = vld [vmem:[#allocation2 + $0x68] sm:$0x1]  ;;  %v3018_v28 = vrot.slane %v7614_v0, 5 }
 0x2d2   : > { %5648 = vmatprep.subr.bf16.mxu0 %v6190_v7  ;;  %v2770_v26 = vshll.u32 %v7729_v19, 16 }
 0x2d3   : > { %v2685_v38 = vor.u32 %v2684_v5, %v2681_v11  ;;  %v2733_v18 = vor.u32 %v2732_v35, %v2729_v48  ;;  %v2720_v29 = vrot.slane %v2719_v44, 4  ;;  %v2984_v35 = vld [vmem:[#allocation2 + $0xc] sm:$0xe]  ;;  %v3025_v44 = vrot.slane %v7625_v20, 5 }
 0x2d4   : > { %5633 = vmatmul.mubr.bf16.gmra.mrb[12].mxu0 %v6189_v34  ;;  %v7709_v34 = vld [vmem:[#allocation2 + $0x50] sm:$0x1]  ;;  %v2772_v48 = vrot.slane %v2770_v26, 5  ;;  %v3034_v20 = vrot.slane %v3032_v27, 4 }
 0x2d5   : > { %5649 = vmatpush3.bf16.msra.mxu0 %v6190_v7  ;;  %5652 = vmatprep.mubr.bf16.mxu0 %v5076_v46  ;;  %v2706_v7 = vshll.u32 %v2573_v16, 16  ;;  %v2705_v46 = vrot.slane %v2703_v50, 4  ;;  %v2686_v17 = vrot.slane %v2685_v38, 4  ;;  %v2722_v5 = vshll.u32 %v7709_v34, 16  ;;  %v6196_v38 = vld [vmem:[#allocation11 + $0x160] sm:$0xff]  }
 0x2d6   : > { %5650 = vmatprep.subr.bf16.mxu0 %v6191_v47  ;;  %v2751_v16 = vshrl.u32 %v2579_v37, 16  ;;  %v2734_v14 = vrot.slane %v2733_v18, 4  ;;  %v3021_v37 = vrot.slane %v7627_v22, 5  ;;  %v6200_v18 = vld [vmem:[#allocation11 + $0x180] sm:$0xff]  }
 0x2d7   : > { %v2691_v54 = vsel %vm7403_vm11, %v2686_v17, %v7677_v63  ;;  %v2724_v50 = vrot.slane %v2722_v5, 5  ;;  %v2985_v5 = vld [vmem:[#allocation2 + $0x18] sm:$0xe] }
 0x2d9   : > { %5651 = vmatpush3.bf16.msra.mxu0 %v6191_v47  ;;  %v2708_v47 = vrot.slane %v2706_v7, 5  ;;  %v2753_v7 = vrot.slane %v2751_v16, 4  ;;  %v2725_v41 = vsel %vm7403_vm11, %v2720_v29, %v2724_v50  ;;  %v3027_v16 = vrot.slane %v3025_v44, 4  ;;  %v6240_v50 = vld [vmem:[#allocation12 + $0x24] ss:$8 sps:$4 sm:$0xff]  }
 0x2da   : > { %5668 = vmatprep.subr.bf16.mxu0 %v6192_v1 }
 0x2db   : > { %v2709_v11 = vor.u32 %v2708_v47, %v2705_v46  ;;  %v6197_v46 = vld [vmem:[#allocation11 + $0x168] sm:$0xff]   ;;  %v3029_v29 = vsel %vm7533_vm14, %v3027_v16, %v3028_v10  ;;  %v6206_v10 = vld [vmem:[#allocation11 + $0x1b0] sm:$0xff]  }
 0x2dc   : > { %5653 = vmatmul.mubr.bf16.vlgmr.msra.gmra.mrb[0].mxu0 %v5077_v62  ;;  %v2667_v62 = vsel %vm7403_vm11, %v2662_v42, %v7675_v52  ;;  %v2746_v52 = vshll.u32 %v7714_v13, 16  ;;  %v6205_v16 = vld [vmem:[#allocation11 + $0x1a8] sm:$0xff]  }
 0x2dd   : > { %5656 = vmatprep.mubr.bf16.mxu0 %v5078_v33  ;;  %5669 = vmatpush3.bf16.msra.mxu0 %v6192_v1  ;;  %v2701_v1 = vsel %vm7403_vm11, %v2696_v3, %v2700_v9  ;;  %v5079_v56 = vcombine.low %v2667_v62, %v2677_v15  ;;  %v2710_v21 = vrot.slane %v2709_v11, 4  ;;  %v2767_v33 = vor.u32 %v2766_v12, %v2762_v39  ;;  %v6235_v12 = vld [vmem:[#allocation12 + $0x10] ss:$8 sps:$4 sm:$0xff]  }
 0x2de   : > { %5670 = vmatprep.subr.bf16.mxu0 %v6193_v40  ;;  %v5080_v4 = vcombine.low %v2691_v54, %v2701_v1  ;;  %v2748_v63 = vrot.slane %v2746_v52, 5  ;;  %v3020_v9 = vrot.slane %v3018_v28, 4  ;;  %v2986_v54 = vld [vmem:[#allocation2 + $0x24] sm:$0xe]  ;;  %v3035_v52 = vrot.slane %v7662_v32, 5 }
 0x2df   : > { %v2715_v42 = vsel %vm7403_vm11, %v2710_v21, %v7703_v51  ;;  %v2768_v17 = vrot.slane %v2767_v33, 4  ;;  %v6198_v51 = vld [vmem:[#allocation11 + $0x170] sm:$0xff]   ;;  %v3048_v33 = vrot.slane %v3046_v61, 4 }
 0x2e0   : > { %v2749_v58 = vsel %vm7403_vm11, %v2744_v57, %v2748_v63  ;;  %v5081_v45 = vcombine.low %v2715_v42, %v2725_v41  ;;  %v3022_v59 = vsel %vm7533_vm14, %v3020_v9, %v3021_v37  ;;  %v5094_v57 = vrot.slane %v2986_v54, 9  ;;  %v6238_v63 = vld [vmem:[#allocation12 + $0x20] ss:$8 sps:$4 sm:$0xff]   ;;  %v2987_v41 = vld [vmem:[#allocation2 + $0x30] sm:$0xe]  ;;  %v6202_v42 = vld [vmem:[#allocation11 + $0x190] sm:$0xff]  }
 0x2e1   : > { %5671 = vmatpush3.bf16.msra.mxu0 %v6193_v40  ;;  %v2756_v40 = vrot.slane %v2754_v6, 5  ;;  %v2773_v15 = vsel %vm7403_vm11, %v2768_v17, %v2772_v48  ;;  %v6232_v6 = vld [vmem:[#allocation12] ss:$8 sps:$4 sm:$0xff]   ;;  %v3036_v21 = vsel %vm7533_vm14, %v3034_v20, %v3035_v52  ;;  %v5095_v26 = vrot.slane %v2987_v41, 9  ;;  %v6216_v41 = vld [vmem:[#allocation11 + $0x1d8] sm:$0xff]  }
 0x2e2   : > { %5672 = vmatprep.subr.bf16.mxu0 %v6194_v31  ;;  %v3060_v9 = vrot.slane %v7686_v23, 5  ;;  %v6244_v37 = vld [vmem:[#allocation12 + $0x40] ss:$8 sps:$4 sm:$0xff]   ;;  %v3056_v23 = vrot.slane %v7709_v34, 5 }
 0x2e3   : > { %v2757_v3 = vor.u32 %v2756_v40, %v2753_v7  ;;  %v3033_v40 = vsel %vm7533_vm14, %v5094_v57, %v3032_v27  ;;  %v3063_v27 = vrot.slane %v7714_v13, 5  ;;  %v6211_v57 = vld [vmem:[#allocation2 + $0x30] sm:$0xff]  }
 0x2e4   : > { %5657 = vmatmul.mubr.bf16.gmra.mrb[4].mxu0 %v5079_v56  ;;  %v6234_v56 = vld [vmem:[#allocation12 + $0x4] ss:$8 sps:$4 sm:$0xff]  }
 0x2e5   : > { %5660 = vmatprep.mubr.bf16.mxu0 %v5080_v4  ;;  %5673 = vmatpush3.bf16.msra.mxu0 %v6194_v31  ;;  %v2739_v31 = vsel %vm7403_vm11, %v2734_v14, %v7705_v53  ;;  %v2758_v0 = vrot.slane %v2757_v3, 4  ;;  %v5092_v53 = vrot.slane %v2984_v35, 9  ;;  %v5093_v4 = vrot.slane %v2985_v5, 9 }
 0x2e6   : > { %5674 = vmatprep.subr.bf16.mxu0 %v6195_v2  ;;  %v5082_v47 = vcombine.low %v2739_v31, %v2749_v58  ;;  %4404 = vmatprep.subr.bf16.mxu1 %v6234_v56  ;;  %v3042_v58 = vrot.slane %v7684_v60, 5  ;;  %v3049_v3 = vrot.slane %v7689_v49, 5  ;;  %v3053_v31 = vrot.slane %v7679_v55, 5  ;;  %v6246_v60 = vld [vmem:[#allocation12 + $0x44] ss:$8 sps:$4 sm:$0xff]   ;;  %v6203_v55 = vld [vmem:[#allocation11 + $0x198] sm:$0xff]  }
 0x2e7   : > { %v2763_v62 = vsel %vm7403_vm11, %v2758_v0, %v2762_v39  ;;  %v3019_v22 = vsel %vm7533_vm14, %v5092_v53, %v3018_v28  ;;  %v3039_v39 = vrot.slane %v7656_v24, 5  ;;  %4405 = vmatpush1.bf16.msra.mxu1 %v6232_v6  ;;  %v3026_v32 = vsel %vm7533_vm14, %v5093_v4, %v3025_v44  ;;  %v6201_v24 = vld [vmem:[#allocation11 + $0x188] sm:$0xff]   ;;  %v2988_v28 = vld [vmem:[#allocation2 + $0x3c] sm:$0xe]  ;;  %v2990_v53 = vld [vmem:[#allocation2 + $0x54] sm:$0xe] }
 0x2e8   : > { %v5083_v1 = vcombine.low %v2763_v62, %v2773_v15  ;;  %v5100_v11 = vcombine.low %v3019_v22, %v3022_v59  ;;  %v5101_v7 = vcombine.low %v3026_v32, %v3029_v29  ;;  %v3050_v17 = vsel %vm7533_vm14, %v3048_v33, %v3049_v3  ;;  %v2989_v15 = vld [vmem:[#allocation2 + $0x48] sm:$0xe]  ;;  %v6204_v59 = vld [vmem:[#allocation11 + $0x1a0] sm:$0xff]   ;;  %v2991_v56 = vld [vmem:[#allocation2 + $0x60] sm:$0xe] }
 0x2e9   : > { %5675 = vmatpush3.bf16.msra.mxu0 %v6195_v2  ;;  %v6237_v2 = vld [vmem:[#allocation12 + $0x14] ss:$8 sps:$4 sm:$0xff]   ;;  %v3041_v14 = vrot.slane %v3039_v39, 4  ;;  %v3040_v49 = vsel %vm7533_vm14, %v5095_v26, %v3039_v39  ;;  %v3062_v44 = vrot.slane %v3060_v9, 4  ;;  %v5097_v62 = vrot.slane %v2989_v15, 9  ;;  %v6207_v29 = vld [vmem:[#allocation2 + $0x18] sm:$0xff]  }
 0x2ea   : > { %5676 = vmatprep.subr.bf16.mxu0 %v6196_v38  ;;  %4406 = vmatprep.subr.bf16.mxu1 %v6237_v2  ;;  %v3067_v22 = vrot.slane %v7707_v43, 5  ;;  %v3070_v43 = vrot.slane %v7729_v19, 5  ;;  %v5099_v54 = vrot.slane %v2991_v56, 9  ;;  %v6208_v4 = vld [vmem:[#allocation11 + $0x1b8] sm:$0xff]   ;;  %v6210_v39 = vld [vmem:[#allocation11 + $0x1c0] sm:$0xff]   ;;  %v6209_v19 = vld [vmem:[#allocation2 + $0x24] sm:$0xff]  }
 0x2eb   : > { %4407 = vmatpush1.bf16.msra.mxu1 %v6235_v12  ;;  %v3054_v34 = vsel %vm7533_vm14, %v5097_v62, %v3053_v31  ;;  %v6212_v12 = vld [vmem:[#allocation11 + $0x1c8] sm:$0xff]   ;;  %v3531_v26 = vld [vmem:[#allocation2 + $0x30] sm:$0xf] }
 0x2ec   : > { %5661 = vmatmul.mubr.bf16.gmra.mrb[8].mxu0 %v5081_v45  ;;  %4408 = vmatprep.subr.bf16.mxu1 %v6240_v50  ;;  %v3043_v45 = vsel %vm7533_vm14, %v3041_v14, %v3042_v58  ;;  %v3069_v6 = vrot.slane %v3067_v22, 4  ;;  %v6214_v50 = vld [vmem:[#allocation11 + $0x1d0] sm:$0xff]   ;;  %v3528_v14 = vld [vmem:[#allocation2 + $0x24] sm:$0xf] }
 0x2ed   : > { %5664 = vmatprep.mubr.bf16.mxu0 %v5082_v47  ;;  %5677 = vmatpush3.bf16.msra.mxu0 %v6196_v38  ;;  %v5102_v38 = vcombine.low %v3033_v40, %v3036_v21  ;;  %v5096_v47 = vrot.slane %v2988_v28, 9  ;;  %v5103_v0 = vcombine.low %v3040_v49, %v3043_v45  ;;  %v7794_v21 = vld [vmem:[#allocation2 + $0x1c] sm:$0xf]  ;;  %v7798_v40 = vld [vmem:[#allocation2 + $0x28] sm:$0xf]  ;;  %v6220_v62 = vld [vmem:[#allocation11 + $0x1e8] sm:$0xff]  }
 0x2ee   : > { %5678 = vmatprep.subr.bf16.mxu0 %v6197_v46  ;;  %v3071_v2 = vsel %vm7533_vm14, %v3069_v6, %v3070_v43  ;;  %v3559_v32 = vshll.u32 %v7794_v21, 16  ;;  %v3583_v58 = vshll.u32 %v7798_v40, 16  ;;  %v6215_v28 = vld [vmem:[#allocation2 + $0x48] sm:$0xff]   ;;  %v3587_v3 = vshrl.u32 %v7798_v40, 16 }
 0x2ef   : > { %4409 = vmatpush1.bf16.msra.mxu1 %v6238_v63  ;;  %v3047_v48 = vsel %vm7533_vm14, %v5096_v47, %v3046_v61  ;;  %v3525_v61 = vld [vmem:[#allocation2 + $0x18] sm:$0xf]  ;;  %v6213_v63 = vld [vmem:[#allocation2 + $0x3c] sm:$0xff]   ;;  %v3577_v47 = vshll.u32 %v3528_v14, 16  ;;  %v7821_v6 = vld [vmem:[#allocation2 + $0x4c] sm:$0xf] }
 0x2f0   : > { %4410 = vmatprep.subr.bf16.mxu1 %v6243_v25  ;;  %v5104_v35 = vcombine.low %v3047_v48, %v3050_v17  ;;  %v7800_v33 = vrot.slane %v3559_v32, 5  ;;  %v7806_v17 = vld [vmem:[#allocation2 + $0x34] sm:$0xf]  ;;  %v3598_v48 = vshrl.u32 %v3531_v26, 16 }
 0x2f1   : > { %5679 = vmatpush3.bf16.msra.mxu0 %v6197_v46  ;;  %v6241_v46 = vld [vmem:[#allocation12 + $0x30] ss:$8 sps:$4 sm:$0xff]  }
 0x2f2   : > { %5680 = vmatprep.subr.bf16.mxu0 %v6198_v51 }
 0x2f3   : > { %4411 = vmatpush1.bf16.msra.mxu1 %v6241_v46  ;;  %v3574_v46 = vshrl.u32 %v3528_v14, 16 }
 0x2f4   : > { %5665 = vmatmul.mubr.bf16.gmra.mrb[12].mxu0 %v5083_v1  ;;  %4412 = vmatprep.subr.bf16.mxu1 %v6246_v60 }
 0x2f5   : > { %5681 = vmatpush3.bf16.msra.mxu0 %v6198_v51  ;;  %5684 = vmatprep.mubr.bf16.mxu0 %v5100_v11  ;;  %v3055_v51 = vrot.slane %v3053_v31, 4  ;;  %v3064_v11 = vsel %vm7533_vm14, %v3062_v44, %v3063_v27  ;;  %v3576_v44 = vrot.slane %v3574_v46, 4  ;;  %v7816_v27 = vld [vmem:[#allocation2 + $0x40] sm:$0xf] }
 0x2f6   : > { %5682 = vmatprep.subr.bf16.mxu0 %v6199_v36 }
 0x2f7   : > { %v3057_v1 = vsel %vm7533_vm14, %v3055_v51, %v3056_v23  ;;  %4413 = vmatpush1.bf16.msra.mxu1 %v6244_v37  ;;  %v3607_v51 = vshll.u32 %v7806_v17, 16  ;;  %v3611_v37 = vshrl.u32 %v7806_v17, 16  ;;  %v3579_v23 = vrot.slane %v3577_v47, 5 }
 0x2f8   : > { %v5105_v5 = vcombine.low %v3054_v34, %v3057_v1  ;;  %v6219_v34 = vld [vmem:[#allocation2 + $0x60] sm:$0xff]  }
 0x2f9   : > { %5683 = vmatpush3.bf16.msra.mxu0 %v6199_v36  ;;  %v5098_v36 = vrot.slane %v2990_v53, 9  ;;  %v6217_v53 = vld [vmem:[#allocation2 + $0x54] sm:$0xff]   ;;  %v3580_v43 = vor.u32 %v3579_v23, %v3576_v44 }
 0x2fa   : > { %5700 = vmatprep.subr.bf16.mxu0 %v6200_v18 }
 0x2fb   : > { %v3061_v13 = vsel %vm7533_vm14, %v5098_v36, %v3060_v9  ;;  %v6218_v9 = vld [vmem:[#allocation11 + $0x1e0] sm:$0xff]   ;;  %v3600_v36 = vrot.slane %v3598_v48, 4 }
 0x2fc   : > { %5685 = vmatmul.mubr.bf16.vlgmr.msra.gmra.mrb[0].mxu0 %v5101_v7  ;;  %v5106_v20 = vcombine.low %v3061_v13, %v3064_v11  ;;  %v3563_v7 = vshrl.u32 %v7794_v21, 16  ;;  %v3534_v11 = vld [vmem:[#allocation2 + $0x3c] sm:$0xf] }
 0x2fd   : > { %5688 = vmatprep.mubr.bf16.mxu0 %v5102_v38  ;;  %5701 = vmatpush3.bf16.msra.mxu0 %v6200_v18  ;;  %v3068_v18 = vsel %vm7533_vm14, %v5099_v54, %v3067_v22  ;;  %v3553_v38 = vshll.u32 %v3525_v61, 16  ;;  %v3635_v54 = vshrl.u32 %v7816_v27, 16  ;;  %v3625_v32 = vshll.u32 %v3534_v11, 16 }
 0x2fe   : > { %5702 = vmatprep.subr.bf16.mxu0 %v6201_v24  ;;  %v5107_v52 = vcombine.low %v3068_v18, %v3071_v2  ;;  %v3565_v25 = vrot.slane %v3563_v7, 4  ;;  %v7826_v18 = vld [vmem:[#allocation2 + $0x38] sm:$0x1] }
 0x2ff   : > { %v3555_v31 = vrot.slane %v3553_v38, 5  ;;  %v3637_v14 = vrot.slane %v3635_v54, 4 }
 0x300   : > { %v3566_v60 = vor.u32 %v3565_v25, %v7800_v33 }
 0x301   : > { %5703 = vmatpush3.bf16.msra.mxu0 %v6201_v24  ;;  %v3550_v24 = vshrl.u32 %v3525_v61, 16 }
 0x302   : > { %5704 = vmatprep.subr.bf16.mxu0 %v6202_v42  ;;  %v3567_v1 = vrot.slane %v3566_v60, 4 }
 0x303   : > { %v3552_v45 = vrot.slane %v3550_v24, 4  ;;  %v3581_v24 = vrot.slane %v3580_v43, 4 }
 0x304   : > { %5689 = vmatmul.mubr.bf16.gmra.mrb[4].mxu0 %v5103_v0  ;;  %v7810_v0 = vrot.slane %v3583_v58, 5 }
 0x305   : > { %5692 = vmatprep.mubr.bf16.mxu0 %v5104_v35  ;;  %5705 = vmatpush3.bf16.msra.mxu0 %v6202_v42  ;;  %v7803_v42 = vld [vmem:[#allocation2 + $0x20] sm:$0x1]  ;;  %v3601_v35 = vshll.u32 %v3531_v26, 16  ;;  %v3556_v15 = vor.u32 %v3555_v31, %v3552_v45  ;;  %v6223_v45 = vld [vmem:[#allocation11 + $0x1f8] sm:$0xff]  }
 0x306   : > { %5706 = vmatprep.subr.bf16.mxu0 %v6203_v55  ;;  %v3569_v49 = vshll.u32 %v7803_v42, 16  ;;  %v3586_v48 = vsel %vm7403_vm11, %v3581_v24, %v7810_v0 }
 0x307   : > { %v3603_v13 = vrot.slane %v3601_v35, 5  ;;  %v3557_v56 = vrot.slane %v3556_v15, 4 }
 0x308   : > { %v3571_v22 = vrot.slane %v3569_v49, 5  ;;  %v3627_v49 = vrot.slane %v3625_v32, 5  ;;  %v3546_v32 = vld [vmem:[#allocation2 + $0x6c] sm:$0xf] }
 0x309   : > { %5707 = vmatpush3.bf16.msra.mxu0 %v6203_v55  ;;  %v3589_v55 = vrot.slane %v3587_v3, 4  ;;  %v3604_v61 = vor.u32 %v3603_v13, %v3600_v36  ;;  %v3562_v7 = vsel %vm7403_vm11, %v3557_v56, %v7800_v33  ;;  %v6221_v3 = vld [vmem:[#allocation2 + $0x6c] sm:$0xff]  }
 0x30a   : > { %5708 = vmatprep.subr.bf16.mxu0 %v6204_v59 }
 0x30c   : > { %5693 = vmatmul.mubr.bf16.gmra.mrb[8].mxu0 %v5105_v5  ;;  %v3590_v5 = vor.u32 %v3589_v55, %v7810_v0  ;;  %v7848_v55 = vld [vmem:[#allocation2 + $0x44] sm:$0x1] }
 0x30d   : > { %5696 = vmatprep.mubr.bf16.mxu0 %v5106_v20  ;;  %5709 = vmatpush3.bf16.msra.mxu0 %v6204_v59  ;;  %v7814_v59 = vld [vmem:[#allocation2 + $0x2c] sm:$0x1]  ;;  %v3613_v20 = vrot.slane %v3611_v37, 4  ;;  %v3641_v13 = vshll.u32 %v7848_v55, 16 }
 0x30e   : > { %5710 = vmatprep.subr.bf16.mxu0 %v6205_v16  ;;  %v3593_v2 = vshll.u32 %v7814_v59, 16 }
 0x311   : > { %5711 = vmatpush3.bf16.msra.mxu0 %v6205_v16  ;;  %v7819_v16 = vrot.slane %v3607_v51, 5  ;;  %v7851_v51 = vld [vmem:[#allocation2 + $0x50] sm:$0x1] }
 0x312   : > { %5712 = vmatprep.subr.bf16.mxu0 %v6206_v10  ;;  %v3665_v43 = vshll.u32 %v7851_v51, 16 }
 0x314   : > { %5697 = vmatmul.mubr.bf16.gmra.mrb[12].mxu0 %v5107_v52  ;;  %v6222_v52 = vld [vmem:[#allocation11 + $0x1f0] sm:$0xff]   ;;  %v3667_v24 = vrot.slane %v3665_v43, 5 }
 0x315   : > { %5713 = vmatpush3.bf16.msra.mxu0 %v6206_v10  ;;  %5716 = vmatprep.mubr.bf16.mxu0 %v6207_v29  ;;  %v3631_v10 = vshll.u32 %v7816_v27, 16  ;;  %v3622_v29 = vshrl.u32 %v3534_v11, 16 }
 0x316   : > { %5714 = vmatprep.subr.bf16.mxu0 %v6208_v4 }
 0x317   : > { %v7836_v38 = vrot.slane %v3631_v10, 5  ;;  %v3624_v31 = vrot.slane %v3622_v29, 4 }
 0x319   : > { %5715 = vmatpush3.bf16.msra.mxu0 %v6208_v4  ;;  %v3572_v4 = vsel %vm7403_vm11, %v3567_v1, %v3571_v22  ;;  %v3638_v35 = vor.u32 %v3637_v14, %v7836_v38  ;;  %v6224_v1 = vld [vmem:[#allocation11 + $0x200] sm:$0xff]   ;;  %v3540_v22 = vld [vmem:[#allocation2 + $0x54] sm:$0xf] }
 0x31a   : > { %5732 = vmatprep.subr.bf16.mxu0 %v6210_v39  ;;  %v5132_v26 = vcombine.low %v3562_v7, %v3572_v4  ;;  %v3673_v4 = vshll.u32 %v3540_v22, 16 }
 0x31b   : > { %v3639_v56 = vrot.slane %v3638_v35, 4  ;;  %v3721_v35 = vshll.u32 %v3546_v32, 16 }
 0x31c   : > { %5717 = vmatmul.mubr.bf16.vlgmr.msra.gmra.mrb[0].mxu0 %v6209_v19  ;;  %v3655_v19 = vshll.u32 %v7821_v6, 16 }
 0x31d   : > { %5720 = vmatprep.mubr.bf16.mxu0 %v6211_v57  ;;  %5733 = vmatpush3.bf16.msra.mxu0 %v6210_v39  ;;  %v3537_v39 = vld [vmem:[#allocation2 + $0x48] sm:$0xf]  ;;  %v3591_v57 = vrot.slane %v3590_v5, 4  ;;  %v3628_v5 = vor.u32 %v3627_v49, %v3624_v31 }
 0x31e   : > { %5734 = vmatprep.subr.bf16.mxu0 %v6212_v12  ;;  %v3646_v25 = vshrl.u32 %v3537_v39, 16  ;;  %v3649_v58 = vshll.u32 %v3537_v39, 16  ;;  %v7841_v46 = vrot.slane %v3655_v19, 5  ;;  %v7878_v49 = vld [vmem:[#allocation2 + $0x68] sm:$0x1] }
 0x31f   : > { %v3629_v7 = vrot.slane %v3628_v5, 4 }
 0x320   : > { %v3648_v15 = vrot.slane %v3646_v25, 4  ;;  %v3651_v44 = vrot.slane %v3649_v58, 5 }
 0x321   : > { %5735 = vmatpush3.bf16.msra.mxu0 %v6212_v12  ;;  %v3659_v12 = vshrl.u32 %v7821_v6, 16 }
 0x322   : > { %5736 = vmatprep.subr.bf16.mxu0 %v6214_v50 }
 0x323   : > { %v3661_v33 = vrot.slane %v3659_v12, 4 }
 0x324   : > { %5721 = vmatmul.mubr.bf16.gmra.mrb[4].mxu0 %v6213_v63  ;;  %v3595_v63 = vrot.slane %v3593_v2, 5  ;;  %v3652_v2 = vor.u32 %v3651_v44, %v3648_v15  ;;  %v3634_v44 = vsel %vm7403_vm11, %v3629_v7, %v7836_v38 }
 0x325   : > { %5724 = vmatprep.mubr.bf16.mxu0 %v6215_v28  ;;  %5737 = vmatpush3.bf16.msra.mxu0 %v6214_v50  ;;  %v3614_v50 = vor.u32 %v3613_v20, %v7819_v16  ;;  %v7839_v28 = vld [vmem:[#allocation2 + $0x58] sm:$0xf]  ;;  %v3662_v0 = vor.u32 %v3661_v33, %v7841_v46  ;;  %v3543_v20 = vld [vmem:[#allocation2 + $0x60] sm:$0xf]  ;;  %v7875_v33 = vld [vmem:[#allocation2 + $0x5c] sm:$0x1] }
 0x326   : > { %5738 = vmatprep.subr.bf16.mxu0 %v6216_v41  ;;  %v3596_v47 = vsel %vm7403_vm11, %v3591_v57, %v3595_v63  ;;  %v3679_v23 = vshll.u32 %v7839_v28, 16  ;;  %v3683_v36 = vshrl.u32 %v7839_v28, 16  ;;  %v3694_v12 = vshrl.u32 %v3543_v20, 16 }
 0x327   : > { %v3615_v60 = vrot.slane %v3614_v50, 4  ;;  %v3663_v39 = vrot.slane %v3662_v0, 4  ;;  %v3697_v57 = vshll.u32 %v3543_v20, 16  ;;  %v3643_v50 = vrot.slane %v3641_v13, 5 }
 0x328   : > { %v7867_v29 = vrot.slane %v3679_v23, 5  ;;  %v3685_v19 = vrot.slane %v3683_v36, 4  ;;  %v3653_v58 = vrot.slane %v3652_v2, 4  ;;  %v3713_v13 = vshll.u32 %v7878_v49, 16 }
 0x329   : > { %5739 = vmatpush3.bf16.msra.mxu0 %v6216_v41  ;;  %v3617_v41 = vshll.u32 %v7826_v18, 16  ;;  %v3644_v25 = vsel %vm7403_vm11, %v3639_v56, %v3643_v50  ;;  %v3668_v31 = vsel %vm7403_vm11, %v3663_v39, %v3667_v24  ;;  %v3723_v56 = vrot.slane %v3721_v35, 5 }
 0x32a   : > { %5740 = vmatprep.subr.bf16.mxu0 %v6218_v9  ;;  %v3985_v50 = vrot.slane %v7794_v21, 5  ;;  %v3951_v21 = vld [vmem:[#allocation2 + $0x18] sm:$0xe]  ;;  %v3999_v35 = vrot.slane %v7806_v17, 5  ;;  %v4002_v17 = vrot.slane %v7826_v18, 5 }
 0x32b   : > { %v3619_v37 = vrot.slane %v3617_v41, 5  ;;  %v7869_v41 = vld [vmem:[#allocation2 + $0x70] sm:$0xf] }
 0x32c   : > { %5725 = vmatmul.mubr.bf16.gmra.mrb[8].mxu0 %v6217_v53  ;;  %v7854_v53 = vld [vmem:[#allocation2 + $0x64] sm:$0xf]  ;;  %v3731_v15 = vshrl.u32 %v7869_v41, 16 }
 0x32d   : > { %5728 = vmatprep.mubr.bf16.mxu0 %v6219_v34  ;;  %5741 = vmatpush3.bf16.msra.mxu0 %v6218_v9  ;;  %v3605_v9 = vrot.slane %v3604_v61, 4  ;;  %v3620_v34 = vsel %vm7403_vm11, %v3615_v60, %v3619_v37  ;;  %v3703_v10 = vshll.u32 %v7854_v53, 16  ;;  %v3707_v54 = vshrl.u32 %v7854_v53, 16 }
 0x32e   : > { %5742 = vmatprep.subr.bf16.mxu0 %v6220_v62  ;;  %v3699_v60 = vrot.slane %v3697_v57, 5  ;;  %v3727_v37 = vshll.u32 %v7869_v41, 16  ;;  %v3733_v43 = vrot.slane %v3731_v15, 4  ;;  %v6231_v15 = vld [vmem:[#allocation11 + $0x238] sm:$0xff]  }
 0x32f   : > { %v3610_v11 = vsel %vm7403_vm11, %v3605_v9, %v7819_v16  ;;  %v6225_v16 = vld [vmem:[#allocation11 + $0x208] sm:$0xff]   ;;  %v3705_v14 = vrot.slane %v3703_v10, 5  ;;  %v3709_v63 = vrot.slane %v3707_v54, 4  ;;  %v3696_v9 = vrot.slane %v3694_v12, 4  ;;  %v7890_v54 = vld [vmem:[#allocation2 + $0x74] sm:$0x1] }
 0x330   : > { %v5134_v61 = vcombine.low %v3610_v11, %v3620_v34  ;;  %v6227_v11 = vld [vmem:[#allocation11 + $0x218] sm:$0xff]   ;;  %v3729_v38 = vrot.slane %v3727_v37, 5  ;;  %v3737_v57 = vshll.u32 %v7890_v54, 16 }
 0x331   : > { %5743 = vmatpush3.bf16.msra.mxu0 %v6220_v62  ;;  %v5133_v62 = vcombine.low %v3586_v48, %v3596_v47  ;;  %v3686_v47 = vor.u32 %v3685_v19, %v7867_v29  ;;  %v3718_v48 = vshrl.u32 %v3546_v32, 16  ;;  %v3710_v23 = vor.u32 %v3709_v63, %v3705_v14  ;;  %v6229_v63 = vld [vmem:[#allocation11 + $0x228] sm:$0xff]  }
 0x332   : > { %5744 = vmatprep.subr.bf16.mxu0 %v6222_v52  ;;  %v3700_v5 = vor.u32 %v3699_v60, %v3696_v9  ;;  %v3734_v12 = vor.u32 %v3733_v43, %v3729_v38  ;;  %v3992_v9 = vrot.slane %v7798_v40, 5  ;;  %v5148_v60 = vrot.slane %v3951_v21, 9 }
 0x333   : > { %v3687_v34 = vrot.slane %v3686_v47, 4  ;;  %v3720_v20 = vrot.slane %v3718_v48, 4  ;;  %v3711_v10 = vrot.slane %v3710_v23, 4  ;;  %v3988_v47 = vrot.slane %v7803_v42, 5 }
 0x334   : > { %5729 = vmatmul.mubr.bf16.gmra.mrb[12].mxu0 %v6221_v3  ;;  %v3986_v42 = vsel %vm7533_vm14, %v5148_v60, %v3985_v50  ;;  %v3994_v23 = vrot.slane %v3992_v9, 4  ;;  %v3995_v40 = vrot.slane %v7814_v59, 5  ;;  %v4013_v59 = vrot.slane %v7821_v6, 5 }
 0x335   : > { %5745 = vmatpush3.bf16.msra.mxu0 %v6222_v52  ;;  %5748 = vmatprep.mubr.bf16.mxu0 %v5132_v26  ;;  %v3670_v52 = vshrl.u32 %v3540_v22, 16  ;;  %v3675_v26 = vrot.slane %v3673_v4, 5  ;;  %v3689_v22 = vshll.u32 %v7875_v33, 16  ;;  %v3701_v4 = vrot.slane %v3700_v5, 4 }
 0x336   : > { %5746 = vmatprep.subr.bf16.mxu0 %v6223_v45  ;;  %v3724_v19 = vor.u32 %v3723_v56, %v3720_v20  ;;  %v4009_v6 = vrot.slane %v7848_v55, 5 }
 0x337   : > { %v3672_v3 = vrot.slane %v3670_v52, 4  ;;  %v3691_v2 = vrot.slane %v3689_v22, 5  ;;  %v6228_v52 = vld [vmem:[#allocation11 + $0x220] sm:$0xff]   ;;  %v3706_v24 = vsel %vm7403_vm11, %v3701_v4, %v3705_v14  ;;  %v5149_v22 = vrot.slane %v3952_v30, 9 }
 0x338   : > { %v4016_v4 = vrot.slane %v7851_v51, 5 }
 0x339   : > { %5747 = vmatpush3.bf16.msra.mxu0 %v6223_v45  ;;  %v6226_v45 = vld [vmem:[#allocation11 + $0x210] sm:$0xff]   ;;  %v3676_v0 = vor.u32 %v3675_v26, %v3672_v3  ;;  %v3692_v39 = vsel %vm7403_vm11, %v3687_v34, %v3691_v2  ;;  %v3735_v3 = vrot.slane %v3734_v12, 4  ;;  %v3739_v26 = vrot.slane %v3737_v57, 5 }
 0x33a   : > { %5764 = vmatprep.subr.bf16.mxu0 %v6224_v1  ;;  %v3993_v18 = vsel %vm7533_vm14, %v5149_v22, %v3992_v9  ;;  %v4015_v2 = vrot.slane %v4013_v59, 4  ;;  %v4020_v12 = vrot.slane %v7839_v28, 5 }
 0x33b   : > { %v3740_v14 = vsel %vm7403_vm11, %v3735_v3, %v3739_v26  ;;  %v4023_v26 = vrot.slane %v7875_v33, 5 }
 0x33c   : > { %5749 = vmatmul.mubr.bf16.vlgmr.msra.gmra.mrb[0].mxu0 %v5133_v62  ;;  %v5135_v62 = vcombine.low %v3634_v44, %v3644_v25 }
 0x33d   : > { %5752 = vmatprep.mubr.bf16.mxu0 %v5134_v61  ;;  %5765 = vmatpush3.bf16.msra.mxu0 %v6224_v1  ;;  %v3658_v1 = vsel %vm7403_vm11, %v3653_v58, %v7841_v46  ;;  %v3677_v46 = vrot.slane %v3676_v0, 4  ;;  %v3725_v58 = vrot.slane %v3724_v19, 4 }
 0x33e   : > { %5766 = vmatprep.subr.bf16.mxu0 %v6225_v16  ;;  %v5136_v36 = vcombine.low %v3658_v1, %v3668_v31  ;;  %v6230_v31 = vld [vmem:[#allocation11 + $0x230] sm:$0xff]   ;;  %v3953_v1 = vld [vmem:[#allocation2 + $0x30] sm:$0xe] }
 0x33f   : > { %v3682_v32 = vsel %vm7403_vm11, %v3677_v46, %v7867_v29  ;;  %v3730_v29 = vsel %vm7403_vm11, %v3725_v58, %v3729_v38  ;;  %v5150_v5 = vrot.slane %v3953_v1, 9  ;;  %v3954_v46 = vld [vmem:[#allocation2 + $0x3c] sm:$0xe]  ;;  %v3956_v58 = vld [vmem:[#allocation2 + $0x54] sm:$0xe] }
 0x340   : > { %v5137_v7 = vcombine.low %v3682_v32, %v3692_v39  ;;  %v5139_v37 = vcombine.low %v3730_v29, %v3740_v14  ;;  %v5151_v39 = vrot.slane %v3954_v46, 9  ;;  %v4027_v32 = vrot.slane %v7854_v53, 5  ;;  %v3957_v53 = vld [vmem:[#allocation2 + $0x60] sm:$0xe] }
 0x341   : > { %5767 = vmatpush3.bf16.msra.mxu0 %v6225_v16  ;;  %v3715_v16 = vrot.slane %v3713_v13, 5  ;;  %v4034_v29 = vrot.slane %v7869_v41, 5  ;;  %v5154_v9 = vrot.slane %v3957_v53, 9 }
 0x342   : > { %5768 = vmatprep.subr.bf16.mxu0 %v6226_v45  ;;  %v4029_v3 = vrot.slane %v4027_v32, 4 }
 0x343   : > { %v3716_v61 = vsel %vm7403_vm11, %v3711_v10, %v3715_v16 }
 0x344   : > { %5753 = vmatmul.mubr.bf16.gmra.mrb[4].mxu0 %v5135_v62  ;;  %v5138_v25 = vcombine.low %v3706_v24, %v3716_v61  ;;  %v4001_v62 = vrot.slane %v3999_v35, 4 }
 0x345   : > { %5756 = vmatprep.mubr.bf16.mxu0 %v5136_v36  ;;  %5769 = vmatpush3.bf16.msra.mxu0 %v6226_v45  ;;  %v3987_v45 = vrot.slane %v3985_v50, 4  ;;  %v3996_v36 = vsel %vm7533_vm14, %v3994_v23, %v3995_v40  ;;  %v4017_v50 = vsel %vm7533_vm14, %v4015_v2, %v4016_v4  ;;  %v4037_v23 = vrot.slane %v7890_v54, 5  ;;  %v6249_v54 = vld [vmem:[#allocation12 + $0x54] ss:$8 sps:$4 sm:$0xff]  }
 0x346   : > { %5770 = vmatprep.subr.bf16.mxu0 %v6227_v11  ;;  %v4003_v13 = vsel %vm7533_vm14, %v4001_v62, %v4002_v17  ;;  %v5157_v38 = vcombine.low %v3993_v18, %v3996_v36  ;;  %4414 = vmatprep.subr.bf16.mxu1 %v6249_v54  ;;  %v6255_v18 = vld [vmem:[#allocation12 + $0x74] ss:$8 sps:$4 sm:$0xff]  }
 0x347   : > { %v3989_v48 = vsel %vm7533_vm14, %v3987_v45, %v3988_v47  ;;  %v4030_v45 = vrot.slane %v7878_v49, 5 }
 0x348   : > { %v5156_v44 = vcombine.low %v3986_v42, %v3989_v48  ;;  %v3958_v48 = vld [vmem:[#allocation2 + $0x6c] sm:$0xe]  ;;  %v4028_v42 = vsel %vm7533_vm14, %v5154_v9, %v4027_v32 }
 0x349   : > { %5771 = vmatpush3.bf16.msra.mxu0 %v6227_v11  ;;  %v4006_v11 = vrot.slane %v7816_v27, 5  ;;  %v4000_v27 = vsel %vm7533_vm14, %v5150_v5, %v3999_v35  ;;  %v4031_v60 = vsel %vm7533_vm14, %v4029_v3, %v4030_v45  ;;  %v5155_v41 = vrot.slane %v3958_v48, 9  ;;  %v6250_v5 = vld [vmem:[#allocation12 + $0x60] ss:$8 sps:$4 sm:$0xff]  }
 0x34a   : > { %5772 = vmatprep.subr.bf16.mxu0 %v6228_v52  ;;  %v5158_v43 = vcombine.low %v4000_v27, %v4003_v13  ;;  %v6252_v13 = vld [vmem:[#allocation12 + $0x64] ss:$8 sps:$4 sm:$0xff]   ;;  %v7990_v27 = vld [vmem:[%s8325_s21] ss:$0 sm:$0xff]  ;;  %s6451_s21 = sshll.u32 %s6622_s19, 4  ;;  %s6452_s21 = int_to_ptr.vmem [resolvable:$false] %s6451_s21 }
 0x34b   : > { %v4008_v10 = vrot.slane %v4006_v11, 4  ;;  %v4007_v51 = vsel %vm7533_vm14, %v5151_v39, %v4006_v11  ;;  %v4035_v62 = vsel %vm7533_vm14, %v5155_v41, %v4034_v29  ;;  %v6247_v11 = vld [vmem:[#allocation12 + $0x50] ss:$8 sps:$4 sm:$0xff]   ;;  %s6453_s13 = scalar_lea.vmem %s6452_s21, 4096  ;;  %p6454_p9 = scmp.lt.s32.totalorder %s8107_s27, %s6452_s21 }
 0x34c   : > { %5757 = vmatmul.mubr.bf16.gmra.mrb[8].mxu0 %v5137_v7  ;;  %4415 = vmatpush1.bf16.msra.mxu1 %v6247_v11  ;;  %p6455_p7 = scmp.lt.s32.totalorder %s6453_s13, %s6447_s7 }
 0x34d   : > { %5760 = vmatprep.mubr.bf16.mxu0 %v5138_v25  ;;  %5773 = vmatpush3.bf16.msra.mxu0 %v6228_v52  ;;  %v3955_v52 = vld [vmem:[#allocation2 + $0x48] sm:$0xe]  ;;  %v4010_v19 = vsel %vm7533_vm14, %v4008_v10, %v4009_v6  ;;  %v4022_v25 = vrot.slane %v4020_v12, 4 }
 0x34e   : > { %5774 = vmatprep.subr.bf16.mxu0 %v6229_v63  ;;  %v5152_v61 = vrot.slane %v3955_v52, 9  ;;  %v5159_v24 = vcombine.low %v4007_v51, %v4010_v19  ;;  %4416 = vmatprep.subr.bf16.mxu1 %v6252_v13  ;;  %p6456_p6 = por %p6455_p7, %p6454_p9 }
 0x34f   : > { %v4024_v47 = vsel %vm7533_vm14, %v4022_v25, %v4023_v26 }
 0x350   : > { %4417 = vmatpush1.bf16.msra.mxu1 %v6250_v5  ;;  %p6457_p13 = pnand %p6456_p6, %p6450_p2 }
 0x351   : > { %5775 = vmatpush3.bf16.msra.mxu0 %v6229_v63  ;;  %v4014_v63 = vsel %vm7533_vm14, %v5152_v61, %v4013_v59  ;;  %v6253_v59 = vld [vmem:[#allocation12 + $0x70] ss:$8 sps:$4 sm:$0xff]   ;;  %4418 = vmatprep.subr.bf16.mxu1 %v6255_v18 }
 0x352   : > { %5776 = vmatprep.subr.bf16.mxu0 %v6230_v31  ;;  %v5160_v28 = vcombine.low %v4014_v63, %v4017_v50 }
 0x354   : > { %5761 = vmatmul.mubr.bf16.gmra.mrb[12].mxu0 %v5139_v37  ;;  %4419 = vmatpush1.bf16.msra.mxu1 %v6253_v59 }
 0x355   : > { %5777 = vmatpush3.bf16.msra.mxu0 %v6230_v31  ;;  %5780 = vmatprep.mubr.bf16.mxu0 %v5156_v44  ;;  %v5153_v31 = vrot.slane %v3956_v58, 9  ;;  %v4036_v44 = vrot.slane %v4034_v29, 4 }
 0x356   : > { %5778 = vmatprep.subr.bf16.mxu0 %v6231_v15 }
 0x357   : > { %v7916_v0 = vpop.f32.mrb[40].mxu1  ;;  %v4021_v33 = vsel %vm7533_vm14, %v5153_v31, %v4020_v12  ;;  %v4038_v40 = vsel %vm7533_vm14, %v4036_v44, %v4037_v23 }
 0x358   : > { %v7921_v34 = vpop.f32.mrb[41].mxu1  ;;  %v5161_v37 = vcombine.low %v4021_v33, %v4024_v47  ;;  %v5163_v36 = vcombine.low %v4035_v62, %v4038_v40 }
 0x359   : > { %5779 = vmatpush3.bf16.msra.mxu0 %v6231_v15  ;;  %v7926_v20 = vpop.f32.mrb[42].mxu1  ;;  %v5162_v15 = vcombine.low %v4028_v42, %v4031_v60 }
 0x35a   : > { %v7930_v56 = vpop.f32.mrb[43].mxu1 }
 0x35c   : > { %5781 = vmatmul.mubr.bf16.vlgmr.msra.gmra.mrb[0].mxu0 %v5157_v38 }
 0x35d   : > { %5784 = vmatprep.mubr.bf16.mxu0 %v5158_v43 }
 0x35f   : > { %v7936_v16 = vpop.f32.mrb[44].mxu1 }
 0x360   : > { %v7941_v57 = vpop.f32.mrb[45].mxu1 }
 0x361   : > { %v7946_v55 = vpop.f32.mrb[46].mxu1 }
 0x362   : > { %v7950_v7 = vpop.f32.mrb[47].mxu1 }
 0x364   : > { %5785 = vmatmul.mubr.bf16.gmra.mrb[4].mxu0 %v5159_v24 }
 0x365   : > { %5788 = vmatprep.mubr.bf16.mxu0 %v5160_v28 }
 0x367   : > { %v7956_v21 = vpop.f32.mrb[48].mxu1 }
 0x368   : > { %v7961_v14 = vpop.f32.mrb[49].mxu1 }
 0x369   : > { %v7965_v35 = vpop.f32.mrb[50].mxu1 }
 0x36a   : > { %v7969_v49 = vpop.f32.mrb[51].mxu1 }
 0x36c   : > { %5789 = vmatmul.mubr.bf16.gmra.mrb[8].mxu0 %v5161_v37 }
 0x36d   : > { %5792 = vmatprep.mubr.bf16.mxu0 %v5162_v15 }
 0x36f   : > { %v7974_v30 = vpop.f32.mrb[52].mxu1 }
 0x370   : > { %v7980_v1 = vpop.f32.mrb[53].mxu1 }
 0x371   : > { %v7982_v17 = vpop.f32.mrb[54].mxu1 }
 0x372   : > { %v7984_v22 = vpop.f32.mrb[55].mxu1 }
 0x374   : > { %5793 = vmatmul.mubr.bf16.gmra.mrb[12].mxu0 %v5163_v36 }
 0x42f   : > { %v5782_v38 = vpop.f32.mrb[0].mxu0 }
 0x430   : > { %v5796_v43 = vadd.f32 %v5782_v38, %v7916_v0  ;;  %v4170_v10 = vpop.f32.mrb[1].mxu0 }
 0x431   : > { %v5797_v46 = vadd.f32 %v4170_v10, %v7921_v34  ;;  %v5783_v2 = vpop.f32.mrb[2].mxu0 }
 0x432   : > { %v4258_v6 = vadd.f32 %v5796_v43, %v7990_v27  ;;  %v5798_v52 = vadd.f32 %v5783_v2, %v7926_v20  ;;  %v4173_v4 = vpop.f32.mrb[3].mxu0 }
 0x433   : > { %v4256_v39 = vadd.f32 %v5797_v46, %v7990_v27  ;;  %v5799_v19 = vadd.f32 %v4173_v4, %v7930_v56 }
 0x434   : > { %v4259_v12 = vadd.f32 %v5798_v52, %v7990_v27  ;;  %v4274_v50 = vmax.f32 %v4258_v6, 0.0 }
 0x435   : > { %v4257_v61 = vadd.f32 %v5799_v19, %v7990_v27  ;;  %v4272_v0 = vmax.f32 %v4256_v39, 0.0 }
 0x436   : > { %v4275_v32 = vmax.f32 %v4259_v12, 0.0 }
 0x437   : > { %v4273_v51 = vmax.f32 %v4257_v61, 0.0  ;;  %v5786_v24 = vpop.f32.mrb[4].mxu0 }
 0x438   : > { %v5800_v34 = vadd.f32 %v5786_v24, %v7936_v16  ;;  %v4186_v63 = vpop.f32.mrb[5].mxu0  ;;  %v4289_v28 = vpack.c.bf16 %v4275_v32, %v4274_v50  ;;  %v4312_v50 = vld [vmem:[%s8326_s11] sm:$0x3]  ;;  %v6257_v24 = vld [vmem:[%s7092_s5] sm:$0xff] }
 0x439   : > { %v4288_v25 = vpack.c.bf16 %v4273_v51, %v4272_v0  ;;  %v5801_v20 = vadd.f32 %v4186_v63, %v7941_v57  ;;  %v5787_v58 = vpop.f32.mrb[6].mxu0 }
 0x43a   : > { %v4262_v3 = vadd.f32 %v5800_v34, %v7990_v27  ;;  %v5802_v56 = vadd.f32 %v5787_v58, %v7946_v55  ;;  %v4189_v26 = vpop.f32.mrb[7].mxu0  ;;  %v4517_v34 = vunpack.c.l.bf16 %v6257_v24 }
 0x43b   : > { %v4260_v53 = vadd.f32 %v5801_v20, %v7990_v27  ;;  %v5803_v45 = vadd.f32 %v4189_v26, %v7950_v7  ;;  %4437 = vmatmul.mubr.bf16.vlgmr.msra.gmra.mrb[56].mxu1 %v4288_v25  ;;  %v6258_v20 = vld [vmem:[%s7092_s5 + $0x8] sm:$0xff] }
 0x43c   : > { %v4263_v31 = vadd.f32 %v5802_v56, %v7990_v27  ;;  %4446 = vmatprep.mubr.bf16.mxu1 %v6621_v8  ;;  %v4278_v47 = vmax.f32 %v4262_v3, 0.0  ;;  %v4519_v58 = vunpack.c.l.bf16 %v6258_v20  ;;  %v4520_v26 = vunpack.c.h.bf16 %v6258_v20 }
 0x43d   : > { %v4261_v16 = vadd.f32 %v5803_v45, %v7990_v27  ;;  %v4276_v57 = vmax.f32 %v4260_v53, 0.0 }
 0x43e   : > { %v4279_v29 = vmax.f32 %v4263_v31, 0.0 }
 0x43f   : > { %v4277_v9 = vmax.f32 %v4261_v16, 0.0  ;;  %v5790_v60 = vpop.f32.mrb[8].mxu0 }
 0x440   : > { %v5804_v48 = vadd.f32 %v5790_v60, %v7956_v21  ;;  %v4202_v55 = vpop.f32.mrb[9].mxu0  ;;  %v4291_v33 = vpack.c.bf16 %v4279_v29, %v4278_v47 }
 0x441   : > { %v5805_v37 = vadd.f32 %v4202_v55, %v7961_v14  ;;  %v5791_v42 = vpop.f32.mrb[10].mxu0  ;;  %v4290_v7 = vpack.c.bf16 %v4277_v9, %v4276_v57  ;;  %v6259_v55 = vld [vmem:[%s7092_s5 + $0x10] sm:$0xff] }
 0x442   : > { %v4266_v15 = vadd.f32 %v5804_v48, %v7990_v27  ;;  %v5806_v41 = vadd.f32 %v5791_v42, %v7965_v35  ;;  %v4205_v44 = vpop.f32.mrb[11].mxu0 }
 0x443   : > { %v4264_v23 = vadd.f32 %v5805_v37, %v7990_v27  ;;  %v5807_v62 = vadd.f32 %v4205_v44, %v7969_v49  ;;  %4447 = vmatmul.mubr.bf16.gmra.mrb[60].mxu1 %v4289_v28  ;;  %v4518_v28 = vunpack.c.h.bf16 %v6257_v24 }
 0x444   : > { %v4267_v40 = vadd.f32 %v5806_v41, %v7990_v27  ;;  %4456 = vmatprep.mubr.bf16.mxu1 %v6621_v8  ;;  %v4282_v36 = vmax.f32 %v4266_v15, 0.0  ;;  %v4522_v15 = vunpack.c.h.bf16 %v6259_v55 }
 0x445   : > { %v4265_v21 = vadd.f32 %v5807_v62, %v7990_v27  ;;  %v4280_v11 = vmax.f32 %v4264_v23, 0.0  ;;  %v6260_v23 = vld [vmem:[%s7092_s5 + $0x18] sm:$0xff] }
 0x446   : > { %v4283_v14 = vmax.f32 %v4267_v40, 0.0  ;;  %v4523_v62 = vunpack.c.l.bf16 %v6260_v23 }
 0x447   : > { %v4281_v54 = vmax.f32 %v4265_v21, 0.0  ;;  %v5794_v5 = vpop.f32.mrb[12].mxu0 }
 0x448   : > { %v5808_v13 = vadd.f32 %v5794_v5, %v7974_v30  ;;  %v4218_v35 = vpop.f32.mrb[13].mxu0  ;;  %v4293_v59 = vpack.c.bf16 %v4283_v14, %v4282_v36  ;;  %v4524_v14 = vunpack.c.h.bf16 %v6260_v23 }
 0x449   : > { %v5809_v18 = vadd.f32 %v4218_v35, %v7980_v1  ;;  %v5795_v38 = vpop.f32.mrb[14].mxu0  ;;  %v4292_v49 = vpack.c.bf16 %v4281_v54, %v4280_v11 }
 0x44a   : > { %v4270_v43 = vadd.f32 %v5808_v13, %v7990_v27  ;;  %v5810_v10 = vadd.f32 %v5795_v38, %v7982_v17  ;;  %v4221_v46 = vpop.f32.mrb[15].mxu0  ;;  %v4314_v17 = vlaneseq }
 0x44b   : > { %v4268_v2 = vadd.f32 %v5809_v18, %v7990_v27  ;;  %v5811_v6 = vadd.f32 %v4221_v46, %v7984_v22  ;;  %4457 = vmatmul.mubr.bf16.gmra.mrb[64].mxu1 %v4290_v7 }
 0x44c   : > { %v4271_v52 = vadd.f32 %v5810_v10, %v7990_v27  ;;  %4466 = vmatprep.mubr.bf16.mxu1 %v6621_v8  ;;  %v4286_v4 = vmax.f32 %v4270_v43, 0.0  ;;  %v4315_v22 = vshrl.u32 %v4314_v17, 7  ;;  %v6261_v10 = vld [vmem:[%s7092_s5 + $0x20] sm:$0xff] }
 0x44d   : > { %v4269_v30 = vadd.f32 %v5811_v6, %v7990_v27  ;;  %v4284_v39 = vmax.f32 %v4268_v2, 0.0  ;;  %v4525_v46 = vunpack.c.l.bf16 %v6261_v10 }
 0x44e   : > { %v4287_v1 = vmax.f32 %v4271_v52, 0.0  ;;  %v4316_v27 = vsub.s32 0, %v4315_v22  ;;  %v4320_v32 = vsub.s32 1, %v4315_v22 }
 0x44f   : > { %v4285_v19 = vmax.f32 %v4269_v30, 0.0  ;;  %v4526_v30 = vunpack.c.h.bf16 %v6261_v10 }
 0x450   : > { %v4295_v12 = vpack.c.bf16 %v4287_v1, %v4286_v4  ;;  %v8034_v0 = vrot.slane %v4312_v50, %v4316_v27  ;;  %v8036_v51 = vrot.slane %v4312_v50, %v4320_v32 }
 0x451   : > { %v4294_v61 = vpack.c.bf16 %v4285_v19, %v4284_v39  ;;  %v6262_v39 = vld [vmem:[%s7092_s5 + $0x28] sm:$0xff] }
 0x452   : > { %v4527_v19 = vunpack.c.l.bf16 %v6262_v39  ;;  %v4528_v22 = vunpack.c.h.bf16 %v6262_v39 }
 0x453   : > { %4467 = vmatmul.mubr.bf16.gmra.mrb[68].mxu1 %v4291_v33  ;;  %v4521_v33 = vunpack.c.l.bf16 %v6259_v55 }
 0x454   : > { %4476 = vmatprep.mubr.bf16.mxu1 %v6621_v8 }
 0x45b   : > { %4477 = vmatmul.mubr.bf16.gmra.mrb[72].mxu1 %v4292_v49 }
 0x45c   : > { %4486 = vmatprep.mubr.bf16.mxu1 %v6621_v8 }
 0x463   : > { %4487 = vmatmul.mubr.bf16.gmra.mrb[76].mxu1 %v4293_v59 }
 0x464   : > { %4496 = vmatprep.mubr.bf16.mxu1 %v6621_v8 }
 0x46b   : > { %4497 = vmatmul.mubr.bf16.gmra.mrb[80].mxu1 %v4294_v61 }
 0x46c   : > { %4506 = vmatprep.mubr.bf16.mxu1 %v6621_v8 }
 0x473   : > { %4507 = vmatmul.mubr.bf16.gmra.mrb[84].mxu1 %v4295_v12 }
 0x50e   : > { %v4438_v63 = vpop.f32.mrb[56].mxu1 }
 0x50f   : > { %v4439_v25 = vadd.f32 %v4438_v63, %v8034_v0  ;;  %v4440_v8 = vpop.f32.mrb[57].mxu1 }
 0x510   : > { %v4441_v3 = vadd.f32 %v4440_v8, %v8036_v51  ;;  %v4442_v56 = vpop.f32.mrb[58].mxu1 }
 0x511   : > { %v4549_v53 = vadd.f32 %v4517_v34, %v4439_v25  ;;  %v4443_v45 = vadd.f32 %v4442_v56, %v8034_v0  ;;  %v4444_v31 = vpop.f32.mrb[59].mxu1 }
 0x512   : > { %v4550_v16 = vadd.f32 %v4518_v28, %v4441_v3  ;;  %v4445_v47 = vadd.f32 %v4444_v31, %v8036_v51 }
 0x513   : > { %v4581_v29 = vmax.f32 %v4549_v53, 0.0  ;;  %v4551_v57 = vadd.f32 %v4519_v58, %v4443_v45  ;;  %v6263_v58 = vld [vmem:[%s7092_s5 + $0x30] sm:$0xff] }
 0x514   : > { %v4582_v9 = vmax.f32 %v4550_v16, 0.0  ;;  %v4552_v60 = vadd.f32 %v4520_v26, %v4445_v47  ;;  %v4529_v3 = vunpack.c.l.bf16 %v6263_v58  ;;  %v4530_v45 = vunpack.c.h.bf16 %v6263_v58  ;;  %v6264_v47 = vld [vmem:[%s7092_s5 + $0x38] sm:$0xff] }
 0x515   : > { %v4583_v48 = vmax.f32 %v4551_v57, 0.0 }
 0x516   : > { %v5239_v37 = vpack.c.bf16 %v4582_v9, %v4581_v29  ;;  %v4584_v42 = vmax.f32 %v4552_v60, 0.0  ;;  %v4448_v7 = vpop.f32.mrb[60].mxu1  ;;  %v4531_v29 = vunpack.c.l.bf16 %v6264_v47 }
 0x517   : > { %v4449_v41 = vadd.f32 %v4448_v7, %v8034_v0  ;;  %v4450_v44 = vpop.f32.mrb[61].mxu1 }
 0x518   : > { %4709 = vst [vmem:[%s8049_s9] sm:$0xff] %v5239_v37  ;;  %v5240_v40 = vpack.c.bf16 %v4584_v42, %v4583_v48  ;;  %v4451_v21 = vadd.f32 %v4450_v44, %v8036_v51  ;;  %v4452_v36 = vpop.f32.mrb[62].mxu1  ;;  %v4532_v48 = vunpack.c.h.bf16 %v6264_v47 }
 0x519   : > { %v4553_v11 = vadd.f32 %v4521_v33, %v4449_v41  ;;  %v4453_v54 = vadd.f32 %v4452_v36, %v8034_v0  ;;  %v4454_v5 = vpop.f32.mrb[63].mxu1 }
 0x51a   : > { %4710 = vst [vmem:[%s8049_s9 + $0x8] sm:$0xff] %v5240_v40  ;;  %v4554_v13 = vadd.f32 %v4522_v15, %v4451_v21  ;;  %v4455_v35 = vadd.f32 %v4454_v5, %v8036_v51  ;;  %v6265_v40 = vld [vmem:[%s7092_s5 + $0x40] sm:$0xff] }
 0x51b   : > { %v4585_v59 = vmax.f32 %v4553_v11, 0.0  ;;  %v4555_v18 = vadd.f32 %v4523_v62, %v4453_v54  ;;  %v4533_v21 = vunpack.c.l.bf16 %v6265_v40  ;;  %v4534_v54 = vunpack.c.h.bf16 %v6265_v40 }
 0x51c   : > { %v4586_v38 = vmax.f32 %v4554_v13, 0.0  ;;  %v4556_v49 = vadd.f32 %v4524_v14, %v4455_v35  ;;  %v6266_v35 = vld [vmem:[%s7092_s5 + $0x48] sm:$0xff] }
 0x51d   : > { %v4587_v43 = vmax.f32 %v4555_v18, 0.0 }
 0x51e   : > { %v5241_v2 = vpack.c.bf16 %v4586_v38, %v4585_v59  ;;  %v4588_v6 = vmax.f32 %v4556_v49, 0.0  ;;  %v4458_v52 = vpop.f32.mrb[64].mxu1  ;;  %v4535_v59 = vunpack.c.l.bf16 %v6266_v35 }
 0x51f   : > { %v4459_v4 = vadd.f32 %v4458_v52, %v8034_v0  ;;  %v4460_v1 = vpop.f32.mrb[65].mxu1 }
 0x520   : > { %4711 = vst [vmem:[%s8049_s9 + $0x10] sm:$0xff] %v5241_v2  ;;  %v5242_v12 = vpack.c.bf16 %v4588_v6, %v4587_v43  ;;  %v4461_v61 = vadd.f32 %v4460_v1, %v8036_v51  ;;  %v4462_v17 = vpop.f32.mrb[66].mxu1  ;;  %v4536_v43 = vunpack.c.h.bf16 %v6266_v35 }
 0x521   : > { %v4557_v27 = vadd.f32 %v4525_v46, %v4459_v4  ;;  %v4463_v50 = vadd.f32 %v4462_v17, %v8034_v0  ;;  %v4464_v32 = vpop.f32.mrb[67].mxu1 }
 0x522   : > { %4712 = vst [vmem:[%s8049_s9 + $0x18] sm:$0xff] %v5242_v12  ;;  %v4558_v24 = vadd.f32 %v4526_v30, %v4461_v61  ;;  %v4465_v34 = vadd.f32 %v4464_v32, %v8036_v51  ;;  %v6267_v12 = vld [vmem:[%s7092_s5 + $0x50] sm:$0xff] }
 0x523   : > { %v4589_v63 = vmax.f32 %v4557_v27, 0.0  ;;  %v4559_v28 = vadd.f32 %v4527_v19, %v4463_v50  ;;  %v4537_v61 = vunpack.c.l.bf16 %v6267_v12  ;;  %v4538_v50 = vunpack.c.h.bf16 %v6267_v12 }
 0x524   : > { %v4590_v25 = vmax.f32 %v4558_v24, 0.0  ;;  %v4560_v8 = vadd.f32 %v4528_v22, %v4465_v34  ;;  %v6268_v34 = vld [vmem:[%s7092_s5 + $0x58] sm:$0xff] }
 0x525   : > { %v4591_v20 = vmax.f32 %v4559_v28, 0.0 }
 0x526   : > { %v5243_v56 = vpack.c.bf16 %v4590_v25, %v4589_v63  ;;  %v4592_v26 = vmax.f32 %v4560_v8, 0.0  ;;  %v4468_v53 = vpop.f32.mrb[68].mxu1  ;;  %v4539_v63 = vunpack.c.l.bf16 %v6268_v34 }
 0x527   : > { %v4469_v31 = vadd.f32 %v4468_v53, %v8034_v0  ;;  %v4470_v16 = vpop.f32.mrb[69].mxu1 }
 0x528   : > { %4713 = vst [vmem:[%s8049_s9 + $0x20] sm:$0xff] %v5243_v56  ;;  %v5244_v57 = vpack.c.bf16 %v4592_v26, %v4591_v20  ;;  %v4471_v9 = vadd.f32 %v4470_v16, %v8036_v51  ;;  %v4472_v60 = vpop.f32.mrb[70].mxu1  ;;  %v4540_v20 = vunpack.c.h.bf16 %v6268_v34 }
 0x529   : > { %v4561_v55 = vadd.f32 %v4529_v3, %v4469_v31  ;;  %v4473_v33 = vadd.f32 %v4472_v60, %v8034_v0  ;;  %v4474_v37 = vpop.f32.mrb[71].mxu1 }
 0x52a   : > { %4714 = vst [vmem:[%s8049_s9 + $0x28] sm:$0xff] %v5244_v57  ;;  %v4562_v42 = vadd.f32 %v4530_v45, %v4471_v9  ;;  %v4475_v7 = vadd.f32 %v4474_v37, %v8036_v51  ;;  %v6269_v57 = vld [vmem:[%s7092_s5 + $0x60] sm:$0xff] }
 0x52b   : > { %v4593_v15 = vmax.f32 %v4561_v55, 0.0  ;;  %v4563_v41 = vadd.f32 %v4531_v29, %v4473_v33  ;;  %v4541_v9 = vunpack.c.l.bf16 %v6269_v57  ;;  %v4542_v33 = vunpack.c.h.bf16 %v6269_v57 }
 0x52c   : > { %v4594_v44 = vmax.f32 %v4562_v42, 0.0  ;;  %v4564_v23 = vadd.f32 %v4532_v48, %v4475_v7  ;;  %v6270_v7 = vld [vmem:[%s7092_s5 + $0x68] sm:$0xff] }
 0x52d   : > { %v4595_v62 = vmax.f32 %v4563_v41, 0.0 }
 0x52e   : > { %v5245_v36 = vpack.c.bf16 %v4594_v44, %v4593_v15  ;;  %v4596_v14 = vmax.f32 %v4564_v23, 0.0  ;;  %v4478_v11 = vpop.f32.mrb[72].mxu1  ;;  %v4543_v15 = vunpack.c.l.bf16 %v6270_v7 }
 0x52f   : > { %v4479_v5 = vadd.f32 %v4478_v11, %v8034_v0  ;;  %v4480_v13 = vpop.f32.mrb[73].mxu1 }
 0x530   : > { %4715 = vst [vmem:[%s8049_s9 + $0x30] sm:$0xff] %v5245_v36  ;;  %v5246_v18 = vpack.c.bf16 %v4596_v14, %v4595_v62  ;;  %v4481_v38 = vadd.f32 %v4480_v13, %v8036_v51  ;;  %v4482_v49 = vpop.f32.mrb[74].mxu1  ;;  %v4544_v62 = vunpack.c.h.bf16 %v6270_v7 }
 0x531   : > { %v4565_v10 = vadd.f32 %v4533_v21, %v4479_v5  ;;  %v4483_v46 = vadd.f32 %v4482_v49, %v8034_v0  ;;  %v4484_v2 = vpop.f32.mrb[75].mxu1 }
 0x532   : > { %4716 = vst [vmem:[%s8049_s9 + $0x38] sm:$0xff] %v5246_v18  ;;  %v4566_v6 = vadd.f32 %v4534_v54, %v4481_v38  ;;  %v4485_v52 = vadd.f32 %v4484_v2, %v8036_v51  ;;  %v6271_v18 = vld [vmem:[%s7092_s5 + $0x70] sm:$0xff] }
 0x533   : > { %v4597_v30 = vmax.f32 %v4565_v10, 0.0  ;;  %v4567_v4 = vadd.f32 %v4535_v59, %v4483_v46  ;;  %v4545_v38 = vunpack.c.l.bf16 %v6271_v18  ;;  %v4546_v46 = vunpack.c.h.bf16 %v6271_v18 }
 0x534   : > { %v4598_v1 = vmax.f32 %v4566_v6, 0.0  ;;  %v4568_v39 = vadd.f32 %v4536_v43, %v4485_v52  ;;  %v6272_v52 = vld [vmem:[%s7092_s5 + $0x78] sm:$0xff]  ;;  %s4739_s5 = sadd.s32 %s5255_s1, %s5208_s23 }
 0x535   : > { %v4599_v19 = vmax.f32 %v4567_v4, 0.0  ;;  %s5209_s25 = sshll.u32 %s4739_s5, 6 }
 0x536   : > { %v5247_v17 = vpack.c.bf16 %v4598_v1, %v4597_v30  ;;  %v4600_v22 = vmax.f32 %v4568_v39, 0.0  ;;  %v4488_v27 = vpop.f32.mrb[76].mxu1  ;;  %v4547_v30 = vunpack.c.l.bf16 %v6272_v52  ;;  %s8113_s3 = scalar_lea.hbm %s8328_s20, %s5209_s25 }
 0x537   : > { %v4489_v32 = vadd.f32 %v4488_v27, %v8034_v0  ;;  %v4490_v24 = vpop.f32.mrb[77].mxu1 }
 0x538   : > { %4717 = vst [vmem:[%s8049_s9 + $0x40] sm:$0xff] %v5247_v17  ;;  %v5248_v28 = vpack.c.bf16 %v4600_v22, %v4599_v19  ;;  %v4491_v25 = vadd.f32 %v4490_v24, %v8036_v51  ;;  %v4492_v8 = vpop.f32.mrb[78].mxu1  ;;  %v4548_v19 = vunpack.c.h.bf16 %v6272_v52 }
 0x539   : > { %v4569_v58 = vadd.f32 %v4537_v61, %v4489_v32  ;;  %v4493_v3 = vadd.f32 %v4492_v8, %v8034_v0  ;;  %v4494_v56 = vpop.f32.mrb[79].mxu1 }
 0x53a   : > { %4718 = vst [vmem:[%s8049_s9 + $0x48] sm:$0xff] %v5248_v28  ;;  %v4570_v26 = vadd.f32 %v4538_v50, %v4491_v25  ;;  %v4495_v53 = vadd.f32 %v4494_v56, %v8036_v51 }
 0x53b   : > { %v4601_v45 = vmax.f32 %v4569_v58, 0.0  ;;  %v4571_v31 = vadd.f32 %v4539_v63, %v4493_v3 }
 0x53c   : > { %v4602_v16 = vmax.f32 %v4570_v26, 0.0  ;;  %v4572_v47 = vadd.f32 %v4540_v20, %v4495_v53 }
 0x53d   : > { %v4603_v29 = vmax.f32 %v4571_v31, 0.0 }
 0x53e   : > { %v5249_v60 = vpack.c.bf16 %v4602_v16, %v4601_v45  ;;  %v4604_v48 = vmax.f32 %v4572_v47, 0.0  ;;  %v4498_v55 = vpop.f32.mrb[80].mxu1 }
 0x53f   : > { %v4499_v37 = vadd.f32 %v4498_v55, %v8034_v0  ;;  %v4500_v42 = vpop.f32.mrb[81].mxu1 }
 0x540   : > { %4719 = vst [vmem:[%s8049_s9 + $0x50] sm:$0xff] %v5249_v60  ;;  %v5250_v41 = vpack.c.bf16 %v4604_v48, %v4603_v29  ;;  %v4501_v44 = vadd.f32 %v4500_v42, %v8036_v51  ;;  %v4502_v23 = vpop.f32.mrb[82].mxu1 }
 0x541   : > { %v4573_v40 = vadd.f32 %v4541_v9, %v4499_v37  ;;  %v4503_v21 = vadd.f32 %v4502_v23, %v8034_v0  ;;  %v4504_v36 = vpop.f32.mrb[83].mxu1 }
 0x542   : > { %4720 = vst [vmem:[%s8049_s9 + $0x58] sm:$0xff] %v5250_v41  ;;  %v4574_v14 = vadd.f32 %v4542_v33, %v4501_v44  ;;  %v4505_v11 = vadd.f32 %v4504_v36, %v8036_v51 }
 0x543   : > { %v4605_v54 = vmax.f32 %v4573_v40, 0.0  ;;  %v4575_v5 = vadd.f32 %v4543_v15, %v4503_v21 }
 0x544   : > { %v4606_v13 = vmax.f32 %v4574_v14, 0.0  ;;  %v4576_v35 = vadd.f32 %v4544_v62, %v4505_v11 }
 0x545   : > { %v4607_v59 = vmax.f32 %v4575_v5, 0.0 }
 0x546   : > { %v5251_v49 = vpack.c.bf16 %v4606_v13, %v4605_v54  ;;  %v4608_v43 = vmax.f32 %v4576_v35, 0.0  ;;  %v4508_v10 = vpop.f32.mrb[84].mxu1 }
 0x547   : > { %v4509_v2 = vadd.f32 %v4508_v10, %v8034_v0  ;;  %v4510_v6 = vpop.f32.mrb[85].mxu1 }
 0x548   : > { %4721 = vst [vmem:[%s8049_s9 + $0x60] sm:$0xff] %v5251_v49  ;;  %v5252_v4 = vpack.c.bf16 %v4608_v43, %v4607_v59  ;;  %v4511_v1 = vadd.f32 %v4510_v6, %v8036_v51  ;;  %v4512_v39 = vpop.f32.mrb[86].mxu1 }
 0x549   : > { %v4577_v12 = vadd.f32 %v4545_v38, %v4509_v2  ;;  %v4513_v61 = vadd.f32 %v4512_v39, %v8034_v0  ;;  %v4514_v17 = vpop.f32.mrb[87].mxu1 }
 0x54a   : > { %4722 = vst [vmem:[%s8049_s9 + $0x68] sm:$0xff] %v5252_v4  ;;  %v4578_v22 = vadd.f32 %v4546_v46, %v4511_v1  ;;  %v4515_v27 = vadd.f32 %v4514_v17, %v8036_v51 }
 0x54b   : > { %v4609_v50 = vmax.f32 %v4577_v12, 0.0  ;;  %v4579_v32 = vadd.f32 %v4547_v30, %v4513_v61 }
 0x54c   : > { %v4610_v24 = vmax.f32 %v4578_v22, 0.0  ;;  %v4580_v34 = vadd.f32 %v4548_v19, %v4515_v27 }
 0x54d   : > { %v4611_v63 = vmax.f32 %v4579_v32, 0.0 }
 0x54e   : > { %v5253_v28 = vpack.c.bf16 %v4610_v24, %v4609_v50  ;;  %v4612_v25 = vmax.f32 %v4580_v34, 0.0 }
 0x550   : > { %4723 = vst [vmem:[%s8049_s9 + $0x70] sm:$0xff] %v5253_v28  ;;  %v5254_v0 = vpack.c.bf16 %v4612_v25, %v4611_v63 }
 0x552   : > { %4724 = vst [vmem:[%s8049_s9 + $0x78] sm:$0xff] %v5254_v0 }
 0x553   : > { %6460 = shalt.err (!%p6457_p13)
}
 0x554   : > { %s6461_s4 = scalar_lea.hbm %s8113_s3, 2048  ;;  %s6465_s12 = scalar_lea.hbm %s8329_s0, 8192 }
 0x555   : > { %p6462_p11 = scmp.ne.s32.totalorder %s8113_s3, %s6461_s4  ;;  %p6466_p3 = scmp.lt.u32.totalorder %s8113_s3, %s8329_s0 }
 0x556   : > { %p6467_p12 = scmp.lt.u32.totalorder %s6465_s12, %s6461_s4  ;;  %p6469_p5 = scmp.lt.u32.totalorder %s6461_s4, %s8113_s3 }
 0x557   : > { %p6463_p0 = pnand %p6462_p11, %p8330_p10 }
 0x558   : > { %p6468_p4 = por %p6467_p12, %p6466_p3 }
 0x559   : > { %p6464_p1 = pneg %p6463_p0 }
 0x55a   : > { %p6470_p8 = por %p6469_p5, %p6468_p4 }
 0x55c   : > { %p6471_p2 = pnand %p6470_p8, %p6464_p1 }
 0x55e   : > { %6474 = shalt.err (!%p6471_p2)
}
 0x55f   : > { %s6623_s5 = smov 128   ;;  %s6624_s25 = smov 8  }
 0x560   : > { %5942 = dma.vmem_to_hbm [thread:$0]  (%p8330_p10), %s8107_s27, 2048, %s8113_s3, %s4726_s26, %s6623_s5, %s6623_s5, %s6624_s25  }
 0x561 PF: > { %p5975_p9 = scmp.ge.s32.totalorder %s6609_s22, 2  ;;  %s4757_s28 = sand.u32 1, %s6581_s15  }
 0x562   : > { %p8331_p7 = scmp.ne.s32.totalorder %s8283_s8, 0  ;;  %s4758_s2 = scalar_lea.sflag [#allocation5], %s4757_s28 }
 0x564   : > { %p5965_p6 = pnand %p5975_p9, %p8331_p7 }
 0x566   : > { %6552 = dma.done.wait (!%p5965_p6), %s4758_s2, 2048  }
 0x567   : > { %6554 = vsyncadd (!%p5965_p6), %s4758_s2, 4294965248  ;;  %s30_s22 = sadd.s32 1, %s6609_s22   ;;  %s8333_s30 = sld [smem:[#allocation22_spill]] }
 0x568   : > { %p8145_p13 = scmp.ge.s32.totalorder %s30_s22, 6   ;;  %s8334_s29 = sld [smem:[#allocation23_spill]] }
 0x569   : > { %s8335_s12 = sld [smem:[#allocation24_spill]]  ;;  %s8336_s27 = smov %s6836_s10 }
 0x56a   : > { %s8337_s3 = sld [smem:[#allocation35_spill]]  ;;  %s8338_s8 = sld [smem:[#allocation27_spill]] }
 0x56b   : > { %s8339_s19 = sld [smem:[#allocation28_spill]]  ;;  %s8340_s26 = sld [smem:[#allocation30_spill]] }
 0x56c   : > { %s8341_s21 = sld [smem:[#allocation31_spill]]  ;;  %s8344_s11 = smov %s8367_s18 }
 0x56d   : > { %s8345_s13 = smov %s6577_s14  ;;  %s8346_s14 = smov %s8336_s27 }
 0x56e   : > { %s8343_s10 = smov %s8334_s29  ;;  %s8347_s15 = smov %s6585_s16 }
 0x56f   : > { %s8348_s16 = smov %s6589_s17  ;;  %29 = sbr.rel (!%p8145_p13) target bundleno = 25 (0x19), region = 148 }
 0x570   : > { %s8349_s17 = smov %s8337_s3  ;;  %s8350_s18 = smov %s8338_s8 }
 0x571   : > { %s8351_s20 = smov %s8340_s26 }
 0x576   :  { %4763 = vsyncpa [#allocation4], 1 }
 0x577   :  { %4765 = vsyncpa [#allocation4 + $0x1], 1 }
 0x578   :  { %4766 = vsyncpa [#allocation7], 1 }
 0x579   :  { %4768 = vsyncpa [#allocation7 + $0x1], 1 }
 0x57a   :  { %4769 = vsyncpa [#allocation10], 1 }
 0x57b   :  { %4770 = vsyncpa [#allocation13], 1 }
 0x57c   :  { %4771 = vsyncpa [#allocation5], 1 }
 0x57d   :  { %4773 = vsyncpa [#allocation5 + $0x1], 1 }

// kernel: tpu_custom_call.1
= control target key start
LH: loop header
LB: loop body
LE: loop exit
PB: predicated region body
PF: predicated region fallthrough
CT: control target
= control target key end

     0   :  { %s8192_s0 = inlined_call_operand.hbm [shape: bf16[2,16,16,256], index: 0, kind: input, shape index: {}]   ;;  %s8193_s1 = inlined_call_operand.hbm [shape: bf16[2,16,16,256], index: 1, kind: input, shape index: {}]   ;;  %s8194_s2 = inlined_call_operand.hbm [shape: bf16[2,16,16,256], index: 2, kind: input, shape index: {}]   ;;  %s8195_s3 = inlined_call_operand.hbm [shape: bf16[256,128], index: 3, kind: input, shape index: {}]   ;;  %s8196_s4 = inlined_call_operand.hbm [shape: bf16[9,128,128], index: 4, kind: input, shape index: {}]   ;;  %s8197_s5 = inlined_call_operand.hbm [shape: bf16[128,256], index: 5, kind: input, shape index: {}]   ;;  %s8198_s6 = inlined_call_operand.vmem [shape: f32[1,128], index: 6, kind: input, shape index: {}]   ;;  %s8199_s7 = inlined_call_operand.vmem [shape: f32[1,128], index: 7, kind: input, shape index: {}]   ;;  %s8200_s8 = inlined_call_operand.vmem [shape: f32[1,256], index: 8, kind: input, shape index: {}]   ;;  %s8201_s9 = inlined_call_operand.hbm [shape: bf16[2,16,16,256], index: 9, kind: output, shape index: {}]  }
   0x1   :  { %8236 = sst [smem:[#allocation36_spill]] %s8192_s0 }
   0x2   :  { %8237 = sst [smem:[#allocation37_spill]] %s8193_s1 }
   0x3   :  { %8238 = sst [smem:[#allocation38_spill]] %s8194_s2 }
   0x4   :  { %8239 = sst [smem:[#allocation39_spill]] %s8195_s3 }
   0x5   :  { %8240 = sst [smem:[#allocation40_spill]] %s8196_s4 }
   0x6   :  { %8241 = sst [smem:[#allocation41_spill]] %s8197_s5 }
   0x7   :  { %8242 = sst [smem:[#allocation42_spill]] %s8198_s6 }
   0x8   :  { %8243 = sst [smem:[#allocation43_spill]] %s8199_s7 }
   0x9   :  { %8244 = sst [smem:[#allocation44_spill]] %s8200_s8 }
   0xa   :  { %8245 = sst [smem:[#allocation45_spill]] %s8201_s9 }
   0xb   :  { %14 = vsyncpa [#allocation4], 0 }
   0xc   :  { %16 = vsyncpa [#allocation4 + $0x1], 0 }
   0xd   :  { %17 = vsyncpa [#allocation7], 0 }
   0xe   :  { %19 = vsyncpa [#allocation7 + $0x1], 0 }
   0xf   :  { %20 = vsyncpa [#allocation10], 0 }
  0x10   :  { %21 = vsyncpa [#allocation13], 0 }
  0x11   :  { %22 = vsyncpa [#allocation5], 0 }
  0x12   :  { %24 = vsyncpa [#allocation5 + $0x1], 0  ;;  %s6675_s30 = smov 0   ;;  %s6677_s10 = smov 0  }
  0x13   :  { %s6679_s11 = smov 0   ;;  %s6681_s12 = smov 0  }
  0x14   :  { %s6683_s13 = smov 0   ;;  %s6685_s14 = smov 0  }
  0x15   :  { %s6687_s15 = smov 0   ;;  %s6689_s16 = smov 0  }
  0x16   :  { %s6691_s17 = smov 0   ;;  %s6693_s18 = smov 0  }
  0x17   :  { %s6695_s19 = smov 0   ;;  %s6697_s20 = smov 0  }
  0x18   :  { %s6699_s21 = smov 0   ;;  %s6701_s22 = smov 0  }
  0x19 LB: > { %8246 = sst [smem:[#allocation21_spill]] %s6557_s30  ;;  %s6746_s23 = sadd.s32 4294967295, %s6609_s22   ;;  %s6609_s22 = sphi %s6701_s22, %s30_s22   ;;  %s6605_s21 = sphi %s6699_s21, %s8341_s21   ;;  %s6601_s20 = sphi %s6697_s20, %s8351_s20   ;;  %s6597_s19 = sphi %s6695_s19, %s8339_s19   ;;  %s6593_s18 = sphi %s6693_s18, %s8350_s18   ;;  %s6589_s17 = sphi %s6691_s17, %s8349_s17   ;;  %s6585_s16 = sphi %s6689_s16, %s8348_s16   ;;  %s6581_s15 = sphi %s6687_s15, %s8347_s15   ;;  %s6577_s14 = sphi %s6685_s14, %s8346_s14   ;;  %s6573_s13 = sphi %s6683_s13, %s8345_s13   ;;  %s6569_s12 = sphi %s6681_s12, %s8335_s12   ;;  %s6565_s11 = sphi %s6679_s11, %s8344_s11   ;;  %s6561_s10 = sphi %s6677_s10, %s8343_s10   ;;  %s6557_s30 = sphi %s6675_s30, %s8333_s30  }
  0x1a   : > { %8247 = sst [smem:[#allocation22_spill]] %s6561_s10  ;;  %p4918_p0 = scmp.ge.s32.totalorder %s6609_s22, 1 }
  0x1b   : > { %8248 = sst [smem:[#allocation23_spill]] %s6565_s11  ;;  %p8204_p1 = scmp.eq.s32.totalorder %s6746_s23, 0 }
  0x1c   : > { %8249 = sst [smem:[#allocation24_spill]] %s6573_s13  ;;  %p301_p3 = scmp.lt.s32.totalorder %s6609_s22, 5 }
  0x1d   : > { %8250 = sst [smem:[#allocation25_spill]] %s6593_s18  ;;  %s6611_s25 = smov [#allocation9]  }
  0x1e   : > { %8251 = sst [smem:[#allocation26_spill]] %s6597_s19  ;;  %p6752_p4 = pnand %p4918_p0, %p301_p3 }
  0x1f   : > { %8252 = sst [smem:[#allocation27_spill]] %s6601_s20  ;;  %s313_s26 = sshll.u32 %s6611_s25, 4  ;;  %s314_s26 = int_to_ptr.vmem [resolvable:$true] %s313_s26 }
  0x20   : > { %8253 = sst [smem:[#allocation28_spill]] %s6605_s21  ;;  %p5944_p5 = pneg %p6752_p4 }
  0x21   : > { %s8254_s24 = scalar_select %p6752_p4, 1, 0 }
  0x22   : > { %p6760_p6 = pnand %p5944_p5, %p8204_p1  ;;  %s8257_s3 = sld [smem:[#allocation39_spill]] }
  0x23   : > { %8255 = sst [smem:[#allocation29_spill]] %s8254_s24 }
  0x24   : > { %s8256_s27 = scalar_select %p6760_p6, 1, 0 }
  0x25   : > { %p6772_p8 = pneg %p6760_p6 }
  0x28   : > { %s6273_s9 = scalar_lea.hbm %s8257_s3, 2048 }
  0x29   : > { %p6274_p7 = scmp.ne.s32.totalorder %s8257_s3, %s6273_s9  ;;  %p6280_p11 = scmp.lt.u32.totalorder %s6273_s9, %s8257_s3 }
  0x2b   : > { %p6276_p9 = pnand %p6772_p8, %p6274_p7 }
  0x2d   : > { %p6277_p10 = pneg %p6276_p9 }
  0x2f   : > { %p6282_p12 = pnand %p6280_p11, %p6277_p10 }
  0x31   : > { %6285 = shalt.err (!%p6282_p12)
}
  0x32   : > { %s6286_s28 = scalar_lea.vmem %s314_s26, 2048  ;;  %p6294_p5 = scmp.lt.s32.totalorder %s314_s26, %s314_s26 }
  0x33   : > { %p6287_p13 = scmp.ne.s32.totalorder %s314_s26, %s6286_s28  ;;  %p6295_p2 = scmp.lt.s32.totalorder %s6286_s28, %s6286_s28 }
  0x35   : > { %p6289_p0 = pnand %p6287_p13, %p6772_p8  ;;  %p6296_p1 = por %p6295_p2, %p6294_p5 }
  0x37   : > { %p6290_p3 = pneg %p6289_p0 }
  0x39   : > { %p6297_p4 = pnand %p6296_p1, %p6290_p3 }
  0x3b   : > { %6300 = shalt.err (!%p6297_p4)
}
  0x3c   : > { %s8209_s8 = smov 64   ;;  %s8210_s7 = smov 4  }
  0x3d   : > { %5947 = dma.hbm_to_vmem [thread:$0]  (!%p6760_p6), %s8257_s3, 2048, %s314_s26, [#allocation10], %s8209_s8, %s8209_s8, %s8210_s7  }
  0x3e   : > { %s39_s19 = sadd.s32 1, %s6601_s20  ;;  %s42_s29 = sadd.s32 1, %s6605_s21 }
  0x3f   : > { %p40_p1 = scmp.ge.s32.totalorder %s39_s19, 2  ;;  %p8223_p2 = scmp.eq.s32.totalorder %s6609_s22, 0 }
  0x40   : > { %s4912_s28 = sshll.u32 %s6601_s20, 3  ;;  %s87_s6 = sadd.s32 1, %s6577_s14 }
  0x41   : > { %s8353_s19 = smov (%p40_p1, %s39_s19), 0  ;;  %s8355_s29 = smov (!%p40_p1, %s42_s29), %s6605_s21 }
  0x42   : > { %8259 = sst [smem:[#allocation30_spill]] %s8353_s19  ;;  %s47_s24 = ssub.s32 %s6601_s20, %s8353_s19 }
  0x43   : > { %s4913_s2 = sadd.s32 4294967295, %s4912_s28  ;;  %p44_p4 = scmp.ge.s32.totalorder %s8355_s29, 2 }
  0x44   : > { %p76_p7 = scmp.gt.s32.totalorder %s4913_s2, 0  ;;  %s4914_s26 = sshll.u32 %s8353_s19, 3 }
  0x45   : > { %p94_p9 = scmp.ne.s32.totalorder %s6577_s14, %s6573_s13  ;;  %s8357_s29 = smov (%p44_p4, %s8355_s29), 0 }
  0x46   : > { %8260 = sst [smem:[#allocation31_spill]] %s8357_s29  ;;  %s8359_s2 = smov (!%p76_p7, %s4913_s2), 0 }
  0x47   : > { %s6808_s9 = ssub.s32 %s6605_s21, %s8357_s29  ;;  %s4915_s18 = sadd.s32 4294967295, %s4914_s26 }
  0x48   : > { %8261 = sst [smem:[#allocation32_spill]] %s6808_s9  ;;  %s6811_s8 = sor.u32 %s47_s24, %s6808_s9 }
  0x49   : > { %p80_p10 = scmp.gt.s32.totalorder %s4915_s18, 0  ;;  %p6816_p12 = por %p94_p9, %p8223_p2 }
  0x4a   : > { %p100_p13 = scmp.ne.s32.totalorder %s6573_s13, %s6569_s12  ;;  %s6822_s3 = sadd.s32 8, %s4912_s28 }
  0x4b   : > { %s8361_s18 = smov (!%p80_p10, %s4915_s18), 0  ;;  %8263 = sst [smem:[#allocation33_spill]] %s6822_s3 }
  0x4c   : > { %s83_s29 = ssub.s32 %s8359_s2, %s8361_s18  ;;  %p8264_p3 = scmp.eq.s32.totalorder %s6746_s23, 0 }
  0x4d   : > { %s84_s24 = sor.u32 %s83_s29, %s6808_s9  ;;  %s6832_s30 = sadd.s32 8, %s4914_s26 }
  0x4e   : > { %p6828_p5 = por %p100_p13, %p8264_p3  ;;  %p85_p1 = scmp.eq.s32.totalorder %s84_s24, 0 }
  0x4f   : > { %p8222_p7 = scmp.lt.s32.totalorder %s6609_s22, 4  ;;  %s6840_s12 = sshll.u32 %s6605_s21, 6 }
  0x50   : > { %s8265_s19 = scalar_select %p6828_p5, 1, 0 }
  0x51   : > { %s6836_s10 = scalar_select %p85_p1, %s6577_s14, %s87_s6  }
  0x52   : > { %8266 = sst [smem:[#allocation34_spill]] %s8265_s19  ;;  %s386_s28 = sand.u32 1, %s6609_s22  }
  0x53   : > { %s388_s29 = sand.u32 1, %s6577_s14   ;;  %s4931_s13 = sshll.u32 %s8359_s2, 2 }
  0x54   : > { %s4928_s18 = sshll.u32 %s388_s29, 4  ;;  %s400_s9 = sadd.s32 %s4931_s13, %s6840_s12 }
  0x55   : > { %s4933_s3 = sshll.u32 %s400_s9, 6  ;;  %s390_s19 = scalar_lea.vmem [#allocation6], %s4928_s18 }
  0x56   : > { %s403_s24 = sshll.u32 %s390_s19, 4  ;;  %s8267_s1 = sld [smem:[#allocation37_spill]]  ;;  %s6850_s24 = int_to_ptr.vmem [resolvable:$true] %s403_s24 }
  0x57   : > { %p6856_p9 = pnand %p8222_p7, %p6816_p12  ;;  %s6614_s2 = smov [#allocation11]  }
  0x58   : > { %s326_s13 = sshll.u32 %s6614_s2, 4  ;;  %s6862_s0 = scalar_lea.sflag [#allocation7], %s386_s28  ;;  %s6860_s13 = int_to_ptr.vmem [resolvable:$true] %s326_s13 }
  0x59   : > { %p6303_p13 = pneg %p6856_p9 }
  0x5c   : > { %s6848_s26 = scalar_lea.hbm %s8267_s1, %s4933_s3  ;;  %s6306_s19 = scalar_lea.hbm %s8267_s1, 8192 }
  0x5d   : > { %s6301_s3 = scalar_lea.hbm %s6848_s26, 256  ;;  %p6307_p12 = scmp.lt.u32.totalorder %s6848_s26, %s8267_s1 }
  0x5e   : > { %p6302_p10 = scmp.ne.s32.totalorder %s6848_s26, %s6301_s3  ;;  %p6308_p4 = scmp.lt.u32.totalorder %s6306_s19, %s6301_s3 }
  0x5f   : > { %p6310_p7 = scmp.lt.u32.totalorder %s6301_s3, %s6848_s26 }
  0x60   : > { %p6304_p3 = pnand %p6303_p13, %p6302_p10  ;;  %p6309_p0 = por %p6308_p4, %p6307_p12 }
  0x62   : > { %p6305_p1 = pneg %p6304_p3  ;;  %p6311_p2 = por %p6310_p7, %p6309_p0 }
  0x64   : > { %p6312_p11 = pnand %p6311_p2, %p6305_p1 }
  0x66   : > { %6315 = shalt.err (!%p6312_p11)
}
  0x67   : > { %s6316_s28 = scalar_lea.vmem %s6850_s24, 256  ;;  %s6615_s18 = smov [#allocation6]  }
  0x68   : > { %p6317_p10 = scmp.ne.s32.totalorder %s6850_s24, %s6316_s28  ;;  %s6321_s2 = sshll.u32 %s6615_s18, 4  ;;  %s6322_s2 = int_to_ptr.vmem [resolvable:$false] %s6321_s2 }
  0x69   : > { %s6323_s11 = scalar_lea.vmem %s6322_s2, 512  ;;  %p6324_p6 = scmp.lt.s32.totalorder %s6850_s24, %s6322_s2 }
  0x6a   : > { %p6319_p3 = pnand %p6317_p10, %p6303_p13  ;;  %p6325_p4 = scmp.lt.s32.totalorder %s6323_s11, %s6316_s28 }
  0x6c   : > { %p6320_p5 = pneg %p6319_p3  ;;  %p6326_p12 = por %p6325_p4, %p6324_p6 }
  0x6e   : > { %p6327_p0 = pnand %p6326_p12, %p6320_p5 }
  0x70   : > { %6330 = shalt.err (!%p6327_p0)
}
  0x71   : > { %s8227_s3 = smov 128   ;;  %s8229_s7 = smov 8  }
  0x72   : > { %5960 = dma.hbm_to_vmem [thread:$0]  (!%p6856_p9), %s6848_s26, 256, %s6850_s24, %s6862_s0, %s8227_s3, %s8227_s3, %s8229_s7  }
  0x73   : > { %s8269_s4 = sld [smem:[#allocation40_spill]] }
  0x79   : > { %s6331_s29 = scalar_lea.hbm %s8269_s4, 9216 }
  0x7a   : > { %p6332_p6 = scmp.ne.s32.totalorder %s8269_s4, %s6331_s29  ;;  %p6338_p5 = scmp.lt.u32.totalorder %s6331_s29, %s8269_s4 }
  0x7c   : > { %p6334_p2 = pnand %p6332_p6, %p6772_p8 }
  0x7e   : > { %p6335_p11 = pneg %p6334_p2 }
  0x80   : > { %p6340_p7 = pnand %p6338_p5, %p6335_p11 }
  0x82   : > { %6343 = shalt.err (!%p6340_p7)
}
  0x83   : > { %s6344_s24 = scalar_lea.vmem %s6860_s13, 9216  ;;  %p6352_p10 = scmp.lt.s32.totalorder %s6860_s13, %s6860_s13 }
  0x84   : > { %p6345_p9 = scmp.ne.s32.totalorder %s6860_s13, %s6344_s24  ;;  %p6353_p3 = scmp.lt.s32.totalorder %s6344_s24, %s6344_s24 }
  0x86   : > { %p6347_p13 = pnand %p6345_p9, %p6772_p8  ;;  %p6354_p4 = por %p6353_p3, %p6352_p10 }
  0x88   : > { %p6348_p1 = pneg %p6347_p13 }
  0x8a   : > { %p6355_p12 = pnand %p6354_p4, %p6348_p1 }
  0x8c   : > { %6358 = shalt.err (!%p6355_p12)
}
  0x8d   : > { %p8270_p0 = scmp.ne.s32.totalorder %s8256_s27, 0  ;;  %s8271_s26 = smov 4  }
  0x8e   : > { %s8272_s6 = smov 64   ;;  %s6618_s29 = smov [#allocation12]  }
  0x8f   : > { %5950 = dma.hbm_to_vmem [thread:$0]  (!%p8270_p0), %s8269_s4, 9216, %s6860_s13, [#allocation10], %s8272_s6, %s8272_s6, %s8271_s26  }
  0x90   : > { %s339_s28 = sshll.u32 %s6618_s29, 4  ;;  %s8273_s5 = sld [smem:[#allocation41_spill]]  ;;  %s340_s28 = int_to_ptr.vmem [resolvable:$true] %s339_s28 }
  0x96   : > { %s6359_s11 = scalar_lea.hbm %s8273_s5, 2048 }
  0x97   : > { %p6360_p6 = scmp.ne.s32.totalorder %s8273_s5, %s6359_s11  ;;  %p6366_p5 = scmp.lt.u32.totalorder %s6359_s11, %s8273_s5 }
  0x99   : > { %p6362_p2 = pnand %p6360_p6, %p6772_p8 }
  0x9b   : > { %p6363_p11 = pneg %p6362_p2 }
  0x9d   : > { %p6368_p7 = pnand %p6366_p5, %p6363_p11 }
  0x9f   : > { %6371 = shalt.err (!%p6368_p7)
}
  0xa0   : > { %s6372_s13 = scalar_lea.vmem %s340_s28, 2048  ;;  %p6380_p10 = scmp.lt.s32.totalorder %s340_s28, %s340_s28 }
  0xa1   : > { %p6373_p9 = scmp.ne.s32.totalorder %s340_s28, %s6372_s13  ;;  %p6381_p3 = scmp.lt.s32.totalorder %s6372_s13, %s6372_s13 }
  0xa3   : > { %p6375_p13 = pnand %p6373_p9, %p6772_p8  ;;  %p6382_p4 = por %p6381_p3, %p6380_p10 }
  0xa5   : > { %p6376_p1 = pneg %p6375_p13 }
  0xa7   : > { %p6383_p12 = pnand %p6382_p4, %p6376_p1 }
  0xa9   : > { %6386 = shalt.err (!%p6383_p12)
}
  0xaa   : > { %s8274_s3 = smov 8   ;;  %s8275_s26 = smov 128  }
  0xab   : > { %5953 = dma.hbm_to_vmem [thread:$0]  (!%p8270_p0), %s8273_s5, 2048, %s340_s28, [#allocation13], %s8275_s26, %s8275_s26, %s8274_s3  }
  0xac   : > { %s4911_s27 = sadd.s32 4294967294, %s6609_s22   ;;  %s51_s25 = sadd.s32 1, %s6589_s17 }
  0xad   : > { %p8276_p8 = scmp.eq.s32.totalorder %s6811_s8, 0  ;;  %p58_p6 = scmp.ne.s32.totalorder %s6589_s17, %s6585_s16 }
  0xae   : > { %p64_p2 = scmp.ne.s32.totalorder %s6585_s16, %s6581_s15  ;;  %p294_p11 = scmp.eq.s32.totalorder %s4911_s27, 3 }
  0xaf   : > { %s6945_s6 = scalar_select %p8276_p8, %s6589_s17, %s51_s25  }
  0xb0   : > { %s362_s19 = sand.u32 1, %s6589_s17   ;;  %p8278_p5 = scmp.eq.s32.totalorder %s6609_s22, 0 }
  0xb1   : > { %8277 = sst [smem:[#allocation35_spill]] %s6945_s6  ;;  %p8279_p9 = scmp.eq.s32.totalorder %s6746_s23, 0 }
  0xb2   : > { %p60_p7 = por %p8278_p5, %p58_p6  ;;  %p8281_p1 = scmp.eq.s32.totalorder %s6746_s23, 3 }
  0xb3   : > { %p6956_p13 = por %p8279_p9, %p64_p2  ;;  %p6966_p0 = por %p294_p11, %p64_p2 }
  0xb4   : > { %p6962_p10 = por %p8281_p1, %p58_p6  ;;  %s4923_s28 = sshll.u32 %s362_s19, 7 }
  0xb5   : > { %s8283_s8 = scalar_select %p6966_p0, 1, 0 }
  0xb6   : > { %s8282_s29 = scalar_select %p6962_p10, 1, 0 }
  0xb7   : > { %s5216_s18 = sshll.u32 %s6601_s20, 5  ;;  %s366_s11 = scalar_lea.vmem [#allocation3], %s4923_s28 }
  0xb8   : > { %s373_s2 = sadd.s32 %s5216_s18, %s6840_s12  ;;  %s376_s24 = sshll.u32 %s366_s11, 4  ;;  %s6972_s24 = int_to_ptr.vmem [resolvable:$true] %s376_s24 }
  0xb9   : > { %s4927_s13 = sshll.u32 %s373_s2, 6  ;;  %s8284_s27 = sld [smem:[#allocation36_spill]] }
  0xba   : > { %p8285_p3 = scmp.lt.s32.totalorder %s6609_s22, 4  ;;  %s6985_s28 = scalar_lea.sflag [#allocation4], %s362_s19 }
  0xbc   : > { %p6981_p4 = pnand %p8285_p3, %p60_p7 }
  0xbe   : > { %p6389_p8 = pneg %p6981_p4 }
  0xbf   : > { %s6977_s25 = scalar_lea.hbm %s8284_s27, %s4927_s13  ;;  %s6392_s13 = scalar_lea.hbm %s8284_s27, 8192 }
  0xc0   : > { %s6387_s18 = scalar_lea.hbm %s6977_s25, 2048  ;;  %p6393_p11 = scmp.lt.u32.totalorder %s6977_s25, %s8284_s27 }
  0xc1   : > { %p6388_p12 = scmp.ne.s32.totalorder %s6977_s25, %s6387_s18  ;;  %p6394_p5 = scmp.lt.u32.totalorder %s6392_s13, %s6387_s18 }
  0xc2   : > { %p6396_p9 = scmp.lt.u32.totalorder %s6387_s18, %s6977_s25 }
  0xc3   : > { %p6390_p6 = pnand %p6389_p8, %p6388_p12  ;;  %p6395_p7 = por %p6394_p5, %p6393_p11 }
  0xc5   : > { %p6391_p2 = pneg %p6390_p6  ;;  %p6397_p1 = por %p6396_p9, %p6395_p7 }
  0xc7   : > { %p6398_p3 = pnand %p6397_p1, %p6391_p2 }
  0xc9   : > { %6401 = shalt.err (!%p6398_p3)
}
  0xca   : > { %s6402_s19 = scalar_lea.vmem %s6972_s24, 2048  ;;  %s6619_s2 = smov [#allocation3]  }
  0xcb   : > { %p6403_p12 = scmp.ne.s32.totalorder %s6972_s24, %s6402_s19  ;;  %s6407_s11 = sshll.u32 %s6619_s2, 4  ;;  %s6408_s11 = int_to_ptr.vmem [resolvable:$false] %s6407_s11 }
  0xcc   : > { %s6409_s1 = scalar_lea.vmem %s6408_s11, 4096  ;;  %p6410_p10 = scmp.lt.s32.totalorder %s6972_s24, %s6408_s11 }
  0xcd   : > { %p6405_p6 = pnand %p6403_p12, %p6389_p8  ;;  %p6411_p11 = scmp.lt.s32.totalorder %s6409_s1, %s6402_s19 }
  0xcf   : > { %p6406_p0 = pneg %p6405_p6  ;;  %p6412_p5 = por %p6411_p11, %p6410_p10 }
  0xd1   : > { %p6413_p7 = pnand %p6412_p5, %p6406_p0 }
  0xd3   : > { %6416 = shalt.err (!%p6413_p7)
}
  0xd4   : > { %s8287_s18 = sld [smem:[#allocation23_spill]]  ;;  %s8288_s13 = sld [smem:[#allocation33_spill]] }
  0xd5   : > { %s8289_s7 = sld [smem:[#allocation22_spill]]  ;;  %s8291_s19 = sld [smem:[#allocation32_spill]] }
  0xd6   : > { %s8290_s2 = sld [smem:[#allocation21_spill]]  ;;  %p8293_p0 = scmp.lt.s32.totalorder %s6832_s30, 15 }
  0xd7   : > { %5957 = dma.hbm_to_vmem [thread:$0]  (!%p6981_p4), %s6977_s25, 2048, %s6972_s24, %s6985_s28, %s8275_s26, %s8275_s26, %s8274_s3  }
  0xd8   : > { %s8365_s30 = smov (!%p8293_p0, %s6832_s30), 15  ;;  %p8294_p9 = scmp.eq.s32.totalorder %s6609_s22, 0 }
  0xd9   : > { %p8295_p12 = scmp.eq.s32.totalorder %s6746_s23, 0  ;;  %s8297_s6 = sld [smem:[#allocation38_spill]] }
  0xda   : > { %s123_s4 = sadd.s32 1, %s8287_s18  ;;  %p8292_p10 = scmp.lt.s32.totalorder %s8288_s13, 15 }
  0xdb   : > { %p130_p8 = scmp.ne.s32.totalorder %s8287_s18, %s8289_s7  ;;  %s415_s1 = sand.u32 1, %s8287_s18  }
  0xdc   : > { %s8363_s13 = smov (!%p8292_p10, %s8288_s13), 15  ;;  %p136_p2 = scmp.ne.s32.totalorder %s8289_s7, %s8290_s2 }
  0xdd   : > { %s119_s11 = ssub.s32 %s8363_s13, %s8365_s30  ;;  %p132_p1 = por %p130_p8, %p8294_p9 }
  0xde   : > { %s120_s5 = sor.u32 %s119_s11, %s8291_s19  ;;  %p7033_p6 = por %p136_p2, %p8295_p12 }
  0xdf   : > { %p121_p3 = scmp.eq.s32.totalorder %s120_s5, 0  ;;  %s4934_s24 = sshll.u32 %s415_s1, 4 }
  0xe0   : > { %s8296_s27 = scalar_select %p7033_p6, 1, 0 }
  0xe1   : > { %s4936_s25 = sshll.u32 %s8363_s13, 2  ;;  %s8367_s18 = smov (!%p121_p3, %s8287_s18), %s123_s4 }
  0xe2   : > { %s427_s28 = sadd.s32 %s4936_s25, %s6840_s12  ;;  %s417_s20 = scalar_lea.vmem [#allocation8], %s4934_s24 }
  0xe3   : > { %s4938_s21 = sshll.u32 %s427_s28, 6  ;;  %s430_s7 = sshll.u32 %s417_s20, 4  ;;  %s7046_s7 = int_to_ptr.vmem [resolvable:$true] %s430_s7 }
  0xe4   : > { %s7044_s19 = scalar_lea.hbm %s8297_s6, %s4938_s21  ;;  %p8298_p4 = scmp.lt.s32.totalorder %s6609_s22, 4 }
  0xe5   : > { %s6417_s12 = scalar_lea.hbm %s7044_s19, 256  ;;  %s6422_s13 = scalar_lea.hbm %s8297_s6, 8192 }
  0xe6   : > { %p7050_p11 = pnand %p8298_p4, %p132_p1  ;;  %p6418_p5 = scmp.ne.s32.totalorder %s7044_s19, %s6417_s12 }
  0xe7   : > { %p6423_p8 = scmp.lt.u32.totalorder %s7044_s19, %s8297_s6  ;;  %p6424_p2 = scmp.lt.u32.totalorder %s6422_s13, %s6417_s12 }
  0xe8   : > { %p6419_p7 = pneg %p7050_p11  ;;  %p6426_p1 = scmp.lt.u32.totalorder %s6417_s12, %s7044_s19 }
  0xe9   : > { %p6425_p9 = por %p6424_p2, %p6423_p8 }
  0xea   : > { %p6420_p10 = pnand %p6419_p7, %p6418_p5 }
  0xeb   : > { %p6427_p3 = por %p6426_p1, %p6425_p9 }
  0xec   : > { %p6421_p0 = pneg %p6420_p10 }
  0xee   : > { %p6428_p12 = pnand %p6427_p3, %p6421_p0 }
  0xf0   : > { %6431 = shalt.err (!%p6428_p12)
}
  0xf1   : > { %s6432_s1 = scalar_lea.vmem %s7046_s7, 256  ;;  %s6620_s24 = smov [#allocation8]  }
  0xf2   : > { %p6433_p4 = scmp.ne.s32.totalorder %s7046_s7, %s6432_s1  ;;  %s6437_s25 = sshll.u32 %s6620_s24, 4  ;;  %s6438_s25 = int_to_ptr.vmem [resolvable:$false] %s6437_s25 }
  0xf3   : > { %s6439_s28 = scalar_lea.vmem %s6438_s25, 512  ;;  %p6440_p6 = scmp.lt.s32.totalorder %s7046_s7, %s6438_s25 }
  0xf4   : > { %p6435_p5 = pnand %p6433_p4, %p6419_p7  ;;  %p6441_p8 = scmp.lt.s32.totalorder %s6439_s28, %s6432_s1 }
  0xf6   : > { %p6436_p10 = pneg %p6435_p5  ;;  %p6442_p2 = por %p6441_p8, %p6440_p6 }
  0xf8   : > { %p6443_p9 = pnand %p6442_p2, %p6436_p10 }
  0xfa   : > { %6446 = shalt.err (!%p6443_p9)
}
  0xfb   : > { %5963 = dma.hbm_to_vmem [thread:$0]  (!%p7050_p11), %s7044_s19, 256, %s7046_s7, %s6862_s0, %s8275_s26, %s8275_s26, %s8274_s3  }
  0xfc   : > { %s8300_s2 = sld [smem:[#allocation29_spill]] }
 0x102   : > { %p8301_p7 = scmp.ne.s32.totalorder %s8300_s2, 0 }
 0x103   : > { %s7086_s30 = sand.u32 (!%p8301_p7), 1, %s6585_s16  }
 0x104   : > { %442 = sbr.rel (%p8301_p7) target bundleno = 1377 (0x561), region = 56  ;;  %s4940_s12 = sshll.u32 (!%p8301_p7), %s7086_s30, 7 }
 0x105   : > { %s445_s20 = scalar_lea.sflag (!%p8301_p7), [#allocation4], %s7086_s30  ;;  %s7092_s5 = scalar_lea.vmem (!%p8301_p7), [#allocation3], %s4940_s12 }
 0x10b   : > { %6532 = dma.done.wait (%p6956_p13), %s445_s20, 2048  }
 0x10c   : > { %6534 = vsyncadd (%p6956_p13), %s445_s20, 4294965248  ;;  %s8302_s0 = sld [smem:[#allocation24_spill]]  ;;  %s8303_s3 = sld [smem:[#allocation34_spill]] }
 0x10d   : > { %s453_s26 = sand.u32 1, %s6746_s23  }
 0x10e   : > { %s454_s21 = scalar_lea.sflag [#allocation7], %s453_s26 }
 0x112   : > { %s455_s7 = sand.u32 1, %s8302_s0   ;;  %p8304_p6 = scmp.ne.s32.totalorder %s8303_s3, 0 }
 0x113   : > { %s7100_s19 = sshll.u32 %s455_s7, 4 }
 0x114   : > { %s457_s13 = scalar_lea.vmem [#allocation6], %s7100_s19 }
 0x115   : > { %6536 = dma.done.wait (%p8304_p6), %s454_s21, 256  }
 0x116   : > { %6538 = vsyncadd (%p8304_p6), %s454_s21, 4294967040  ;;  %s8305_s4 = sld [smem:[#allocation22_spill]]  ;;  %p8306_p13 = scmp.ne.s32.totalorder %s8296_s27, 0 }
 0x11c   : > { %s464_s11 = sand.u32 1, %s8305_s4  }
 0x11d   : > { %s7108_s9 = sshll.u32 %s464_s11, 4 }
 0x11e   : > { %s466_s1 = scalar_lea.vmem [#allocation8], %s7108_s9 }
 0x11f   : > { %6540 = dma.done.wait (%p8306_p13), %s454_s21, 256  }
 0x120   : > { %6542 = vsyncadd (%p8306_p13), %s454_s21, 4294967040  ;;  %p8307_p11 = scmp.eq.s32.totalorder %s6746_s23, 0 }
 0x122   : > { %6544 = dma.done.wait (%p8307_p11), [#allocation10], 11264   ;;  %p8308_p0 = pmov %p8307_p11 }
 0x124   : > { %6546 = vsyncadd (%p8308_p0), [#allocation10], 4294956032  ;;  %p8309_p1 = pmov %p8308_p0 }
 0x125   : > { %p8310_p3 = pmov %p8308_p0 }
 0x126   : > { %6548 = dma.done.wait (%p8309_p1), [#allocation13], 2048  }
 0x127   : > { %6550 = vsyncadd (%p8310_p3), [#allocation13], 4294965248  ;;  %v7123_v0 = vld [vmem:[#allocation9 + $0x40] sm:$0xff]   ;;  %v7128_v2 = vld [vmem:[#allocation9 + $0x48] sm:$0xff]   ;;  %vm1000_vm0 = vcmask 1040384   ;;  %s8315_s24 = sld [smem:[#allocation42_spill]] }
 0x128   : > { %v7125_v1 = vld [vmem:[#allocation9] sm:$0xff]   ;;  %5256 = vmatprep.subr.bf16.mxu1 %v7123_v0  ;;  %v7131_v3 = vld [vmem:[#allocation9 + $0x8] sm:$0xff]   ;;  %v7134_v4 = vld [vmem:[#allocation9 + $0x50] sm:$0xff]   ;;  %vm1001_vm1 = vsmask.f32 256  ;;  %vm1093_vm5 = vcmask 1043456  }
 0x129   : > { %5257 = vmatpush3.bf16.msra.mxu1 %v7125_v1  ;;  %v7137_v5 = vld [vmem:[#allocation9 + $0x10] sm:$0xff]   ;;  %v7140_v6 = vld [vmem:[#allocation9 + $0x58] sm:$0xff]   ;;  %v7146_v8 = vld [vmem:[#allocation9 + $0x60] sm:$0xff]   ;;  %vm1033_vm3 = vsmask.f32 7938  ;;  %s8320_s25 = sld [smem:[#allocation25_spill]] }
 0x12a   : > { %5258 = vmatprep.subr.bf16.mxu1 %v7128_v2  ;;  %v7143_v7 = vld [vmem:[#allocation9 + $0x18] sm:$0xff]   ;;  %v7149_v9 = vld [vmem:[#allocation9 + $0x20] sm:$0xff]   ;;  %v7152_v10 = vld [vmem:[#allocation9 + $0x68] sm:$0xff]   ;;  %vm1071_vm6 = vsmask.f32 4368  ;;  %vm2047_vm12 = vcmask 1042432  }
 0x12b   : > { %v567_v11 = vld [vmem:[%s7092_s5] sm:$0xff]  ;;  %v568_v12 = vld [vmem:[%s7092_s5 + $0x8] sm:$0xff]  ;;  %v7160_v15 = vld [vmem:[#allocation9 + $0x70] sm:$0xff]   ;;  %vm1441_vm9 = vsmask.f32 3328  ;;  %vm2048_vm13 = vcmask 1046532  }
 0x12c   : > { %v4949_v13 = vcombine.high %v567_v11, %v568_v12  ;;  %v7157_v14 = vld [vmem:[#allocation9 + $0x28] sm:$0xff]   ;;  %v7162_v16 = vld [vmem:[#allocation9 + $0x30] sm:$0xff]   ;;  %v7164_v17 = vld [vmem:[#allocation9 + $0x78] sm:$0xff]   ;;  %v4948_v21 = vcombine.low %v567_v11, %v568_v12  ;;  %vm1442_vm10 = vsmask.f32 7440  ;;  %s8325_s21 = sld [smem:[#allocation43_spill]] }
 0x12d   : > { %5259 = vmatpush3.bf16.msra.mxu1 %v7131_v3  ;;  %v7168_v18 = vld [vmem:[#allocation9 + $0x38] sm:$0xff]   ;;  %v569_v19 = vld [vmem:[%s7092_s5 + $0x10] sm:$0xff]  ;;  %v571_v23 = vld [vmem:[%s7092_s5 + $0x20] sm:$0xff]  ;;  %s8326_s11 = sld [smem:[#allocation44_spill]]  ;;  %s8049_s9 = scalar_lea.vmem [#allocation14], %s4940_s12 }
 0x12e   : > { %5260 = vmatprep.subr.bf16.mxu1 %v7134_v4  ;;  %797 = vmatprep.mubr.bf16.mxu1 %v4949_v13  ;;  %v570_v20 = vld [vmem:[%s7092_s5 + $0x18] sm:$0xff]  ;;  %v572_v24 = vld [vmem:[%s7092_s5 + $0x28] sm:$0xff]  ;;  %v573_v27 = vld [vmem:[%s7092_s5 + $0x30] sm:$0xff]  ;;  %s8327_s12 = sld [smem:[#allocation26_spill]]  ;;  %s4742_s27 = sshll.u32 %s8049_s9, 4  ;;  %s8107_s27 = int_to_ptr.vmem [resolvable:$true] %s4742_s27 }
 0x12f   : > { %v4951_v22 = vcombine.high %v569_v19, %v570_v20  ;;  %v4950_v25 = vcombine.low %v569_v19, %v570_v20  ;;  %v4953_v26 = vcombine.high %v571_v23, %v572_v24  ;;  %v574_v28 = vld [vmem:[%s7092_s5 + $0x38] sm:$0xff]  ;;  %v4952_v29 = vcombine.low %v571_v23, %v572_v24  ;;  %v575_v31 = vld [vmem:[%s7092_s5 + $0x40] sm:$0xff]  ;;  %v576_v32 = vld [vmem:[%s7092_s5 + $0x48] sm:$0xff]  ;;  %p878_p12 = scmp.gt.s32.totalorder %s8320_s25, 0  ;;  %p881_p4 = scmp.lt.s32.totalorder %s8320_s25, 1 }
 0x130   : > { %v4955_v30 = vcombine.high %v573_v27, %v574_v28  ;;  %v4954_v33 = vcombine.low %v573_v27, %v574_v28  ;;  %v4957_v34 = vcombine.high %v575_v31, %v576_v32  ;;  %v577_v35 = vld [vmem:[%s7092_s5 + $0x50] sm:$0xff]  ;;  %v578_v36 = vld [vmem:[%s7092_s5 + $0x58] sm:$0xff]  ;;  %v4956_v37 = vcombine.low %v575_v31, %v576_v32  ;;  %v579_v39 = vld [vmem:[%s7092_s5 + $0x60] sm:$0xff]  ;;  %s4726_s26 = scalar_lea.sflag [#allocation5], %s7086_s30  ;;  %s6447_s7 = scalar_lea.vmem %s8107_s27, 2048 }
 0x131   : > { %5261 = vmatpush3.bf16.msra.mxu1 %v7137_v5  ;;  %v4959_v38 = vcombine.high %v577_v35, %v578_v36  ;;  %v580_v40 = vld [vmem:[%s7092_s5 + $0x68] sm:$0xff]  ;;  %v4958_v41 = vcombine.low %v577_v35, %v578_v36  ;;  %v581_v43 = vld [vmem:[%s7092_s5 + $0x70] sm:$0xff]  ;;  %v582_v44 = vld [vmem:[%s7092_s5 + $0x78] sm:$0xff]  ;;  %s7346_s28 = scalar_select %p878_p12, 1, 0 }
 0x132   : > { %5262 = vmatprep.subr.bf16.mxu1 %v7140_v6  ;;  %v4961_v42 = vcombine.high %v579_v39, %v580_v40  ;;  %v4960_v45 = vcombine.low %v579_v39, %v580_v40  ;;  %v4963_v46 = vcombine.high %v581_v43, %v582_v44  ;;  %v4962_v47 = vcombine.low %v581_v43, %v582_v44  ;;  %v6132_v48 = vld [vmem:[%s457_s13 + $0x4] ss:$8 sps:$4 sm:$0xff]   ;;  %v6130_v49 = vld [vmem:[%s457_s13] ss:$8 sps:$4 sm:$0xff]   ;;  %vm7221_vm2 = vmand %vm1000_vm0, %vm1001_vm1  ;;  %s882_s20 = scalar_select %p881_p4, 1, 0 }
 0x133   : > { %v1006_v51 = vld [vmem:[#allocation2 + $0xc] sm:$0x1]  ;;  %vm7229_vm4 = vmand %vm1000_vm0, %vm1033_vm3  ;;  %v1038_v54 = vld [vmem:[#allocation2 + $0x14] sm:$0x1]  ;;  %s880_s2 = scvt.s32.f32 %s7346_s28  ;;  %p6448_p5 = scmp.ne.s32.totalorder %s8107_s27, %s6447_s7 }
 0x134   : > { %v1007_v52 = vsel %vm7221_vm2, 0, %v1006_v51  ;;  %v1039_v55 = vsel %vm7229_vm4, 0, %v1038_v54  ;;  %v1009_v56 = vld [vmem:[#allocation2 + $0x18] sm:$0x1]  ;;  %v1041_v58 = vld [vmem:[#allocation2 + $0x20] sm:$0x1]  ;;  %vm7285_vm7 = vmand %vm1093_vm5, %vm1033_vm3  ;;  %s883_s0 = scvt.s32.f32 %s882_s20 }
 0x135   : > { %5263 = vmatpush3.bf16.msra.mxu1 %v7143_v7  ;;  %1008 = vst [vmem:[#allocation2 + $0xc] sm:$0x1] %v1007_v52  ;;  %1040 = vst [vmem:[#allocation2 + $0x14] sm:$0x1] %v1039_v55  ;;  %v1010_v57 = vsel %vm7221_vm2, 0, %v1009_v56  ;;  %v1042_v59 = vsel %vm7229_vm4, 0, %v1041_v58 }
 0x136   : > { %5264 = vmatprep.subr.bf16.mxu1 %v7146_v8  ;;  %1011 = vst [vmem:[#allocation2 + $0x18] sm:$0x1] %v1010_v57  ;;  %1043 = vst [vmem:[#allocation2 + $0x20] sm:$0x1] %v1042_v59  ;;  %v1012_v60 = vld [vmem:[#allocation2 + $0x24] sm:$0x1] }
 0x137   : > { %v1013_v61 = vsel %vm7221_vm2, 0, %v1012_v60  ;;  %v1044_v62 = vld [vmem:[#allocation2 + $0x2c] sm:$0x1]  ;;  %v1053_v12 = vld [vmem:[#allocation2 + $0x50] sm:$0x1]  ;;  %v6136_v19 = vld [vmem:[#allocation11] sm:$0xff]  }
 0x138   : > { %1014 = vst [vmem:[#allocation2 + $0x24] sm:$0x1] %v1013_v61  ;;  %v1045_v63 = vsel %vm7229_vm4, 0, %v1044_v62  ;;  %v1054_v13 = vsel %vm7229_vm4, 0, %v1053_v12  ;;  %5540 = vmatprep.subr.bf16.mxu0 %v6136_v19  ;;  %v6137_v23 = vld [vmem:[#allocation11 + $0x8] sm:$0xff]   ;;  %v6138_v24 = vld [vmem:[#allocation11 + $0x10] sm:$0xff]   ;;  %vm7290_vm8 = vmor %vm1001_vm1, %vm1071_vm6 }
 0x139   : > { %5265 = vmatpush3.bf16.msra.mxu1 %v7149_v9  ;;  %1046 = vst [vmem:[#allocation2 + $0x2c] sm:$0x1] %v1045_v63  ;;  %1055 = vst [vmem:[#allocation2 + $0x50] sm:$0x1] %v1054_v13  ;;  %5541 = vmatpush3.bf16.msra.mxu0 %v6136_v19  ;;  %v1035_v28 = vld [vmem:[#allocation2 + $0x8] sm:$0x1] }
 0x13a   : > { %5266 = vmatprep.subr.bf16.mxu1 %v7152_v10  ;;  %5542 = vmatprep.subr.bf16.mxu0 %v6137_v23  ;;  %v6141_v31 = vld [vmem:[#allocation11 + $0x48] sm:$0xff]   ;;  %v6142_v32 = vld [vmem:[#allocation11 + $0x20] sm:$0xff]   ;;  %v6145_v35 = vld [vmem:[#allocation11 + $0x58] sm:$0xff]   ;;  %s5208_s23 = sshll.u32 %s8327_s12, 6  ;;  %s8328_s20 = sld [smem:[#allocation45_spill]] }
 0x13b   : > { %v6146_v36 = vld [vmem:[#allocation11 + $0x30] sm:$0xff]   ;;  %v6149_v39 = vld [vmem:[#allocation11 + $0x68] sm:$0xff]   ;;  %v7273_v40 = vld [vmem:[#allocation11 + $0x80] sm:$0xff]   ;;  %p8330_p10 = scmp.ne.s32.totalorder %s8282_s29, 0  ;;  %s6622_s19 = smov [#allocation14]  }
 0x13c   : > { %v7279_v44 = vld [vmem:[%s8315_s24] ss:$0 sm:$0xff]  ;;  %v1349_v13 = vld [vmem:[#allocation2 + $0x14] sm:$0x1]  ;;  %vm7403_vm11 = vmor %vm1441_vm9, %vm1442_vm10 }
 0x13d   : > { %5267 = vmatpush3.bf16.msra.mxu1 %v7157_v14  ;;  %5543 = vmatpush3.bf16.msra.mxu0 %v6137_v23  ;;  %vm7533_vm14 = vmor %vm2047_vm12, %vm2048_vm13  ;;  %p6449_p8 = pnand %p6448_p5, %p8330_p10 }
 0x13e   : > { %5268 = vmatprep.subr.bf16.mxu1 %v7160_v15  ;;  %5544 = vmatprep.subr.bf16.mxu0 %v6138_v24 }
 0x13f   : > { %p6450_p2 = pneg %p6449_p8 }
 0x141   : > { %5269 = vmatpush3.bf16.msra.mxu1 %v7162_v16  ;;  %5545 = vmatpush3.bf16.msra.mxu0 %v6138_v24 }
 0x142   : > { %5270 = vmatprep.subr.bf16.mxu1 %v7164_v17 }
 0x145   : > { %5271 = vmatpush3.bf16.msra.mxu1 %v7168_v18 }
 0x146   : > { %5320 = vmatprep.subr.bf16.mxu1 %v7123_v0 }
 0x148   : > { %798 = vmatmul.mubr.bf16.vlgmr.msra.gmra.mrb[0].mxu1 %v4948_v21  ;;  %v1059_v21 = vld [vmem:[#allocation2 + $0x68] sm:$0x1] }
 0x149   : > { %5321 = vmatpush3.bf16.msra.mxu1 %v7125_v1  ;;  %805 = vmatprep.mubr.bf16.mxu1 %v4951_v22  ;;  %v1060_v22 = vsel %vm7229_vm4, 0, %v1059_v21 }
 0x14a   : > { %5322 = vmatprep.subr.bf16.mxu1 %v7128_v2  ;;  %1061 = vst [vmem:[#allocation2 + $0x68] sm:$0x1] %v1060_v22 }
 0x14d   : > { %5323 = vmatpush3.bf16.msra.mxu1 %v7131_v3 }
 0x14e   : > { %5324 = vmatprep.subr.bf16.mxu1 %v7134_v4 }
 0x150   : > { %806 = vmatmul.mubr.bf16.gmra.mrb[4].mxu1 %v4950_v25  ;;  %v6139_v25 = vld [vmem:[#allocation11 + $0x40] sm:$0xff]  }
 0x151   : > { %813 = vmatprep.mubr.bf16.mxu1 %v4953_v26  ;;  %5325 = vmatpush3.bf16.msra.mxu1 %v7137_v5  ;;  %v1003_v26 = vld [vmem:[#allocation2] sm:$0x1] }
 0x152   : > { %5326 = vmatprep.subr.bf16.mxu1 %v7140_v6  ;;  %v1004_v27 = vsel %vm7221_vm2, 0, %v1003_v26 }
 0x153   : > { %1005 = vst [vmem:[#allocation2] sm:$0x1] %v1004_v27 }
 0x155   : > { %5327 = vmatpush3.bf16.msra.mxu1 %v7143_v7 }
 0x156   : > { %5328 = vmatprep.subr.bf16.mxu1 %v7146_v8 }
 0x158   : > { %814 = vmatmul.mubr.bf16.gmra.mrb[8].mxu1 %v4952_v29  ;;  %v6140_v29 = vld [vmem:[#allocation11 + $0x18] sm:$0xff]  }
 0x159   : > { %821 = vmatprep.mubr.bf16.mxu1 %v4955_v30  ;;  %5329 = vmatpush3.bf16.msra.mxu1 %v7149_v9  ;;  %v1036_v30 = vsel %vm7229_vm4, 0, %v1035_v28 }
 0x15a   : > { %5330 = vmatprep.subr.bf16.mxu1 %v7152_v10  ;;  %1037 = vst [vmem:[#allocation2 + $0x8] sm:$0x1] %v1036_v30  ;;  %5546 = vmatprep.subr.bf16.mxu0 %v6140_v29 }
 0x15b   : > { %5547 = vmatpush3.bf16.msra.mxu0 %v6140_v29 }
 0x15c   : > { %5548 = vmatprep.subr.bf16.mxu0 %v6142_v32 }
 0x15d   : > { %5331 = vmatpush3.bf16.msra.mxu1 %v7157_v14 }
 0x15e   : > { %5332 = vmatprep.subr.bf16.mxu1 %v7160_v15 }
 0x15f   : > { %5549 = vmatpush3.bf16.msra.mxu0 %v6142_v32  ;;  %v1352_v32 = vld [vmem:[#allocation2 + $0x18] sm:$0xf] }
 0x160   : > { %822 = vmatmul.mubr.bf16.gmra.mrb[12].mxu1 %v4954_v33  ;;  %v6143_v33 = vld [vmem:[#allocation11 + $0x50] sm:$0xff]  }
 0x161   : > { %829 = vmatprep.mubr.bf16.mxu1 %v4957_v34  ;;  %5333 = vmatpush3.bf16.msra.mxu1 %v7162_v16  ;;  %v6144_v34 = vld [vmem:[#allocation11 + $0x28] sm:$0xff]  }
 0x162   : > { %5334 = vmatprep.subr.bf16.mxu1 %v7164_v17  ;;  %5550 = vmatprep.subr.bf16.mxu0 %v6144_v34 }
 0x163   : > { %5551 = vmatpush3.bf16.msra.mxu0 %v6144_v34 }
 0x164   : > { %5552 = vmatprep.subr.bf16.mxu0 %v6146_v36 }
 0x165   : > { %5335 = vmatpush3.bf16.msra.mxu1 %v7168_v18 }
 0x166   : > { %5342 = vmatprep.subr.bf16.mxu1 %v7123_v0  ;;  %v6135_v0 = vld [vmem:[%s466_s1 + $0x4] ss:$8 sps:$4 sm:$0xff]  }
 0x167   : > { %5553 = vmatpush3.bf16.msra.mxu0 %v6146_v36 }
 0x168   : > { %830 = vmatmul.mubr.bf16.gmra.mrb[16].mxu1 %v4956_v37  ;;  %v6147_v37 = vld [vmem:[#allocation11 + $0x60] sm:$0xff]  }
 0x169   : > { %837 = vmatprep.mubr.bf16.mxu1 %v4959_v38  ;;  %v6148_v38 = vld [vmem:[#allocation11 + $0x38] sm:$0xff]  }
 0x16a   : > { %5554 = vmatprep.subr.bf16.mxu0 %v6148_v38 }
 0x16b   : > { %5555 = vmatpush3.bf16.msra.mxu0 %v6148_v38 }
 0x16c   : > { %5572 = vmatprep.subr.bf16.mxu0 %v7273_v40 }
 0x170   : > { %838 = vmatmul.mubr.bf16.gmra.mrb[20].mxu1 %v4958_v41  ;;  %v6153_v41 = vld [vmem:[#allocation11 + $0x70] sm:$0xff]  }
 0x171   : > { %845 = vmatprep.mubr.bf16.mxu1 %v4961_v42  ;;  %v6156_v42 = vld [vmem:[#allocation11 + $0x78] sm:$0xff]  }
 0x178   : > { %846 = vmatmul.mubr.bf16.gmra.mrb[24].mxu1 %v4960_v45 }
 0x179   : > { %853 = vmatprep.mubr.bf16.mxu1 %v4963_v46 }
 0x180   : > { %854 = vmatmul.mubr.bf16.gmra.mrb[28].mxu1 %v4962_v47 }
 0x181   : > { %930 = vmatprep.mubr.bf16.mxu1 %v6132_v48 }
 0x188   : > { %931 = vmatmul.mubr.bf16.vlgmr.msra.gmra.mrb[32].mxu1 %v6130_v49 }
 0x189   : > { %5343 = vmatpush3.bf16.msra.mxu1 %v7125_v1  ;;  %v6133_v1 = vld [vmem:[%s466_s1] ss:$8 sps:$4 sm:$0xff]   ;;  %986 = vmatprep.mubr.bf16.mxu1 %v6135_v0  ;;  %s5255_s1 = sshll.u32 %s8320_s25, 5 }
 0x18a   : > { %5344 = vmatprep.subr.bf16.mxu1 %v7128_v2  ;;  %v1015_v2 = vld [vmem:[#allocation2 + $0x30] sm:$0x1] }
 0x18d   : > { %5345 = vmatpush3.bf16.msra.mxu1 %v7131_v3  ;;  %v1016_v3 = vsel %vm7221_vm2, 0, %v1015_v2 }
 0x18e   : > { %5346 = vmatprep.subr.bf16.mxu1 %v7134_v4  ;;  %1017 = vst [vmem:[#allocation2 + $0x30] sm:$0x1] %v1016_v3  ;;  %v1047_v4 = vld [vmem:[#allocation2 + $0x38] sm:$0x1] }
 0x191   : > { %5347 = vmatpush3.bf16.msra.mxu1 %v7137_v5  ;;  %v1048_v5 = vsel %vm7229_vm4, 0, %v1047_v4 }
 0x192   : > { %5348 = vmatprep.subr.bf16.mxu1 %v7140_v6  ;;  %1049 = vst [vmem:[#allocation2 + $0x38] sm:$0x1] %v1048_v5  ;;  %v1018_v6 = vld [vmem:[#allocation2 + $0x3c] sm:$0x1]  ;;  %v1345_v5 = vld [vmem:[#allocation2 + $0xc] sm:$0xf] }
 0x195   : > { %5349 = vmatpush3.bf16.msra.mxu1 %v7143_v7  ;;  %v1019_v7 = vsel %vm7221_vm2, 0, %v1018_v6 }
 0x196   : > { %5350 = vmatprep.subr.bf16.mxu1 %v7146_v8  ;;  %1020 = vst [vmem:[#allocation2 + $0x3c] sm:$0x1] %v1019_v7  ;;  %v1050_v8 = vld [vmem:[#allocation2 + $0x44] sm:$0x1] }
 0x199   : > { %5351 = vmatpush3.bf16.msra.mxu1 %v7149_v9  ;;  %v1051_v9 = vsel %vm7229_vm4, 0, %v1050_v8 }
 0x19a   : > { %5352 = vmatprep.subr.bf16.mxu1 %v7152_v10  ;;  %1052 = vst [vmem:[#allocation2 + $0x44] sm:$0x1] %v1051_v9  ;;  %v1021_v10 = vld [vmem:[#allocation2 + $0x48] sm:$0x1] }
 0x19b   : > { %v1022_v11 = vsel %vm7221_vm2, 0, %v1021_v10 }
 0x19c   : > { %1023 = vst [vmem:[#allocation2 + $0x48] sm:$0x1] %v1022_v11 }
 0x19d   : > { %5353 = vmatpush3.bf16.msra.mxu1 %v7157_v14  ;;  %v1024_v14 = vld [vmem:[#allocation2 + $0x54] sm:$0x1] }
 0x19e   : > { %5354 = vmatprep.subr.bf16.mxu1 %v7160_v15  ;;  %v1025_v15 = vsel %vm7221_vm2, 0, %v1024_v14 }
 0x19f   : > { %1026 = vst [vmem:[#allocation2 + $0x54] sm:$0x1] %v1025_v15 }
 0x1a1   : > { %5355 = vmatpush3.bf16.msra.mxu1 %v7162_v16  ;;  %v1056_v16 = vld [vmem:[#allocation2 + $0x5c] sm:$0x1] }
 0x1a2   : > { %5356 = vmatprep.subr.bf16.mxu1 %v7164_v17  ;;  %v1057_v17 = vsel %vm7229_vm4, 0, %v1056_v16 }
 0x1a3   : > { %1058 = vst [vmem:[#allocation2 + $0x5c] sm:$0x1] %v1057_v17 }
 0x1a5   : > { %5357 = vmatpush3.bf16.msra.mxu1 %v7168_v18  ;;  %v1027_v18 = vld [vmem:[#allocation2 + $0x60] sm:$0x1] }
 0x1a6   : > { %v1028_v20 = vsel %vm7221_vm2, 0, %v1027_v18  ;;  %5508 = vmatprep.subr.bf16.mxu1 %v6139_v25 }
 0x1a7   : > { %1029 = vst [vmem:[#allocation2 + $0x60] sm:$0x1] %v1028_v20 }
 0x1a8   : > { %987 = vmatmul.mubr.bf16.vlgmr.msra.gmra.mrb[36].mxu1 %v6133_v1 }
 0x1a9   : > { %5509 = vmatpush3.bf16.msra.mxu1 %v6139_v25 }
 0x1aa   : > { %5510 = vmatprep.subr.bf16.mxu1 %v6141_v31 }
 0x1ad   : > { %5511 = vmatpush3.bf16.msra.mxu1 %v6141_v31 }
 0x1ae   : > { %5512 = vmatprep.subr.bf16.mxu1 %v6143_v33 }
 0x1b1   : > { %5513 = vmatpush3.bf16.msra.mxu1 %v6143_v33 }
 0x1b2   : > { %5514 = vmatprep.subr.bf16.mxu1 %v6145_v35 }
 0x1b5   : > { %5515 = vmatpush3.bf16.msra.mxu1 %v6145_v35 }
 0x1b6   : > { %5516 = vmatprep.subr.bf16.mxu1 %v6147_v37 }
 0x1b9   : > { %5517 = vmatpush3.bf16.msra.mxu1 %v6147_v37 }
 0x1ba   : > { %5518 = vmatprep.subr.bf16.mxu1 %v6149_v39 }
 0x1bd   : > { %5519 = vmatpush3.bf16.msra.mxu1 %v6149_v39 }
 0x1be   : > { %5520 = vmatprep.subr.bf16.mxu1 %v6153_v41 }
 0x1c1   : > { %5521 = vmatpush3.bf16.msra.mxu1 %v6153_v41 }
 0x1c2   : > { %5522 = vmatprep.subr.bf16.mxu1 %v6156_v42 }
 0x1c5   : > { %5523 = vmatpush3.bf16.msra.mxu1 %v6156_v42  ;;  %v1356_v42 = vld [vmem:[#allocation2 + $0x20] sm:$0x1] }
 0x21b   : > { %v5272_v43 = vpop.f32.mrb[0].mxu1 }
 0x21c   : > { %v5273_v45 = vpop.f32.mrb[1].mxu1 }
 0x21d   : > { %v5274_v46 = vadd.f32 %v5273_v45, %v5272_v43  ;;  %v5275_v47 = vpop.f32.mrb[2].mxu1 }
 0x21e   : > { %v5276_v48 = vpop.f32.mrb[3].mxu1 }
 0x21f   : > { %v800_v49 = vadd.f32 %v5274_v46, %v7279_v44  ;;  %v5277_v51 = vadd.f32 %v5276_v48, %v5275_v47 }
 0x221   : > { %v862_v52 = vmax.f32 %v800_v49, 0.0  ;;  %v803_v54 = vadd.f32 %v5277_v51, %v7279_v44 }
 0x223   : > { %v5223_v55 = vpack.c.bf16 %v862_v52, %v862_v52  ;;  %v863_v56 = vmax.f32 %v803_v54, 0.0  ;;  %v5278_v57 = vpop.f32.mrb[4].mxu1 }
 0x224   : > { %v5279_v58 = vpop.f32.mrb[5].mxu1 }
 0x225   : > { %v1185_v59 = vshrl.u32 %v5223_v55, 16  ;;  %v5224_v60 = vpack.c.bf16 %v863_v56, %v863_v56  ;;  %v5280_v61 = vadd.f32 %v5279_v58, %v5278_v57  ;;  %v5281_v62 = vpop.f32.mrb[6].mxu1  ;;  %v1188_v1 = vshll.u32 %v5223_v55, 16 }
 0x226   : > { %v5282_v63 = vpop.f32.mrb[7].mxu1 }
 0x227   : > { %v1187_v0 = vrot.slane %v1185_v59, 7  ;;  %v1193_v2 = vshrl.u32 %v5224_v60, 16  ;;  %v808_v3 = vadd.f32 %v5280_v61, %v7279_v44  ;;  %v5283_v6 = vadd.f32 %v5282_v63, %v5281_v62 }
 0x228   : > { %v1196_v9 = vshll.u32 %v5224_v60, 16 }
 0x229   : > { %v1190_v7 = vor.u32 %v1188_v1, %v1187_v0  ;;  %v1195_v8 = vrot.slane %v1193_v2, 7  ;;  %v864_v10 = vmax.f32 %v808_v3, 0.0  ;;  %v1191_v11 = vrot.slane %v1187_v0, 4  ;;  %v1359_v1 = vld [vmem:[#allocation2 + $0x24] sm:$0xf] }
 0x22a   : > { %v811_v14 = vadd.f32 %v5283_v6, %v7279_v44 }
 0x22b   : > { %v1346_v15 = vsel %vm7285_vm7, %v1190_v7, %v1345_v5  ;;  %v1198_v16 = vor.u32 %v1196_v9, %v1195_v8  ;;  %v1200_v17 = vrot.slane %v1195_v8, 4  ;;  %v5225_v18 = vpack.c.bf16 %v864_v10, %v864_v10  ;;  %v5284_v19 = vpop.f32.mrb[8].mxu1  ;;  %v1363_v9 = vld [vmem:[#allocation2 + $0x2c] sm:$0x1] }
 0x22c   : > { %1347 = vst [vmem:[#allocation2 + $0xc] sm:$0xf] %v1346_v15  ;;  %v865_v20 = vmax.f32 %v811_v14, 0.0  ;;  %v5285_v21 = vpop.f32.mrb[9].mxu1 }
 0x22d   : > { %v1199_v22 = vsel %vm7290_vm8, %v1191_v11, %v1198_v16  ;;  %v1350_v23 = vsel %vm7221_vm2, %v1200_v17, %v1349_v13  ;;  %v1202_v24 = vshrl.u32 %v5225_v18, 16  ;;  %v5287_v25 = vpop.f32.mrb[10].mxu1  ;;  %v5286_v27 = vadd.f32 %v5285_v21, %v5284_v19 }
 0x22e   : > { %1348 = vst [vmem:[#allocation2 + $0x10] sm:$0xf] %v1199_v22  ;;  %1351 = vst [vmem:[#allocation2 + $0x14] sm:$0x1] %v1350_v23  ;;  %v5226_v26 = vpack.c.bf16 %v865_v20, %v865_v20  ;;  %v5288_v28 = vpop.f32.mrb[11].mxu1  ;;  %v1205_v30 = vshll.u32 %v5225_v18, 16 }
 0x22f   : > { %v1204_v29 = vrot.slane %v1202_v24, 7  ;;  %v5289_v31 = vadd.f32 %v5288_v28, %v5287_v25  ;;  %v816_v34 = vadd.f32 %v5286_v27, %v7279_v44  ;;  %v1366_v28 = vld [vmem:[#allocation2 + $0x30] sm:$0xf] }
 0x230   : > { %v1210_v33 = vshrl.u32 %v5226_v26, 16  ;;  %v1213_v38 = vshll.u32 %v5226_v26, 16 }
 0x231   : > { %v1207_v35 = vor.u32 %v1205_v30, %v1204_v29  ;;  %v819_v36 = vadd.f32 %v5289_v31, %v7279_v44  ;;  %v866_v39 = vmax.f32 %v816_v34, 0.0  ;;  %v1208_v46 = vrot.slane %v1204_v29, 4 }
 0x232   : > { %v1212_v37 = vrot.slane %v1210_v33, 7 }
 0x233   : > { %v1353_v41 = vsel %vm7285_vm7, %v1207_v35, %v1352_v32  ;;  %v867_v43 = vmax.f32 %v819_v36, 0.0  ;;  %v5290_v45 = vpop.f32.mrb[12].mxu1  ;;  %v5227_v49 = vpack.c.bf16 %v866_v39, %v866_v39 }
 0x234   : > { %1354 = vst [vmem:[#allocation2 + $0x18] sm:$0xf] %v1353_v41  ;;  %v1215_v47 = vor.u32 %v1213_v38, %v1212_v37  ;;  %v1217_v48 = vrot.slane %v1212_v37, 4  ;;  %v5291_v51 = vpop.f32.mrb[13].mxu1  ;;  %v1370_v37 = vld [vmem:[#allocation2 + $0x38] sm:$0x1] }
 0x235   : > { %v5228_v52 = vpack.c.bf16 %v867_v43, %v867_v43  ;;  %v5292_v54 = vadd.f32 %v5291_v51, %v5290_v45  ;;  %v5293_v55 = vpop.f32.mrb[14].mxu1  ;;  %v1219_v58 = vshrl.u32 %v5227_v49, 16  ;;  %v1222_v0 = vshll.u32 %v5227_v49, 16 }
 0x236   : > { %v1216_v56 = vsel %vm7290_vm8, %v1208_v46, %v1215_v47  ;;  %v1357_v57 = vsel %vm7221_vm2, %v1217_v48, %v1356_v42  ;;  %v5294_v59 = vpop.f32.mrb[15].mxu1 }
 0x237   : > { %1355 = vst [vmem:[#allocation2 + $0x1c] sm:$0xf] %v1216_v56  ;;  %1358 = vst [vmem:[#allocation2 + $0x20] sm:$0x1] %v1357_v57  ;;  %v1227_v60 = vshrl.u32 %v5228_v52, 16  ;;  %v824_v61 = vadd.f32 %v5292_v54, %v7279_v44  ;;  %v5295_v62 = vadd.f32 %v5294_v59, %v5293_v55  ;;  %v1221_v63 = vrot.slane %v1219_v58, 7 }
 0x238   : > { %v1230_v3 = vshll.u32 %v5228_v52, 16 }
 0x239   : > { %v1229_v2 = vrot.slane %v1227_v60, 7  ;;  %v868_v5 = vmax.f32 %v824_v61, 0.0  ;;  %v827_v6 = vadd.f32 %v5295_v62, %v7279_v44  ;;  %v1224_v7 = vor.u32 %v1222_v0, %v1221_v63  ;;  %v1373_v61 = vld [vmem:[#allocation2 + $0x3c] sm:$0xf] }
 0x23a   : > { %v1225_v8 = vrot.slane %v1221_v63, 4 }
 0x23b   : > { %v1232_v10 = vor.u32 %v1230_v3, %v1229_v2  ;;  %v1234_v11 = vrot.slane %v1229_v2, 4  ;;  %v5229_v13 = vpack.c.bf16 %v868_v5, %v868_v5  ;;  %v869_v14 = vmax.f32 %v827_v6, 0.0  ;;  %v5296_v15 = vpop.f32.mrb[16].mxu1  ;;  %v1377_v5 = vld [vmem:[#allocation2 + $0x44] sm:$0x1] }
 0x23c   : > { %v1360_v16 = vsel %vm7285_vm7, %v1224_v7, %v1359_v1  ;;  %v5297_v17 = vpop.f32.mrb[17].mxu1 }
 0x23d   : > { %1361 = vst [vmem:[#allocation2 + $0x24] sm:$0xf] %v1360_v16  ;;  %v1233_v18 = vsel %vm7290_vm8, %v1225_v8, %v1232_v10  ;;  %v1364_v19 = vsel %vm7221_vm2, %v1234_v11, %v1363_v9  ;;  %v1236_v20 = vshrl.u32 %v5229_v13, 16  ;;  %v5299_v21 = vpop.f32.mrb[18].mxu1  ;;  %v5230_v22 = vpack.c.bf16 %v869_v14, %v869_v14 }
 0x23e   : > { %1362 = vst [vmem:[#allocation2 + $0x28] sm:$0xf] %v1233_v18  ;;  %1365 = vst [vmem:[#allocation2 + $0x2c] sm:$0x1] %v1364_v19  ;;  %v5298_v23 = vadd.f32 %v5297_v17, %v5296_v15  ;;  %v5300_v24 = vpop.f32.mrb[19].mxu1  ;;  %v1239_v26 = vshll.u32 %v5229_v13, 16 }
 0x23f   : > { %v1238_v25 = vrot.slane %v1236_v20, 7  ;;  %v5301_v27 = vadd.f32 %v5300_v24, %v5299_v21  ;;  %v1244_v29 = vshrl.u32 %v5230_v22, 16  ;;  %v1247_v34 = vshll.u32 %v5230_v22, 16  ;;  %v1380_v24 = vld [vmem:[#allocation2 + $0x48] sm:$0xf] }
 0x240   : > { %v832_v30 = vadd.f32 %v5298_v23, %v7279_v44 }
 0x241   : > { %v1241_v31 = vor.u32 %v1239_v26, %v1238_v25  ;;  %v835_v32 = vadd.f32 %v5301_v27, %v7279_v44  ;;  %v1246_v33 = vrot.slane %v1244_v29, 7  ;;  %v1242_v41 = vrot.slane %v1238_v25, 4 }
 0x242   : > { %v870_v35 = vmax.f32 %v832_v30, 0.0 }
 0x243   : > { %v1367_v36 = vsel %vm7285_vm7, %v1241_v31, %v1366_v28  ;;  %v871_v38 = vmax.f32 %v835_v32, 0.0  ;;  %v5302_v39 = vpop.f32.mrb[20].mxu1  ;;  %v1249_v42 = vor.u32 %v1247_v34, %v1246_v33  ;;  %v1251_v43 = vrot.slane %v1246_v33, 4  ;;  %v1384_v33 = vld [vmem:[#allocation2 + $0x50] sm:$0x1] }
 0x244   : > { %1368 = vst [vmem:[#allocation2 + $0x30] sm:$0xf] %v1367_v36  ;;  %v5231_v45 = vpack.c.bf16 %v870_v35, %v870_v35  ;;  %v5303_v46 = vpop.f32.mrb[21].mxu1 }
 0x245   : > { %v5232_v47 = vpack.c.bf16 %v871_v38, %v871_v38  ;;  %v5304_v48 = vadd.f32 %v5303_v46, %v5302_v39  ;;  %v5305_v49 = vpop.f32.mrb[22].mxu1  ;;  %v1250_v51 = vsel %vm7290_vm8, %v1242_v41, %v1249_v42  ;;  %v1371_v52 = vsel %vm7221_vm2, %v1251_v43, %v1370_v37 }
 0x246   : > { %v1253_v54 = vshrl.u32 %v5231_v45, 16  ;;  %v5306_v55 = vpop.f32.mrb[23].mxu1  ;;  %1369 = vst [vmem:[#allocation2 + $0x34] sm:$0xf] %v1250_v51  ;;  %1372 = vst [vmem:[#allocation2 + $0x38] sm:$0x1] %v1371_v52 }
 0x247   : > { %v1261_v56 = vshrl.u32 %v5232_v47, 16  ;;  %v840_v57 = vadd.f32 %v5304_v48, %v7279_v44  ;;  %v5307_v58 = vadd.f32 %v5306_v55, %v5305_v49  ;;  %v1256_v60 = vshll.u32 %v5231_v45, 16 }
 0x248   : > { %v1255_v59 = vrot.slane %v1253_v54, 7  ;;  %v1264_v63 = vshll.u32 %v5232_v47, 16 }
 0x249   : > { %v1263_v62 = vrot.slane %v1261_v56, 7  ;;  %v872_v0 = vmax.f32 %v840_v57, 0.0  ;;  %v843_v1 = vadd.f32 %v5307_v58, %v7279_v44  ;;  %v1387_v57 = vld [vmem:[#allocation2 + $0x54] sm:$0xf] }
 0x24a   : > { %v1258_v2 = vor.u32 %v1256_v60, %v1255_v59  ;;  %v1259_v3 = vrot.slane %v1255_v59, 4 }
 0x24b   : > { %v1266_v6 = vor.u32 %v1264_v63, %v1263_v62  ;;  %v1268_v7 = vrot.slane %v1263_v62, 4  ;;  %v5233_v8 = vpack.c.bf16 %v872_v0, %v872_v0  ;;  %v873_v9 = vmax.f32 %v843_v1, 0.0  ;;  %v5308_v10 = vpop.f32.mrb[24].mxu1  ;;  %v1391_v0 = vld [vmem:[#allocation2 + $0x5c] sm:$0x1] }
 0x24c   : > { %v1374_v11 = vsel %vm7285_vm7, %v1258_v2, %v1373_v61  ;;  %v5309_v13 = vpop.f32.mrb[25].mxu1 }
 0x24d   : > { %1375 = vst [vmem:[#allocation2 + $0x3c] sm:$0xf] %v1374_v11  ;;  %v1267_v14 = vsel %vm7290_vm8, %v1259_v3, %v1266_v6  ;;  %v1378_v15 = vsel %vm7221_vm2, %v1268_v7, %v1377_v5  ;;  %v1270_v16 = vshrl.u32 %v5233_v8, 16  ;;  %v5311_v17 = vpop.f32.mrb[26].mxu1  ;;  %v5234_v18 = vpack.c.bf16 %v873_v9, %v873_v9 }
 0x24e   : > { %1376 = vst [vmem:[#allocation2 + $0x40] sm:$0xf] %v1267_v14  ;;  %1379 = vst [vmem:[#allocation2 + $0x44] sm:$0x1] %v1378_v15  ;;  %v5310_v19 = vadd.f32 %v5309_v13, %v5308_v10  ;;  %v5312_v20 = vpop.f32.mrb[27].mxu1  ;;  %v1273_v22 = vshll.u32 %v5233_v8, 16 }
 0x24f   : > { %v1272_v21 = vrot.slane %v1270_v16, 7  ;;  %v5313_v23 = vadd.f32 %v5312_v20, %v5311_v17  ;;  %v1278_v25 = vshrl.u32 %v5234_v18, 16  ;;  %v1281_v30 = vshll.u32 %v5234_v18, 16  ;;  %v7355_v17 = vld [vmem:[#allocation2 + $0xc] sm:$0xf] }
 0x250   : > { %v848_v26 = vadd.f32 %v5310_v19, %v7279_v44 }
 0x251   : > { %v1275_v27 = vor.u32 %v1273_v22, %v1272_v21  ;;  %v851_v28 = vadd.f32 %v5313_v23, %v7279_v44  ;;  %v1280_v29 = vrot.slane %v1278_v25, 7  ;;  %v1276_v36 = vrot.slane %v1272_v21, 4  ;;  %v1394_v21 = vld [vmem:[#allocation2 + $0x60] sm:$0xf] }
 0x252   : > { %v874_v31 = vmax.f32 %v848_v26, 0.0  ;;  %v941_v26 = vstv %s880_s2 }
 0x253   : > { %v1381_v32 = vsel %vm7285_vm7, %v1275_v27, %v1380_v24  ;;  %v875_v34 = vmax.f32 %v851_v28, 0.0  ;;  %v5314_v35 = vpop.f32.mrb[28].mxu1  ;;  %v1283_v37 = vor.u32 %v1281_v30, %v1280_v29  ;;  %v1285_v38 = vrot.slane %v1280_v29, 4  ;;  %v7358_v24 = vld [vmem:[#allocation2 + $0x10] sm:$0xf] }
 0x254   : > { %1382 = vst [vmem:[#allocation2 + $0x48] sm:$0xf] %v1381_v32  ;;  %v5235_v39 = vpack.c.bf16 %v874_v31, %v874_v31  ;;  %v5315_v41 = vpop.f32.mrb[29].mxu1  ;;  %v1469_v28 = vshrl.u32 %v7355_v17, 16  ;;  %v1398_v31 = vld [vmem:[#allocation2 + $0x68] sm:$0x1] }
 0x255   : > { %v5236_v42 = vpack.c.bf16 %v875_v34, %v875_v34  ;;  %v5316_v43 = vadd.f32 %v5315_v41, %v5314_v35  ;;  %v5317_v45 = vpop.f32.mrb[30].mxu1  ;;  %v1284_v46 = vsel %vm7290_vm8, %v1276_v36, %v1283_v37  ;;  %v1385_v47 = vsel %vm7221_vm2, %v1285_v38, %v1384_v33 }
 0x256   : > { %v1287_v48 = vshrl.u32 %v5235_v39, 16  ;;  %v5318_v49 = vpop.f32.mrb[31].mxu1  ;;  %1383 = vst [vmem:[#allocation2 + $0x4c] sm:$0xf] %v1284_v46  ;;  %1386 = vst [vmem:[#allocation2 + $0x50] sm:$0x1] %v1385_v47 }
 0x257   : > { %v1295_v51 = vshrl.u32 %v5236_v42, 16  ;;  %v856_v52 = vadd.f32 %v5316_v43, %v7279_v44  ;;  %v5319_v54 = vadd.f32 %v5318_v49, %v5317_v45  ;;  %v1290_v56 = vshll.u32 %v5235_v39, 16 }
 0x258   : > { %v1289_v55 = vrot.slane %v1287_v48, 7  ;;  %v1298_v59 = vshll.u32 %v5236_v42, 16  ;;  %v1472_v33 = vshll.u32 %v7355_v17, 16  ;;  %v1478_v36 = vshll.u32 %v7358_v24, 16 }
 0x259   : > { %v1297_v58 = vrot.slane %v1295_v51, 7  ;;  %v876_v60 = vmax.f32 %v856_v52, 0.0  ;;  %v859_v61 = vadd.f32 %v5319_v54, %v7279_v44  ;;  %v1482_v37 = vshrl.u32 %v7358_v24, 16  ;;  %v7371_v51 = vld [vmem:[#allocation2 + $0x18] sm:$0xf] }
 0x25a   : > { %v1292_v62 = vor.u32 %v1290_v56, %v1289_v55  ;;  %v1293_v63 = vrot.slane %v1289_v55, 4  ;;  %v1471_v43 = vrot.slane %v1469_v28, 4  ;;  %v1474_v48 = vrot.slane %v1472_v33, 5  ;;  %v1095_v56 = vld [vmem:[#allocation2] sm:$0xf] }
 0x25b   : > { %v1300_v1 = vor.u32 %v1298_v59, %v1297_v58  ;;  %v1302_v2 = vrot.slane %v1297_v58, 4  ;;  %v5237_v3 = vpack.c.bf16 %v876_v60, %v876_v60  ;;  %v877_v5 = vmax.f32 %v859_v61, 0.0  ;;  %v5336_v6 = vpop.f32.mrb[32].mxu1  ;;  %v7375_v58 = vld [vmem:[#allocation2 + $0x1c] sm:$0xf] }
 0x25c   : > { %v1388_v7 = vsel %vm7285_vm7, %v1292_v62, %v1387_v57  ;;  %v5337_v8 = vpop.f32.mrb[33].mxu1  ;;  %v7373_v54 = vrot.slane %v1478_v36, 5  ;;  %v1484_v55 = vrot.slane %v1482_v37, 4  ;;  %v1475_v61 = vor.u32 %v1474_v48, %v1471_v43  ;;  %v7415_v36 = vld [vmem:[#allocation2 + $0x34] sm:$0xf] }
 0x25d   : > { %1389 = vst [vmem:[#allocation2 + $0x54] sm:$0xf] %v1388_v7  ;;  %v1301_v9 = vsel %vm7290_vm8, %v1293_v63, %v1300_v1  ;;  %v1392_v10 = vsel %vm7221_vm2, %v1302_v2, %v1391_v0  ;;  %v1304_v11 = vshrl.u32 %v5237_v3, 16  ;;  %v5339_v13 = vpop.f32.mrb[34].mxu1  ;;  %v5238_v14 = vpack.c.bf16 %v877_v5, %v877_v5  ;;  %v7378_v63 = vld [vmem:[#allocation2 + $0x14] sm:$0x1] }
 0x25e   : > { %1390 = vst [vmem:[#allocation2 + $0x58] sm:$0xf] %v1301_v9  ;;  %1393 = vst [vmem:[#allocation2 + $0x5c] sm:$0x1] %v1392_v10  ;;  %v5338_v15 = vadd.f32 %v5337_v8, %v5336_v6  ;;  %v5340_v16 = vpop.f32.mrb[35].mxu1  ;;  %v1307_v19 = vshll.u32 %v5237_v3, 16  ;;  %v1485_v8 = vor.u32 %v1484_v55, %v7373_v54  ;;  %v5021_v33 = vcombine.low %v7355_v17, %v7358_v24 }
 0x25f   : > { %v1306_v18 = vrot.slane %v1304_v11, 7  ;;  %v5341_v20 = vadd.f32 %v5340_v16, %v5339_v13  ;;  %v1312_v22 = vshrl.u32 %v5238_v14, 16  ;;  %v1315_v30 = vshll.u32 %v5238_v14, 16  ;;  %v1099_v5 = vld [vmem:[#allocation2 + $0x8] sm:$0x1] }
 0x260   : > { %v933_v23 = vadd.f32 %v5338_v15, %v7279_v44  ;;  %v1493_v62 = vshrl.u32 %v7371_v51, 16  ;;  %v1496_v2 = vshll.u32 %v7371_v51, 16  ;;  %v1506_v6 = vshrl.u32 %v7375_v58, 16  ;;  %v7382_v7 = vld [vmem:[#allocation2 + $0x24] sm:$0xf] }
 0x261   : > { %v1309_v25 = vor.u32 %v1307_v19, %v1306_v18  ;;  %v936_v27 = vadd.f32 %v5341_v20, %v7279_v44  ;;  %v1314_v29 = vrot.slane %v1312_v22, 7  ;;  %v1310_v38 = vrot.slane %v1306_v18, 4 }
 0x262   : > { %v939_v32 = vmax.f32 %v933_v23, 0.0  ;;  %v1502_v13 = vshll.u32 %v7375_v58, 16  ;;  %v1476_v15 = vrot.slane %v1475_v61, 4  ;;  %v1495_v16 = vrot.slane %v1493_v62, 4  ;;  %v7394_v23 = vld [vmem:[#allocation2 + $0x28] sm:$0xf] }
 0x263   : > { %v1395_v34 = vsel %vm7285_vm7, %v1309_v25, %v1394_v21  ;;  %v940_v35 = vmax.f32 %v936_v27, 0.0  ;;  %v1317_v39 = vor.u32 %v1315_v30, %v1314_v29  ;;  %v1319_v44 = vrot.slane %v1314_v29, 4  ;;  %v7397_v27 = vld [vmem:[#allocation2 + $0x20] sm:$0x1]  ;;  %v3952_v30 = vld [vmem:[#allocation2 + $0x24] sm:$0xe] }
 0x264   : > { %1396 = vst [vmem:[#allocation2 + $0x60] sm:$0xf] %v1395_v34  ;;  %v942_v41 = vmul.f32 %v941_v26, %v939_v32  ;;  %v1488_v18 = vshll.u32 %v7378_v63, 16  ;;  %v1498_v21 = vrot.slane %v1496_v2, 5  ;;  %v1517_v22 = vshrl.u32 %v7382_v7, 16  ;;  %v6155_v2 = vld [vmem:[#allocation11 + $0x88] sm:$0xff]  }
 0x265   : > { %v943_v42 = vmul.f32 %v941_v26, %v940_v35  ;;  %v1318_v45 = vsel %vm7290_vm8, %v1310_v38, %v1317_v39  ;;  %v1399_v46 = vsel %vm7221_vm2, %v1319_v44, %v1398_v31  ;;  %v1520_v25 = vshll.u32 %v7382_v7, 16  ;;  %v7407_v32 = vld [vmem:[#allocation2 + $0x30] sm:$0xf] }
 0x266   : > { %v5219_v47 = vpack.c.bf16 %v942_v41, %v942_v41  ;;  %1397 = vst [vmem:[#allocation2 + $0x64] sm:$0xf] %v1318_v45  ;;  %1400 = vst [vmem:[#allocation2 + $0x68] sm:$0x1] %v1399_v46  ;;  %v1486_v26 = vrot.slane %v1485_v8, 4  ;;  %v7399_v28 = vrot.slane %v1502_v13, 5  ;;  %v5022_v34 = vcombine.low %v7371_v51, %v7375_v58 }
 0x267   : > { %v5220_v49 = vpack.c.bf16 %v943_v42, %v943_v42  ;;  %v1508_v29 = vrot.slane %v1506_v6, 4  ;;  %v1490_v31 = vrot.slane %v1488_v18, 5  ;;  %v7413_v35 = vrot.slane %v1517_v22, 4  ;;  %v7455_v22 = vld [vmem:[#allocation2 + $0x2c] sm:$0x1] }
 0x268   : > { %v1074_v52 = vshrl.u32 %v5219_v47, 16  ;;  %v1077_v60 = vshll.u32 %v5219_v47, 16  ;;  %v7417_v37 = vrot.slane %v1520_v25, 5  ;;  %v1530_v38 = vshrl.u32 %v7394_v23, 16 }
 0x269   : > { %v1082_v57 = vshrl.u32 %v5220_v49, 16  ;;  %v1085_v1 = vshll.u32 %v5220_v49, 16  ;;  %v1491_v39 = vsel %vm7403_vm11, %v1486_v26, %v1490_v31  ;;  %v1499_v44 = vor.u32 %v1498_v21, %v1495_v16  ;;  %v6158_v26 = vld [vmem:[#allocation11 + $0x90] sm:$0xff]  }
 0x26a   : > { %v1076_v59 = vrot.slane %v1074_v52, 7  ;;  %v1481_v41 = vsel %vm7403_vm11, %v1476_v15, %v7373_v54  ;;  %v1541_v17 = vshrl.u32 %v7407_v32, 16  ;;  %v1544_v42 = vshll.u32 %v7407_v32, 16 }
 0x26b   : > { %v1084_v0 = vrot.slane %v1082_v57, 7  ;;  %v1509_v43 = vor.u32 %v1508_v29, %v7399_v28  ;;  %v1554_v46 = vshrl.u32 %v7415_v36, 16  ;;  %v1512_v47 = vshll.u32 %v7397_v27, 16 }
 0x26c   : > { %v1079_v3 = vor.u32 %v1077_v60, %v1076_v59  ;;  %v1080_v9 = vrot.slane %v1076_v59, 4  ;;  %v1526_v48 = vshll.u32 %v7394_v23, 16  ;;  %v1550_v49 = vshll.u32 %v7415_v36, 16 }
 0x26d   : > { %v1087_v10 = vor.u32 %v1085_v1, %v1084_v0  ;;  %v1089_v11 = vrot.slane %v1084_v0, 4  ;;  %v7438_v57 = vcombine.low %v1481_v41, %v1491_v39  ;;  %v1500_v62 = vrot.slane %v1499_v44, 4  ;;  %v7467_v44 = vld [vmem:[#allocation2 + $0x38] sm:$0x1] }
 0x26e   : > { %v1096_v14 = vsel %vm7285_vm7, %v1079_v3, %v1095_v56  ;;  %v5023_v56 = vcombine.low %v7382_v7, %v7394_v23  ;;  %v1510_v3 = vrot.slane %v1509_v43, 4  ;;  %v7444_v7 = vld [vmem:[#allocation2 + $0x3c] sm:$0xf]  ;;  %v1514_v13 = vrot.slane %v1512_v47, 5 }
 0x26f   : > { %1097 = vst [vmem:[#allocation2] sm:$0xf] %v1096_v14  ;;  %v1088_v19 = vsel %vm7290_vm8, %v1080_v9, %v1087_v10  ;;  %v1100_v20 = vsel %vm7221_vm2, %v1089_v11, %v1099_v5  ;;  %v1532_v5 = vrot.slane %v1530_v38, 4  ;;  %v7446_v10 = vrot.slane %v1526_v48, 5  ;;  %v7448_v14 = vld [vmem:[#allocation2 + $0x40] sm:$0xf] }
 0x270   : > { %1098 = vst [vmem:[#allocation2 + $0x4] sm:$0xf] %v1088_v19  ;;  %1101 = vst [vmem:[#allocation2 + $0x8] sm:$0x1] %v1100_v20  ;;  %v7450_v15 = vrot.slane %v1550_v49, 5  ;;  %v1556_v16 = vrot.slane %v1554_v46, 4  ;;  %v5024_v21 = vcombine.low %v7407_v32, %v7415_v36  ;;  %v1505_v29 = vsel %vm7403_vm11, %v1500_v62, %v7399_v28 }
 0x271   : > { %v1543_v19 = vrot.slane %v1541_v17, 4  ;;  %v1546_v20 = vrot.slane %v1544_v42, 5  ;;  %v1515_v31 = vsel %vm7403_vm11, %v1510_v3, %v1514_v13  ;;  %v1578_v32 = vshrl.u32 %v7448_v14, 16  ;;  %v7472_v17 = vld [vmem:[#allocation2 + $0x48] sm:$0xf] }
 0x272   : > { %v1533_v39 = vor.u32 %v1532_v5, %v7446_v10  ;;  %v1523_v41 = vor.u32 %v7417_v37, %v7413_v35  ;;  %v1536_v28 = vshll.u32 %v7455_v22, 16  ;;  %v1557_v42 = vor.u32 %v1556_v16, %v7450_v15 }
 0x273   : > { %v1574_v43 = vshll.u32 %v7448_v14, 16  ;;  %v1568_v37 = vshll.u32 %v7444_v7, 16  ;;  %v1547_v49 = vor.u32 %v1546_v20, %v1543_v19  ;;  %v1592_v62 = vshll.u32 %v7472_v17, 16  ;;  %v7497_v19 = vld [vmem:[#allocation2 + $0x54] sm:$0xf]  ;;  %v6162_v20 = vld [vmem:[#allocation11 + $0xa0] sm:$0xff]  }
 0x274   : > { %v1580_v5 = vrot.slane %v1578_v32, 4  ;;  %v5025_v13 = vcombine.low %v7444_v7, %v7448_v14 }
 0x275   : > { %v7490_v3 = vrot.slane %v1574_v43, 5  ;;  %v1548_v16 = vrot.slane %v1547_v49, 4 }
 0x276   : > { %v1401_v45 = vld [vmem:[#allocation2] sm:$0xf] }
 0x277   : > { %v7432_v51 = vld [vmem:[#allocation2 + $0x4] sm:$0xf]  ;;  %v1445_v52 = vshrl.u32 %v1401_v45, 16  ;;  %v1448_v55 = vshll.u32 %v1401_v45, 16  ;;  %v7434_v54 = vld [vmem:[#allocation2 + $0x8] sm:$0x1] }
 0x278   : > { %v1454_v59 = vshll.u32 %v7432_v51, 16  ;;  %v1458_v60 = vshrl.u32 %v7432_v51, 16  ;;  %v5020_v61 = vcombine.low %v1401_v45, %v7432_v51  ;;  %v1464_v9 = vshll.u32 %v7434_v54, 16 }
 0x279   : > { %v1447_v0 = vrot.slane %v1445_v52, 4  ;;  %v1450_v1 = vrot.slane %v1448_v55, 5  ;;  %v1560_v52 = vshll.u32 %v7467_v44, 16  ;;  %v6160_v55 = vld [vmem:[#allocation11 + $0x98] sm:$0xff]  }
 0x27a   : > { %v1456_v6 = vrot.slane %v1454_v59, 5  ;;  %v1460_v8 = vrot.slane %v1458_v60, 4  ;;  %5556 = vmatprep.mubr.bf16.mxu0 %v5020_v61  ;;  %v1466_v38 = vrot.slane %v1464_v9, 5  ;;  %v1534_v60 = vrot.slane %v1533_v39, 4 }
 0x27b   : > { %v1451_v11 = vor.u32 %v1450_v1, %v1447_v0  ;;  %5557 = vmatmul.mubr.bf16.vlgmr.msra.gmra.mrb[0].mxu0 %v5021_v33  ;;  %v7463_v33 = vld [vmem:[#allocation2 + $0x4c] sm:$0xf]  ;;  %v1589_v61 = vshrl.u32 %v7472_v17, 16  ;;  %v5006_v0 = vcombine.low %v1505_v29, %v1515_v31  ;;  %v1558_v1 = vrot.slane %v1557_v42, 4  ;;  %v7502_v31 = vld [vmem:[#allocation2 + $0x44] sm:$0x1] }
 0x27c   : > { %5560 = vmatprep.mubr.bf16.mxu0 %v5022_v34  ;;  %5573 = vmatpush3.bf16.msra.mxu0 %v7273_v40  ;;  %v1461_v18 = vor.u32 %v1460_v8, %v1456_v6  ;;  %v1565_v40 = vshrl.u32 %v7444_v7, 16  ;;  %v1602_v47 = vshrl.u32 %v7463_v33, 16  ;;  %v1598_v48 = vshll.u32 %v7463_v33, 16 }
 0x27d   : > { %v1452_v25 = vrot.slane %v1451_v11, 4  ;;  %5574 = vmatprep.subr.bf16.mxu0 %v6155_v2  ;;  %v1538_v8 = vrot.slane %v1536_v28, 5  ;;  %v5026_v39 = vcombine.low %v7472_v17, %v7463_v33  ;;  %v1553_v28 = vsel %vm7403_vm11, %v1548_v16, %v7450_v15 }
 0x27e   : > { %v1462_v34 = vrot.slane %v1461_v18, 4  ;;  %v7484_v59 = vrot.slane %v1565_v40, 4  ;;  %v7493_v9 = vrot.slane %v1598_v48, 5  ;;  %v1604_v11 = vrot.slane %v1602_v47, 4  ;;  %v6164_v47 = vld [vmem:[#allocation11 + $0xa8] sm:$0xff]  }
 0x27f   : > { %v1457_v45 = vsel %vm7403_vm11, %v1452_v25, %v1456_v6  ;;  %v1524_v6 = vrot.slane %v1523_v41, 4  ;;  %v1562_v18 = vrot.slane %v1560_v52, 5  ;;  %v1594_v25 = vrot.slane %v1592_v62, 5 }
 0x280   : > { %5575 = vmatpush3.bf16.msra.mxu0 %v6155_v2  ;;  %v1467_v46 = vsel %vm7403_vm11, %v1462_v34, %v1466_v38  ;;  %v7488_v2 = vld [vmem:[#allocation2 + $0x58] sm:$0xf]  ;;  %v1581_v40 = vor.u32 %v1580_v5, %v7490_v3  ;;  %v7508_v34 = vld [vmem:[#allocation2 + $0x50] sm:$0x1]  ;;  %v1613_v41 = vshrl.u32 %v7497_v19, 16  ;;  %v1616_v42 = vshll.u32 %v7497_v19, 16 }
 0x281   : > { %v5004_v35 = vcombine.low %v1457_v45, %v1467_v46  ;;  %5576 = vmatprep.subr.bf16.mxu0 %v6158_v26  ;;  %v1626_v29 = vshrl.u32 %v7488_v2, 16  ;;  %v1563_v7 = vsel %vm7403_vm11, %v1558_v1, %v1562_v18  ;;  %v1622_v38 = vshll.u32 %v7488_v2, 16  ;;  %v7528_v5 = vpop.f32.mrb[36].mxu1 }
 0x282   : > { %v1529_v32 = vsel %vm7403_vm11, %v1524_v6, %v7446_v10  ;;  %v1584_v45 = vshll.u32 %v7502_v31, 16  ;;  %v5008_v46 = vcombine.low %v1553_v28, %v1563_v7  ;;  %v1608_v48 = vshll.u32 %v7508_v34, 16  ;;  %v7539_v16 = vpop.f32.mrb[37].mxu1 }
 0x283   : > { %5524 = vmatprep.mubr.bf16.mxu1 %v5004_v35  ;;  %5561 = vmatmul.mubr.bf16.gmra.mrb[4].mxu0 %v5023_v56  ;;  %v1570_v56 = vrot.slane %v1568_v37, 5  ;;  %v1582_v35 = vrot.slane %v1581_v40, 4  ;;  %v7525_v49 = vrot.slane %v1622_v38, 5  ;;  %v1628_v52 = vrot.slane %v1626_v29, 4  ;;  %v7551_v29 = vpop.f32.mrb[38].mxu1 }
 0x284   : > { %5525 = vmatmul.mubr.bf16.vlgmr.msra.gmra.mrb[40].mxu1 %v7438_v57  ;;  %5564 = vmatprep.mubr.bf16.mxu0 %v5024_v21  ;;  %v1539_v57 = vsel %vm7403_vm11, %v1534_v60, %v1538_v8  ;;  %v1591_v21 = vrot.slane %v1589_v61, 4  ;;  %v1615_v15 = vrot.slane %v1613_v41, 4  ;;  %v1618_v60 = vrot.slane %v1616_v42, 5  ;;  %v6166_v61 = vld [vmem:[#allocation11 + $0xb0] sm:$0xff]  }
 0x285   : > { %5577 = vmatpush3.bf16.msra.mxu0 %v6158_v26  ;;  %5528 = vmatprep.mubr.bf16.mxu1 %v5006_v0  ;;  %v2052_v26 = vrot.slane %v7432_v51, 5  ;;  %v1605_v51 = vor.u32 %v1604_v11, %v7493_v9  ;;  %v1571_v43 = vor.u32 %v1570_v56, %v7484_v59  ;;  %v5007_v10 = vcombine.low %v1529_v32, %v1539_v57 }
 0x286   : > { %5578 = vmatprep.subr.bf16.mxu0 %v6160_v55  ;;  %v1595_v17 = vor.u32 %v1594_v25, %v1591_v21  ;;  %v1586_v0 = vrot.slane %v1584_v45, 5  ;;  %v2055_v1 = vrot.slane %v7434_v54, 5  ;;  %v2059_v6 = vrot.slane %v7358_v24, 5 }
 0x287   : > { %v2054_v37 = vrot.slane %v2052_v26, 4  ;;  %v1606_v59 = vrot.slane %v1605_v51, 4  ;;  %v1572_v62 = vrot.slane %v1571_v43, 4  ;;  %v1610_v56 = vrot.slane %v1608_v48, 5  ;;  %v6167_v51 = vld [vmem:[#allocation11 + $0xb8] sm:$0xff]  }
 0x288   : > { %v1596_v11 = vrot.slane %v1595_v17, 4  ;;  %v1587_v54 = vsel %vm7403_vm11, %v1582_v35, %v1586_v0  ;;  %v5027_v57 = vcombine.low %v7497_v19, %v7488_v2  ;;  %v2066_v25 = vrot.slane %v7375_v58, 5  ;;  %v6168_v17 = vld [vmem:[#allocation11 + $0xc0] sm:$0xff]  }
 0x289   : > { %5579 = vmatpush3.bf16.msra.mxu0 %v6160_v55  ;;  %v2023_v55 = vld [vmem:[#allocation2] sm:$0xe]  ;;  %v2056_v24 = vsel %vm7533_vm14, %v2054_v37, %v2055_v1  ;;  %v1611_v21 = vsel %vm7403_vm11, %v1606_v59, %v1610_v56  ;;  %v1577_v7 = vsel %vm7403_vm11, %v1572_v62, %v7490_v3  ;;  %v1619_v38 = vor.u32 %v1618_v60, %v1615_v15  ;;  %v2027_v56 = vld [vmem:[#allocation2 + $0x30] sm:$0xe] }
 0x28a   : > { %5580 = vmatprep.subr.bf16.mxu0 %v6162_v20  ;;  %v5036_v18 = vrot.slane %v2023_v55, 9  ;;  %v5009_v19 = vcombine.low %v1577_v7, %v1587_v54  ;;  %v1601_v58 = vsel %vm7403_vm11, %v1596_v11, %v7493_v9  ;;  %v2061_v28 = vrot.slane %v2059_v6, 4  ;;  %v6169_v62 = vld [vmem:[#allocation11 + $0xc8] sm:$0xff]  }
 0x28b   : > { %5565 = vmatmul.mubr.bf16.gmra.mrb[8].mxu0 %v5025_v13  ;;  %v7537_v13 = vld [vmem:[#allocation2 + $0x5c] sm:$0x1]  ;;  %v5010_v42 = vcombine.low %v1601_v58, %v1611_v21  ;;  %v2068_v43 = vrot.slane %v2066_v25, 4  ;;  %v2062_v45 = vrot.slane %v7378_v63, 5  ;;  %v2069_v9 = vrot.slane %v7397_v27, 5 }
 0x28c   : > { %5529 = vmatmul.mubr.bf16.gmra.mrb[44].mxu1 %v5007_v10  ;;  %5568 = vmatprep.mubr.bf16.mxu0 %v5026_v39  ;;  %v2053_v40 = vsel %vm7533_vm14, %v5036_v18, %v2052_v26  ;;  %v1632_v32 = vshll.u32 %v7537_v13, 16  ;;  %v7559_v39 = vpop.f32.mrb[39].mxu1  ;;  %v2024_v26 = vld [vmem:[#allocation2 + $0xc] sm:$0xe]  ;;  %v1620_v10 = vrot.slane %v1619_v38, 4  ;;  %v2080_v55 = vrot.slane %v7415_v36, 5 }
 0x28d   : > { %5581 = vmatpush3.bf16.msra.mxu0 %v6162_v20  ;;  %5532 = vmatprep.mubr.bf16.mxu1 %v5008_v46  ;;  %v1629_v20 = vor.u32 %v1628_v52, %v7525_v49  ;;  %v5044_v41 = vcombine.low %v2053_v40, %v2056_v24  ;;  %v5037_v48 = vrot.slane %v2024_v26, 9  ;;  %v2063_v35 = vsel %vm7533_vm14, %v2061_v28, %v2062_v45  ;;  %v2026_v36 = vld [vmem:[#allocation2 + $0x24] sm:$0xe]  ;;  %v6171_v40 = vld [vmem:[#allocation11 + $0xd8] sm:$0xff]   ;;  %v6172_v58 = vld [vmem:[#allocation11 + $0xe0] sm:$0xff]  }
 0x28e   : > { %5582 = vmatprep.subr.bf16.mxu0 %v6164_v47  ;;  %v1634_v46 = vrot.slane %v1632_v32, 5  ;;  %v2073_v52 = vrot.slane %v7394_v23, 5  ;;  %v2070_v63 = vsel %vm7533_vm14, %v2068_v43, %v2069_v9  ;;  %v1625_v27 = vsel %vm7403_vm11, %v1620_v10, %v7525_v49  ;;  %v6170_v49 = vld [vmem:[#allocation11 + $0xd0] sm:$0xff]   ;;  %v6173_v10 = vld [vmem:[#allocation11 + $0xe8] sm:$0xff]  }
 0x28f   : > { %v1630_v3 = vrot.slane %v1629_v20, 4  ;;  %v2060_v59 = vsel %vm7533_vm14, %v5037_v48, %v2059_v6  ;;  %v2082_v11 = vrot.slane %v2080_v55, 4  ;;  %v2076_v6 = vrot.slane %v7455_v22, 5  ;;  %v6174_v9 = vld [vmem:[#allocation11 + $0xf0] sm:$0xff]  }
 0x290   : > { %v5045_v60 = vcombine.low %v2060_v59, %v2063_v35  ;;  %v2075_v1 = vrot.slane %v2073_v52, 4  ;;  %v2083_v54 = vrot.slane %v7467_v44, 5  ;;  %v5039_v18 = vrot.slane %v2026_v36, 9  ;;  %v1062_v59 = vld [vmem:[#allocation2 + $0x74] sm:$0x1] }
 0x291   : > { %5583 = vmatpush3.bf16.msra.mxu0 %v6164_v47  ;;  %v2025_v47 = vld [vmem:[#allocation2 + $0x18] sm:$0xe]  ;;  %v1635_v37 = vsel %vm7403_vm11, %v1630_v3, %v1634_v46  ;;  %v2087_v20 = vrot.slane %v7448_v14, 5  ;;  %v2028_v14 = vld [vmem:[#allocation2 + $0x3c] sm:$0xe]  ;;  %v2101_v3 = vrot.slane %v7488_v2, 5 }
 0x292   : > { %5584 = vmatprep.subr.bf16.mxu0 %v6166_v61  ;;  %v5038_v15 = vrot.slane %v2025_v47, 9  ;;  %v2077_v24 = vsel %vm7533_vm14, %v2075_v1, %v2076_v6  ;;  %v2084_v21 = vsel %vm7533_vm14, %v2082_v11, %v2083_v54  ;;  %v2074_v22 = vsel %vm7533_vm14, %v5039_v18, %v2073_v52  ;;  %v6179_v11 = vld [vmem:[#allocation2 + $0x24] sm:$0xff]  }
 0x293   : > { %5569 = vmatmul.mubr.bf16.gmra.mrb[12].mxu0 %v5027_v57  ;;  %v5040_v57 = vrot.slane %v2027_v56, 9  ;;  %v5047_v7 = vcombine.low %v2074_v22, %v2077_v24  ;;  %v2089_v32 = vrot.slane %v2087_v20, 4  ;;  %v5041_v28 = vrot.slane %v2028_v14, 9  ;;  %v7627_v22 = vld [vmem:[#allocation2 + $0x14] sm:$0x1] }
 0x294   : > { %5533 = vmatmul.mubr.bf16.gmra.mrb[48].mxu1 %v5009_v19  ;;  %5588 = vmatprep.mubr.bf16.mxu0 %v5044_v41  ;;  %v2067_v23 = vsel %vm7533_vm14, %v5038_v15, %v2066_v25  ;;  %v2094_v25 = vrot.slane %v7463_v33, 5  ;;  %v2090_v41 = vrot.slane %v7502_v31, 5  ;;  %v2029_v33 = vld [vmem:[#allocation2 + $0x48] sm:$0xe]  ;;  %v2103_v47 = vrot.slane %v2101_v3, 4  ;;  %v6176_v15 = vld [vmem:[#allocation11 + $0xf8] sm:$0xff]  }
 0x295   : > { %5585 = vmatpush3.bf16.msra.mxu0 %v6166_v61  ;;  %5536 = vmatprep.mubr.bf16.mxu1 %v5010_v42  ;;  %v5011_v61 = vcombine.low %v1625_v27, %v1635_v37  ;;  %v5046_v0 = vcombine.low %v2067_v23, %v2070_v63  ;;  %v2081_v44 = vsel %vm7533_vm14, %v5040_v57, %v2080_v55  ;;  %v5042_v26 = vrot.slane %v2029_v33, 9  ;;  %v6175_v63 = vld [vmem:[#allocation2 + $0xc] sm:$0xff]   ;;  %v6177_v23 = vld [vmem:[#allocation2 + $0x18] sm:$0xff]  }
 0x296   : > { %5586 = vmatprep.subr.bf16.mxu0 %v6167_v51  ;;  %v5048_v38 = vcombine.low %v2081_v44, %v2084_v21  ;;  %v2096_v19 = vrot.slane %v2094_v25, 4  ;;  %v2091_v42 = vsel %vm7533_vm14, %v2089_v32, %v2090_v41  ;;  %v2088_v45 = vsel %vm7533_vm14, %v5041_v28, %v2087_v20  ;;  %v1030_v55 = vld [vmem:[#allocation2 + $0x6c] sm:$0x1]  ;;  %v7625_v20 = vld [vmem:[#allocation2 + $0x1c] sm:$0xf]  ;;  %v6184_v32 = vld [vmem:[#allocation11 + $0x118] sm:$0xff]  }
 0x297   : > { %v5049_v31 = vcombine.low %v2088_v45, %v2091_v42  ;;  %v2104_v2 = vrot.slane %v7537_v13, 5  ;;  %v6178_v13 = vld [vmem:[#allocation11 + $0x100] sm:$0xff]   ;;  %v2558_v27 = vld [vmem:[#allocation2 + $0xc] sm:$0xf]  ;;  %v5363_v1 = vadd.f32 %v7559_v39, %v7551_v29  ;;  %v1063_v36 = vsel %vm7229_vm4, 0, %v1062_v59 }
 0x298   : > { %1064 = vst [vmem:[#allocation2 + $0x74] sm:$0x1] %v1063_v36  ;;  %v997_v6 = vstv %s883_s0  ;;  %v6182_v29 = vld [vmem:[#allocation11 + $0x110] sm:$0xff]   ;;  %v2586_v24 = vshll.u32 %v2558_v27, 16  ;;  %v2561_v21 = vld [vmem:[#allocation2 + $0x18] sm:$0xf]  ;;  %s8329_s0 = smov %s8328_s20 }
 0x299   : > { %5587 = vmatpush3.bf16.msra.mxu0 %v6167_v51  ;;  %v2097_v51 = vrot.slane %v7508_v34, 5  ;;  %v2095_v34 = vsel %vm7533_vm14, %v5042_v26, %v2094_v25  ;;  %v2105_v35 = vsel %vm7533_vm14, %v2103_v47, %v2104_v2  ;;  %v2620_v41 = vshrl.u32 %v7625_v20, 16  ;;  %v2564_v26 = vld [vmem:[#allocation2 + $0x24] sm:$0xf]  ;;  %v6186_v47 = vld [vmem:[#allocation11 + $0x120] sm:$0xff]  }
 0x29a   : > { %5604 = vmatprep.subr.bf16.mxu0 %v6168_v17  ;;  %v2607_v28 = vshrl.u32 %v2561_v21, 16  ;;  %v6621_v8 = vmov 0  }
 0x29b   : > { %v2098_v43 = vsel %vm7533_vm14, %v2096_v19, %v2097_v51  ;;  %v2616_v19 = vshll.u32 %v7625_v20, 16  ;;  %v2588_v51 = vrot.slane %v2586_v24, 5  ;;  %v7656_v24 = vld [vmem:[#allocation2 + $0x34] sm:$0xf] }
 0x29c   : > { %5589 = vmatmul.mubr.bf16.vlgmr.msra.gmra.mrb[0].mxu0 %v5045_v60  ;;  %5537 = vmatmul.mubr.bf16.gmra.mrb[52].mxu1 %v5011_v61  ;;  %v5050_v46 = vcombine.low %v2095_v34, %v2098_v43  ;;  %v5360_v60 = vadd.f32 %v7539_v16, %v7528_v5  ;;  %v1031_v61 = vsel %vm7221_vm2, 0, %v1030_v55  ;;  %v6256_v5 = vld [vmem:[%s8315_s24] ss:$0 sm:$0xff]  ;;  %v2610_v34 = vshll.u32 %v2561_v21, 16 }
 0x29d   : > { %5592 = vmatprep.mubr.bf16.mxu0 %v5046_v0  ;;  %5605 = vmatpush3.bf16.msra.mxu0 %v6168_v17  ;;  %v2030_v17 = vld [vmem:[#allocation2 + $0x54] sm:$0xe]  ;;  %v7614_v0 = vld [vmem:[#allocation2 + $0x10] sm:$0xf]  ;;  %1032 = vst [vmem:[#allocation2 + $0x6c] sm:$0x1] %v1031_v61  ;;  %v992_v56 = vadd.f32 %v6256_v5, %v5363_v1 }
 0x29e   : > { %5606 = vmatprep.subr.bf16.mxu0 %v6169_v62  ;;  %v5043_v48 = vrot.slane %v2030_v17, 9  ;;  %v989_v16 = vadd.f32 %v6256_v5, %v5360_v60  ;;  %v2592_v54 = vshll.u32 %v7614_v0, 16  ;;  %v2596_v53 = vshrl.u32 %v7614_v0, 16  ;;  %v7644_v61 = vld [vmem:[#allocation2 + $0x20] sm:$0x1]  ;;  %4436 = vmatprep.mubr.bf16.mxu1 %v6621_v8 }
 0x29f   : > { %v996_v39 = vmax.f32 %v992_v56, 0.0  ;;  %v7639_v2 = vrot.slane %v2616_v19, 5  ;;  %v2634_v1 = vshll.u32 %v2564_v26, 16  ;;  %v6188_v5 = vld [vmem:[#allocation11 + $0x128] sm:$0xff]  }
 0x2a0   : > { %v2102_v37 = vsel %vm7533_vm14, %v5043_v48, %v2101_v3  ;;  %v995_v18 = vmax.f32 %v989_v16, 0.0  ;;  %v7631_v44 = vrot.slane %v2592_v54, 5  ;;  %v2598_v14 = vrot.slane %v2596_v53, 4  ;;  %v6187_v54 = vld [vmem:[#allocation2 + $0x54] sm:$0xff]  }
 0x2a1   : > { %5607 = vmatpush3.bf16.msra.mxu0 %v6169_v62  ;;  %v5051_v52 = vcombine.low %v2102_v37, %v2105_v35  ;;  %v6180_v62 = vld [vmem:[#allocation11 + $0x108] sm:$0xff]   ;;  %v999_v25 = vmul.f32 %v997_v6, %v996_v39  ;;  %v2636_v50 = vrot.slane %v2634_v1, 5  ;;  %v6192_v1 = vld [vmem:[#allocation11 + $0x140] sm:$0xff]  }
 0x2a2   : > { %5608 = vmatprep.subr.bf16.mxu0 %v6170_v49  ;;  %v998_v57 = vmul.f32 %v997_v6, %v995_v18  ;;  %v2599_v17 = vor.u32 %v2598_v14, %v7631_v44  ;;  %v2567_v18 = vld [vmem:[#allocation2 + $0x30] sm:$0xf] }
 0x2a3   : > { %v5222_v33 = vpack.c.bf16 %v999_v25, %v999_v25  ;;  %v7658_v25 = vld [vmem:[#allocation2 + $0x40] sm:$0xf]  ;;  %v2655_v14 = vshrl.u32 %v2567_v18, 16  ;;  %v2658_v19 = vshll.u32 %v2567_v18, 16  ;;  %v2576_v18 = vld [vmem:[#allocation2 + $0x54] sm:$0xf] }
 0x2a4   : > { %5593 = vmatmul.mubr.bf16.gmra.mrb[4].mxu0 %v5047_v7  ;;  %v1129_v48 = vld [vmem:[#allocation2 + $0x6c] sm:$0xf]  ;;  %v2600_v16 = vrot.slane %v2599_v17, 4 }
 0x2a5   : > { %5596 = vmatprep.mubr.bf16.mxu0 %v5048_v38  ;;  %5609 = vmatpush3.bf16.msra.mxu0 %v6170_v49  ;;  %v2583_v49 = vshrl.u32 %v2558_v27, 16  ;;  %v6181_v38 = vld [vmem:[#allocation2 + $0x30] sm:$0xff]   ;;  %v1117_v43 = vshrl.u32 %v5222_v33, 16  ;;  %v1120_v45 = vshll.u32 %v5222_v33, 16  ;;  %v2668_v33 = vshrl.u32 %v7656_v24, 16 }
 0x2a6   : > { %5610 = vmatprep.subr.bf16.mxu0 %v6171_v40 }
 0x2a7   : > { %v7629_v7 = vrot.slane %v2583_v49, 4  ;;  %v1119_v35 = vrot.slane %v1117_v43, 7 }
 0x2a9   : > { %5611 = vmatpush3.bf16.msra.mxu0 %v6171_v40  ;;  %v5221_v40 = vpack.c.bf16 %v998_v57, %v998_v57  ;;  %v2589_v37 = vor.u32 %v2588_v51, %v7629_v7  ;;  %v1122_v27 = vor.u32 %v1120_v45, %v1119_v35  ;;  %v1124_v60 = vrot.slane %v1119_v35, 4  ;;  %v6190_v7 = vld [vmem:[#allocation11 + $0x130] sm:$0xff]  }
 0x2aa   : > { %5612 = vmatprep.subr.bf16.mxu0 %v6172_v58  ;;  %v2657_v35 = vrot.slane %v2655_v14, 4 }
 0x2ab   : > { %v1109_v42 = vshrl.u32 %v5221_v40, 16  ;;  %v1112_v3 = vshll.u32 %v5221_v40, 16  ;;  %v2590_v12 = vrot.slane %v2589_v37, 4  ;;  %v2660_v37 = vrot.slane %v2658_v19, 5 }
 0x2ac   : > { %5597 = vmatmul.mubr.bf16.gmra.mrb[8].mxu0 %v5049_v31  ;;  %v2602_v31 = vshll.u32 %v7627_v22, 16  ;;  %v2727_v19 = vshrl.u32 %v2576_v18, 16 }
 0x2ad   : > { %5600 = vmatprep.mubr.bf16.mxu0 %v5050_v46  ;;  %5613 = vmatpush3.bf16.msra.mxu0 %v6172_v58  ;;  %v6183_v58 = vld [vmem:[#allocation2 + $0x3c] sm:$0xff]   ;;  %v1111_v46 = vrot.slane %v1109_v42, 7  ;;  %v2688_v42 = vshll.u32 %v7658_v25, 16 }
 0x2ae   : > { %5614 = vmatprep.subr.bf16.mxu0 %v6173_v10  ;;  %v2604_v4 = vrot.slane %v2602_v31, 5 }
 0x2b0   : > { %v2605_v40 = vsel %vm7403_vm11, %v2600_v16, %v2604_v4  ;;  %v2573_v16 = vld [vmem:[#allocation2 + $0x48] sm:$0xf] }
 0x2b1   : > { %5615 = vmatpush3.bf16.msra.mxu0 %v6173_v10  ;;  %v7636_v10 = vld [vmem:[#allocation2 + $0x28] sm:$0xf] }
 0x2b2   : > { %5616 = vmatprep.subr.bf16.mxu0 %v6174_v9  ;;  %v2640_v55 = vshll.u32 %v7636_v10, 16  ;;  %v2644_v59 = vshrl.u32 %v7636_v10, 16 }
 0x2b4   : > { %5601 = vmatmul.mubr.bf16.gmra.mrb[12].mxu0 %v5051_v52  ;;  %v2609_v52 = vrot.slane %v2607_v28, 4  ;;  %v7654_v53 = vrot.slane %v2640_v55, 5  ;;  %v2646_v39 = vrot.slane %v2644_v59, 4  ;;  %v7679_v55 = vld [vmem:[#allocation2 + $0x4c] sm:$0xf] }
 0x2b5   : > { %5617 = vmatpush3.bf16.msra.mxu0 %v6174_v9  ;;  %5620 = vmatprep.mubr.bf16.mxu0 %v6175_v63  ;;  %v2622_v9 = vrot.slane %v2620_v41, 4  ;;  %v1115_v63 = vrot.slane %v1111_v46, 4  ;;  %v2664_v41 = vshll.u32 %v7656_v24, 16 }
 0x2b6   : > { %5618 = vmatprep.subr.bf16.mxu0 %v6176_v15  ;;  %v2647_v28 = vor.u32 %v2646_v39, %v7654_v53 }
 0x2b7   : > { %v2623_v6 = vor.u32 %v2622_v9, %v7639_v2  ;;  %v1123_v56 = vsel %vm7290_vm8, %v1115_v63, %v1122_v27  ;;  %v7677_v63 = vrot.slane %v2688_v42, 5 }
 0x2b8   : > { %1132 = vst [vmem:[#allocation2 + $0x70] sm:$0xf] %v1123_v56 }
 0x2b9   : > { %5619 = vmatpush3.bf16.msra.mxu0 %v6176_v15  ;;  %v1114_v15 = vor.u32 %v1112_v3, %v1111_v46  ;;  %v2692_v3 = vshrl.u32 %v7658_v25, 16 }
 0x2ba   : > { %5636 = vmatprep.subr.bf16.mxu0 %v6178_v13 }
 0x2bb   : > { %v1130_v36 = vsel %vm7285_vm7, %v1114_v15, %v1129_v48  ;;  %v2670_v15 = vrot.slane %v2668_v33, 4 }
 0x2bc   : > { %5621 = vmatmul.mubr.bf16.vlgmr.msra.gmra.mrb[0].mxu0 %v6177_v23  ;;  %v2612_v23 = vrot.slane %v2610_v34, 5  ;;  %1131 = vst [vmem:[#allocation2 + $0x6c] sm:$0xf] %v1130_v36  ;;  %v6189_v34 = vld [vmem:[#allocation2 + $0x60] sm:$0xff]  }
 0x2bd   : > { %5624 = vmatprep.mubr.bf16.mxu0 %v6179_v11  ;;  %5637 = vmatpush3.bf16.msra.mxu0 %v6178_v13  ;;  %v1133_v13 = vld [vmem:[#allocation2 + $0x74] sm:$0x1]  ;;  %v6185_v11 = vld [vmem:[#allocation2 + $0x48] sm:$0xff]  }
 0x2be   : > { %5638 = vmatprep.subr.bf16.mxu0 %v6180_v62  ;;  %v1134_v49 = vsel %vm7221_vm2, %v1124_v60, %v1133_v13  ;;  %v2613_v57 = vor.u32 %v2612_v23, %v2609_v52  ;;  %v7675_v52 = vrot.slane %v2664_v41, 5  ;;  %v2694_v13 = vrot.slane %v2692_v3, 4  ;;  %v7684_v60 = vld [vmem:[#allocation2 + $0x38] sm:$0x1] }
 0x2bf   : > { %1135 = vst [vmem:[#allocation2 + $0x74] sm:$0x1] %v1134_v49  ;;  %v7686_v23 = vld [vmem:[#allocation2 + $0x58] sm:$0xf]  ;;  %v7689_v49 = vld [vmem:[#allocation2 + $0x44] sm:$0x1] }
 0x2c0   : > { %v2614_v43 = vrot.slane %v2613_v57, 4  ;;  %v2671_v56 = vor.u32 %v2670_v15, %v7675_v52  ;;  %v2736_v39 = vshll.u32 %v7686_v23, 16  ;;  %v2698_v14 = vshll.u32 %v7689_v49, 16 }
 0x2c1   : > { %5639 = vmatpush3.bf16.msra.mxu0 %v6180_v62  ;;  %v2631_v62 = vshrl.u32 %v2564_v26, 16  ;;  %v2595_v26 = vsel %vm7403_vm11, %v2590_v12, %v7631_v44  ;;  %v2648_v44 = vrot.slane %v2647_v28, 4  ;;  %v2740_v12 = vshrl.u32 %v7686_v23, 16 }
 0x2c2   : > { %5640 = vmatprep.subr.bf16.mxu0 %v6182_v29  ;;  %v5076_v46 = vcombine.low %v2595_v26, %v2605_v40  ;;  %v2619_v59 = vsel %vm7403_vm11, %v2614_v43, %v7639_v2  ;;  %v2716_v2 = vshrl.u32 %v7679_v55, 16  ;;  %v6193_v40 = vld [vmem:[#allocation11 + $0x148] sm:$0xff]   ;;  %v2730_v41 = vshll.u32 %v2576_v18, 16 }
 0x2c3   : > { %v2633_v21 = vrot.slane %v2631_v62, 4  ;;  %v2742_v26 = vrot.slane %v2740_v12, 4  ;;  %v7707_v43 = vld [vmem:[#allocation2 + $0x64] sm:$0xf] }
 0x2c4   : > { %5625 = vmatmul.mubr.bf16.gmra.mrb[4].mxu0 %v6181_v38  ;;  %v2624_v38 = vrot.slane %v2623_v6, 4  ;;  %v2661_v6 = vor.u32 %v2660_v37, %v2657_v35  ;;  %v2718_v28 = vrot.slane %v2716_v2, 4  ;;  %v2732_v35 = vrot.slane %v2730_v41, 5  ;;  %v2579_v37 = vld [vmem:[#allocation2 + $0x60] sm:$0xf]  ;;  %v6195_v2 = vld [vmem:[#allocation11 + $0x158] sm:$0xff]  }
 0x2c5   : > { %5628 = vmatprep.mubr.bf16.mxu0 %v6183_v58  ;;  %5641 = vmatpush3.bf16.msra.mxu0 %v6182_v29  ;;  %v2626_v29 = vshll.u32 %v7644_v61, 16  ;;  %v2570_v58 = vld [vmem:[#allocation2 + $0x3c] sm:$0xf]  ;;  %v2637_v45 = vor.u32 %v2636_v50, %v2633_v21  ;;  %v2674_v21 = vshll.u32 %v7684_v60, 16  ;;  %v2703_v50 = vshrl.u32 %v2573_v16, 16 }
 0x2c6   : > { %5642 = vmatprep.subr.bf16.mxu0 %v6184_v32  ;;  %v2679_v9 = vshrl.u32 %v2570_v58, 16  ;;  %v2682_v48 = vshll.u32 %v2570_v58, 16  ;;  %v2672_v58 = vrot.slane %v2671_v56, 4  ;;  %v2662_v42 = vrot.slane %v2661_v6, 4 }
 0x2c7   : > { %v2628_v51 = vrot.slane %v2626_v29, 5  ;;  %v2638_v27 = vrot.slane %v2637_v45, 4  ;;  %v2695_v29 = vor.u32 %v2694_v13, %v7677_v63  ;;  %v2676_v45 = vrot.slane %v2674_v21, 5  ;;  %v7714_v13 = vld [vmem:[#allocation2 + $0x5c] sm:$0x1] }
 0x2c8   : > { %v2754_v6 = vshll.u32 %v2579_v37, 16 }
 0x2c9   : > { %5643 = vmatpush3.bf16.msra.mxu0 %v6184_v32  ;;  %v7662_v32 = vld [vmem:[#allocation2 + $0x2c] sm:$0x1]  ;;  %v2629_v17 = vsel %vm7403_vm11, %v2624_v38, %v2628_v51  ;;  %v2643_v57 = vsel %vm7403_vm11, %v2638_v27, %v7654_v53  ;;  %v2696_v3 = vrot.slane %v2695_v29, 4  ;;  %v7705_v53 = vrot.slane %v2736_v39, 5 }
 0x2ca   : > { %5644 = vmatprep.subr.bf16.mxu0 %v6186_v47  ;;  %v2650_v31 = vshll.u32 %v7662_v32, 16  ;;  %v5077_v62 = vcombine.low %v2619_v59, %v2629_v17  ;;  %v2677_v15 = vsel %vm7403_vm11, %v2672_v58, %v2676_v45  ;;  %v2760_v59 = vshll.u32 %v7707_v43, 16 }
 0x2cb   : > { %v2764_v27 = vshrl.u32 %v7707_v43, 16 }
 0x2cc   : > { %5629 = vmatmul.mubr.bf16.gmra.mrb[8].mxu0 %v6185_v11  ;;  %v2652_v36 = vrot.slane %v2650_v31, 5  ;;  %v2681_v11 = vrot.slane %v2679_v9, 4  ;;  %v6194_v31 = vld [vmem:[#allocation11 + $0x150] sm:$0xff]   ;;  %v2700_v9 = vrot.slane %v2698_v14, 5  ;;  %v2762_v39 = vrot.slane %v2760_v59, 5 }
 0x2cd   : > { %5632 = vmatprep.mubr.bf16.mxu0 %v6187_v54  ;;  %5645 = vmatpush3.bf16.msra.mxu0 %v6186_v47  ;;  %v6191_v47 = vld [vmem:[#allocation11 + $0x138] sm:$0xff]   ;;  %v2712_v54 = vshll.u32 %v7679_v55, 16  ;;  %v2766_v12 = vrot.slane %v2764_v27, 4  ;;  %v3032_v27 = vrot.slane %v7636_v10, 5  ;;  %v3028_v10 = vrot.slane %v7644_v61, 5 }
 0x2ce   : > { %5646 = vmatprep.subr.bf16.mxu0 %v6188_v5  ;;  %v2653_v4 = vsel %vm7403_vm11, %v2648_v44, %v2652_v36  ;;  %v2743_v36 = vor.u32 %v2742_v26, %v7705_v53  ;;  %v3046_v61 = vrot.slane %v7658_v25, 5  ;;  %v6243_v25 = vld [vmem:[#allocation12 + $0x34] ss:$8 sps:$4 sm:$0xff]  }
 0x2cf   : > { %v5078_v33 = vcombine.low %v2643_v57, %v2653_v4  ;;  %v7703_v51 = vrot.slane %v2712_v54, 5 }
 0x2d0   : > { %v2744_v57 = vrot.slane %v2743_v36, 4  ;;  %v6199_v36 = vld [vmem:[#allocation11 + $0x178] sm:$0xff]  }
 0x2d1   : > { %5647 = vmatpush3.bf16.msra.mxu0 %v6188_v5  ;;  %v2684_v5 = vrot.slane %v2682_v48, 5  ;;  %v2729_v48 = vrot.slane %v2727_v19, 4  ;;  %v2719_v44 = vor.u32 %v2718_v28, %v7703_v51  ;;  %v7729_v19 = vld [vmem:[#allocation2 + $0x68] sm:$0x1]  ;;  %v3018_v28 = vrot.slane %v7614_v0, 5 }
 0x2d2   : > { %5648 = vmatprep.subr.bf16.mxu0 %v6190_v7  ;;  %v2770_v26 = vshll.u32 %v7729_v19, 16 }
 0x2d3   : > { %v2685_v38 = vor.u32 %v2684_v5, %v2681_v11  ;;  %v2733_v18 = vor.u32 %v2732_v35, %v2729_v48  ;;  %v2720_v29 = vrot.slane %v2719_v44, 4  ;;  %v2984_v35 = vld [vmem:[#allocation2 + $0xc] sm:$0xe]  ;;  %v3025_v44 = vrot.slane %v7625_v20, 5 }
 0x2d4   : > { %5633 = vmatmul.mubr.bf16.gmra.mrb[12].mxu0 %v6189_v34  ;;  %v7709_v34 = vld [vmem:[#allocation2 + $0x50] sm:$0x1]  ;;  %v2772_v48 = vrot.slane %v2770_v26, 5  ;;  %v3034_v20 = vrot.slane %v3032_v27, 4 }
 0x2d5   : > { %5649 = vmatpush3.bf16.msra.mxu0 %v6190_v7  ;;  %5652 = vmatprep.mubr.bf16.mxu0 %v5076_v46  ;;  %v2706_v7 = vshll.u32 %v2573_v16, 16  ;;  %v2705_v46 = vrot.slane %v2703_v50, 4  ;;  %v2686_v17 = vrot.slane %v2685_v38, 4  ;;  %v2722_v5 = vshll.u32 %v7709_v34, 16  ;;  %v6196_v38 = vld [vmem:[#allocation11 + $0x160] sm:$0xff]  }
 0x2d6   : > { %5650 = vmatprep.subr.bf16.mxu0 %v6191_v47  ;;  %v2751_v16 = vshrl.u32 %v2579_v37, 16  ;;  %v2734_v14 = vrot.slane %v2733_v18, 4  ;;  %v3021_v37 = vrot.slane %v7627_v22, 5  ;;  %v6200_v18 = vld [vmem:[#allocation11 + $0x180] sm:$0xff]  }
 0x2d7   : > { %v2691_v54 = vsel %vm7403_vm11, %v2686_v17, %v7677_v63  ;;  %v2724_v50 = vrot.slane %v2722_v5, 5  ;;  %v2985_v5 = vld [vmem:[#allocation2 + $0x18] sm:$0xe] }
 0x2d9   : > { %5651 = vmatpush3.bf16.msra.mxu0 %v6191_v47  ;;  %v2708_v47 = vrot.slane %v2706_v7, 5  ;;  %v2753_v7 = vrot.slane %v2751_v16, 4  ;;  %v2725_v41 = vsel %vm7403_vm11, %v2720_v29, %v2724_v50  ;;  %v3027_v16 = vrot.slane %v3025_v44, 4  ;;  %v6240_v50 = vld [vmem:[#allocation12 + $0x24] ss:$8 sps:$4 sm:$0xff]  }
 0x2da   : > { %5668 = vmatprep.subr.bf16.mxu0 %v6192_v1 }
 0x2db   : > { %v2709_v11 = vor.u32 %v2708_v47, %v2705_v46  ;;  %v6197_v46 = vld [vmem:[#allocation11 + $0x168] sm:$0xff]   ;;  %v3029_v29 = vsel %vm7533_vm14, %v3027_v16, %v3028_v10  ;;  %v6206_v10 = vld [vmem:[#allocation11 + $0x1b0] sm:$0xff]  }
 0x2dc   : > { %5653 = vmatmul.mubr.bf16.vlgmr.msra.gmra.mrb[0].mxu0 %v5077_v62  ;;  %v2667_v62 = vsel %vm7403_vm11, %v2662_v42, %v7675_v52  ;;  %v2746_v52 = vshll.u32 %v7714_v13, 16  ;;  %v6205_v16 = vld [vmem:[#allocation11 + $0x1a8] sm:$0xff]  }
 0x2dd   : > { %5656 = vmatprep.mubr.bf16.mxu0 %v5078_v33  ;;  %5669 = vmatpush3.bf16.msra.mxu0 %v6192_v1  ;;  %v2701_v1 = vsel %vm7403_vm11, %v2696_v3, %v2700_v9  ;;  %v5079_v56 = vcombine.low %v2667_v62, %v2677_v15  ;;  %v2710_v21 = vrot.slane %v2709_v11, 4  ;;  %v2767_v33 = vor.u32 %v2766_v12, %v2762_v39  ;;  %v6235_v12 = vld [vmem:[#allocation12 + $0x10] ss:$8 sps:$4 sm:$0xff]  }
 0x2de   : > { %5670 = vmatprep.subr.bf16.mxu0 %v6193_v40  ;;  %v5080_v4 = vcombine.low %v2691_v54, %v2701_v1  ;;  %v2748_v63 = vrot.slane %v2746_v52, 5  ;;  %v3020_v9 = vrot.slane %v3018_v28, 4  ;;  %v2986_v54 = vld [vmem:[#allocation2 + $0x24] sm:$0xe]  ;;  %v3035_v52 = vrot.slane %v7662_v32, 5 }
 0x2df   : > { %v2715_v42 = vsel %vm7403_vm11, %v2710_v21, %v7703_v51  ;;  %v2768_v17 = vrot.slane %v2767_v33, 4  ;;  %v6198_v51 = vld [vmem:[#allocation11 + $0x170] sm:$0xff]   ;;  %v3048_v33 = vrot.slane %v3046_v61, 4 }
 0x2e0   : > { %v2749_v58 = vsel %vm7403_vm11, %v2744_v57, %v2748_v63  ;;  %v5081_v45 = vcombine.low %v2715_v42, %v2725_v41  ;;  %v3022_v59 = vsel %vm7533_vm14, %v3020_v9, %v3021_v37  ;;  %v5094_v57 = vrot.slane %v2986_v54, 9  ;;  %v6238_v63 = vld [vmem:[#allocation12 + $0x20] ss:$8 sps:$4 sm:$0xff]   ;;  %v2987_v41 = vld [vmem:[#allocation2 + $0x30] sm:$0xe]  ;;  %v6202_v42 = vld [vmem:[#allocation11 + $0x190] sm:$0xff]  }
 0x2e1   : > { %5671 = vmatpush3.bf16.msra.mxu0 %v6193_v40  ;;  %v2756_v40 = vrot.slane %v2754_v6, 5  ;;  %v2773_v15 = vsel %vm7403_vm11, %v2768_v17, %v2772_v48  ;;  %v6232_v6 = vld [vmem:[#allocation12] ss:$8 sps:$4 sm:$0xff]   ;;  %v3036_v21 = vsel %vm7533_vm14, %v3034_v20, %v3035_v52  ;;  %v5095_v26 = vrot.slane %v2987_v41, 9  ;;  %v6216_v41 = vld [vmem:[#allocation11 + $0x1d8] sm:$0xff]  }
 0x2e2   : > { %5672 = vmatprep.subr.bf16.mxu0 %v6194_v31  ;;  %v3060_v9 = vrot.slane %v7686_v23, 5  ;;  %v6244_v37 = vld [vmem:[#allocation12 + $0x40] ss:$8 sps:$4 sm:$0xff]   ;;  %v3056_v23 = vrot.slane %v7709_v34, 5 }
 0x2e3   : > { %v2757_v3 = vor.u32 %v2756_v40, %v2753_v7  ;;  %v3033_v40 = vsel %vm7533_vm14, %v5094_v57, %v3032_v27  ;;  %v3063_v27 = vrot.slane %v7714_v13, 5  ;;  %v6211_v57 = vld [vmem:[#allocation2 + $0x30] sm:$0xff]  }
 0x2e4   : > { %5657 = vmatmul.mubr.bf16.gmra.mrb[4].mxu0 %v5079_v56  ;;  %v6234_v56 = vld [vmem:[#allocation12 + $0x4] ss:$8 sps:$4 sm:$0xff]  }
 0x2e5   : > { %5660 = vmatprep.mubr.bf16.mxu0 %v5080_v4  ;;  %5673 = vmatpush3.bf16.msra.mxu0 %v6194_v31  ;;  %v2739_v31 = vsel %vm7403_vm11, %v2734_v14, %v7705_v53  ;;  %v2758_v0 = vrot.slane %v2757_v3, 4  ;;  %v5092_v53 = vrot.slane %v2984_v35, 9  ;;  %v5093_v4 = vrot.slane %v2985_v5, 9 }
 0x2e6   : > { %5674 = vmatprep.subr.bf16.mxu0 %v6195_v2  ;;  %v5082_v47 = vcombine.low %v2739_v31, %v2749_v58  ;;  %4404 = vmatprep.subr.bf16.mxu1 %v6234_v56  ;;  %v3042_v58 = vrot.slane %v7684_v60, 5  ;;  %v3049_v3 = vrot.slane %v7689_v49, 5  ;;  %v3053_v31 = vrot.slane %v7679_v55, 5  ;;  %v6246_v60 = vld [vmem:[#allocation12 + $0x44] ss:$8 sps:$4 sm:$0xff]   ;;  %v6203_v55 = vld [vmem:[#allocation11 + $0x198] sm:$0xff]  }
 0x2e7   : > { %v2763_v62 = vsel %vm7403_vm11, %v2758_v0, %v2762_v39  ;;  %v3019_v22 = vsel %vm7533_vm14, %v5092_v53, %v3018_v28  ;;  %v3039_v39 = vrot.slane %v7656_v24, 5  ;;  %4405 = vmatpush1.bf16.msra.mxu1 %v6232_v6  ;;  %v3026_v32 = vsel %vm7533_vm14, %v5093_v4, %v3025_v44  ;;  %v6201_v24 = vld [vmem:[#allocation11 + $0x188] sm:$0xff]   ;;  %v2988_v28 = vld [vmem:[#allocation2 + $0x3c] sm:$0xe]  ;;  %v2990_v53 = vld [vmem:[#allocation2 + $0x54] sm:$0xe] }
 0x2e8   : > { %v5083_v1 = vcombine.low %v2763_v62, %v2773_v15  ;;  %v5100_v11 = vcombine.low %v3019_v22, %v3022_v59  ;;  %v5101_v7 = vcombine.low %v3026_v32, %v3029_v29  ;;  %v3050_v17 = vsel %vm7533_vm14, %v3048_v33, %v3049_v3  ;;  %v2989_v15 = vld [vmem:[#allocation2 + $0x48] sm:$0xe]  ;;  %v6204_v59 = vld [vmem:[#allocation11 + $0x1a0] sm:$0xff]   ;;  %v2991_v56 = vld [vmem:[#allocation2 + $0x60] sm:$0xe] }
 0x2e9   : > { %5675 = vmatpush3.bf16.msra.mxu0 %v6195_v2  ;;  %v6237_v2 = vld [vmem:[#allocation12 + $0x14] ss:$8 sps:$4 sm:$0xff]   ;;  %v3041_v14 = vrot.slane %v3039_v39, 4  ;;  %v3040_v49 = vsel %vm7533_vm14, %v5095_v26, %v3039_v39  ;;  %v3062_v44 = vrot.slane %v3060_v9, 4  ;;  %v5097_v62 = vrot.slane %v2989_v15, 9  ;;  %v6207_v29 = vld [vmem:[#allocation2 + $0x18] sm:$0xff]  }
 0x2ea   : > { %5676 = vmatprep.subr.bf16.mxu0 %v6196_v38  ;;  %4406 = vmatprep.subr.bf16.mxu1 %v6237_v2  ;;  %v3067_v22 = vrot.slane %v7707_v43, 5  ;;  %v3070_v43 = vrot.slane %v7729_v19, 5  ;;  %v5099_v54 = vrot.slane %v2991_v56, 9  ;;  %v6208_v4 = vld [vmem:[#allocation11 + $0x1b8] sm:$0xff]   ;;  %v6210_v39 = vld [vmem:[#allocation11 + $0x1c0] sm:$0xff]   ;;  %v6209_v19 = vld [vmem:[#allocation2 + $0x24] sm:$0xff]  }
 0x2eb   : > { %4407 = vmatpush1.bf16.msra.mxu1 %v6235_v12  ;;  %v3054_v34 = vsel %vm7533_vm14, %v5097_v62, %v3053_v31  ;;  %v6212_v12 = vld [vmem:[#allocation11 + $0x1c8] sm:$0xff]   ;;  %v3531_v26 = vld [vmem:[#allocation2 + $0x30] sm:$0xf] }
 0x2ec   : > { %5661 = vmatmul.mubr.bf16.gmra.mrb[8].mxu0 %v5081_v45  ;;  %4408 = vmatprep.subr.bf16.mxu1 %v6240_v50  ;;  %v3043_v45 = vsel %vm7533_vm14, %v3041_v14, %v3042_v58  ;;  %v3069_v6 = vrot.slane %v3067_v22, 4  ;;  %v6214_v50 = vld [vmem:[#allocation11 + $0x1d0] sm:$0xff]   ;;  %v3528_v14 = vld [vmem:[#allocation2 + $0x24] sm:$0xf] }
 0x2ed   : > { %5664 = vmatprep.mubr.bf16.mxu0 %v5082_v47  ;;  %5677 = vmatpush3.bf16.msra.mxu0 %v6196_v38  ;;  %v5102_v38 = vcombine.low %v3033_v40, %v3036_v21  ;;  %v5096_v47 = vrot.slane %v2988_v28, 9  ;;  %v5103_v0 = vcombine.low %v3040_v49, %v3043_v45  ;;  %v7794_v21 = vld [vmem:[#allocation2 + $0x1c] sm:$0xf]  ;;  %v7798_v40 = vld [vmem:[#allocation2 + $0x28] sm:$0xf]  ;;  %v6220_v62 = vld [vmem:[#allocation11 + $0x1e8] sm:$0xff]  }
 0x2ee   : > { %5678 = vmatprep.subr.bf16.mxu0 %v6197_v46  ;;  %v3071_v2 = vsel %vm7533_vm14, %v3069_v6, %v3070_v43  ;;  %v3559_v32 = vshll.u32 %v7794_v21, 16  ;;  %v3583_v58 = vshll.u32 %v7798_v40, 16  ;;  %v6215_v28 = vld [vmem:[#allocation2 + $0x48] sm:$0xff]   ;;  %v3587_v3 = vshrl.u32 %v7798_v40, 16 }
 0x2ef   : > { %4409 = vmatpush1.bf16.msra.mxu1 %v6238_v63  ;;  %v3047_v48 = vsel %vm7533_vm14, %v5096_v47, %v3046_v61  ;;  %v3525_v61 = vld [vmem:[#allocation2 + $0x18] sm:$0xf]  ;;  %v6213_v63 = vld [vmem:[#allocation2 + $0x3c] sm:$0xff]   ;;  %v3577_v47 = vshll.u32 %v3528_v14, 16  ;;  %v7821_v6 = vld [vmem:[#allocation2 + $0x4c] sm:$0xf] }
 0x2f0   : > { %4410 = vmatprep.subr.bf16.mxu1 %v6243_v25  ;;  %v5104_v35 = vcombine.low %v3047_v48, %v3050_v17  ;;  %v7800_v33 = vrot.slane %v3559_v32, 5  ;;  %v7806_v17 = vld [vmem:[#allocation2 + $0x34] sm:$0xf]  ;;  %v3598_v48 = vshrl.u32 %v3531_v26, 16 }
 0x2f1   : > { %5679 = vmatpush3.bf16.msra.mxu0 %v6197_v46  ;;  %v6241_v46 = vld [vmem:[#allocation12 + $0x30] ss:$8 sps:$4 sm:$0xff]  }
 0x2f2   : > { %5680 = vmatprep.subr.bf16.mxu0 %v6198_v51 }
 0x2f3   : > { %4411 = vmatpush1.bf16.msra.mxu1 %v6241_v46  ;;  %v3574_v46 = vshrl.u32 %v3528_v14, 16 }
 0x2f4   : > { %5665 = vmatmul.mubr.bf16.gmra.mrb[12].mxu0 %v5083_v1  ;;  %4412 = vmatprep.subr.bf16.mxu1 %v6246_v60 }
 0x2f5   : > { %5681 = vmatpush3.bf16.msra.mxu0 %v6198_v51  ;;  %5684 = vmatprep.mubr.bf16.mxu0 %v5100_v11  ;;  %v3055_v51 = vrot.slane %v3053_v31, 4  ;;  %v3064_v11 = vsel %vm7533_vm14, %v3062_v44, %v3063_v27  ;;  %v3576_v44 = vrot.slane %v3574_v46, 4  ;;  %v7816_v27 = vld [vmem:[#allocation2 + $0x40] sm:$0xf] }
 0x2f6   : > { %5682 = vmatprep.subr.bf16.mxu0 %v6199_v36 }
 0x2f7   : > { %v3057_v1 = vsel %vm7533_vm14, %v3055_v51, %v3056_v23  ;;  %4413 = vmatpush1.bf16.msra.mxu1 %v6244_v37  ;;  %v3607_v51 = vshll.u32 %v7806_v17, 16  ;;  %v3611_v37 = vshrl.u32 %v7806_v17, 16  ;;  %v3579_v23 = vrot.slane %v3577_v47, 5 }
 0x2f8   : > { %v5105_v5 = vcombine.low %v3054_v34, %v3057_v1  ;;  %v6219_v34 = vld [vmem:[#allocation2 + $0x60] sm:$0xff]  }
 0x2f9   : > { %5683 = vmatpush3.bf16.msra.mxu0 %v6199_v36  ;;  %v5098_v36 = vrot.slane %v2990_v53, 9  ;;  %v6217_v53 = vld [vmem:[#allocation2 + $0x54] sm:$0xff]   ;;  %v3580_v43 = vor.u32 %v3579_v23, %v3576_v44 }
 0x2fa   : > { %5700 = vmatprep.subr.bf16.mxu0 %v6200_v18 }
 0x2fb   : > { %v3061_v13 = vsel %vm7533_vm14, %v5098_v36, %v3060_v9  ;;  %v6218_v9 = vld [vmem:[#allocation11 + $0x1e0] sm:$0xff]   ;;  %v3600_v36 = vrot.slane %v3598_v48, 4 }
 0x2fc   : > { %5685 = vmatmul.mubr.bf16.vlgmr.msra.gmra.mrb[0].mxu0 %v5101_v7  ;;  %v5106_v20 = vcombine.low %v3061_v13, %v3064_v11  ;;  %v3563_v7 = vshrl.u32 %v7794_v21, 16  ;;  %v3534_v11 = vld [vmem:[#allocation2 + $0x3c] sm:$0xf] }
 0x2fd   : > { %5688 = vmatprep.mubr.bf16.mxu0 %v5102_v38  ;;  %5701 = vmatpush3.bf16.msra.mxu0 %v6200_v18  ;;  %v3068_v18 = vsel %vm7533_vm14, %v5099_v54, %v3067_v22  ;;  %v3553_v38 = vshll.u32 %v3525_v61, 16  ;;  %v3635_v54 = vshrl.u32 %v7816_v27, 16  ;;  %v3625_v32 = vshll.u32 %v3534_v11, 16 }
 0x2fe   : > { %5702 = vmatprep.subr.bf16.mxu0 %v6201_v24  ;;  %v5107_v52 = vcombine.low %v3068_v18, %v3071_v2  ;;  %v3565_v25 = vrot.slane %v3563_v7, 4  ;;  %v7826_v18 = vld [vmem:[#allocation2 + $0x38] sm:$0x1] }
 0x2ff   : > { %v3555_v31 = vrot.slane %v3553_v38, 5  ;;  %v3637_v14 = vrot.slane %v3635_v54, 4 }
 0x300   : > { %v3566_v60 = vor.u32 %v3565_v25, %v7800_v33 }
 0x301   : > { %5703 = vmatpush3.bf16.msra.mxu0 %v6201_v24  ;;  %v3550_v24 = vshrl.u32 %v3525_v61, 16 }
 0x302   : > { %5704 = vmatprep.subr.bf16.mxu0 %v6202_v42  ;;  %v3567_v1 = vrot.slane %v3566_v60, 4 }
 0x303   : > { %v3552_v45 = vrot.slane %v3550_v24, 4  ;;  %v3581_v24 = vrot.slane %v3580_v43, 4 }
 0x304   : > { %5689 = vmatmul.mubr.bf16.gmra.mrb[4].mxu0 %v5103_v0  ;;  %v7810_v0 = vrot.slane %v3583_v58, 5 }
 0x305   : > { %5692 = vmatprep.mubr.bf16.mxu0 %v5104_v35  ;;  %5705 = vmatpush3.bf16.msra.mxu0 %v6202_v42  ;;  %v7803_v42 = vld [vmem:[#allocation2 + $0x20] sm:$0x1]  ;;  %v3601_v35 = vshll.u32 %v3531_v26, 16  ;;  %v3556_v15 = vor.u32 %v3555_v31, %v3552_v45  ;;  %v6223_v45 = vld [vmem:[#allocation11 + $0x1f8] sm:$0xff]  }
 0x306   : > { %5706 = vmatprep.subr.bf16.mxu0 %v6203_v55  ;;  %v3569_v49 = vshll.u32 %v7803_v42, 16  ;;  %v3586_v48 = vsel %vm7403_vm11, %v3581_v24, %v7810_v0 }
 0x307   : > { %v3603_v13 = vrot.slane %v3601_v35, 5  ;;  %v3557_v56 = vrot.slane %v3556_v15, 4 }
 0x308   : > { %v3571_v22 = vrot.slane %v3569_v49, 5  ;;  %v3627_v49 = vrot.slane %v3625_v32, 5  ;;  %v3546_v32 = vld [vmem:[#allocation2 + $0x6c] sm:$0xf] }
 0x309   : > { %5707 = vmatpush3.bf16.msra.mxu0 %v6203_v55  ;;  %v3589_v55 = vrot.slane %v3587_v3, 4  ;;  %v3604_v61 = vor.u32 %v3603_v13, %v3600_v36  ;;  %v3562_v7 = vsel %vm7403_vm11, %v3557_v56, %v7800_v33  ;;  %v6221_v3 = vld [vmem:[#allocation2 + $0x6c] sm:$0xff]  }
 0x30a   : > { %5708 = vmatprep.subr.bf16.mxu0 %v6204_v59 }
 0x30c   : > { %5693 = vmatmul.mubr.bf16.gmra.mrb[8].mxu0 %v5105_v5  ;;  %v3590_v5 = vor.u32 %v3589_v55, %v7810_v0  ;;  %v7848_v55 = vld [vmem:[#allocation2 + $0x44] sm:$0x1] }
 0x30d   : > { %5696 = vmatprep.mubr.bf16.mxu0 %v5106_v20  ;;  %5709 = vmatpush3.bf16.msra.mxu0 %v6204_v59  ;;  %v7814_v59 = vld [vmem:[#allocation2 + $0x2c] sm:$0x1]  ;;  %v3613_v20 = vrot.slane %v3611_v37, 4  ;;  %v3641_v13 = vshll.u32 %v7848_v55, 16 }
 0x30e   : > { %5710 = vmatprep.subr.bf16.mxu0 %v6205_v16  ;;  %v3593_v2 = vshll.u32 %v7814_v59, 16 }
 0x311   : > { %5711 = vmatpush3.bf16.msra.mxu0 %v6205_v16  ;;  %v7819_v16 = vrot.slane %v3607_v51, 5  ;;  %v7851_v51 = vld [vmem:[#allocation2 + $0x50] sm:$0x1] }
 0x312   : > { %5712 = vmatprep.subr.bf16.mxu0 %v6206_v10  ;;  %v3665_v43 = vshll.u32 %v7851_v51, 16 }
 0x314   : > { %5697 = vmatmul.mubr.bf16.gmra.mrb[12].mxu0 %v5107_v52  ;;  %v6222_v52 = vld [vmem:[#allocation11 + $0x1f0] sm:$0xff]   ;;  %v3667_v24 = vrot.slane %v3665_v43, 5 }
 0x315   : > { %5713 = vmatpush3.bf16.msra.mxu0 %v6206_v10  ;;  %5716 = vmatprep.mubr.bf16.mxu0 %v6207_v29  ;;  %v3631_v10 = vshll.u32 %v7816_v27, 16  ;;  %v3622_v29 = vshrl.u32 %v3534_v11, 16 }
 0x316   : > { %5714 = vmatprep.subr.bf16.mxu0 %v6208_v4 }
 0x317   : > { %v7836_v38 = vrot.slane %v3631_v10, 5  ;;  %v3624_v31 = vrot.slane %v3622_v29, 4 }
 0x319   : > { %5715 = vmatpush3.bf16.msra.mxu0 %v6208_v4  ;;  %v3572_v4 = vsel %vm7403_vm11, %v3567_v1, %v3571_v22  ;;  %v3638_v35 = vor.u32 %v3637_v14, %v7836_v38  ;;  %v6224_v1 = vld [vmem:[#allocation11 + $0x200] sm:$0xff]   ;;  %v3540_v22 = vld [vmem:[#allocation2 + $0x54] sm:$0xf] }
 0x31a   : > { %5732 = vmatprep.subr.bf16.mxu0 %v6210_v39  ;;  %v5132_v26 = vcombine.low %v3562_v7, %v3572_v4  ;;  %v3673_v4 = vshll.u32 %v3540_v22, 16 }
 0x31b   : > { %v3639_v56 = vrot.slane %v3638_v35, 4  ;;  %v3721_v35 = vshll.u32 %v3546_v32, 16 }
 0x31c   : > { %5717 = vmatmul.mubr.bf16.vlgmr.msra.gmra.mrb[0].mxu0 %v6209_v19  ;;  %v3655_v19 = vshll.u32 %v7821_v6, 16 }
 0x31d   : > { %5720 = vmatprep.mubr.bf16.mxu0 %v6211_v57  ;;  %5733 = vmatpush3.bf16.msra.mxu0 %v6210_v39  ;;  %v3537_v39 = vld [vmem:[#allocation2 + $0x48] sm:$0xf]  ;;  %v3591_v57 = vrot.slane %v3590_v5, 4  ;;  %v3628_v5 = vor.u32 %v3627_v49, %v3624_v31 }
 0x31e   : > { %5734 = vmatprep.subr.bf16.mxu0 %v6212_v12  ;;  %v3646_v25 = vshrl.u32 %v3537_v39, 16  ;;  %v3649_v58 = vshll.u32 %v3537_v39, 16  ;;  %v7841_v46 = vrot.slane %v3655_v19, 5  ;;  %v7878_v49 = vld [vmem:[#allocation2 + $0x68] sm:$0x1] }
 0x31f   : > { %v3629_v7 = vrot.slane %v3628_v5, 4 }
 0x320   : > { %v3648_v15 = vrot.slane %v3646_v25, 4  ;;  %v3651_v44 = vrot.slane %v3649_v58, 5 }
 0x321   : > { %5735 = vmatpush3.bf16.msra.mxu0 %v6212_v12  ;;  %v3659_v12 = vshrl.u32 %v7821_v6, 16 }
 0x322   : > { %5736 = vmatprep.subr.bf16.mxu0 %v6214_v50 }
 0x323   : > { %v3661_v33 = vrot.slane %v3659_v12, 4 }
 0x324   : > { %5721 = vmatmul.mubr.bf16.gmra.mrb[4].mxu0 %v6213_v63  ;;  %v3595_v63 = vrot.slane %v3593_v2, 5  ;;  %v3652_v2 = vor.u32 %v3651_v44, %v3648_v15  ;;  %v3634_v44 = vsel %vm7403_vm11, %v3629_v7, %v7836_v38 }
 0x325   : > { %5724 = vmatprep.mubr.bf16.mxu0 %v6215_v28  ;;  %5737 = vmatpush3.bf16.msra.mxu0 %v6214_v50  ;;  %v3614_v50 = vor.u32 %v3613_v20, %v7819_v16  ;;  %v7839_v28 = vld [vmem:[#allocation2 + $0x58] sm:$0xf]  ;;  %v3662_v0 = vor.u32 %v3661_v33, %v7841_v46  ;;  %v3543_v20 = vld [vmem:[#allocation2 + $0x60] sm:$0xf]  ;;  %v7875_v33 = vld [vmem:[#allocation2 + $0x5c] sm:$0x1] }
 0x326   : > { %5738 = vmatprep.subr.bf16.mxu0 %v6216_v41  ;;  %v3596_v47 = vsel %vm7403_vm11, %v3591_v57, %v3595_v63  ;;  %v3679_v23 = vshll.u32 %v7839_v28, 16  ;;  %v3683_v36 = vshrl.u32 %v7839_v28, 16  ;;  %v3694_v12 = vshrl.u32 %v3543_v20, 16 }
 0x327   : > { %v3615_v60 = vrot.slane %v3614_v50, 4  ;;  %v3663_v39 = vrot.slane %v3662_v0, 4  ;;  %v3697_v57 = vshll.u32 %v3543_v20, 16  ;;  %v3643_v50 = vrot.slane %v3641_v13, 5 }
 0x328   : > { %v7867_v29 = vrot.slane %v3679_v23, 5  ;;  %v3685_v19 = vrot.slane %v3683_v36, 4  ;;  %v3653_v58 = vrot.slane %v3652_v2, 4  ;;  %v3713_v13 = vshll.u32 %v7878_v49, 16 }
 0x329   : > { %5739 = vmatpush3.bf16.msra.mxu0 %v6216_v41  ;;  %v3617_v41 = vshll.u32 %v7826_v18, 16  ;;  %v3644_v25 = vsel %vm7403_vm11, %v3639_v56, %v3643_v50  ;;  %v3668_v31 = vsel %vm7403_vm11, %v3663_v39, %v3667_v24  ;;  %v3723_v56 = vrot.slane %v3721_v35, 5 }
 0x32a   : > { %5740 = vmatprep.subr.bf16.mxu0 %v6218_v9  ;;  %v3985_v50 = vrot.slane %v7794_v21, 5  ;;  %v3951_v21 = vld [vmem:[#allocation2 + $0x18] sm:$0xe]  ;;  %v3999_v35 = vrot.slane %v7806_v17, 5  ;;  %v4002_v17 = vrot.slane %v7826_v18, 5 }
 0x32b   : > { %v3619_v37 = vrot.slane %v3617_v41, 5  ;;  %v7869_v41 = vld [vmem:[#allocation2 + $0x70] sm:$0xf] }
 0x32c   : > { %5725 = vmatmul.mubr.bf16.gmra.mrb[8].mxu0 %v6217_v53  ;;  %v7854_v53 = vld [vmem:[#allocation2 + $0x64] sm:$0xf]  ;;  %v3731_v15 = vshrl.u32 %v7869_v41, 16 }
 0x32d   : > { %5728 = vmatprep.mubr.bf16.mxu0 %v6219_v34  ;;  %5741 = vmatpush3.bf16.msra.mxu0 %v6218_v9  ;;  %v3605_v9 = vrot.slane %v3604_v61, 4  ;;  %v3620_v34 = vsel %vm7403_vm11, %v3615_v60, %v3619_v37  ;;  %v3703_v10 = vshll.u32 %v7854_v53, 16  ;;  %v3707_v54 = vshrl.u32 %v7854_v53, 16 }
 0x32e   : > { %5742 = vmatprep.subr.bf16.mxu0 %v6220_v62  ;;  %v3699_v60 = vrot.slane %v3697_v57, 5  ;;  %v3727_v37 = vshll.u32 %v7869_v41, 16  ;;  %v3733_v43 = vrot.slane %v3731_v15, 4  ;;  %v6231_v15 = vld [vmem:[#allocation11 + $0x238] sm:$0xff]  }
 0x32f   : > { %v3610_v11 = vsel %vm7403_vm11, %v3605_v9, %v7819_v16  ;;  %v6225_v16 = vld [vmem:[#allocation11 + $0x208] sm:$0xff]   ;;  %v3705_v14 = vrot.slane %v3703_v10, 5  ;;  %v3709_v63 = vrot.slane %v3707_v54, 4  ;;  %v3696_v9 = vrot.slane %v3694_v12, 4  ;;  %v7890_v54 = vld [vmem:[#allocation2 + $0x74] sm:$0x1] }
 0x330   : > { %v5134_v61 = vcombine.low %v3610_v11, %v3620_v34  ;;  %v6227_v11 = vld [vmem:[#allocation11 + $0x218] sm:$0xff]   ;;  %v3729_v38 = vrot.slane %v3727_v37, 5  ;;  %v3737_v57 = vshll.u32 %v7890_v54, 16 }
 0x331   : > { %5743 = vmatpush3.bf16.msra.mxu0 %v6220_v62  ;;  %v5133_v62 = vcombine.low %v3586_v48, %v3596_v47  ;;  %v3686_v47 = vor.u32 %v3685_v19, %v7867_v29  ;;  %v3718_v48 = vshrl.u32 %v3546_v32, 16  ;;  %v3710_v23 = vor.u32 %v3709_v63, %v3705_v14  ;;  %v6229_v63 = vld [vmem:[#allocation11 + $0x228] sm:$0xff]  }
 0x332   : > { %5744 = vmatprep.subr.bf16.mxu0 %v6222_v52  ;;  %v3700_v5 = vor.u32 %v3699_v60, %v3696_v9  ;;  %v3734_v12 = vor.u32 %v3733_v43, %v3729_v38  ;;  %v3992_v9 = vrot.slane %v7798_v40, 5  ;;  %v5148_v60 = vrot.slane %v3951_v21, 9 }
 0x333   : > { %v3687_v34 = vrot.slane %v3686_v47, 4  ;;  %v3720_v20 = vrot.slane %v3718_v48, 4  ;;  %v3711_v10 = vrot.slane %v3710_v23, 4  ;;  %v3988_v47 = vrot.slane %v7803_v42, 5 }
 0x334   : > { %5729 = vmatmul.mubr.bf16.gmra.mrb[12].mxu0 %v6221_v3  ;;  %v3986_v42 = vsel %vm7533_vm14, %v5148_v60, %v3985_v50  ;;  %v3994_v23 = vrot.slane %v3992_v9, 4  ;;  %v3995_v40 = vrot.slane %v7814_v59, 5  ;;  %v4013_v59 = vrot.slane %v7821_v6, 5 }
 0x335   : > { %5745 = vmatpush3.bf16.msra.mxu0 %v6222_v52  ;;  %5748 = vmatprep.mubr.bf16.mxu0 %v5132_v26  ;;  %v3670_v52 = vshrl.u32 %v3540_v22, 16  ;;  %v3675_v26 = vrot.slane %v3673_v4, 5  ;;  %v3689_v22 = vshll.u32 %v7875_v33, 16  ;;  %v3701_v4 = vrot.slane %v3700_v5, 4 }
 0x336   : > { %5746 = vmatprep.subr.bf16.mxu0 %v6223_v45  ;;  %v3724_v19 = vor.u32 %v3723_v56, %v3720_v20  ;;  %v4009_v6 = vrot.slane %v7848_v55, 5 }
 0x337   : > { %v3672_v3 = vrot.slane %v3670_v52, 4  ;;  %v3691_v2 = vrot.slane %v3689_v22, 5  ;;  %v6228_v52 = vld [vmem:[#allocation11 + $0x220] sm:$0xff]   ;;  %v3706_v24 = vsel %vm7403_vm11, %v3701_v4, %v3705_v14  ;;  %v5149_v22 = vrot.slane %v3952_v30, 9 }
 0x338   : > { %v4016_v4 = vrot.slane %v7851_v51, 5 }
 0x339   : > { %5747 = vmatpush3.bf16.msra.mxu0 %v6223_v45  ;;  %v6226_v45 = vld [vmem:[#allocation11 + $0x210] sm:$0xff]   ;;  %v3676_v0 = vor.u32 %v3675_v26, %v3672_v3  ;;  %v3692_v39 = vsel %vm7403_vm11, %v3687_v34, %v3691_v2  ;;  %v3735_v3 = vrot.slane %v3734_v12, 4  ;;  %v3739_v26 = vrot.slane %v3737_v57, 5 }
 0x33a   : > { %5764 = vmatprep.subr.bf16.mxu0 %v6224_v1  ;;  %v3993_v18 = vsel %vm7533_vm14, %v5149_v22, %v3992_v9  ;;  %v4015_v2 = vrot.slane %v4013_v59, 4  ;;  %v4020_v12 = vrot.slane %v7839_v28, 5 }
 0x33b   : > { %v3740_v14 = vsel %vm7403_vm11, %v3735_v3, %v3739_v26  ;;  %v4023_v26 = vrot.slane %v7875_v33, 5 }
 0x33c   : > { %5749 = vmatmul.mubr.bf16.vlgmr.msra.gmra.mrb[0].mxu0 %v5133_v62  ;;  %v5135_v62 = vcombine.low %v3634_v44, %v3644_v25 }
 0x33d   : > { %5752 = vmatprep.mubr.bf16.mxu0 %v5134_v61  ;;  %5765 = vmatpush3.bf16.msra.mxu0 %v6224_v1  ;;  %v3658_v1 = vsel %vm7403_vm11, %v3653_v58, %v7841_v46  ;;  %v3677_v46 = vrot.slane %v3676_v0, 4  ;;  %v3725_v58 = vrot.slane %v3724_v19, 4 }
 0x33e   : > { %5766 = vmatprep.subr.bf16.mxu0 %v6225_v16  ;;  %v5136_v36 = vcombine.low %v3658_v1, %v3668_v31  ;;  %v6230_v31 = vld [vmem:[#allocation11 + $0x230] sm:$0xff]   ;;  %v3953_v1 = vld [vmem:[#allocation2 + $0x30] sm:$0xe] }
 0x33f   : > { %v3682_v32 = vsel %vm7403_vm11, %v3677_v46, %v7867_v29  ;;  %v3730_v29 = vsel %vm7403_vm11, %v3725_v58, %v3729_v38  ;;  %v5150_v5 = vrot.slane %v3953_v1, 9  ;;  %v3954_v46 = vld [vmem:[#allocation2 + $0x3c] sm:$0xe]  ;;  %v3956_v58 = vld [vmem:[#allocation2 + $0x54] sm:$0xe] }
 0x340   : > { %v5137_v7 = vcombine.low %v3682_v32, %v3692_v39  ;;  %v5139_v37 = vcombine.low %v3730_v29, %v3740_v14  ;;  %v5151_v39 = vrot.slane %v3954_v46, 9  ;;  %v4027_v32 = vrot.slane %v7854_v53, 5  ;;  %v3957_v53 = vld [vmem:[#allocation2 + $0x60] sm:$0xe] }
 0x341   : > { %5767 = vmatpush3.bf16.msra.mxu0 %v6225_v16  ;;  %v3715_v16 = vrot.slane %v3713_v13, 5  ;;  %v4034_v29 = vrot.slane %v7869_v41, 5  ;;  %v5154_v9 = vrot.slane %v3957_v53, 9 }
 0x342   : > { %5768 = vmatprep.subr.bf16.mxu0 %v6226_v45  ;;  %v4029_v3 = vrot.slane %v4027_v32, 4 }
 0x343   : > { %v3716_v61 = vsel %vm7403_vm11, %v3711_v10, %v3715_v16 }
 0x344   : > { %5753 = vmatmul.mubr.bf16.gmra.mrb[4].mxu0 %v5135_v62  ;;  %v5138_v25 = vcombine.low %v3706_v24, %v3716_v61  ;;  %v4001_v62 = vrot.slane %v3999_v35, 4 }
 0x345   : > { %5756 = vmatprep.mubr.bf16.mxu0 %v5136_v36  ;;  %5769 = vmatpush3.bf16.msra.mxu0 %v6226_v45  ;;  %v3987_v45 = vrot.slane %v3985_v50, 4  ;;  %v3996_v36 = vsel %vm7533_vm14, %v3994_v23, %v3995_v40  ;;  %v4017_v50 = vsel %vm7533_vm14, %v4015_v2, %v4016_v4  ;;  %v4037_v23 = vrot.slane %v7890_v54, 5  ;;  %v6249_v54 = vld [vmem:[#allocation12 + $0x54] ss:$8 sps:$4 sm:$0xff]  }
 0x346   : > { %5770 = vmatprep.subr.bf16.mxu0 %v6227_v11  ;;  %v4003_v13 = vsel %vm7533_vm14, %v4001_v62, %v4002_v17  ;;  %v5157_v38 = vcombine.low %v3993_v18, %v3996_v36  ;;  %4414 = vmatprep.subr.bf16.mxu1 %v6249_v54  ;;  %v6255_v18 = vld [vmem:[#allocation12 + $0x74] ss:$8 sps:$4 sm:$0xff]  }
 0x347   : > { %v3989_v48 = vsel %vm7533_vm14, %v3987_v45, %v3988_v47  ;;  %v4030_v45 = vrot.slane %v7878_v49, 5 }
 0x348   : > { %v5156_v44 = vcombine.low %v3986_v42, %v3989_v48  ;;  %v3958_v48 = vld [vmem:[#allocation2 + $0x6c] sm:$0xe]  ;;  %v4028_v42 = vsel %vm7533_vm14, %v5154_v9, %v4027_v32 }
 0x349   : > { %5771 = vmatpush3.bf16.msra.mxu0 %v6227_v11  ;;  %v4006_v11 = vrot.slane %v7816_v27, 5  ;;  %v4000_v27 = vsel %vm7533_vm14, %v5150_v5, %v3999_v35  ;;  %v4031_v60 = vsel %vm7533_vm14, %v4029_v3, %v4030_v45  ;;  %v5155_v41 = vrot.slane %v3958_v48, 9  ;;  %v6250_v5 = vld [vmem:[#allocation12 + $0x60] ss:$8 sps:$4 sm:$0xff]  }
 0x34a   : > { %5772 = vmatprep.subr.bf16.mxu0 %v6228_v52  ;;  %v5158_v43 = vcombine.low %v4000_v27, %v4003_v13  ;;  %v6252_v13 = vld [vmem:[#allocation12 + $0x64] ss:$8 sps:$4 sm:$0xff]   ;;  %v7990_v27 = vld [vmem:[%s8325_s21] ss:$0 sm:$0xff]  ;;  %s6451_s21 = sshll.u32 %s6622_s19, 4  ;;  %s6452_s21 = int_to_ptr.vmem [resolvable:$false] %s6451_s21 }
 0x34b   : > { %v4008_v10 = vrot.slane %v4006_v11, 4  ;;  %v4007_v51 = vsel %vm7533_vm14, %v5151_v39, %v4006_v11  ;;  %v4035_v62 = vsel %vm7533_vm14, %v5155_v41, %v4034_v29  ;;  %v6247_v11 = vld [vmem:[#allocation12 + $0x50] ss:$8 sps:$4 sm:$0xff]   ;;  %s6453_s13 = scalar_lea.vmem %s6452_s21, 4096  ;;  %p6454_p9 = scmp.lt.s32.totalorder %s8107_s27, %s6452_s21 }
 0x34c   : > { %5757 = vmatmul.mubr.bf16.gmra.mrb[8].mxu0 %v5137_v7  ;;  %4415 = vmatpush1.bf16.msra.mxu1 %v6247_v11  ;;  %p6455_p7 = scmp.lt.s32.totalorder %s6453_s13, %s6447_s7 }
 0x34d   : > { %5760 = vmatprep.mubr.bf16.mxu0 %v5138_v25  ;;  %5773 = vmatpush3.bf16.msra.mxu0 %v6228_v52  ;;  %v3955_v52 = vld [vmem:[#allocation2 + $0x48] sm:$0xe]  ;;  %v4010_v19 = vsel %vm7533_vm14, %v4008_v10, %v4009_v6  ;;  %v4022_v25 = vrot.slane %v4020_v12, 4 }
 0x34e   : > { %5774 = vmatprep.subr.bf16.mxu0 %v6229_v63  ;;  %v5152_v61 = vrot.slane %v3955_v52, 9  ;;  %v5159_v24 = vcombine.low %v4007_v51, %v4010_v19  ;;  %4416 = vmatprep.subr.bf16.mxu1 %v6252_v13  ;;  %p6456_p6 = por %p6455_p7, %p6454_p9 }
 0x34f   : > { %v4024_v47 = vsel %vm7533_vm14, %v4022_v25, %v4023_v26 }
 0x350   : > { %4417 = vmatpush1.bf16.msra.mxu1 %v6250_v5  ;;  %p6457_p13 = pnand %p6456_p6, %p6450_p2 }
 0x351   : > { %5775 = vmatpush3.bf16.msra.mxu0 %v6229_v63  ;;  %v4014_v63 = vsel %vm7533_vm14, %v5152_v61, %v4013_v59  ;;  %v6253_v59 = vld [vmem:[#allocation12 + $0x70] ss:$8 sps:$4 sm:$0xff]   ;;  %4418 = vmatprep.subr.bf16.mxu1 %v6255_v18 }
 0x352   : > { %5776 = vmatprep.subr.bf16.mxu0 %v6230_v31  ;;  %v5160_v28 = vcombine.low %v4014_v63, %v4017_v50 }
 0x354   : > { %5761 = vmatmul.mubr.bf16.gmra.mrb[12].mxu0 %v5139_v37  ;;  %4419 = vmatpush1.bf16.msra.mxu1 %v6253_v59 }
 0x355   : > { %5777 = vmatpush3.bf16.msra.mxu0 %v6230_v31  ;;  %5780 = vmatprep.mubr.bf16.mxu0 %v5156_v44  ;;  %v5153_v31 = vrot.slane %v3956_v58, 9  ;;  %v4036_v44 = vrot.slane %v4034_v29, 4 }
 0x356   : > { %5778 = vmatprep.subr.bf16.mxu0 %v6231_v15 }
 0x357   : > { %v7916_v0 = vpop.f32.mrb[40].mxu1  ;;  %v4021_v33 = vsel %vm7533_vm14, %v5153_v31, %v4020_v12  ;;  %v4038_v40 = vsel %vm7533_vm14, %v4036_v44, %v4037_v23 }
 0x358   : > { %v7921_v34 = vpop.f32.mrb[41].mxu1  ;;  %v5161_v37 = vcombine.low %v4021_v33, %v4024_v47  ;;  %v5163_v36 = vcombine.low %v4035_v62, %v4038_v40 }
 0x359   : > { %5779 = vmatpush3.bf16.msra.mxu0 %v6231_v15  ;;  %v7926_v20 = vpop.f32.mrb[42].mxu1  ;;  %v5162_v15 = vcombine.low %v4028_v42, %v4031_v60 }
 0x35a   : > { %v7930_v56 = vpop.f32.mrb[43].mxu1 }
 0x35c   : > { %5781 = vmatmul.mubr.bf16.vlgmr.msra.gmra.mrb[0].mxu0 %v5157_v38 }
 0x35d   : > { %5784 = vmatprep.mubr.bf16.mxu0 %v5158_v43 }
 0x35f   : > { %v7936_v16 = vpop.f32.mrb[44].mxu1 }
 0x360   : > { %v7941_v57 = vpop.f32.mrb[45].mxu1 }
 0x361   : > { %v7946_v55 = vpop.f32.mrb[46].mxu1 }
 0x362   : > { %v7950_v7 = vpop.f32.mrb[47].mxu1 }
 0x364   : > { %5785 = vmatmul.mubr.bf16.gmra.mrb[4].mxu0 %v5159_v24 }
 0x365   : > { %5788 = vmatprep.mubr.bf16.mxu0 %v5160_v28 }
 0x367   : > { %v7956_v21 = vpop.f32.mrb[48].mxu1 }
 0x368   : > { %v7961_v14 = vpop.f32.mrb[49].mxu1 }
 0x369   : > { %v7965_v35 = vpop.f32.mrb[50].mxu1 }
 0x36a   : > { %v7969_v49 = vpop.f32.mrb[51].mxu1 }
 0x36c   : > { %5789 = vmatmul.mubr.bf16.gmra.mrb[8].mxu0 %v5161_v37 }
 0x36d   : > { %5792 = vmatprep.mubr.bf16.mxu0 %v5162_v15 }
 0x36f   : > { %v7974_v30 = vpop.f32.mrb[52].mxu1 }
 0x370   : > { %v7980_v1 = vpop.f32.mrb[53].mxu1 }
 0x371   : > { %v7982_v17 = vpop.f32.mrb[54].mxu1 }
 0x372   : > { %v7984_v22 = vpop.f32.mrb[55].mxu1 }
 0x374   : > { %5793 = vmatmul.mubr.bf16.gmra.mrb[12].mxu0 %v5163_v36 }
 0x42f   : > { %v5782_v38 = vpop.f32.mrb[0].mxu0 }
 0x430   : > { %v5796_v43 = vadd.f32 %v5782_v38, %v7916_v0  ;;  %v4170_v10 = vpop.f32.mrb[1].mxu0 }
 0x431   : > { %v5797_v46 = vadd.f32 %v4170_v10, %v7921_v34  ;;  %v5783_v2 = vpop.f32.mrb[2].mxu0 }
 0x432   : > { %v4258_v6 = vadd.f32 %v5796_v43, %v7990_v27  ;;  %v5798_v52 = vadd.f32 %v5783_v2, %v7926_v20  ;;  %v4173_v4 = vpop.f32.mrb[3].mxu0 }
 0x433   : > { %v4256_v39 = vadd.f32 %v5797_v46, %v7990_v27  ;;  %v5799_v19 = vadd.f32 %v4173_v4, %v7930_v56 }
 0x434   : > { %v4259_v12 = vadd.f32 %v5798_v52, %v7990_v27  ;;  %v4274_v50 = vmax.f32 %v4258_v6, 0.0 }
 0x435   : > { %v4257_v61 = vadd.f32 %v5799_v19, %v7990_v27  ;;  %v4272_v0 = vmax.f32 %v4256_v39, 0.0 }
 0x436   : > { %v4275_v32 = vmax.f32 %v4259_v12, 0.0 }
 0x437   : > { %v4273_v51 = vmax.f32 %v4257_v61, 0.0  ;;  %v5786_v24 = vpop.f32.mrb[4].mxu0 }
 0x438   : > { %v5800_v34 = vadd.f32 %v5786_v24, %v7936_v16  ;;  %v4186_v63 = vpop.f32.mrb[5].mxu0  ;;  %v4289_v28 = vpack.c.bf16 %v4275_v32, %v4274_v50  ;;  %v4312_v50 = vld [vmem:[%s8326_s11] sm:$0x3]  ;;  %v6257_v24 = vld [vmem:[%s7092_s5] sm:$0xff] }
 0x439   : > { %v4288_v25 = vpack.c.bf16 %v4273_v51, %v4272_v0  ;;  %v5801_v20 = vadd.f32 %v4186_v63, %v7941_v57  ;;  %v5787_v58 = vpop.f32.mrb[6].mxu0 }
 0x43a   : > { %v4262_v3 = vadd.f32 %v5800_v34, %v7990_v27  ;;  %v5802_v56 = vadd.f32 %v5787_v58, %v7946_v55  ;;  %v4189_v26 = vpop.f32.mrb[7].mxu0  ;;  %v4517_v34 = vunpack.c.l.bf16 %v6257_v24 }
 0x43b   : > { %v4260_v53 = vadd.f32 %v5801_v20, %v7990_v27  ;;  %v5803_v45 = vadd.f32 %v4189_v26, %v7950_v7  ;;  %4437 = vmatmul.mubr.bf16.vlgmr.msra.gmra.mrb[56].mxu1 %v4288_v25  ;;  %v6258_v20 = vld [vmem:[%s7092_s5 + $0x8] sm:$0xff] }
 0x43c   : > { %v4263_v31 = vadd.f32 %v5802_v56, %v7990_v27  ;;  %4446 = vmatprep.mubr.bf16.mxu1 %v6621_v8  ;;  %v4278_v47 = vmax.f32 %v4262_v3, 0.0  ;;  %v4519_v58 = vunpack.c.l.bf16 %v6258_v20  ;;  %v4520_v26 = vunpack.c.h.bf16 %v6258_v20 }
 0x43d   : > { %v4261_v16 = vadd.f32 %v5803_v45, %v7990_v27  ;;  %v4276_v57 = vmax.f32 %v4260_v53, 0.0 }
 0x43e   : > { %v4279_v29 = vmax.f32 %v4263_v31, 0.0 }
 0x43f   : > { %v4277_v9 = vmax.f32 %v4261_v16, 0.0  ;;  %v5790_v60 = vpop.f32.mrb[8].mxu0 }
 0x440   : > { %v5804_v48 = vadd.f32 %v5790_v60, %v7956_v21  ;;  %v4202_v55 = vpop.f32.mrb[9].mxu0  ;;  %v4291_v33 = vpack.c.bf16 %v4279_v29, %v4278_v47 }
 0x441   : > { %v5805_v37 = vadd.f32 %v4202_v55, %v7961_v14  ;;  %v5791_v42 = vpop.f32.mrb[10].mxu0  ;;  %v4290_v7 = vpack.c.bf16 %v4277_v9, %v4276_v57  ;;  %v6259_v55 = vld [vmem:[%s7092_s5 + $0x10] sm:$0xff] }
 0x442   : > { %v4266_v15 = vadd.f32 %v5804_v48, %v7990_v27  ;;  %v5806_v41 = vadd.f32 %v5791_v42, %v7965_v35  ;;  %v4205_v44 = vpop.f32.mrb[11].mxu0 }
 0x443   : > { %v4264_v23 = vadd.f32 %v5805_v37, %v7990_v27  ;;  %v5807_v62 = vadd.f32 %v4205_v44, %v7969_v49  ;;  %4447 = vmatmul.mubr.bf16.gmra.mrb[60].mxu1 %v4289_v28  ;;  %v4518_v28 = vunpack.c.h.bf16 %v6257_v24 }
 0x444   : > { %v4267_v40 = vadd.f32 %v5806_v41, %v7990_v27  ;;  %4456 = vmatprep.mubr.bf16.mxu1 %v6621_v8  ;;  %v4282_v36 = vmax.f32 %v4266_v15, 0.0  ;;  %v4522_v15 = vunpack.c.h.bf16 %v6259_v55 }
 0x445   : > { %v4265_v21 = vadd.f32 %v5807_v62, %v7990_v27  ;;  %v4280_v11 = vmax.f32 %v4264_v23, 0.0  ;;  %v6260_v23 = vld [vmem:[%s7092_s5 + $0x18] sm:$0xff] }
 0x446   : > { %v4283_v14 = vmax.f32 %v4267_v40, 0.0  ;;  %v4523_v62 = vunpack.c.l.bf16 %v6260_v23 }
 0x447   : > { %v4281_v54 = vmax.f32 %v4265_v21, 0.0  ;;  %v5794_v5 = vpop.f32.mrb[12].mxu0 }
 0x448   : > { %v5808_v13 = vadd.f32 %v5794_v5, %v7974_v30  ;;  %v4218_v35 = vpop.f32.mrb[13].mxu0  ;;  %v4293_v59 = vpack.c.bf16 %v4283_v14, %v4282_v36  ;;  %v4524_v14 = vunpack.c.h.bf16 %v6260_v23 }
 0x449   : > { %v5809_v18 = vadd.f32 %v4218_v35, %v7980_v1  ;;  %v5795_v38 = vpop.f32.mrb[14].mxu0  ;;  %v4292_v49 = vpack.c.bf16 %v4281_v54, %v4280_v11 }
 0x44a   : > { %v4270_v43 = vadd.f32 %v5808_v13, %v7990_v27  ;;  %v5810_v10 = vadd.f32 %v5795_v38, %v7982_v17  ;;  %v4221_v46 = vpop.f32.mrb[15].mxu0  ;;  %v4314_v17 = vlaneseq }
 0x44b   : > { %v4268_v2 = vadd.f32 %v5809_v18, %v7990_v27  ;;  %v5811_v6 = vadd.f32 %v4221_v46, %v7984_v22  ;;  %4457 = vmatmul.mubr.bf16.gmra.mrb[64].mxu1 %v4290_v7 }
 0x44c   : > { %v4271_v52 = vadd.f32 %v5810_v10, %v7990_v27  ;;  %4466 = vmatprep.mubr.bf16.mxu1 %v6621_v8  ;;  %v4286_v4 = vmax.f32 %v4270_v43, 0.0  ;;  %v4315_v22 = vshrl.u32 %v4314_v17, 7  ;;  %v6261_v10 = vld [vmem:[%s7092_s5 + $0x20] sm:$0xff] }
 0x44d   : > { %v4269_v30 = vadd.f32 %v5811_v6, %v7990_v27  ;;  %v4284_v39 = vmax.f32 %v4268_v2, 0.0  ;;  %v4525_v46 = vunpack.c.l.bf16 %v6261_v10 }
 0x44e   : > { %v4287_v1 = vmax.f32 %v4271_v52, 0.0  ;;  %v4316_v27 = vsub.s32 0, %v4315_v22  ;;  %v4320_v32 = vsub.s32 1, %v4315_v22 }
 0x44f   : > { %v4285_v19 = vmax.f32 %v4269_v30, 0.0  ;;  %v4526_v30 = vunpack.c.h.bf16 %v6261_v10 }
 0x450   : > { %v4295_v12 = vpack.c.bf16 %v4287_v1, %v4286_v4  ;;  %v8034_v0 = vrot.slane %v4312_v50, %v4316_v27  ;;  %v8036_v51 = vrot.slane %v4312_v50, %v4320_v32 }
 0x451   : > { %v4294_v61 = vpack.c.bf16 %v4285_v19, %v4284_v39  ;;  %v6262_v39 = vld [vmem:[%s7092_s5 + $0x28] sm:$0xff] }
 0x452   : > { %v4527_v19 = vunpack.c.l.bf16 %v6262_v39  ;;  %v4528_v22 = vunpack.c.h.bf16 %v6262_v39 }
 0x453   : > { %4467 = vmatmul.mubr.bf16.gmra.mrb[68].mxu1 %v4291_v33  ;;  %v4521_v33 = vunpack.c.l.bf16 %v6259_v55 }
 0x454   : > { %4476 = vmatprep.mubr.bf16.mxu1 %v6621_v8 }
 0x45b   : > { %4477 = vmatmul.mubr.bf16.gmra.mrb[72].mxu1 %v4292_v49 }
 0x45c   : > { %4486 = vmatprep.mubr.bf16.mxu1 %v6621_v8 }
 0x463   : > { %4487 = vmatmul.mubr.bf16.gmra.mrb[76].mxu1 %v4293_v59 }
 0x464   : > { %4496 = vmatprep.mubr.bf16.mxu1 %v6621_v8 }
 0x46b   : > { %4497 = vmatmul.mubr.bf16.gmra.mrb[80].mxu1 %v4294_v61 }
 0x46c   : > { %4506 = vmatprep.mubr.bf16.mxu1 %v6621_v8 }
 0x473   : > { %4507 = vmatmul.mubr.bf16.gmra.mrb[84].mxu1 %v4295_v12 }
 0x50e   : > { %v4438_v63 = vpop.f32.mrb[56].mxu1 }
 0x50f   : > { %v4439_v25 = vadd.f32 %v4438_v63, %v8034_v0  ;;  %v4440_v8 = vpop.f32.mrb[57].mxu1 }
 0x510   : > { %v4441_v3 = vadd.f32 %v4440_v8, %v8036_v51  ;;  %v4442_v56 = vpop.f32.mrb[58].mxu1 }
 0x511   : > { %v4549_v53 = vadd.f32 %v4517_v34, %v4439_v25  ;;  %v4443_v45 = vadd.f32 %v4442_v56, %v8034_v0  ;;  %v4444_v31 = vpop.f32.mrb[59].mxu1 }
 0x512   : > { %v4550_v16 = vadd.f32 %v4518_v28, %v4441_v3  ;;  %v4445_v47 = vadd.f32 %v4444_v31, %v8036_v51 }
 0x513   : > { %v4581_v29 = vmax.f32 %v4549_v53, 0.0  ;;  %v4551_v57 = vadd.f32 %v4519_v58, %v4443_v45  ;;  %v6263_v58 = vld [vmem:[%s7092_s5 + $0x30] sm:$0xff] }
 0x514   : > { %v4582_v9 = vmax.f32 %v4550_v16, 0.0  ;;  %v4552_v60 = vadd.f32 %v4520_v26, %v4445_v47  ;;  %v4529_v3 = vunpack.c.l.bf16 %v6263_v58  ;;  %v4530_v45 = vunpack.c.h.bf16 %v6263_v58  ;;  %v6264_v47 = vld [vmem:[%s7092_s5 + $0x38] sm:$0xff] }
 0x515   : > { %v4583_v48 = vmax.f32 %v4551_v57, 0.0 }
 0x516   : > { %v5239_v37 = vpack.c.bf16 %v4582_v9, %v4581_v29  ;;  %v4584_v42 = vmax.f32 %v4552_v60, 0.0  ;;  %v4448_v7 = vpop.f32.mrb[60].mxu1  ;;  %v4531_v29 = vunpack.c.l.bf16 %v6264_v47 }
 0x517   : > { %v4449_v41 = vadd.f32 %v4448_v7, %v8034_v0  ;;  %v4450_v44 = vpop.f32.mrb[61].mxu1 }
 0x518   : > { %4709 = vst [vmem:[%s8049_s9] sm:$0xff] %v5239_v37  ;;  %v5240_v40 = vpack.c.bf16 %v4584_v42, %v4583_v48  ;;  %v4451_v21 = vadd.f32 %v4450_v44, %v8036_v51  ;;  %v4452_v36 = vpop.f32.mrb[62].mxu1  ;;  %v4532_v48 = vunpack.c.h.bf16 %v6264_v47 }
 0x519   : > { %v4553_v11 = vadd.f32 %v4521_v33, %v4449_v41  ;;  %v4453_v54 = vadd.f32 %v4452_v36, %v8034_v0  ;;  %v4454_v5 = vpop.f32.mrb[63].mxu1 }
 0x51a   : > { %4710 = vst [vmem:[%s8049_s9 + $0x8] sm:$0xff] %v5240_v40  ;;  %v4554_v13 = vadd.f32 %v4522_v15, %v4451_v21  ;;  %v4455_v35 = vadd.f32 %v4454_v5, %v8036_v51  ;;  %v6265_v40 = vld [vmem:[%s7092_s5 + $0x40] sm:$0xff] }
 0x51b   : > { %v4585_v59 = vmax.f32 %v4553_v11, 0.0  ;;  %v4555_v18 = vadd.f32 %v4523_v62, %v4453_v54  ;;  %v4533_v21 = vunpack.c.l.bf16 %v6265_v40  ;;  %v4534_v54 = vunpack.c.h.bf16 %v6265_v40 }
 0x51c   : > { %v4586_v38 = vmax.f32 %v4554_v13, 0.0  ;;  %v4556_v49 = vadd.f32 %v4524_v14, %v4455_v35  ;;  %v6266_v35 = vld [vmem:[%s7092_s5 + $0x48] sm:$0xff] }
 0x51d   : > { %v4587_v43 = vmax.f32 %v4555_v18, 0.0 }
 0x51e   : > { %v5241_v2 = vpack.c.bf16 %v4586_v38, %v4585_v59  ;;  %v4588_v6 = vmax.f32 %v4556_v49, 0.0  ;;  %v4458_v52 = vpop.f32.mrb[64].mxu1  ;;  %v4535_v59 = vunpack.c.l.bf16 %v6266_v35 }
 0x51f   : > { %v4459_v4 = vadd.f32 %v4458_v52, %v8034_v0  ;;  %v4460_v1 = vpop.f32.mrb[65].mxu1 }
 0x520   : > { %4711 = vst [vmem:[%s8049_s9 + $0x10] sm:$0xff] %v5241_v2  ;;  %v5242_v12 = vpack.c.bf16 %v4588_v6, %v4587_v43  ;;  %v4461_v61 = vadd.f32 %v4460_v1, %v8036_v51  ;;  %v4462_v17 = vpop.f32.mrb[66].mxu1  ;;  %v4536_v43 = vunpack.c.h.bf16 %v6266_v35 }
 0x521   : > { %v4557_v27 = vadd.f32 %v4525_v46, %v4459_v4  ;;  %v4463_v50 = vadd.f32 %v4462_v17, %v8034_v0  ;;  %v4464_v32 = vpop.f32.mrb[67].mxu1 }
 0x522   : > { %4712 = vst [vmem:[%s8049_s9 + $0x18] sm:$0xff] %v5242_v12  ;;  %v4558_v24 = vadd.f32 %v4526_v30, %v4461_v61  ;;  %v4465_v34 = vadd.f32 %v4464_v32, %v8036_v51  ;;  %v6267_v12 = vld [vmem:[%s7092_s5 + $0x50] sm:$0xff] }
 0x523   : > { %v4589_v63 = vmax.f32 %v4557_v27, 0.0  ;;  %v4559_v28 = vadd.f32 %v4527_v19, %v4463_v50  ;;  %v4537_v61 = vunpack.c.l.bf16 %v6267_v12  ;;  %v4538_v50 = vunpack.c.h.bf16 %v6267_v12 }
 0x524   : > { %v4590_v25 = vmax.f32 %v4558_v24, 0.0  ;;  %v4560_v8 = vadd.f32 %v4528_v22, %v4465_v34  ;;  %v6268_v34 = vld [vmem:[%s7092_s5 + $0x58] sm:$0xff] }
 0x525   : > { %v4591_v20 = vmax.f32 %v4559_v28, 0.0 }
 0x526   : > { %v5243_v56 = vpack.c.bf16 %v4590_v25, %v4589_v63  ;;  %v4592_v26 = vmax.f32 %v4560_v8, 0.0  ;;  %v4468_v53 = vpop.f32.mrb[68].mxu1  ;;  %v4539_v63 = vunpack.c.l.bf16 %v6268_v34 }
 0x527   : > { %v4469_v31 = vadd.f32 %v4468_v53, %v8034_v0  ;;  %v4470_v16 = vpop.f32.mrb[69].mxu1 }
 0x528   : > { %4713 = vst [vmem:[%s8049_s9 + $0x20] sm:$0xff] %v5243_v56  ;;  %v5244_v57 = vpack.c.bf16 %v4592_v26, %v4591_v20  ;;  %v4471_v9 = vadd.f32 %v4470_v16, %v8036_v51  ;;  %v4472_v60 = vpop.f32.mrb[70].mxu1  ;;  %v4540_v20 = vunpack.c.h.bf16 %v6268_v34 }
 0x529   : > { %v4561_v55 = vadd.f32 %v4529_v3, %v4469_v31  ;;  %v4473_v33 = vadd.f32 %v4472_v60, %v8034_v0  ;;  %v4474_v37 = vpop.f32.mrb[71].mxu1 }
 0x52a   : > { %4714 = vst [vmem:[%s8049_s9 + $0x28] sm:$0xff] %v5244_v57  ;;  %v4562_v42 = vadd.f32 %v4530_v45, %v4471_v9  ;;  %v4475_v7 = vadd.f32 %v4474_v37, %v8036_v51  ;;  %v6269_v57 = vld [vmem:[%s7092_s5 + $0x60] sm:$0xff] }
 0x52b   : > { %v4593_v15 = vmax.f32 %v4561_v55, 0.0  ;;  %v4563_v41 = vadd.f32 %v4531_v29, %v4473_v33  ;;  %v4541_v9 = vunpack.c.l.bf16 %v6269_v57  ;;  %v4542_v33 = vunpack.c.h.bf16 %v6269_v57 }
 0x52c   : > { %v4594_v44 = vmax.f32 %v4562_v42, 0.0  ;;  %v4564_v23 = vadd.f32 %v4532_v48, %v4475_v7  ;;  %v6270_v7 = vld [vmem:[%s7092_s5 + $0x68] sm:$0xff] }
 0x52d   : > { %v4595_v62 = vmax.f32 %v4563_v41, 0.0 }
 0x52e   : > { %v5245_v36 = vpack.c.bf16 %v4594_v44, %v4593_v15  ;;  %v4596_v14 = vmax.f32 %v4564_v23, 0.0  ;;  %v4478_v11 = vpop.f32.mrb[72].mxu1  ;;  %v4543_v15 = vunpack.c.l.bf16 %v6270_v7 }
 0x52f   : > { %v4479_v5 = vadd.f32 %v4478_v11, %v8034_v0  ;;  %v4480_v13 = vpop.f32.mrb[73].mxu1 }
 0x530   : > { %4715 = vst [vmem:[%s8049_s9 + $0x30] sm:$0xff] %v5245_v36  ;;  %v5246_v18 = vpack.c.bf16 %v4596_v14, %v4595_v62  ;;  %v4481_v38 = vadd.f32 %v4480_v13, %v8036_v51  ;;  %v4482_v49 = vpop.f32.mrb[74].mxu1  ;;  %v4544_v62 = vunpack.c.h.bf16 %v6270_v7 }
 0x531   : > { %v4565_v10 = vadd.f32 %v4533_v21, %v4479_v5  ;;  %v4483_v46 = vadd.f32 %v4482_v49, %v8034_v0  ;;  %v4484_v2 = vpop.f32.mrb[75].mxu1 }
 0x532   : > { %4716 = vst [vmem:[%s8049_s9 + $0x38] sm:$0xff] %v5246_v18  ;;  %v4566_v6 = vadd.f32 %v4534_v54, %v4481_v38  ;;  %v4485_v52 = vadd.f32 %v4484_v2, %v8036_v51  ;;  %v6271_v18 = vld [vmem:[%s7092_s5 + $0x70] sm:$0xff] }
 0x533   : > { %v4597_v30 = vmax.f32 %v4565_v10, 0.0  ;;  %v4567_v4 = vadd.f32 %v4535_v59, %v4483_v46  ;;  %v4545_v38 = vunpack.c.l.bf16 %v6271_v18  ;;  %v4546_v46 = vunpack.c.h.bf16 %v6271_v18 }
 0x534   : > { %v4598_v1 = vmax.f32 %v4566_v6, 0.0  ;;  %v4568_v39 = vadd.f32 %v4536_v43, %v4485_v52  ;;  %v6272_v52 = vld [vmem:[%s7092_s5 + $0x78] sm:$0xff]  ;;  %s4739_s5 = sadd.s32 %s5255_s1, %s5208_s23 }
 0x535   : > { %v4599_v19 = vmax.f32 %v4567_v4, 0.0  ;;  %s5209_s25 = sshll.u32 %s4739_s5, 6 }
 0x536   : > { %v5247_v17 = vpack.c.bf16 %v4598_v1, %v4597_v30  ;;  %v4600_v22 = vmax.f32 %v4568_v39, 0.0  ;;  %v4488_v27 = vpop.f32.mrb[76].mxu1  ;;  %v4547_v30 = vunpack.c.l.bf16 %v6272_v52  ;;  %s8113_s3 = scalar_lea.hbm %s8328_s20, %s5209_s25 }
 0x537   : > { %v4489_v32 = vadd.f32 %v4488_v27, %v8034_v0  ;;  %v4490_v24 = vpop.f32.mrb[77].mxu1 }
 0x538   : > { %4717 = vst [vmem:[%s8049_s9 + $0x40] sm:$0xff] %v5247_v17  ;;  %v5248_v28 = vpack.c.bf16 %v4600_v22, %v4599_v19  ;;  %v4491_v25 = vadd.f32 %v4490_v24, %v8036_v51  ;;  %v4492_v8 = vpop.f32.mrb[78].mxu1  ;;  %v4548_v19 = vunpack.c.h.bf16 %v6272_v52 }
 0x539   : > { %v4569_v58 = vadd.f32 %v4537_v61, %v4489_v32  ;;  %v4493_v3 = vadd.f32 %v4492_v8, %v8034_v0  ;;  %v4494_v56 = vpop.f32.mrb[79].mxu1 }
 0x53a   : > { %4718 = vst [vmem:[%s8049_s9 + $0x48] sm:$0xff] %v5248_v28  ;;  %v4570_v26 = vadd.f32 %v4538_v50, %v4491_v25  ;;  %v4495_v53 = vadd.f32 %v4494_v56, %v8036_v51 }
 0x53b   : > { %v4601_v45 = vmax.f32 %v4569_v58, 0.0  ;;  %v4571_v31 = vadd.f32 %v4539_v63, %v4493_v3 }
 0x53c   : > { %v4602_v16 = vmax.f32 %v4570_v26, 0.0  ;;  %v4572_v47 = vadd.f32 %v4540_v20, %v4495_v53 }
 0x53d   : > { %v4603_v29 = vmax.f32 %v4571_v31, 0.0 }
 0x53e   : > { %v5249_v60 = vpack.c.bf16 %v4602_v16, %v4601_v45  ;;  %v4604_v48 = vmax.f32 %v4572_v47, 0.0  ;;  %v4498_v55 = vpop.f32.mrb[80].mxu1 }
 0x53f   : > { %v4499_v37 = vadd.f32 %v4498_v55, %v8034_v0  ;;  %v4500_v42 = vpop.f32.mrb[81].mxu1 }
 0x540   : > { %4719 = vst [vmem:[%s8049_s9 + $0x50] sm:$0xff] %v5249_v60  ;;  %v5250_v41 = vpack.c.bf16 %v4604_v48, %v4603_v29  ;;  %v4501_v44 = vadd.f32 %v4500_v42, %v8036_v51  ;;  %v4502_v23 = vpop.f32.mrb[82].mxu1 }
 0x541   : > { %v4573_v40 = vadd.f32 %v4541_v9, %v4499_v37  ;;  %v4503_v21 = vadd.f32 %v4502_v23, %v8034_v0  ;;  %v4504_v36 = vpop.f32.mrb[83].mxu1 }
 0x542   : > { %4720 = vst [vmem:[%s8049_s9 + $0x58] sm:$0xff] %v5250_v41  ;;  %v4574_v14 = vadd.f32 %v4542_v33, %v4501_v44  ;;  %v4505_v11 = vadd.f32 %v4504_v36, %v8036_v51 }
 0x543   : > { %v4605_v54 = vmax.f32 %v4573_v40, 0.0  ;;  %v4575_v5 = vadd.f32 %v4543_v15, %v4503_v21 }
 0x544   : > { %v4606_v13 = vmax.f32 %v4574_v14, 0.0  ;;  %v4576_v35 = vadd.f32 %v4544_v62, %v4505_v11 }
 0x545   : > { %v4607_v59 = vmax.f32 %v4575_v5, 0.0 }
 0x546   : > { %v5251_v49 = vpack.c.bf16 %v4606_v13, %v4605_v54  ;;  %v4608_v43 = vmax.f32 %v4576_v35, 0.0  ;;  %v4508_v10 = vpop.f32.mrb[84].mxu1 }
 0x547   : > { %v4509_v2 = vadd.f32 %v4508_v10, %v8034_v0  ;;  %v4510_v6 = vpop.f32.mrb[85].mxu1 }
 0x548   : > { %4721 = vst [vmem:[%s8049_s9 + $0x60] sm:$0xff] %v5251_v49  ;;  %v5252_v4 = vpack.c.bf16 %v4608_v43, %v4607_v59  ;;  %v4511_v1 = vadd.f32 %v4510_v6, %v8036_v51  ;;  %v4512_v39 = vpop.f32.mrb[86].mxu1 }
 0x549   : > { %v4577_v12 = vadd.f32 %v4545_v38, %v4509_v2  ;;  %v4513_v61 = vadd.f32 %v4512_v39, %v8034_v0  ;;  %v4514_v17 = vpop.f32.mrb[87].mxu1 }
 0x54a   : > { %4722 = vst [vmem:[%s8049_s9 + $0x68] sm:$0xff] %v5252_v4  ;;  %v4578_v22 = vadd.f32 %v4546_v46, %v4511_v1  ;;  %v4515_v27 = vadd.f32 %v4514_v17, %v8036_v51 }
 0x54b   : > { %v4609_v50 = vmax.f32 %v4577_v12, 0.0  ;;  %v4579_v32 = vadd.f32 %v4547_v30, %v4513_v61 }
 0x54c   : > { %v4610_v24 = vmax.f32 %v4578_v22, 0.0  ;;  %v4580_v34 = vadd.f32 %v4548_v19, %v4515_v27 }
 0x54d   : > { %v4611_v63 = vmax.f32 %v4579_v32, 0.0 }
 0x54e   : > { %v5253_v28 = vpack.c.bf16 %v4610_v24, %v4609_v50  ;;  %v4612_v25 = vmax.f32 %v4580_v34, 0.0 }
 0x550   : > { %4723 = vst [vmem:[%s8049_s9 + $0x70] sm:$0xff] %v5253_v28  ;;  %v5254_v0 = vpack.c.bf16 %v4612_v25, %v4611_v63 }
 0x552   : > { %4724 = vst [vmem:[%s8049_s9 + $0x78] sm:$0xff] %v5254_v0 }
 0x553   : > { %6460 = shalt.err (!%p6457_p13)
}
 0x554   : > { %s6461_s4 = scalar_lea.hbm %s8113_s3, 2048  ;;  %s6465_s12 = scalar_lea.hbm %s8329_s0, 8192 }
 0x555   : > { %p6462_p11 = scmp.ne.s32.totalorder %s8113_s3, %s6461_s4  ;;  %p6466_p3 = scmp.lt.u32.totalorder %s8113_s3, %s8329_s0 }
 0x556   : > { %p6467_p12 = scmp.lt.u32.totalorder %s6465_s12, %s6461_s4  ;;  %p6469_p5 = scmp.lt.u32.totalorder %s6461_s4, %s8113_s3 }
 0x557   : > { %p6463_p0 = pnand %p6462_p11, %p8330_p10 }
 0x558   : > { %p6468_p4 = por %p6467_p12, %p6466_p3 }
 0x559   : > { %p6464_p1 = pneg %p6463_p0 }
 0x55a   : > { %p6470_p8 = por %p6469_p5, %p6468_p4 }
 0x55c   : > { %p6471_p2 = pnand %p6470_p8, %p6464_p1 }
 0x55e   : > { %6474 = shalt.err (!%p6471_p2)
}
 0x55f   : > { %s6623_s5 = smov 128   ;;  %s6624_s25 = smov 8  }
 0x560   : > { %5942 = dma.vmem_to_hbm [thread:$0]  (%p8330_p10), %s8107_s27, 2048, %s8113_s3, %s4726_s26, %s6623_s5, %s6623_s5, %s6624_s25  }
 0x561 PF: > { %p5975_p9 = scmp.ge.s32.totalorder %s6609_s22, 2  ;;  %s4757_s28 = sand.u32 1, %s6581_s15  }
 0x562   : > { %p8331_p7 = scmp.ne.s32.totalorder %s8283_s8, 0  ;;  %s4758_s2 = scalar_lea.sflag [#allocation5], %s4757_s28 }
 0x564   : > { %p5965_p6 = pnand %p5975_p9, %p8331_p7 }
 0x566   : > { %6552 = dma.done.wait (!%p5965_p6), %s4758_s2, 2048  }
 0x567   : > { %6554 = vsyncadd (!%p5965_p6), %s4758_s2, 4294965248  ;;  %s30_s22 = sadd.s32 1, %s6609_s22   ;;  %s8333_s30 = sld [smem:[#allocation22_spill]] }
 0x568   : > { %p8145_p13 = scmp.ge.s32.totalorder %s30_s22, 6   ;;  %s8334_s29 = sld [smem:[#allocation23_spill]] }
 0x569   : > { %s8335_s12 = sld [smem:[#allocation24_spill]]  ;;  %s8336_s27 = smov %s6836_s10 }
 0x56a   : > { %s8337_s3 = sld [smem:[#allocation35_spill]]  ;;  %s8338_s8 = sld [smem:[#allocation27_spill]] }
 0x56b   : > { %s8339_s19 = sld [smem:[#allocation28_spill]]  ;;  %s8340_s26 = sld [smem:[#allocation30_spill]] }
 0x56c   : > { %s8341_s21 = sld [smem:[#allocation31_spill]]  ;;  %s8344_s11 = smov %s8367_s18 }
 0x56d   : > { %s8345_s13 = smov %s6577_s14  ;;  %s8346_s14 = smov %s8336_s27 }
 0x56e   : > { %s8343_s10 = smov %s8334_s29  ;;  %s8347_s15 = smov %s6585_s16 }
 0x56f   : > { %s8348_s16 = smov %s6589_s17  ;;  %29 = sbr.rel (!%p8145_p13) target bundleno = 25 (0x19), region = 148 }
 0x570   : > { %s8349_s17 = smov %s8337_s3  ;;  %s8350_s18 = smov %s8338_s8 }
 0x571   : > { %s8351_s20 = smov %s8340_s26 }
 0x576   :  { %4763 = vsyncpa [#allocation4], 1 }
 0x577   :  { %4765 = vsyncpa [#allocation4 + $0x1], 1 }
 0x578   :  { %4766 = vsyncpa [#allocation7], 1 }
 0x579   :  { %4768 = vsyncpa [#allocation7 + $0x1], 1 }
 0x57a   :  { %4769 = vsyncpa [#allocation10], 1 }
 0x57b   :  { %4770 = vsyncpa [#allocation13], 1 }
 0x57c   :  { %4771 = vsyncpa [#allocation5], 1 }
 0x57d   :  { %4773 = vsyncpa [#allocation5 + $0x1], 1 }

</bundles_post_ra>
